<compile_context>
chip_gen: v7x
topology: tpu7x:2x2x1
jax: 0.10.0
libtpu: 0.0.40
codegen_flags: <defaults>
</compile_context>

<pallas_src>
import functools

import numpy as np

import jax
import jax.numpy as jnp
from jax.experimental import pallas as pl
from jax.experimental.pallas import tpu as pltpu

# ----------------------------- "cfg" (synthetic) -----------------------------
NUM_CLASSES = 1                       # e.g. LUNG_DATA['NUM']
ANCHORS_PER_SCALE = 3
STRIDES = [8.0, 16.0, 32.0]
ANCHORS3D = [                         # anchors in grid units (raw anchors / stride)
    [[1.25, 1.625], [2.0, 3.75], [4.125, 2.875]],
    [[1.875, 3.8125], [3.875, 2.8125], [3.6875, 7.4375]],
    [[3.625, 2.8125], [4.875, 6.1875], [11.65625, 10.1875]],
]
OUT_CHANNEL = ANCHORS_PER_SCALE * (NUM_CLASSES + 5)   # dims == 2  ->  3 * 6 = 18
D = NUM_CLASSES + 5                                   # per-anchor prediction width
LEAKY_SLOPE = 0.1                                     # YOLO convention


def _round_up(x, m):
    return (x + m - 1) // m * m


def _pick_tm(M):
    """Row-tile size: big blocks, but keep >=2 row blocks when M allows (v7x megacore)."""
    if M >= 2048:
        return 1024
    if M >= 32:
        return _round_up((M + 1) // 2, 16)
    return 16


# --------------------------- Pallas kernel bodies ----------------------------
def _mm_bias_act_kernel(x_ref, w_ref, b_ref, o_ref, *, act):
    """(tm, K) @ (K, N) single-shot MXU matmul; bias + leaky-relu fused; f32 math."""
    out = jnp.dot(x_ref[...], w_ref[...], preferred_element_type=jnp.float32) + b_ref[...]
    if act == "leaky":
        out = jnp.where(out > 0, out, LEAKY_SLOPE * out)
    o_ref[...] = out.astype(o_ref.dtype)


def _head_decode_kernel(feat_ref, w_ref, b_ref, sel_ref, grid_ref, p_ref, pd_ref, *, stride):
    """Fused 1x1 head conv + YOLO decode for the whole batch of one scale.

    feat_ref: (BR, Cin) bf16      w_ref: (Cin, CP) bf16     b_ref: (1, CP) f32
    sel_ref:  (8, CP)   f32 trace-time constants:
        row 0: 1.0 at x/y lanes       row 1: 1.0 at w/h lanes
        row 2: 1.0 at conf/cls lanes  row 3: anchor*stride at w/h lanes (0 elsewhere)
    grid_ref: (BR, CP) f32, grid-cell offset (gx at x lanes, gy at y lanes, 0 elsewhere)
    p_ref:    raw conv output (BR, CP) f32
    pd_ref:   decoded boxes   (BR, CP) f32 (padded lanes written as 0)
    """
    conv = jnp.dot(feat_ref[...], w_ref[...], preferred_element_type=jnp.float32) + b_ref[...]
    p_ref[...] = conv

    sel_xy = sel_ref[0:1, :]
    sel_wh = sel_ref[1:2, :]
    sel_ot = sel_ref[2:3, :]
    anc_s = sel_ref[3:4, :]

    sig = jax.nn.sigmoid(conv)
    xy = (sig + grid_ref[...]) * stride
    # exp only on the real w/h lanes (conv * mask) -> no inf from conf/class logits.
    wh = jnp.exp(conv * sel_wh) * anc_s
    pd_ref[...] = sel_xy * xy + sel_wh * wh + sel_ot * sig


# ------------------------------ kernel wrappers -------------------------------
def matmul_bias_act(x_rows, w_mat, b_vec, act, out_dtype=jnp.bfloat16):
    """Conv-as-matmul: rows (M,K) @ weights (K,N) + bias (+ leaky). Single K block."""
    M, K = x_rows.shape
    _, N = w_mat.shape

    N_pad = _round_up(N, 128)             # lane-dense output stores
    K_pad = _round_up(K, 128)             # single reduction block (no grid axis over K)
    tm = _pick_tm(M)
    M_pad = _round_up(M, tm)

    x_p = jnp.pad(x_rows.astype(jnp.bfloat16), ((0, M_pad - M), (0, K_pad - K)))
    w_p = jnp.pad(w_mat.astype(jnp.bfloat16), ((0, K_pad - K), (0, N_pad - N)))
    b_p = jnp.pad(b_vec.astype(jnp.float32), (0, N_pad - N)).reshape(1, N_pad)

    out = pl.pallas_call(
        functools.partial(_mm_bias_act_kernel, act=act),
        out_shape=jax.ShapeDtypeStruct((M_pad, N_pad), out_dtype),
        grid_spec=pltpu.PrefetchScalarGridSpec(
            num_scalar_prefetch=0,
            grid=(M_pad // tm,),
            in_specs=[
                pl.BlockSpec((tm, K_pad), lambda i: (i, 0)),
                pl.BlockSpec((K_pad, N_pad), lambda i: (0, 0)),
                pl.BlockSpec((1, N_pad), lambda i: (0, 0)),
            ],
            out_specs=pl.BlockSpec((tm, N_pad), lambda i: (i, 0)),
        ),
        compiler_params=pltpu.CompilerParams(
            dimension_semantics=("parallel",),
            vmem_limit_bytes=32 * 1024 * 1024,
            allow_input_fusion=[True, True, True],
        ),
    )(x_p, w_p, b_p)
    return out[:M, :N]


def head_and_decode(feat, w, b, anchors, stride):
    """Fused 1x1 head conv + decode over the whole batch. feat: NHWC (B, nG, nG, Cin)."""
    B, nG, _, Cin = feat.shape
    nA = len(anchors)
    Dd = D
    Cout = nA * Dd
    CP = _round_up(Cout, 128)
    BR = B * nG * nG
    BRp = _round_up(BR, 8)

    w2 = jnp.pad(w.reshape(Cout, Cin).T.astype(jnp.bfloat16), ((0, 0), (0, CP - Cout)))
    b2 = jnp.pad(b.astype(jnp.float32), (0, CP - Cout)).reshape(1, CP)
    feat2 = jnp.pad(feat.reshape(BR, Cin).astype(jnp.bfloat16), ((0, BRp - BR), (0, 0)))

    # Trace-time (numpy) constants: lane selectors, anchor*stride, grid-cell offsets.
    sel = np.zeros((8, CP), np.float32)
    for a in range(nA):
        sel[0, a * Dd + 0] = 1.0
        sel[0, a * Dd + 1] = 1.0
        sel[1, a * Dd + 2] = 1.0
        sel[1, a * Dd + 3] = 1.0
        sel[2, a * Dd + 4: a * Dd + Dd] = 1.0
        sel[3, a * Dd + 2] = float(anchors[a][0]) * float(stride)
        sel[3, a * Dd + 3] = float(anchors[a][1]) * float(stride)

    rows = np.arange(BRp)
    local = rows % (nG * nG)
    gy = (local // nG).astype(np.float32)
    gx = (local % nG).astype(np.float32)
    grid_term = np.zeros((BRp, CP), np.float32)
    for a in range(nA):
        grid_term[:, a * Dd + 0] = gx
        grid_term[:, a * Dd + 1] = gy

    kern = functools.partial(_head_decode_kernel, stride=float(stride))

    p_pad, pd_pad = pl.pallas_call(
        kern,
        out_shape=(jax.ShapeDtypeStruct((BRp, CP), jnp.float32),
                   jax.ShapeDtypeStruct((BRp, CP), jnp.float32)),
        grid_spec=pltpu.PrefetchScalarGridSpec(
            num_scalar_prefetch=0,
            grid=(1,),
            in_specs=[
                pl.BlockSpec((BRp, Cin), lambda i: (0, 0)),
                pl.BlockSpec((Cin, CP), lambda i: (0, 0)),
                pl.BlockSpec((1, CP), lambda i: (0, 0)),
                pl.BlockSpec((8, CP), lambda i: (0, 0)),
                pl.BlockSpec((BRp, CP), lambda i: (0, 0)),
            ],
            out_specs=(
                pl.BlockSpec((BRp, CP), lambda i: (0, 0)),
                pl.BlockSpec((BRp, CP), lambda i: (0, 0)),
            ),
        ),
        compiler_params=pltpu.CompilerParams(
            dimension_semantics=("arbitrary",),
            vmem_limit_bytes=32 * 1024 * 1024,
        ),
    )(feat2, w2, b2, jnp.asarray(sel), jnp.asarray(grid_term))

    p = p_pad[:BR, :Cout].reshape(B, nG, nG, nA, Dd)      # == PyTorch permuted p
    p_d = pd_pad[:BR, :Cout].reshape(-1, Dd)              # eval-mode flat decode
    return p, p_d


# --------------------------------- JAX glue -----------------------------------
def im2col_nhwc(x, k, stride, pad):
    """x NHWC -> rows (B*Ho*Wo, k*k*C), tap-major / channel-minor feature order."""
    B, H, W, C = x.shape
    xp = jnp.pad(x, ((0, 0), (pad, pad), (pad, pad), (0, 0)))
    Ho = (H + 2 * pad - k) // stride + 1
    Wo = (W + 2 * pad - k) // stride + 1
    taps = []
    for i in range(k):
        for j in range(k):
            taps.append(xp[:, i:i + stride * Ho:stride, j:j + stride * Wo:stride, :])
    col = jnp.concatenate(taps, axis=-1)                 # (B, Ho, Wo, k*k*C)
    return col.reshape(B * Ho * Wo, k * k * C), Ho, Wo


def conv2d_nhwc(x, w, b, *, stride, pad, act):
    """x NHWC; w in PyTorch layout (Cout, Cin, k, k). Matmul + bias + act run in Pallas."""
    Cout, Cin, k, _ = w.shape
    rows, Ho, Wo = im2col_nhwc(x, k, stride, pad)
    w2 = jnp.transpose(w, (2, 3, 1, 0)).reshape(k * k * Cin, Cout)
    out = matmul_bias_act(rows, w2, b, act)
    B = x.shape[0]
    return out.reshape(B, Ho, Wo, Cout)                  # stays NHWC, no transpose


def init_params(key):
    def conv_p(key, cout, cin, k, scale=0.05):
        kw, kb = jax.random.split(key)
        return (scale * jax.random.normal(kw, (cout, cin, k, k), jnp.float32),
                scale * jax.random.normal(kb, (cout,), jnp.float32))

    keys = jax.random.split(key, 8)
    return {
        "c1": conv_p(keys[0], 16, 3, 3),     # /2
        "c2": conv_p(keys[1], 32, 16, 3),    # /4
        "c3": conv_p(keys[2], 64, 32, 3),    # /8
        "c4": conv_p(keys[3], 128, 64, 3),   # /16
        "c5": conv_p(keys[4], 128, 128, 3),  # /32
        "hs": conv_p(keys[5], OUT_CHANNEL, 64, 1),
        "hm": conv_p(keys[6], OUT_CHANNEL, 128, 1),
        "hl": conv_p(keys[7], OUT_CHANNEL, 128, 1),
    }


def build_model_forward(params, x):
    """Equivalent of Build_Model.forward in eval mode: returns ((p_s,p_m,p_l), p_d_cat)."""
    # PyTorch NCHW input -> NHWC bf16 once; backbone stays NHWC/bf16 end-to-end.
    x = jnp.transpose(x, (0, 2, 3, 1)).astype(jnp.bfloat16)

    f = conv2d_nhwc(x, *params["c1"], stride=2, pad=1, act="leaky")
    f = conv2d_nhwc(f, *params["c2"], stride=2, pad=1, act="leaky")
    f8 = conv2d_nhwc(f, *params["c3"], stride=2, pad=1, act="leaky")      # stride 8
    f16 = conv2d_nhwc(f8, *params["c4"], stride=2, pad=1, act="leaky")    # stride 16
    f32f = conv2d_nhwc(f16, *params["c5"], stride=2, pad=1, act="leaky")  # stride 32

    p_s, pd_s = head_and_decode(f8, *params["hs"], ANCHORS3D[0], STRIDES[0])
    p_m, pd_m = head_and_decode(f16, *params["hm"], ANCHORS3D[1], STRIDES[1])
    p_l, pd_l = head_and_decode(f32f, *params["hl"], ANCHORS3D[2], STRIDES[2])

    p = (p_s, p_m, p_l)
    p_d = jnp.concatenate([pd_s, pd_m, pd_l], axis=0)    # eval branch: torch.cat(p_d, 0)
    return p, p_d


if __name__ == "__main__":
    key = jax.random.PRNGKey(0)
    kx, kp = jax.random.split(key)
    x = jax.random.normal(kx, (2, 3, 64, 64), jnp.float32)   # NCHW, like PyTorch
    params = init_params(kp)

    p, p_d = jax.jit(build_model_forward)(params, x)
    jax.block_until_ready(p_d)

    # sanity: shapes match the PyTorch module's eval-mode outputs
    assert p[0].shape == (2, 8, 8, 3, D)
    assert p[1].shape == (2, 4, 4, 3, D)
    assert p[2].shape == (2, 2, 2, 3, D)
    assert p_d.shape == (2 * (8 * 8 + 4 * 4 + 2 * 2) * 3, D)
    assert bool(jnp.all(jnp.isfinite(p_d)))
    print("KERNEL_OK")
</pallas_src>

<mosaic_0001>
module attributes {stable_mosaic.version = 11 : i64} {
  func.func @_mm_bias_act_kernel(%arg0: i32, %arg1: memref<1024x128xbf16, #tpu.memory_space<vmem>>, %arg2: memref<128x128xbf16, #tpu.memory_space<vmem>>, %arg3: memref<1x128xf32, #tpu.memory_space<vmem>>, %arg4: memref<1024x128xbf16, #tpu.memory_space<vmem>>) attributes {dimension_semantics = [#tpu.dimension_semantics<parallel>], iteration_bounds = array<i64: 2>, scalar_prefetch = 0 : i64, scratch_operands = 0 : i64, tpu.core_type = #tpu.core_type<tc>, window_params = [{transform_indices = @transform_0, window_bounds = array<i64: 1024, 128>}, {pipeline_mode = #tpu.pipeline_mode<synchronous>, transform_indices = @transform_1, window_bounds = array<i64: 128, 128>}, {pipeline_mode = #tpu.pipeline_mode<synchronous>, transform_indices = @transform_2, window_bounds = array<i64: 1, 128>}, {transform_indices = @transform_3, window_bounds = array<i64: 1024, 128>}]} {
    %c0 = arith.constant 0 : index
    %c0_0 = arith.constant 0 : index
    %0 = vector.load %arg1[%c0, %c0_0] : memref<1024x128xbf16, #tpu.memory_space<vmem>>, vector<1024x128xbf16>
    %c0_1 = arith.constant 0 : index
    %c0_2 = arith.constant 0 : index
    %1 = vector.load %arg2[%c0_1, %c0_2] : memref<128x128xbf16, #tpu.memory_space<vmem>>, vector<128x128xbf16>
    %cst = arith.constant dense<0.000000e+00> : vector<1024x128xf32>
    %2 = tpu.matmul %0, %1, %cst {dimension_numbers = #tpu.dot_dimension_numbers<[1], [0], [0], [1], [0, 0, 1, 1], [], []>} : vector<1024x128xbf16>, vector<128x128xbf16>, vector<1024x128xf32> -> vector<1024x128xf32>
    %c0_3 = arith.constant 0 : index
    %c0_4 = arith.constant 0 : index
    %3 = vector.load %arg3[%c0_3, %c0_4] : memref<1x128xf32, #tpu.memory_space<vmem>>, vector<1x128xf32>
    %4 = vector.broadcast %3 : vector<1x128xf32> to vector<1024x128xf32>
    %5 = arith.addf %2, %4 : vector<1024x128xf32>
    %cst_5 = arith.constant 0.000000e+00 : f32
    %6 = vector.broadcast %cst_5 : f32 to vector<1024x128xf32>
    %7 = arith.cmpf ogt, %5, %6 : vector<1024x128xf32>
    %cst_6 = arith.constant 1.000000e-01 : f32
    %8 = vector.broadcast %cst_6 : f32 to vector<1024x128xf32>
    %9 = arith.mulf %8, %5 : vector<1024x128xf32>
    %10 = arith.select %7, %5, %9 : vector<1024x128xi1>, vector<1024x128xf32>
    %11 = arith.truncf %10 : vector<1024x128xf32> to vector<1024x128xbf16>
    %c0_7 = arith.constant 0 : index
    %c0_8 = arith.constant 0 : index
    %12 = vector.load %arg4[%c0_7, %c0_8] : memref<1024x128xbf16, #tpu.memory_space<vmem>>, vector<1024x128xbf16>
    tpu.vector_store %arg4[%c0_7, %c0_8], %11 {strides = array<i32>} : memref<1024x128xbf16, #tpu.memory_space<vmem>>, vector<1024x128xbf16>,
    return
  }
  func.func @transform_0(%arg0: i32) -> (i32, i32) {
    %c0_i32 = arith.constant 0 : i32
    %c0_i32_0 = arith.constant 0 : i32
    return %arg0, %c0_i32 : i32, i32
  }
  func.func @transform_1(%arg0: i32) -> (i32, i32) {
    %c0_i32 = arith.constant 0 : i32
    %c0_i32_0 = arith.constant 0 : i32
    %c0_i32_1 = arith.constant 0 : i32
    return %c0_i32, %c0_i32_0 : i32, i32
  }
  func.func @transform_2(%arg0: i32) -> (i32, i32) {
    %c0_i32 = arith.constant 0 : i32
    %c0_i32_0 = arith.constant 0 : i32
    %c0_i32_1 = arith.constant 0 : i32
    return %c0_i32, %c0_i32_0 : i32, i32
  }
  func.func @transform_3(%arg0: i32) -> (i32, i32) {
    %c0_i32 = arith.constant 0 : i32
    %c0_i32_0 = arith.constant 0 : i32
    return %arg0, %c0_i32 : i32, i32
  }
}

module attributes {stable_mosaic.version = 11 : i64} {
  func.func @_mm_bias_act_kernel(%arg0: i32, %arg1: memref<256x256xbf16, #tpu.memory_space<vmem>>, %arg2: memref<256x128xbf16, #tpu.memory_space<vmem>>, %arg3: memref<1x128xf32, #tpu.memory_space<vmem>>, %arg4: memref<256x128xbf16, #tpu.memory_space<vmem>>) attributes {dimension_semantics = [#tpu.dimension_semantics<parallel>], iteration_bounds = array<i64: 2>, scalar_prefetch = 0 : i64, scratch_operands = 0 : i64, tpu.core_type = #tpu.core_type<tc>, window_params = [{transform_indices = @transform_0, window_bounds = array<i64: 256, 256>}, {pipeline_mode = #tpu.pipeline_mode<synchronous>, transform_indices = @transform_1, window_bounds = array<i64: 256, 128>}, {pipeline_mode = #tpu.pipeline_mode<synchronous>, transform_indices = @transform_2, window_bounds = array<i64: 1, 128>}, {transform_indices = @transform_3, window_bounds = array<i64: 256, 128>}]} {
    %c0 = arith.constant 0 : index
    %c0_0 = arith.constant 0 : index
    %0 = vector.load %arg1[%c0, %c0_0] : memref<256x256xbf16, #tpu.memory_space<vmem>>, vector<256x256xbf16>
    %c0_1 = arith.constant 0 : index
    %c0_2 = arith.constant 0 : index
    %1 = vector.load %arg2[%c0_1, %c0_2] : memref<256x128xbf16, #tpu.memory_space<vmem>>, vector<256x128xbf16>
    %cst = arith.constant dense<0.000000e+00> : vector<256x128xf32>
    %2 = tpu.matmul %0, %1, %cst {dimension_numbers = #tpu.dot_dimension_numbers<[1], [0], [0], [1], [0, 0, 1, 1], [], []>} : vector<256x256xbf16>, vector<256x128xbf16>, vector<256x128xf32> -> vector<256x128xf32>
    %c0_3 = arith.constant 0 : index
    %c0_4 = arith.constant 0 : index
    %3 = vector.load %arg3[%c0_3, %c0_4] : memref<1x128xf32, #tpu.memory_space<vmem>>, vector<1x128xf32>
    %4 = vector.broadcast %3 : vector<1x128xf32> to vector<256x128xf32>
    %5 = arith.addf %2, %4 : vector<256x128xf32>
    %cst_5 = arith.constant 0.000000e+00 : f32
    %6 = vector.broadcast %cst_5 : f32 to vector<256x128xf32>
    %7 = arith.cmpf ogt, %5, %6 : vector<256x128xf32>
    %cst_6 = arith.constant 1.000000e-01 : f32
    %8 = vector.broadcast %cst_6 : f32 to vector<256x128xf32>
    %9 = arith.mulf %8, %5 : vector<256x128xf32>
    %10 = arith.select %7, %5, %9 : vector<256x128xi1>, vector<256x128xf32>
    %11 = arith.truncf %10 : vector<256x128xf32> to vector<256x128xbf16>
    %c0_7 = arith.constant 0 : index
    %c0_8 = arith.constant 0 : index
    %12 = vector.load %arg4[%c0_7, %c0_8] : memref<256x128xbf16, #tpu.memory_space<vmem>>, vector<256x128xbf16>
    tpu.vector_store %arg4[%c0_7, %c0_8], %11 {strides = array<i32>} : memref<256x128xbf16, #tpu.memory_space<vmem>>, vector<256x128xbf16>,
    return
  }
  func.func @transform_0(%arg0: i32) -> (i32, i32) {
    %c0_i32 = arith.constant 0 : i32
    %c0_i32_0 = arith.constant 0 : i32
    return %arg0, %c0_i32 : i32, i32
  }
  func.func @transform_1(%arg0: i32) -> (i32, i32) {
    %c0_i32 = arith.constant 0 : i32
    %c0_i32_0 = arith.constant 0 : i32
    %c0_i32_1 = arith.constant 0 : i32
    return %c0_i32, %c0_i32_0 : i32, i32
  }
  func.func @transform_2(%arg0: i32) -> (i32, i32) {
    %c0_i32 = arith.constant 0 : i32
    %c0_i32_0 = arith.constant 0 : i32
    %c0_i32_1 = arith.constant 0 : i32
    return %c0_i32, %c0_i32_0 : i32, i32
  }
  func.func @transform_3(%arg0: i32) -> (i32, i32) {
    %c0_i32 = arith.constant 0 : i32
    %c0_i32_0 = arith.constant 0 : i32
    return %arg0, %c0_i32 : i32, i32
  }
}

module attributes {stable_mosaic.version = 11 : i64} {
  func.func @_mm_bias_act_kernel(%arg0: i32, %arg1: memref<64x384xbf16, #tpu.memory_space<vmem>>, %arg2: memref<384x128xbf16, #tpu.memory_space<vmem>>, %arg3: memref<1x128xf32, #tpu.memory_space<vmem>>, %arg4: memref<64x128xbf16, #tpu.memory_space<vmem>>) attributes {dimension_semantics = [#tpu.dimension_semantics<parallel>], iteration_bounds = array<i64: 2>, scalar_prefetch = 0 : i64, scratch_operands = 0 : i64, tpu.core_type = #tpu.core_type<tc>, window_params = [{transform_indices = @transform_0, window_bounds = array<i64: 64, 384>}, {pipeline_mode = #tpu.pipeline_mode<synchronous>, transform_indices = @transform_1, window_bounds = array<i64: 384, 128>}, {pipeline_mode = #tpu.pipeline_mode<synchronous>, transform_indices = @transform_2, window_bounds = array<i64: 1, 128>}, {transform_indices = @transform_3, window_bounds = array<i64: 64, 128>}]} {
    %c0 = arith.constant 0 : index
    %c0_0 = arith.constant 0 : index
    %0 = vector.load %arg1[%c0, %c0_0] : memref<64x384xbf16, #tpu.memory_space<vmem>>, vector<64x384xbf16>
    %c0_1 = arith.constant 0 : index
    %c0_2 = arith.constant 0 : index
    %1 = vector.load %arg2[%c0_1, %c0_2] : memref<384x128xbf16, #tpu.memory_space<vmem>>, vector<384x128xbf16>
    %cst = arith.constant dense<0.000000e+00> : vector<64x128xf32>
    %2 = tpu.matmul %0, %1, %cst {dimension_numbers = #tpu.dot_dimension_numbers<[1], [0], [0], [1], [0, 0, 1, 1], [], []>} : vector<64x384xbf16>, vector<384x128xbf16>, vector<64x128xf32> -> vector<64x128xf32>
    %c0_3 = arith.constant 0 : index
    %c0_4 = arith.constant 0 : index
    %3 = vector.load %arg3[%c0_3, %c0_4] : memref<1x128xf32, #tpu.memory_space<vmem>>, vector<1x128xf32>
    %4 = vector.broadcast %3 : vector<1x128xf32> to vector<64x128xf32>
    %5 = arith.addf %2, %4 : vector<64x128xf32>
    %cst_5 = arith.constant 0.000000e+00 : f32
    %6 = vector.broadcast %cst_5 : f32 to vector<64x128xf32>
    %7 = arith.cmpf ogt, %5, %6 : vector<64x128xf32>
    %cst_6 = arith.constant 1.000000e-01 : f32
    %8 = vector.broadcast %cst_6 : f32 to vector<64x128xf32>
    %9 = arith.mulf %8, %5 : vector<64x128xf32>
    %10 = arith.select %7, %5, %9 : vector<64x128xi1>, vector<64x128xf32>
    %11 = arith.truncf %10 : vector<64x128xf32> to vector<64x128xbf16>
    %c0_7 = arith.constant 0 : index
    %c0_8 = arith.constant 0 : index
    %12 = vector.load %arg4[%c0_7, %c0_8] : memref<64x128xbf16, #tpu.memory_space<vmem>>, vector<64x128xbf16>
    tpu.vector_store %arg4[%c0_7, %c0_8], %11 {strides = array<i32>} : memref<64x128xbf16, #tpu.memory_space<vmem>>, vector<64x128xbf16>,
    return
  }
  func.func @transform_0(%arg0: i32) -> (i32, i32) {
    %c0_i32 = arith.constant 0 : i32
    %c0_i32_0 = arith.constant 0 : i32
    return %arg0, %c0_i32 : i32, i32
  }
  func.func @transform_1(%arg0: i32) -> (i32, i32) {
    %c0_i32 = arith.constant 0 : i32
    %c0_i32_0 = arith.constant 0 : i32
    %c0_i32_1 = arith.constant 0 : i32
    return %c0_i32, %c0_i32_0 : i32, i32
  }
  func.func @transform_2(%arg0: i32) -> (i32, i32) {
    %c0_i32 = arith.constant 0 : i32
    %c0_i32_0 = arith.constant 0 : i32
    %c0_i32_1 = arith.constant 0 : i32
    return %c0_i32, %c0_i32_0 : i32, i32
  }
  func.func @transform_3(%arg0: i32) -> (i32, i32) {
    %c0_i32 = arith.constant 0 : i32
    %c0_i32_0 = arith.constant 0 : i32
    return %arg0, %c0_i32 : i32, i32
  }
}

module attributes {stable_mosaic.version = 11 : i64} {
  func.func @_mm_bias_act_kernel(%arg0: i32, %arg1: memref<16x640xbf16, #tpu.memory_space<vmem>>, %arg2: memref<640x128xbf16, #tpu.memory_space<vmem>>, %arg3: memref<1x128xf32, #tpu.memory_space<vmem>>, %arg4: memref<16x128xbf16, #tpu.memory_space<vmem>>) attributes {dimension_semantics = [#tpu.dimension_semantics<parallel>], iteration_bounds = array<i64: 2>, scalar_prefetch = 0 : i64, scratch_operands = 0 : i64, tpu.core_type = #tpu.core_type<tc>, window_params = [{transform_indices = @transform_0, window_bounds = array<i64: 16, 640>}, {pipeline_mode = #tpu.pipeline_mode<synchronous>, transform_indices = @transform_1, window_bounds = array<i64: 640, 128>}, {pipeline_mode = #tpu.pipeline_mode<synchronous>, transform_indices = @transform_2, window_bounds = array<i64: 1, 128>}, {transform_indices = @transform_3, window_bounds = array<i64: 16, 128>}]} {
    %c0 = arith.constant 0 : index
    %c0_0 = arith.constant 0 : index
    %0 = vector.load %arg1[%c0, %c0_0] : memref<16x640xbf16, #tpu.memory_space<vmem>>, vector<16x640xbf16>
    %c0_1 = arith.constant 0 : index
    %c0_2 = arith.constant 0 : index
    %1 = vector.load %arg2[%c0_1, %c0_2] : memref<640x128xbf16, #tpu.memory_space<vmem>>, vector<640x128xbf16>
    %cst = arith.constant dense<0.000000e+00> : vector<16x128xf32>
    %2 = tpu.matmul %0, %1, %cst {dimension_numbers = #tpu.dot_dimension_numbers<[1], [0], [0], [1], [0, 0, 1, 1], [], []>} : vector<16x640xbf16>, vector<640x128xbf16>, vector<16x128xf32> -> vector<16x128xf32>
    %c0_3 = arith.constant 0 : index
    %c0_4 = arith.constant 0 : index
    %3 = vector.load %arg3[%c0_3, %c0_4] : memref<1x128xf32, #tpu.memory_space<vmem>>, vector<1x128xf32>
    %4 = vector.broadcast %3 : vector<1x128xf32> to vector<16x128xf32>
    %5 = arith.addf %2, %4 : vector<16x128xf32>
    %cst_5 = arith.constant 0.000000e+00 : f32
    %6 = vector.broadcast %cst_5 : f32 to vector<16x128xf32>
    %7 = arith.cmpf ogt, %5, %6 : vector<16x128xf32>
    %cst_6 = arith.constant 1.000000e-01 : f32
    %8 = vector.broadcast %cst_6 : f32 to vector<16x128xf32>
    %9 = arith.mulf %8, %5 : vector<16x128xf32>
    %10 = arith.select %7, %5, %9 : vector<16x128xi1>, vector<16x128xf32>
    %11 = arith.truncf %10 : vector<16x128xf32> to vector<16x128xbf16>
    %c0_7 = arith.constant 0 : index
    %c0_8 = arith.constant 0 : index
    %12 = vector.load %arg4[%c0_7, %c0_8] : memref<16x128xbf16, #tpu.memory_space<vmem>>, vector<16x128xbf16>
    tpu.vector_store %arg4[%c0_7, %c0_8], %11 {strides = array<i32>} : memref<16x128xbf16, #tpu.memory_space<vmem>>, vector<16x128xbf16>,
    return
  }
  func.func @transform_0(%arg0: i32) -> (i32, i32) {
    %c0_i32 = arith.constant 0 : i32
    %c0_i32_0 = arith.constant 0 : i32
    return %arg0, %c0_i32 : i32, i32
  }
  func.func @transform_1(%arg0: i32) -> (i32, i32) {
    %c0_i32 = arith.constant 0 : i32
    %c0_i32_0 = arith.constant 0 : i32
    %c0_i32_1 = arith.constant 0 : i32
    return %c0_i32, %c0_i32_0 : i32, i32
  }
  func.func @transform_2(%arg0: i32) -> (i32, i32) {
    %c0_i32 = arith.constant 0 : i32
    %c0_i32_0 = arith.constant 0 : i32
    %c0_i32_1 = arith.constant 0 : i32
    return %c0_i32, %c0_i32_0 : i32, i32
  }
  func.func @transform_3(%arg0: i32) -> (i32, i32) {
    %c0_i32 = arith.constant 0 : i32
    %c0_i32_0 = arith.constant 0 : i32
    return %arg0, %c0_i32 : i32, i32
  }
}

module attributes {stable_mosaic.version = 11 : i64} {
  func.func @_mm_bias_act_kernel(%arg0: i32, %arg1: memref<16x1152xbf16, #tpu.memory_space<vmem>>, %arg2: memref<1152x128xbf16, #tpu.memory_space<vmem>>, %arg3: memref<1x128xf32, #tpu.memory_space<vmem>>, %arg4: memref<16x128xbf16, #tpu.memory_space<vmem>>) attributes {dimension_semantics = [#tpu.dimension_semantics<parallel>], iteration_bounds = array<i64: 1>, scalar_prefetch = 0 : i64, scratch_operands = 0 : i64, tpu.core_type = #tpu.core_type<tc>, window_params = [{transform_indices = @transform_0, window_bounds = array<i64: 16, 1152>}, {pipeline_mode = #tpu.pipeline_mode<synchronous>, transform_indices = @transform_1, window_bounds = array<i64: 1152, 128>}, {pipeline_mode = #tpu.pipeline_mode<synchronous>, transform_indices = @transform_2, window_bounds = array<i64: 1, 128>}, {transform_indices = @transform_3, window_bounds = array<i64: 16, 128>}]} {
    %c0 = arith.constant 0 : index
    %c0_0 = arith.constant 0 : index
    %0 = vector.load %arg1[%c0, %c0_0] : memref<16x1152xbf16, #tpu.memory_space<vmem>>, vector<16x1152xbf16>
    %c0_1 = arith.constant 0 : index
    %c0_2 = arith.constant 0 : index
    %1 = vector.load %arg2[%c0_1, %c0_2] : memref<1152x128xbf16, #tpu.memory_space<vmem>>, vector<1152x128xbf16>
    %cst = arith.constant dense<0.000000e+00> : vector<16x128xf32>
    %2 = tpu.matmul %0, %1, %cst {dimension_numbers = #tpu.dot_dimension_numbers<[1], [0], [0], [1], [0, 0, 1, 1], [], []>} : vector<16x1152xbf16>, vector<1152x128xbf16>, vector<16x128xf32> -> vector<16x128xf32>
    %c0_3 = arith.constant 0 : index
    %c0_4 = arith.constant 0 : index
    %3 = vector.load %arg3[%c0_3, %c0_4] : memref<1x128xf32, #tpu.memory_space<vmem>>, vector<1x128xf32>
    %4 = vector.broadcast %3 : vector<1x128xf32> to vector<16x128xf32>
    %5 = arith.addf %2, %4 : vector<16x128xf32>
    %cst_5 = arith.constant 0.000000e+00 : f32
    %6 = vector.broadcast %cst_5 : f32 to vector<16x128xf32>
    %7 = arith.cmpf ogt, %5, %6 : vector<16x128xf32>
    %cst_6 = arith.constant 1.000000e-01 : f32
    %8 = vector.broadcast %cst_6 : f32 to vector<16x128xf32>
    %9 = arith.mulf %8, %5 : vector<16x128xf32>
    %10 = arith.select %7, %5, %9 : vector<16x128xi1>, vector<16x128xf32>
    %11 = arith.truncf %10 : vector<16x128xf32> to vector<16x128xbf16>
    %c0_7 = arith.constant 0 : index
    %c0_8 = arith.constant 0 : index
    %12 = vector.load %arg4[%c0_7, %c0_8] : memref<16x128xbf16, #tpu.memory_space<vmem>>, vector<16x128xbf16>
    tpu.vector_store %arg4[%c0_7, %c0_8], %11 {strides = array<i32>} : memref<16x128xbf16, #tpu.memory_space<vmem>>, vector<16x128xbf16>,
    return
  }
  func.func @transform_0(%arg0: i32) -> (i32, i32) {
    %c0_i32 = arith.constant 0 : i32
    %c0_i32_0 = arith.constant 0 : i32
    return %arg0, %c0_i32 : i32, i32
  }
  func.func @transform_1(%arg0: i32) -> (i32, i32) {
    %c0_i32 = arith.constant 0 : i32
    %c0_i32_0 = arith.constant 0 : i32
    %c0_i32_1 = arith.constant 0 : i32
    return %c0_i32, %c0_i32_0 : i32, i32
  }
  func.func @transform_2(%arg0: i32) -> (i32, i32) {
    %c0_i32 = arith.constant 0 : i32
    %c0_i32_0 = arith.constant 0 : i32
    %c0_i32_1 = arith.constant 0 : i32
    return %c0_i32, %c0_i32_0 : i32, i32
  }
  func.func @transform_3(%arg0: i32) -> (i32, i32) {
    %c0_i32 = arith.constant 0 : i32
    %c0_i32_0 = arith.constant 0 : i32
    return %arg0, %c0_i32 : i32, i32
  }
}

module attributes {stable_mosaic.version = 11 : i64} {
  func.func @_head_decode_kernel(%arg0: i32, %arg1: memref<8x128xbf16, #tpu.memory_space<vmem>>, %arg2: memref<128x128xbf16, #tpu.memory_space<vmem>>, %arg3: memref<1x128xf32, #tpu.memory_space<vmem>>, %arg4: memref<8x128xf32, #tpu.memory_space<vmem>>, %arg5: memref<8x128xf32, #tpu.memory_space<vmem>>, %arg6: memref<8x128xf32, #tpu.memory_space<vmem>>, %arg7: memref<8x128xf32, #tpu.memory_space<vmem>>) attributes {dimension_semantics = [#tpu.dimension_semantics<arbitrary>], iteration_bounds = array<i64: 1>, scalar_prefetch = 0 : i64, scratch_operands = 0 : i64, tpu.core_type = #tpu.core_type<tc>, window_params = [{pipeline_mode = #tpu.pipeline_mode<synchronous>, transform_indices = @transform_0, window_bounds = array<i64: 8, 128>}, {pipeline_mode = #tpu.pipeline_mode<synchronous>, transform_indices = @transform_1, window_bounds = array<i64: 128, 128>}, {pipeline_mode = #tpu.pipeline_mode<synchronous>, transform_indices = @transform_2, window_bounds = array<i64: 1, 128>}, {pipeline_mode = #tpu.pipeline_mode<synchronous>, transform_indices = @transform_3, window_bounds = array<i64: 8, 128>}, {pipeline_mode = #tpu.pipeline_mode<synchronous>, transform_indices = @transform_4, window_bounds = array<i64: 8, 128>}, {pipeline_mode = #tpu.pipeline_mode<synchronous>, transform_indices = @transform_5, window_bounds = array<i64: 8, 128>}, {pipeline_mode = #tpu.pipeline_mode<synchronous>, transform_indices = @transform_6, window_bounds = array<i64: 8, 128>}]} {
    %c0 = arith.constant 0 : index
    %c0_0 = arith.constant 0 : index
    %0 = vector.load %arg1[%c0, %c0_0] : memref<8x128xbf16, #tpu.memory_space<vmem>>, vector<8x128xbf16>
    %c0_1 = arith.constant 0 : index
    %c0_2 = arith.constant 0 : index
    %1 = vector.load %arg2[%c0_1, %c0_2] : memref<128x128xbf16, #tpu.memory_space<vmem>>, vector<128x128xbf16>
    %cst = arith.constant dense<0.000000e+00> : vector<8x128xf32>
    %2 = tpu.matmul %0, %1, %cst {dimension_numbers = #tpu.dot_dimension_numbers<[1], [0], [0], [1], [0, 0, 1, 1], [], []>} : vector<8x128xbf16>, vector<128x128xbf16>, vector<8x128xf32> -> vector<8x128xf32>
    %c0_3 = arith.constant 0 : index
    %c0_4 = arith.constant 0 : index
    %3 = vector.load %arg3[%c0_3, %c0_4] : memref<1x128xf32, #tpu.memory_space<vmem>>, vector<1x128xf32>
    %4 = vector.broadcast %3 : vector<1x128xf32> to vector<8x128xf32>
    %5 = arith.addf %2, %4 : vector<8x128xf32>
    %c0_5 = arith.constant 0 : index
    %c0_6 = arith.constant 0 : index
    %6 = vector.load %arg6[%c0_5, %c0_6] : memref<8x128xf32, #tpu.memory_space<vmem>>, vector<8x128xf32>
    tpu.vector_store %arg6[%c0_5, %c0_6], %5 {strides = array<i32>} : memref<8x128xf32, #tpu.memory_space<vmem>>, vector<8x128xf32>,
    %c0_7 = arith.constant 0 : index
    %c0_8 = arith.constant 0 : index
    %7 = vector.load %arg4[%c0_7, %c0_8] : memref<8x128xf32, #tpu.memory_space<vmem>>, vector<1x128xf32>
    %c1 = arith.constant 1 : index
    %c0_9 = arith.constant 0 : index
    %8 = vector.load %arg4[%c1, %c0_9] : memref<8x128xf32, #tpu.memory_space<vmem>>, vector<1x128xf32>
    %c2 = arith.constant 2 : index
    %c0_10 = arith.constant 0 : index
    %9 = vector.load %arg4[%c2, %c0_10] : memref<8x128xf32, #tpu.memory_space<vmem>>, vector<1x128xf32>
    %c3 = arith.constant 3 : index
    %c0_11 = arith.constant 0 : index
    %10 = vector.load %arg4[%c3, %c0_11] : memref<8x128xf32, #tpu.memory_space<vmem>>, vector<1x128xf32>
    %11 = arith.negf %5 : vector<8x128xf32>
    %12 = math.exp %11 : vector<8x128xf32>
    %cst_12 = arith.constant 1.000000e+00 : f32
    %13 = vector.broadcast %cst_12 : f32 to vector<8x128xf32>
    %14 = arith.addf %13, %12 : vector<8x128xf32>
    %15 = arith.divf %13, %14 : vector<8x128xf32>
    %c0_13 = arith.constant 0 : index
    %c0_14 = arith.constant 0 : index
    %16 = vector.load %arg5[%c0_13, %c0_14] : memref<8x128xf32, #tpu.memory_space<vmem>>, vector<8x128xf32>
    %17 = arith.addf %15, %16 : vector<8x128xf32>
    %cst_15 = arith.constant 3.200000e+01 : f32
    %18 = vector.broadcast %cst_15 : f32 to vector<8x128xf32>
    %19 = arith.mulf %17, %18 : vector<8x128xf32>
    %20 = vector.broadcast %8 : vector<1x128xf32> to vector<8x128xf32>
    %21 = arith.mulf %5, %20 : vector<8x128xf32>
    %22 = math.exp %21 : vector<8x128xf32>
    %23 = vector.broadcast %10 : vector<1x128xf32> to vector<8x128xf32>
    %24 = arith.mulf %22, %23 : vector<8x128xf32>
    %25 = vector.broadcast %7 : vector<1x128xf32> to vector<8x128xf32>
    %26 = arith.mulf %25, %19 : vector<8x128xf32>
    %27 = vector.broadcast %8 : vector<1x128xf32> to vector<8x128xf32>
    %28 = arith.mulf %27, %24 : vector<8x128xf32>
    %29 = arith.addf %26, %28 : vector<8x128xf32>
    %30 = vector.broadcast %9 : vector<1x128xf32> to vector<8x128xf32>
    %31 = arith.mulf %30, %15 : vector<8x128xf32>
    %32 = arith.addf %29, %31 : vector<8x128xf32>
    %c0_16 = arith.constant 0 : index
    %c0_17 = arith.constant 0 : index
    %33 = vector.load %arg7[%c0_16, %c0_17] : memref<8x128xf32, #tpu.memory_space<vmem>>, vector<8x128xf32>
    tpu.vector_store %arg7[%c0_16, %c0_17], %32 {strides = array<i32>} : memref<8x128xf32, #tpu.memory_space<vmem>>, vector<8x128xf32>,
    return
  }
  func.func @transform_0(%arg0: i32) -> (i32, i32) {
    %c0_i32 = arith.constant 0 : i32
    %c0_i32_0 = arith.constant 0 : i32
    %c0_i32_1 = arith.constant 0 : i32
    return %c0_i32, %c0_i32_0 : i32, i32
  }
  func.func @transform_1(%arg0: i32) -> (i32, i32) {
    %c0_i32 = arith.constant 0 : i32
    %c0_i32_0 = arith.constant 0 : i32
    %c0_i32_1 = arith.constant 0 : i32
    return %c0_i32, %c0_i32_0 : i32, i32
  }
  func.func @transform_2(%arg0: i32) -> (i32, i32) {
    %c0_i32 = arith.constant 0 : i32
    %c0_i32_0 = arith.constant 0 : i32
    %c0_i32_1 = arith.constant 0 : i32
    return %c0_i32, %c0_i32_0 : i32, i32
  }
  func.func @transform_3(%arg0: i32) -> (i32, i32) {
    %c0_i32 = arith.constant 0 : i32
    %c0_i32_0 = arith.constant 0 : i32
    %c0_i32_1 = arith.constant 0 : i32
    return %c0_i32, %c0_i32_0 : i32, i32
  }
  func.func @transform_4(%arg0: i32) -> (i32, i32) {
    %c0_i32 = arith.constant 0 : i32
    %c0_i32_0 = arith.constant 0 : i32
    %c0_i32_1 = arith.constant 0 : i32
    return %c0_i32, %c0_i32_0 : i32, i32
  }
  func.func @transform_5(%arg0: i32) -> (i32, i32) {
    %c0_i32 = arith.constant 0 : i32
    %c0_i32_0 = arith.constant 0 : i32
    %c0_i32_1 = arith.constant 0 : i32
    return %c0_i32, %c0_i32_0 : i32, i32
  }
  func.func @transform_6(%arg0: i32) -> (i32, i32) {
    %c0_i32 = arith.constant 0 : i32
    %c0_i32_0 = arith.constant 0 : i32
    %c0_i32_1 = arith.constant 0 : i32
    return %c0_i32, %c0_i32_0 : i32, i32
  }
}

module attributes {stable_mosaic.version = 11 : i64} {
  func.func @_head_decode_kernel(%arg0: i32, %arg1: memref<32x128xbf16, #tpu.memory_space<vmem>>, %arg2: memref<128x128xbf16, #tpu.memory_space<vmem>>, %arg3: memref<1x128xf32, #tpu.memory_space<vmem>>, %arg4: memref<8x128xf32, #tpu.memory_space<vmem>>, %arg5: memref<32x128xf32, #tpu.memory_space<vmem>>, %arg6: memref<32x128xf32, #tpu.memory_space<vmem>>, %arg7: memref<32x128xf32, #tpu.memory_space<vmem>>) attributes {dimension_semantics = [#tpu.dimension_semantics<arbitrary>], iteration_bounds = array<i64: 1>, scalar_prefetch = 0 : i64, scratch_operands = 0 : i64, tpu.core_type = #tpu.core_type<tc>, window_params = [{pipeline_mode = #tpu.pipeline_mode<synchronous>, transform_indices = @transform_0, window_bounds = array<i64: 32, 128>}, {pipeline_mode = #tpu.pipeline_mode<synchronous>, transform_indices = @transform_1, window_bounds = array<i64: 128, 128>}, {pipeline_mode = #tpu.pipeline_mode<synchronous>, transform_indices = @transform_2, window_bounds = array<i64: 1, 128>}, {pipeline_mode = #tpu.pipeline_mode<synchronous>, transform_indices = @transform_3, window_bounds = array<i64: 8, 128>}, {pipeline_mode = #tpu.pipeline_mode<synchronous>, transform_indices = @transform_4, window_bounds = array<i64: 32, 128>}, {pipeline_mode = #tpu.pipeline_mode<synchronous>, transform_indices = @transform_5, window_bounds = array<i64: 32, 128>}, {pipeline_mode = #tpu.pipeline_mode<synchronous>, transform_indices = @transform_6, window_bounds = array<i64: 32, 128>}]} {
    %c0 = arith.constant 0 : index
    %c0_0 = arith.constant 0 : index
    %0 = vector.load %arg1[%c0, %c0_0] : memref<32x128xbf16, #tpu.memory_space<vmem>>, vector<32x128xbf16>
    %c0_1 = arith.constant 0 : index
    %c0_2 = arith.constant 0 : index
    %1 = vector.load %arg2[%c0_1, %c0_2] : memref<128x128xbf16, #tpu.memory_space<vmem>>, vector<128x128xbf16>
    %cst = arith.constant dense<0.000000e+00> : vector<32x128xf32>
    %2 = tpu.matmul %0, %1, %cst {dimension_numbers = #tpu.dot_dimension_numbers<[1], [0], [0], [1], [0, 0, 1, 1], [], []>} : vector<32x128xbf16>, vector<128x128xbf16>, vector<32x128xf32> -> vector<32x128xf32>
    %c0_3 = arith.constant 0 : index
    %c0_4 = arith.constant 0 : index
    %3 = vector.load %arg3[%c0_3, %c0_4] : memref<1x128xf32, #tpu.memory_space<vmem>>, vector<1x128xf32>
    %4 = vector.broadcast %3 : vector<1x128xf32> to vector<32x128xf32>
    %5 = arith.addf %2, %4 : vector<32x128xf32>
    %c0_5 = arith.constant 0 : index
    %c0_6 = arith.constant 0 : index
    %6 = vector.load %arg6[%c0_5, %c0_6] : memref<32x128xf32, #tpu.memory_space<vmem>>, vector<32x128xf32>
    tpu.vector_store %arg6[%c0_5, %c0_6], %5 {strides = array<i32>} : memref<32x128xf32, #tpu.memory_space<vmem>>, vector<32x128xf32>,
    %c0_7 = arith.constant 0 : index
    %c0_8 = arith.constant 0 : index
    %7 = vector.load %arg4[%c0_7, %c0_8] : memref<8x128xf32, #tpu.memory_space<vmem>>, vector<1x128xf32>
    %c1 = arith.constant 1 : index
    %c0_9 = arith.constant 0 : index
    %8 = vector.load %arg4[%c1, %c0_9] : memref<8x128xf32, #tpu.memory_space<vmem>>, vector<1x128xf32>
    %c2 = arith.constant 2 : index
    %c0_10 = arith.constant 0 : index
    %9 = vector.load %arg4[%c2, %c0_10] : memref<8x128xf32, #tpu.memory_space<vmem>>, vector<1x128xf32>
    %c3 = arith.constant 3 : index
    %c0_11 = arith.constant 0 : index
    %10 = vector.load %arg4[%c3, %c0_11] : memref<8x128xf32, #tpu.memory_space<vmem>>, vector<1x128xf32>
    %11 = arith.negf %5 : vector<32x128xf32>
    %12 = math.exp %11 : vector<32x128xf32>
    %cst_12 = arith.constant 1.000000e+00 : f32
    %13 = vector.broadcast %cst_12 : f32 to vector<32x128xf32>
    %14 = arith.addf %13, %12 : vector<32x128xf32>
    %15 = arith.divf %13, %14 : vector<32x128xf32>
    %c0_13 = arith.constant 0 : index
    %c0_14 = arith.constant 0 : index
    %16 = vector.load %arg5[%c0_13, %c0_14] : memref<32x128xf32, #tpu.memory_space<vmem>>, vector<32x128xf32>
    %17 = arith.addf %15, %16 : vector<32x128xf32>
    %cst_15 = arith.constant 1.600000e+01 : f32
    %18 = vector.broadcast %cst_15 : f32 to vector<32x128xf32>
    %19 = arith.mulf %17, %18 : vector<32x128xf32>
    %20 = vector.broadcast %8 : vector<1x128xf32> to vector<32x128xf32>
    %21 = arith.mulf %5, %20 : vector<32x128xf32>
    %22 = math.exp %21 : vector<32x128xf32>
    %23 = vector.broadcast %10 : vector<1x128xf32> to vector<32x128xf32>
    %24 = arith.mulf %22, %23 : vector<32x128xf32>
    %25 = vector.broadcast %7 : vector<1x128xf32> to vector<32x128xf32>
    %26 = arith.mulf %25, %19 : vector<32x128xf32>
    %27 = vector.broadcast %8 : vector<1x128xf32> to vector<32x128xf32>
    %28 = arith.mulf %27, %24 : vector<32x128xf32>
    %29 = arith.addf %26, %28 : vector<32x128xf32>
    %30 = vector.broadcast %9 : vector<1x128xf32> to vector<32x128xf32>
    %31 = arith.mulf %30, %15 : vector<32x128xf32>
    %32 = arith.addf %29, %31 : vector<32x128xf32>
    %c0_16 = arith.constant 0 : index
    %c0_17 = arith.constant 0 : index
    %33 = vector.load %arg7[%c0_16, %c0_17] : memref<32x128xf32, #tpu.memory_space<vmem>>, vector<32x128xf32>
    tpu.vector_store %arg7[%c0_16, %c0_17], %32 {strides = array<i32>} : memref<32x128xf32, #tpu.memory_space<vmem>>, vector<32x128xf32>,
    return
  }
  func.func @transform_0(%arg0: i32) -> (i32, i32) {
    %c0_i32 = arith.constant 0 : i32
    %c0_i32_0 = arith.constant 0 : i32
    %c0_i32_1 = arith.constant 0 : i32
    return %c0_i32, %c0_i32_0 : i32, i32
  }
  func.func @transform_1(%arg0: i32) -> (i32, i32) {
    %c0_i32 = arith.constant 0 : i32
    %c0_i32_0 = arith.constant 0 : i32
    %c0_i32_1 = arith.constant 0 : i32
    return %c0_i32, %c0_i32_0 : i32, i32
  }
  func.func @transform_2(%arg0: i32) -> (i32, i32) {
    %c0_i32 = arith.constant 0 : i32
    %c0_i32_0 = arith.constant 0 : i32
    %c0_i32_1 = arith.constant 0 : i32
    return %c0_i32, %c0_i32_0 : i32, i32
  }
  func.func @transform_3(%arg0: i32) -> (i32, i32) {
    %c0_i32 = arith.constant 0 : i32
    %c0_i32_0 = arith.constant 0 : i32
    %c0_i32_1 = arith.constant 0 : i32
    return %c0_i32, %c0_i32_0 : i32, i32
  }
  func.func @transform_4(%arg0: i32) -> (i32, i32) {
    %c0_i32 = arith.constant 0 : i32
    %c0_i32_0 = arith.constant 0 : i32
    %c0_i32_1 = arith.constant 0 : i32
    return %c0_i32, %c0_i32_0 : i32, i32
  }
  func.func @transform_5(%arg0: i32) -> (i32, i32) {
    %c0_i32 = arith.constant 0 : i32
    %c0_i32_0 = arith.constant 0 : i32
    %c0_i32_1 = arith.constant 0 : i32
    return %c0_i32, %c0_i32_0 : i32, i32
  }
  func.func @transform_6(%arg0: i32) -> (i32, i32) {
    %c0_i32 = arith.constant 0 : i32
    %c0_i32_0 = arith.constant 0 : i32
    %c0_i32_1 = arith.constant 0 : i32
    return %c0_i32, %c0_i32_0 : i32, i32
  }
}

module attributes {stable_mosaic.version = 11 : i64} {
  func.func @_head_decode_kernel(%arg0: i32, %arg1: memref<128x64xbf16, #tpu.memory_space<vmem>>, %arg2: memref<64x128xbf16, #tpu.memory_space<vmem>>, %arg3: memref<1x128xf32, #tpu.memory_space<vmem>>, %arg4: memref<8x128xf32, #tpu.memory_space<vmem>>, %arg5: memref<128x128xf32, #tpu.memory_space<vmem>>, %arg6: memref<128x128xf32, #tpu.memory_space<vmem>>, %arg7: memref<128x128xf32, #tpu.memory_space<vmem>>) attributes {dimension_semantics = [#tpu.dimension_semantics<arbitrary>], iteration_bounds = array<i64: 1>, scalar_prefetch = 0 : i64, scratch_operands = 0 : i64, tpu.core_type = #tpu.core_type<tc>, window_params = [{pipeline_mode = #tpu.pipeline_mode<synchronous>, transform_indices = @transform_0, window_bounds = array<i64: 128, 64>}, {pipeline_mode = #tpu.pipeline_mode<synchronous>, transform_indices = @transform_1, window_bounds = array<i64: 64, 128>}, {pipeline_mode = #tpu.pipeline_mode<synchronous>, transform_indices = @transform_2, window_bounds = array<i64: 1, 128>}, {pipeline_mode = #tpu.pipeline_mode<synchronous>, transform_indices = @transform_3, window_bounds = array<i64: 8, 128>}, {pipeline_mode = #tpu.pipeline_mode<synchronous>, transform_indices = @transform_4, window_bounds = array<i64: 128, 128>}, {pipeline_mode = #tpu.pipeline_mode<synchronous>, transform_indices = @transform_5, window_bounds = array<i64: 128, 128>}, {pipeline_mode = #tpu.pipeline_mode<synchronous>, transform_indices = @transform_6, window_bounds = array<i64: 128, 128>}]} {
    %c0 = arith.constant 0 : index
    %c0_0 = arith.constant 0 : index
    %0 = vector.load %arg1[%c0, %c0_0] : memref<128x64xbf16, #tpu.memory_space<vmem>>, vector<128x64xbf16>
    %c0_1 = arith.constant 0 : index
    %c0_2 = arith.constant 0 : index
    %1 = vector.load %arg2[%c0_1, %c0_2] : memref<64x128xbf16, #tpu.memory_space<vmem>>, vector<64x128xbf16>
    %cst = arith.constant dense<0.000000e+00> : vector<128x128xf32>
    %2 = tpu.matmul %0, %1, %cst {dimension_numbers = #tpu.dot_dimension_numbers<[1], [0], [0], [1], [0, 0, 1, 1], [], []>} : vector<128x64xbf16>, vector<64x128xbf16>, vector<128x128xf32> -> vector<128x128xf32>
    %c0_3 = arith.constant 0 : index
    %c0_4 = arith.constant 0 : index
    %3 = vector.load %arg3[%c0_3, %c0_4] : memref<1x128xf32, #tpu.memory_space<vmem>>, vector<1x128xf32>
    %4 = vector.broadcast %3 : vector<1x128xf32> to vector<128x128xf32>
    %5 = arith.addf %2, %4 : vector<128x128xf32>
    %c0_5 = arith.constant 0 : index
    %c0_6 = arith.constant 0 : index
    %6 = vector.load %arg6[%c0_5, %c0_6] : memref<128x128xf32, #tpu.memory_space<vmem>>, vector<128x128xf32>
    tpu.vector_store %arg6[%c0_5, %c0_6], %5 {strides = array<i32>} : memref<128x128xf32, #tpu.memory_space<vmem>>, vector<128x128xf32>,
    %c0_7 = arith.constant 0 : index
    %c0_8 = arith.constant 0 : index
    %7 = vector.load %arg4[%c0_7, %c0_8] : memref<8x128xf32, #tpu.memory_space<vmem>>, vector<1x128xf32>
    %c1 = arith.constant 1 : index
    %c0_9 = arith.constant 0 : index
    %8 = vector.load %arg4[%c1, %c0_9] : memref<8x128xf32, #tpu.memory_space<vmem>>, vector<1x128xf32>
    %c2 = arith.constant 2 : index
    %c0_10 = arith.constant 0 : index
    %9 = vector.load %arg4[%c2, %c0_10] : memref<8x128xf32, #tpu.memory_space<vmem>>, vector<1x128xf32>
    %c3 = arith.constant 3 : index
    %c0_11 = arith.constant 0 : index
    %10 = vector.load %arg4[%c3, %c0_11] : memref<8x128xf32, #tpu.memory_space<vmem>>, vector<1x128xf32>
    %11 = arith.negf %5 : vector<128x128xf32>
    %12 = math.exp %11 : vector<128x128xf32>
    %cst_12 = arith.constant 1.000000e+00 : f32
    %13 = vector.broadcast %cst_12 : f32 to vector<128x128xf32>
    %14 = arith.addf %13, %12 : vector<128x128xf32>
    %15 = arith.divf %13, %14 : vector<128x128xf32>
    %c0_13 = arith.constant 0 : index
    %c0_14 = arith.constant 0 : index
    %16 = vector.load %arg5[%c0_13, %c0_14] : memref<128x128xf32, #tpu.memory_space<vmem>>, vector<128x128xf32>
    %17 = arith.addf %15, %16 : vector<128x128xf32>
    %cst_15 = arith.constant 8.000000e+00 : f32
    %18 = vector.broadcast %cst_15 : f32 to vector<128x128xf32>
    %19 = arith.mulf %17, %18 : vector<128x128xf32>
    %20 = vector.broadcast %8 : vector<1x128xf32> to vector<128x128xf32>
    %21 = arith.mulf %5, %20 : vector<128x128xf32>
    %22 = math.exp %21 : vector<128x128xf32>
    %23 = vector.broadcast %10 : vector<1x128xf32> to vector<128x128xf32>
    %24 = arith.mulf %22, %23 : vector<128x128xf32>
    %25 = vector.broadcast %7 : vector<1x128xf32> to vector<128x128xf32>
    %26 = arith.mulf %25, %19 : vector<128x128xf32>
    %27 = vector.broadcast %8 : vector<1x128xf32> to vector<128x128xf32>
    %28 = arith.mulf %27, %24 : vector<128x128xf32>
    %29 = arith.addf %26, %28 : vector<128x128xf32>
    %30 = vector.broadcast %9 : vector<1x128xf32> to vector<128x128xf32>
    %31 = arith.mulf %30, %15 : vector<128x128xf32>
    %32 = arith.addf %29, %31 : vector<128x128xf32>
    %c0_16 = arith.constant 0 : index
    %c0_17 = arith.constant 0 : index
    %33 = vector.load %arg7[%c0_16, %c0_17] : memref<128x128xf32, #tpu.memory_space<vmem>>, vector<128x128xf32>
    tpu.vector_store %arg7[%c0_16, %c0_17], %32 {strides = array<i32>} : memref<128x128xf32, #tpu.memory_space<vmem>>, vector<128x128xf32>,
    return
  }
  func.func @transform_0(%arg0: i32) -> (i32, i32) {
    %c0_i32 = arith.constant 0 : i32
    %c0_i32_0 = arith.constant 0 : i32
    %c0_i32_1 = arith.constant 0 : i32
    return %c0_i32, %c0_i32_0 : i32, i32
  }
  func.func @transform_1(%arg0: i32) -> (i32, i32) {
    %c0_i32 = arith.constant 0 : i32
    %c0_i32_0 = arith.constant 0 : i32
    %c0_i32_1 = arith.constant 0 : i32
    return %c0_i32, %c0_i32_0 : i32, i32
  }
  func.func @transform_2(%arg0: i32) -> (i32, i32) {
    %c0_i32 = arith.constant 0 : i32
    %c0_i32_0 = arith.constant 0 : i32
    %c0_i32_1 = arith.constant 0 : i32
    return %c0_i32, %c0_i32_0 : i32, i32
  }
  func.func @transform_3(%arg0: i32) -> (i32, i32) {
    %c0_i32 = arith.constant 0 : i32
    %c0_i32_0 = arith.constant 0 : i32
    %c0_i32_1 = arith.constant 0 : i32
    return %c0_i32, %c0_i32_0 : i32, i32
  }
  func.func @transform_4(%arg0: i32) -> (i32, i32) {
    %c0_i32 = arith.constant 0 : i32
    %c0_i32_0 = arith.constant 0 : i32
    %c0_i32_1 = arith.constant 0 : i32
    return %c0_i32, %c0_i32_0 : i32, i32
  }
  func.func @transform_5(%arg0: i32) -> (i32, i32) {
    %c0_i32 = arith.constant 0 : i32
    %c0_i32_0 = arith.constant 0 : i32
    %c0_i32_1 = arith.constant 0 : i32
    return %c0_i32, %c0_i32_0 : i32, i32
  }
  func.func @transform_6(%arg0: i32) -> (i32, i32) {
    %c0_i32 = arith.constant 0 : i32
    %c0_i32_0 = arith.constant 0 : i32
    %c0_i32_1 = arith.constant 0 : i32
    return %c0_i32, %c0_i32_0 : i32, i32
  }
}

</mosaic_0001>

<bundles_post_ra>
// kernel: build_model_forward.16
= control target key start
LH: loop header
LB: loop body
LE: loop exit
PB: predicated region body
PF: predicated region fallthrough
CT: control target
= control target key end

     0   :  { %s6615_s22 = smov 0   ;;  %s7592_s0 = inlined_call_operand.vmem [shape: bf16[2048,27], index: 0, kind: input, shape index: {}]   ;;  %s7593_s1 = inlined_call_operand.<no memory space> [shape: bf16[], index: 1, kind: input, shape index: {}]   ;;  %s7594_s2 = inlined_call_operand.vmem [shape: bf16[27,16], index: 2, kind: input, shape index: {}]   ;;  %s7595_s3 = inlined_call_operand.vmem [shape: f32[16], index: 3, kind: input, shape index: {}]   ;;  %s7596_s4 = inlined_call_operand.<no memory space> [shape: f32[], index: 4, kind: input, shape index: {}]   ;;  %s7597_s5 = inlined_call_operand.vmem [shape: bf16[2048,128], index: 5, kind: output, shape index: {}]  }
   0x1   :  { %v10_v0 = vstv %s7593_s1  ;;  %v20_v1 = vstv %s7596_s4 }
   0x2   :  { %v6613_v2 = vunpack.i.l.bf16 %v10_v0 }
   0x3 LB: > { %s5371_s23 = sadd.s32 4294967295, %s6574_s22   ;;  %p5375_p0 = scmp.ge.s32.totalorder %s6574_s22, 1  ;;  %s6574_s22 = sphi %s6615_s22, %s26_s22  }
   0x4   : > { %p151_p1 = scmp.lt.s32.totalorder %s6574_s22, 3 }
   0x6   : > { %p152_p2 = pnand %p5375_p0, %p151_p1 }
   0x8   : > { %155 = sbr.rel (%p152_p2) target bundleno = 424 (0x1a8), region = 32 }
   0xf   : > { %v199_v3 = vlaneseq  ;;  %v3010_v4 = vld [vmem:[%s7594_s2] sm:$0xff]   ;;  %v5508_v6 = vld [vmem:[%s7594_s2 + $0x8] sm:$0xff]   ;;  %v5844_v7 = vpack.c.bf16 %v6613_v2, %v6613_v2  ;;  %s5376_s29 = sshll.u32 %s5371_s23, 7  ;;  %v6576_v19 = vmov 0.0  }
  0x10   : > { %v3155_v5 = vld [vmem:[%s7595_s3] sm:$0x1]  ;;  %v3011_v8 = vunpack.c.l.bf16 %v3010_v4  ;;  %v3037_v9 = vunpack.c.h.bf16 %v3010_v4  ;;  %v3064_v10 = vunpack.c.l.bf16 %v5508_v6  ;;  %p176_p3 = scmp.lt.s32.totalorder %s5376_s29, 255  ;;  %v3091_v14 = vunpack.c.h.bf16 %v5508_v6 }
  0x11   : > { %v6634_v11 = vand.u32 127, %v199_v3  ;;  %vm3158_vm0 = vcmp.lt.s32.totalorder %v199_v3, 16  ;;  %v3094_v12 = vshrl.u32 %v199_v3, 7  ;;  %5845 = vst [vmem:[#allocation18 + $0x10] sm:$0xff] %v5844_v7   ;;  %5850 = vst [vmem:[#allocation18 + $0x18] sm:$0xff] %v5844_v7  }
  0x12   : > { %5855 = vst [vmem:[#allocation18 + $0x20] sm:$0xff] %v5844_v7   ;;  %5860 = vst [vmem:[#allocation18 + $0x28] sm:$0xff] %v5844_v7   ;;  %v3159_v13 = vsel %vm3158_vm0, %v3155_v5, %v20_v1  ;;  %s7599_s29 = smov (!%p176_p3, %s5376_s29), 255 }
  0x13   : > { %5865 = vst [vmem:[#allocation18 + $0x30] sm:$0xff] %v5844_v7   ;;  %5870 = vst [vmem:[#allocation18 + $0x38] sm:$0xff] %v5844_v7   ;;  %vm3021_vm1 = vcmp.lt.s32.totalorder %v6634_v11, 16  ;;  %v3095_v15 = vadd.s32 24, %v3094_v12  ;;  %s5377_s7 = sshll.u32 %s7599_s29, 2  ;;  %vm202_vm3 = vcmp.lt.s32.totalorder %v6634_v11, 27 }
  0x14   : > { %3161 = vst [vmem:[#allocation19] sm:$0x1] %v3159_v13  ;;  %v3022_v16 = vsel %vm3021_vm1, %v3011_v8, %v6613_v2  ;;  %v3048_v17 = vsel %vm3021_vm1, %v3037_v9, %v6613_v2  ;;  %v3075_v18 = vsel %vm3021_vm1, %v3064_v10, %v6613_v2  ;;  %s6661_s10 = scalar_lea.vmem %s7592_s0, %s5377_s7  ;;  %s7268_s13 = scalar_lea.vmem %s7597_s5, %s5377_s7 }
  0x15   : > { %v3023_v20 = vpack.c.bf16 %v6576_v19, %v3022_v16  ;;  %v3050_v21 = vpack.c.bf16 %v6576_v19, %v3048_v17  ;;  %v3077_v22 = vpack.c.bf16 %v6576_v19, %v3075_v18  ;;  %vm3096_vm2 = vcmp.lt.s32.totalorder %v3095_v15, 27  ;;  %v196_v24 = vld [vmem:[%s6661_s10] sm:$0xff]   ;;  %v5381_v26 = vld [vmem:[%s6661_s10 + $0x8] sm:$0xff]   ;;  %v5383_v40 = vld [vmem:[%s6661_s10 + $0x10] sm:$0xff]  }
  0x16   : > { %v3097_v23 = vsel %vm3096_vm2, %v3091_v14, %v6613_v2  ;;  %v5443_v25 = vld [vmem:[%s6661_s10 + $0x100] sm:$0xff]   ;;  %v197_v28 = vunpack.c.l.bf16 %v196_v24  ;;  %v218_v29 = vunpack.c.h.bf16 %v196_v24  ;;  %v5445_v31 = vld [vmem:[%s6661_s10 + $0x108] sm:$0xff]   ;;  %v240_v34 = vunpack.c.l.bf16 %v5381_v26  ;;  %v5447_v45 = vld [vmem:[%s6661_s10 + $0x110] sm:$0xff]  }
  0x17   : > { %3025 = vst [vmem:[#allocation18] sm:$0xf] %v3023_v20  ;;  %3052 = vst [vmem:[#allocation18 + $0x4] sm:$0xf] %v3050_v21  ;;  %v3102_v27 = vsel %vm3021_vm1, %v3097_v23, %v6613_v2  ;;  %v1604_v30 = vunpack.c.l.bf16 %v5443_v25  ;;  %v1626_v33 = vunpack.c.h.bf16 %v5443_v25  ;;  %v262_v35 = vunpack.c.h.bf16 %v5381_v26  ;;  %v5385_v0 = vld [vmem:[%s6661_s10 + $0x18] sm:$0xff]   ;;  %v5387_v8 = vld [vmem:[%s6661_s10 + $0x20] sm:$0xff]  }
  0x18   : > { %3079 = vst [vmem:[#allocation18 + $0x8] sm:$0xf] %v3077_v22  ;;  %v3104_v32 = vpack.c.bf16 %v6576_v19, %v3102_v27  ;;  %v203_v36 = vsel %vm202_vm3, %v197_v28, %v6613_v2  ;;  %v224_v37 = vsel %vm202_vm3, %v218_v29, %v6613_v2  ;;  %v1648_v39 = vunpack.c.l.bf16 %v5445_v31  ;;  %v5449_v7 = vld [vmem:[%s6661_s10 + $0x118] sm:$0xff]   ;;  %v5451_v9 = vld [vmem:[%s6661_s10 + $0x120] sm:$0xff]   ;;  %v6497_v16 = vld [vmem:[#allocation18 + $0x10] sm:$0xff]  }
  0x19   : > { %v1610_v38 = vsel %vm202_vm3, %v1604_v30, %v6613_v2  ;;  %v204_v41 = vpack.c.bf16 %v6576_v19, %v203_v36  ;;  %v226_v42 = vpack.c.bf16 %v6576_v19, %v224_v37  ;;  %v1632_v44 = vsel %vm202_vm3, %v1626_v33, %v6613_v2  ;;  %v5389_v22 = vld [vmem:[%s6661_s10 + $0x28] sm:$0xff]  }
  0x1a   : > { %3106 = vst [vmem:[#allocation18 + $0xc] sm:$0xf] %v3104_v32  ;;  %v1612_v43 = vpack.c.bf16 %v6576_v19, %v1610_v38  ;;  %v1634_v46 = vpack.c.bf16 %v6576_v19, %v1632_v44  ;;  %v246_v47 = vsel %vm202_vm3, %v240_v34, %v6613_v2  ;;  %v268_v48 = vsel %vm202_vm3, %v262_v35, %v6613_v2  ;;  %v5453_v23 = vld [vmem:[%s6661_s10 + $0x128] sm:$0xff]   ;;  %v5391_v38 = vld [vmem:[%s6661_s10 + $0x30] sm:$0xff]  }
  0x1b   : > { %v1654_v49 = vsel %vm202_vm3, %v1648_v39, %v6613_v2  ;;  %206 = vst [vmem:[#allocation17] sm:$0xf] %v204_v41  ;;  %228 = vst [vmem:[#allocation17 + $0x4] sm:$0xf] %v226_v42  ;;  %v248_v50 = vpack.c.bf16 %v6576_v19, %v246_v47  ;;  %v270_v51 = vpack.c.bf16 %v6576_v19, %v268_v48  ;;  %v1670_v53 = vunpack.c.h.bf16 %v5445_v31  ;;  %v6498_v39 = vld [vmem:[#allocation18 + $0x18] sm:$0xff]   ;;  %v5455_v48 = vld [vmem:[%s6661_s10 + $0x130] sm:$0xff]  }
  0x1c   : > { %1614 = vst [vmem:[#allocation17 + $0x100] sm:$0xf] %v1612_v43  ;;  %v1656_v52 = vpack.c.bf16 %v6576_v19, %v1654_v49  ;;  %1636 = vst [vmem:[#allocation17 + $0x104] sm:$0xf] %v1634_v46  ;;  %v284_v54 = vunpack.c.l.bf16 %v5383_v40  ;;  %v306_v55 = vunpack.c.h.bf16 %v5383_v40  ;;  %v1692_v56 = vunpack.c.l.bf16 %v5447_v45 }
  0x1d   : > { %v1714_v57 = vunpack.c.h.bf16 %v5447_v45  ;;  %250 = vst [vmem:[#allocation17 + $0x8] sm:$0xf] %v248_v50  ;;  %272 = vst [vmem:[#allocation17 + $0xc] sm:$0xf] %v270_v51  ;;  %v1676_v59 = vsel %vm202_vm3, %v1670_v53, %v6613_v2  ;;  %v328_v6 = vunpack.c.l.bf16 %v5385_v0  ;;  %v350_v13 = vunpack.c.h.bf16 %v5385_v0 }
  0x1e   : > { %v6495_v58 = vld [vmem:[#allocation18] sm:$0xff]   ;;  %1658 = vst [vmem:[#allocation17 + $0x108] sm:$0xf] %v1656_v52  ;;  %v1678_v60 = vpack.c.bf16 %v6576_v19, %v1676_v59  ;;  %v290_v61 = vsel %vm202_vm3, %v284_v54, %v6613_v2  ;;  %v312_v62 = vsel %vm202_vm3, %v306_v55, %v6613_v2  ;;  %v1698_v63 = vsel %vm202_vm3, %v1692_v56, %v6613_v2 }
  0x1f   : > { %6326 = vmatprep.subr.bf16.mxu0 %v6495_v58  ;;  %6470 = vmatprep.subr.bf16.mxu1 %v6495_v58  ;;  %v292_v3 = vpack.c.bf16 %v6576_v19, %v290_v61  ;;  %v314_v4 = vpack.c.bf16 %v6576_v19, %v312_v62  ;;  %v1700_v5 = vpack.c.bf16 %v6576_v19, %v1698_v63  ;;  %v1736_v14 = vunpack.c.l.bf16 %v5449_v7  ;;  %v5457_v63 = vld [vmem:[%s6661_s10 + $0x138] sm:$0xff]  }
  0x20   : > { %6327 = vmatpush3.bf16.msra.mxu0 %v6495_v58  ;;  %6478 = vmatpush3.bf16.msra.mxu1 %v6495_v58  ;;  %1680 = vst [vmem:[#allocation17 + $0x10c] sm:$0xf] %v1678_v60  ;;  %v1720_v12 = vsel %vm202_vm3, %v1714_v57, %v6613_v2  ;;  %v1758_v15 = vunpack.c.h.bf16 %v5449_v7  ;;  %v334_v18 = vsel %vm202_vm3, %v328_v6, %v6613_v2  ;;  %v372_v20 = vunpack.c.l.bf16 %v5387_v8  ;;  %v5393_v57 = vld [vmem:[%s6661_s10 + $0x38] sm:$0xff]   ;;  %v6499_v58 = vld [vmem:[#allocation18 + $0x20] sm:$0xff]   ;;  %v6789_v7 = vld [vmem:[#allocation18 + $0x28] sm:$0xff]  }
  0x21   : > { %v6496_v10 = vld [vmem:[#allocation18 + $0x8] sm:$0xff]   ;;  %294 = vst [vmem:[#allocation17 + $0x10] sm:$0xf] %v292_v3  ;;  %316 = vst [vmem:[#allocation17 + $0x14] sm:$0xf] %v314_v4  ;;  %v1722_v17 = vpack.c.bf16 %v6576_v19, %v1720_v12  ;;  %v394_v21 = vunpack.c.h.bf16 %v5387_v8  ;;  %v336_v25 = vpack.c.bf16 %v6576_v19, %v334_v18  ;;  %v356_v26 = vsel %vm202_vm3, %v350_v13, %v6613_v2  ;;  %v5395_v6 = vld [vmem:[%s6661_s10 + $0x40] sm:$0xff]  }
  0x22   : > { %1702 = vst [vmem:[#allocation17 + $0x110] sm:$0xf] %v1700_v5  ;;  %6328 = vmatprep.subr.bf16.mxu0 %v6496_v10  ;;  %6471 = vmatprep.subr.bf16.mxu1 %v6496_v10  ;;  %v6503_v24 = vld [vmem:[#allocation17] sm:$0xff]   ;;  %v1742_v27 = vsel %vm202_vm3, %v1736_v14, %v6613_v2  ;;  %v1780_v28 = vunpack.c.l.bf16 %v5451_v9  ;;  %v358_v30 = vpack.c.bf16 %v6576_v19, %v356_v26  ;;  %v1802_v37 = vunpack.c.h.bf16 %v5451_v9 }
  0x23   : > { %v6504_v29 = vld [vmem:[#allocation17 + $0x100] sm:$0xff]   ;;  %1724 = vst [vmem:[#allocation17 + $0x114] sm:$0xf] %v1722_v17  ;;  %v1744_v31 = vpack.c.bf16 %v6576_v19, %v1742_v27  ;;  %v1764_v32 = vsel %vm202_vm3, %v1758_v15, %v6613_v2  ;;  %v378_v33 = vsel %vm202_vm3, %v372_v20, %v6613_v2  ;;  %338 = vst [vmem:[#allocation17 + $0x18] sm:$0xf] %v336_v25  ;;  %v416_v42 = vunpack.c.l.bf16 %v5389_v22 }
  0x24   : > { %6329 = vmatpush3.bf16.msra.mxu0 %v6496_v10  ;;  %6479 = vmatpush3.bf16.msra.mxu1 %v6496_v10  ;;  %v1766_v34 = vpack.c.bf16 %v6576_v19, %v1764_v32  ;;  %v380_v35 = vpack.c.bf16 %v6576_v19, %v378_v33  ;;  %v400_v36 = vsel %vm202_vm3, %v394_v21, %v6613_v2  ;;  %v438_v43 = vunpack.c.h.bf16 %v5389_v22  ;;  %v5459_v17 = vld [vmem:[%s6661_s10 + $0x140] sm:$0xff]   ;;  %v6501_v33 = vld [vmem:[#allocation18 + $0x30] sm:$0xff]  }
  0x25   : > { %6330 = vmatprep.subr.bf16.mxu0 %v6497_v16  ;;  %6472 = vmatprep.subr.bf16.mxu1 %v6497_v16  ;;  %360 = vst [vmem:[#allocation17 + $0x1c] sm:$0xf] %v358_v30  ;;  %1746 = vst [vmem:[#allocation17 + $0x118] sm:$0xf] %v1744_v31  ;;  %v402_v40 = vpack.c.bf16 %v6576_v19, %v400_v36  ;;  %v1786_v41 = vsel %vm202_vm3, %v1780_v28, %v6613_v2  ;;  %v1824_v46 = vunpack.c.l.bf16 %v5453_v23  ;;  %v5461_v28 = vld [vmem:[%s6661_s10 + $0x148] sm:$0xff]  }
  0x26   : > { %6342 = vmatprep.mubr.bf16.mxu0 %v6503_v24  ;;  %6406 = vmatprep.mubr.bf16.mxu1 %v6504_v29  ;;  %1768 = vst [vmem:[#allocation17 + $0x11c] sm:$0xf] %v1766_v34  ;;  %382 = vst [vmem:[#allocation17 + $0x20] sm:$0xf] %v380_v35  ;;  %v1788_v44 = vpack.c.bf16 %v6576_v19, %v1786_v41  ;;  %v1808_v45 = vsel %vm202_vm3, %v1802_v37, %v6613_v2  ;;  %v1846_v47 = vunpack.c.h.bf16 %v5453_v23  ;;  %v5397_v23 = vld [vmem:[%s6661_s10 + $0x48] sm:$0xff]  }
  0x27   : > { %404 = vst [vmem:[#allocation17 + $0x24] sm:$0xf] %v402_v40  ;;  %v1810_v49 = vpack.c.bf16 %v6576_v19, %v1808_v45  ;;  %v422_v50 = vsel %vm202_vm3, %v416_v42, %v6613_v2  ;;  %v444_v51 = vsel %vm202_vm3, %v438_v43, %v6613_v2  ;;  %v460_v52 = vunpack.c.l.bf16 %v5391_v38  ;;  %v5399_v42 = vld [vmem:[%s6661_s10 + $0x50] sm:$0xff]  }
  0x28   : > { %6331 = vmatpush3.bf16.msra.mxu0 %v6497_v16  ;;  %6480 = vmatpush3.bf16.msra.mxu1 %v6497_v16  ;;  %1790 = vst [vmem:[#allocation17 + $0x120] sm:$0xf] %v1788_v44  ;;  %v424_v53 = vpack.c.bf16 %v6576_v19, %v422_v50  ;;  %v446_v54 = vpack.c.bf16 %v6576_v19, %v444_v51  ;;  %v482_v56 = vunpack.c.h.bf16 %v5391_v38  ;;  %v1868_v62 = vunpack.c.l.bf16 %v5455_v48 }
  0x29   : > { %v1830_v55 = vsel %vm202_vm3, %v1824_v46, %v6613_v2  ;;  %6332 = vmatprep.subr.bf16.mxu0 %v6498_v39  ;;  %6473 = vmatprep.subr.bf16.mxu1 %v6498_v39  ;;  %1812 = vst [vmem:[#allocation17 + $0x124] sm:$0xf] %v1810_v49  ;;  %v1852_v60 = vsel %vm202_vm3, %v1846_v47, %v6613_v2  ;;  %v1890_v5 = vunpack.c.h.bf16 %v5455_v48  ;;  %v504_v10 = vunpack.c.l.bf16 %v5393_v57  ;;  %v5463_v47 = vld [vmem:[%s6661_s10 + $0x150] sm:$0xff]  }
  0x2a   : > { %v1832_v59 = vpack.c.bf16 %v6576_v19, %v1830_v55  ;;  %v466_v61 = vsel %vm202_vm3, %v460_v52, %v6613_v2  ;;  %426 = vst [vmem:[#allocation17 + $0x28] sm:$0xf] %v424_v53  ;;  %448 = vst [vmem:[#allocation17 + $0x2c] sm:$0xf] %v446_v54  ;;  %v1854_v0 = vpack.c.bf16 %v6576_v19, %v1852_v60  ;;  %v526_v12 = vunpack.c.h.bf16 %v5393_v57  ;;  %v5401_v52 = vld [vmem:[%s6661_s10 + $0x58] sm:$0xff]  }
  0x2b   : > { %v468_v3 = vpack.c.bf16 %v6576_v19, %v466_v61  ;;  %v488_v4 = vsel %vm202_vm3, %v482_v56, %v6613_v2  ;;  %v1874_v9 = vsel %vm202_vm3, %v1868_v62, %v6613_v2  ;;  %v1896_v14 = vsel %vm202_vm3, %v1890_v5, %v6613_v2  ;;  %v5465_v57 = vld [vmem:[%s6661_s10 + $0x158] sm:$0xff]   ;;  %v5403_v5 = vld [vmem:[%s6661_s10 + $0x60] sm:$0xff]  }
  0x2c   : > { %1834 = vst [vmem:[#allocation17 + $0x128] sm:$0xf] %v1832_v59  ;;  %v490_v8 = vpack.c.bf16 %v6576_v19, %v488_v4  ;;  %6333 = vmatpush3.bf16.msra.mxu0 %v6498_v39  ;;  %6481 = vmatpush3.bf16.msra.mxu1 %v6498_v39  ;;  %1856 = vst [vmem:[#allocation17 + $0x12c] sm:$0xf] %v1854_v0  ;;  %v1876_v13 = vpack.c.bf16 %v6576_v19, %v1874_v9  ;;  %v1912_v15 = vunpack.c.l.bf16 %v5457_v63 }
  0x2d   : > { %470 = vst [vmem:[#allocation17 + $0x30] sm:$0xf] %v468_v3  ;;  %v1934_v16 = vunpack.c.h.bf16 %v5457_v63  ;;  %6334 = vmatprep.subr.bf16.mxu0 %v6499_v58  ;;  %6474 = vmatprep.subr.bf16.mxu1 %v6499_v58  ;;  %v1898_v18 = vpack.c.bf16 %v6576_v19, %v1896_v14  ;;  %v510_v20 = vsel %vm202_vm3, %v504_v10, %v6613_v2  ;;  %v548_v22 = vunpack.c.l.bf16 %v5395_v6 }
  0x2e   : > { %492 = vst [vmem:[#allocation17 + $0x34] sm:$0xf] %v490_v8  ;;  %v532_v21 = vsel %vm202_vm3, %v526_v12, %v6613_v2  ;;  %1878 = vst [vmem:[#allocation17 + $0x130] sm:$0xf] %v1876_v13  ;;  %v512_v24 = vpack.c.bf16 %v6576_v19, %v510_v20  ;;  %v1918_v26 = vsel %vm202_vm3, %v1912_v15, %v6613_v2  ;;  %v570_v32 = vunpack.c.h.bf16 %v5395_v6  ;;  %v5467_v20 = vld [vmem:[%s6661_s10 + $0x160] sm:$0xff]  }
  0x2f   : > { %v534_v25 = vpack.c.bf16 %v6576_v19, %v532_v21  ;;  %v1940_v27 = vsel %vm202_vm3, %v1934_v16, %v6613_v2  ;;  %1900 = vst [vmem:[#allocation17 + $0x134] sm:$0xf] %v1898_v18  ;;  %v1920_v29 = vpack.c.bf16 %v6576_v19, %v1918_v26  ;;  %v554_v31 = vsel %vm202_vm3, %v548_v22, %v6613_v2  ;;  %v5405_v21 = vld [vmem:[%s6661_s10 + $0x68] sm:$0xff]  }
  0x30   : > { %v1942_v30 = vpack.c.bf16 %v6576_v19, %v1940_v27  ;;  %6335 = vmatpush3.bf16.msra.mxu0 %v6499_v58  ;;  %6482 = vmatpush3.bf16.msra.mxu1 %v6499_v58  ;;  %514 = vst [vmem:[#allocation17 + $0x38] sm:$0xf] %v512_v24  ;;  %v556_v34 = vpack.c.bf16 %v6576_v19, %v554_v31  ;;  %v1956_v35 = vunpack.c.l.bf16 %v5459_v17  ;;  %v1978_v36 = vunpack.c.h.bf16 %v5459_v17  ;;  %v6502_v58 = vld [vmem:[#allocation18 + $0x38] sm:$0xff]   ;;  %v6505_v22 = vld [vmem:[#allocation17 + $0x8] sm:$0xff]  }
  0x31   : > { %536 = vst [vmem:[#allocation17 + $0x3c] sm:$0xf] %v534_v25  ;;  %v592_v37 = vunpack.c.l.bf16 %v5397_v23  ;;  %6336 = vmatprep.subr.bf16.mxu0 %v6789_v7  ;;  %6475 = vmatprep.subr.bf16.mxu1 %v6789_v7  ;;  %1922 = vst [vmem:[#allocation17 + $0x138] sm:$0xf] %v1920_v29  ;;  %v576_v38 = vsel %vm202_vm3, %v570_v32, %v6613_v2  ;;  %v614_v39 = vunpack.c.h.bf16 %v5397_v23  ;;  %v2000_v40 = vunpack.c.l.bf16 %v5461_v28  ;;  %v6506_v23 = vld [vmem:[#allocation17 + $0x108] sm:$0xff]   ;;  %v6507_v29 = vld [vmem:[#allocation17 + $0x10] sm:$0xff]  }
  0x32   : > { %1944 = vst [vmem:[#allocation17 + $0x13c] sm:$0xf] %v1942_v30  ;;  %v2022_v41 = vunpack.c.h.bf16 %v5461_v28  ;;  %558 = vst [vmem:[#allocation17 + $0x40] sm:$0xf] %v556_v34  ;;  %v578_v43 = vpack.c.bf16 %v6576_v19, %v576_v38  ;;  %v1962_v44 = vsel %vm202_vm3, %v1956_v35, %v6613_v2  ;;  %v1984_v45 = vsel %vm202_vm3, %v1978_v36, %v6613_v2  ;;  %v5469_v28 = vld [vmem:[%s6661_s10 + $0x168] sm:$0xff]   ;;  %v6508_v30 = vld [vmem:[#allocation17 + $0x110] sm:$0xff]  }
  0x33   : > { %v598_v46 = vsel %vm202_vm3, %v592_v37, %v6613_v2  ;;  %v1964_v48 = vpack.c.bf16 %v6576_v19, %v1962_v44  ;;  %v1986_v49 = vpack.c.bf16 %v6576_v19, %v1984_v45  ;;  %v620_v51 = vsel %vm202_vm3, %v614_v39, %v6613_v2  ;;  %v5407_v39 = vld [vmem:[%s6661_s10 + $0x70] sm:$0xff]  }
  0x34   : > { %v600_v50 = vpack.c.bf16 %v6576_v19, %v598_v46  ;;  %6337 = vmatpush3.bf16.msra.mxu0 %v6789_v7  ;;  %6483 = vmatpush3.bf16.msra.mxu1 %v6789_v7  ;;  %580 = vst [vmem:[#allocation17 + $0x44] sm:$0xf] %v578_v43  ;;  %v622_v53 = vpack.c.bf16 %v6576_v19, %v620_v51  ;;  %v636_v56 = vunpack.c.l.bf16 %v5399_v42  ;;  %v658_v61 = vunpack.c.h.bf16 %v5399_v42 }
  0x35   : > { %v2006_v54 = vsel %vm202_vm3, %v2000_v40, %v6613_v2  ;;  %v2028_v55 = vsel %vm202_vm3, %v2022_v41, %v6613_v2  ;;  %6338 = vmatprep.subr.bf16.mxu0 %v6501_v33  ;;  %6476 = vmatprep.subr.bf16.mxu1 %v6501_v33  ;;  %1966 = vst [vmem:[#allocation17 + $0x140] sm:$0xf] %v1964_v48  ;;  %1988 = vst [vmem:[#allocation17 + $0x144] sm:$0xf] %v1986_v49  ;;  %v2044_v62 = vunpack.c.l.bf16 %v5463_v47 }
  0x36   : > { %602 = vst [vmem:[#allocation17 + $0x48] sm:$0xf] %v600_v50  ;;  %v2008_v59 = vpack.c.bf16 %v6576_v19, %v2006_v54  ;;  %v2030_v60 = vpack.c.bf16 %v6576_v19, %v2028_v55  ;;  %624 = vst [vmem:[#allocation17 + $0x4c] sm:$0xf] %v622_v53  ;;  %v642_v63 = vsel %vm202_vm3, %v636_v56, %v6613_v2  ;;  %v2066_v0 = vunpack.c.h.bf16 %v5463_v47 }
  0x37   : > { %v680_v3 = vunpack.c.l.bf16 %v5401_v52  ;;  %v702_v4 = vunpack.c.h.bf16 %v5401_v52  ;;  %v644_v6 = vpack.c.bf16 %v6576_v19, %v642_v63  ;;  %v664_v7 = vsel %vm202_vm3, %v658_v61, %v6613_v2  ;;  %v5471_v52 = vld [vmem:[%s6661_s10 + $0x170] sm:$0xff]   ;;  %v5411_v63 = vld [vmem:[%s6661_s10 + $0x80] sm:$0xff]  }
  0x38   : > { %2010 = vst [vmem:[#allocation17 + $0x148] sm:$0xf] %v2008_v59  ;;  %2032 = vst [vmem:[#allocation17 + $0x14c] sm:$0xf] %v2030_v60  ;;  %v2050_v8 = vsel %vm202_vm3, %v2044_v62, %v6613_v2  ;;  %v2088_v9 = vunpack.c.l.bf16 %v5465_v57  ;;  %6339 = vmatpush3.bf16.msra.mxu0 %v6501_v33  ;;  %6484 = vmatpush3.bf16.msra.mxu1 %v6501_v33  ;;  %v666_v10 = vpack.c.bf16 %v6576_v19, %v664_v7 }
  0x39   : > { %v2052_v12 = vpack.c.bf16 %v6576_v19, %v2050_v8  ;;  %v2072_v13 = vsel %vm202_vm3, %v2066_v0, %v6613_v2  ;;  %v2110_v14 = vunpack.c.h.bf16 %v5465_v57  ;;  %6340 = vmatprep.subr.bf16.mxu0 %v6502_v58  ;;  %6477 = vmatprep.subr.bf16.mxu1 %v6502_v58  ;;  %646 = vst [vmem:[#allocation17 + $0x50] sm:$0xf] %v644_v6  ;;  %v724_v18 = vunpack.c.l.bf16 %v5403_v5  ;;  %v5409_v57 = vld [vmem:[%s6661_s10 + $0x78] sm:$0xff]   ;;  %v6511_v8 = vld [vmem:[#allocation17 + $0x20] sm:$0xff]  }
  0x3a   : > { %v2074_v15 = vpack.c.bf16 %v6576_v19, %v2072_v13  ;;  %v686_v16 = vsel %vm202_vm3, %v680_v3, %v6613_v2  ;;  %v708_v17 = vsel %vm202_vm3, %v702_v4, %v6613_v2  ;;  %668 = vst [vmem:[#allocation17 + $0x54] sm:$0xf] %v666_v10  ;;  %v2094_v26 = vsel %vm202_vm3, %v2088_v9, %v6613_v2  ;;  %v6509_v0 = vld [vmem:[#allocation17 + $0x18] sm:$0xff]  }
  0x3b   : > { %2054 = vst [vmem:[#allocation17 + $0x150] sm:$0xf] %v2052_v12  ;;  %v688_v24 = vpack.c.bf16 %v6576_v19, %v686_v16  ;;  %v710_v25 = vpack.c.bf16 %v6576_v19, %v708_v17  ;;  %v2116_v27 = vsel %vm202_vm3, %v2110_v14, %v6613_v2  ;;  %v2096_v31 = vpack.c.bf16 %v6576_v19, %v2094_v26  ;;  %v6510_v3 = vld [vmem:[#allocation17 + $0x118] sm:$0xff]   ;;  %v6512_v14 = vld [vmem:[#allocation17 + $0x120] sm:$0xff]  }
  0x3c   : > { %2076 = vst [vmem:[#allocation17 + $0x154] sm:$0xf] %v2074_v15  ;;  %v2118_v32 = vpack.c.bf16 %v6576_v19, %v2116_v27  ;;  %v730_v33 = vsel %vm202_vm3, %v724_v18, %v6613_v2  ;;  %v746_v34 = vunpack.c.h.bf16 %v5403_v5  ;;  %6341 = vmatpush3.bf16.msra.mxu0 %v6502_v58  ;;  %6485 = vmatpush3.bf16.msra.mxu1 %v6502_v58  ;;  %v2132_v36 = vunpack.c.l.bf16 %v5467_v20  ;;  %v5473_v58 = vld [vmem:[%s6661_s10 + $0x178] sm:$0xff]  }
  0x3d   : > { %690 = vst [vmem:[#allocation17 + $0x58] sm:$0xf] %v688_v24  ;;  %712 = vst [vmem:[#allocation17 + $0x5c] sm:$0xf] %v710_v25  ;;  %v732_v35 = vpack.c.bf16 %v6576_v19, %v730_v33  ;;  %v2154_v37 = vunpack.c.h.bf16 %v5467_v20  ;;  %v768_v38 = vunpack.c.l.bf16 %v5405_v21  ;;  %v790_v41 = vunpack.c.h.bf16 %v5405_v21  ;;  %v5475_v24 = vld [vmem:[%s6661_s10 + $0x180] sm:$0xff]   ;;  %v5413_v25 = vld [vmem:[%s6661_s10 + $0x88] sm:$0xff]  }
  0x3e   : > { %2098 = vst [vmem:[#allocation17 + $0x158] sm:$0xf] %v2096_v31  ;;  %2120 = vst [vmem:[#allocation17 + $0x15c] sm:$0xf] %v2118_v32  ;;  %v752_v40 = vsel %vm202_vm3, %v746_v34, %v6613_v2  ;;  %v2176_v42 = vunpack.c.l.bf16 %v5469_v28  ;;  %v2198_v43 = vunpack.c.h.bf16 %v5469_v28  ;;  %v2138_v45 = vsel %vm202_vm3, %v2132_v36, %v6613_v2 }
  0x3f   : > { %734 = vst [vmem:[#allocation17 + $0x60] sm:$0xf] %v732_v35  ;;  %v754_v44 = vpack.c.bf16 %v6576_v19, %v752_v40  ;;  %v2160_v46 = vsel %vm202_vm3, %v2154_v37, %v6613_v2  ;;  %v774_v47 = vsel %vm202_vm3, %v768_v38, %v6613_v2  ;;  %6343 = vmatmul.mubr.bf16.vlgmr.msra.gmra.mrb[0].mxu0 %v6505_v22  ;;  %v812_v51 = vunpack.c.l.bf16 %v5407_v39  ;;  %v6514_v40 = vld [vmem:[#allocation17 + $0x128] sm:$0xff]  }
  0x40   : > { %6407 = vmatmul.mubr.bf16.vlgmr.msra.gmra.mrb[0].mxu1 %v6506_v23  ;;  %v2140_v48 = vpack.c.bf16 %v6576_v19, %v2138_v45  ;;  %v2162_v49 = vpack.c.bf16 %v6576_v19, %v2160_v46  ;;  %v776_v50 = vpack.c.bf16 %v6576_v19, %v774_v47  ;;  %6346 = vmatprep.mubr.bf16.mxu0 %v6507_v29  ;;  %v834_v56 = vunpack.c.h.bf16 %v5407_v39  ;;  %v6513_v39 = vld [vmem:[#allocation17 + $0x28] sm:$0xff]   ;;  %v5415_v45 = vld [vmem:[%s6661_s10 + $0x90] sm:$0xff]  }
  0x41   : > { %6410 = vmatprep.mubr.bf16.mxu1 %v6508_v30  ;;  %756 = vst [vmem:[#allocation17 + $0x64] sm:$0xf] %v754_v44  ;;  %v796_v53 = vsel %vm202_vm3, %v790_v41, %v6613_v2  ;;  %v2182_v54 = vsel %vm202_vm3, %v2176_v42, %v6613_v2  ;;  %v2204_v55 = vsel %vm202_vm3, %v2198_v43, %v6613_v2  ;;  %v2220_v6 = vunpack.c.l.bf16 %v5471_v52  ;;  %v5477_v30 = vld [vmem:[%s6661_s10 + $0x188] sm:$0xff]   ;;  %v6515_v46 = vld [vmem:[#allocation17 + $0x30] sm:$0xff]  }
  0x42   : > { %2142 = vst [vmem:[#allocation17 + $0x160] sm:$0xf] %v2140_v48  ;;  %2164 = vst [vmem:[#allocation17 + $0x164] sm:$0xf] %v2162_v49  ;;  %v798_v59 = vpack.c.bf16 %v6576_v19, %v796_v53  ;;  %v2184_v60 = vpack.c.bf16 %v6576_v19, %v2182_v54  ;;  %v2206_v61 = vpack.c.bf16 %v6576_v19, %v2204_v55  ;;  %v2242_v7 = vunpack.c.h.bf16 %v5471_v52 }
  0x43   : > { %778 = vst [vmem:[#allocation17 + $0x68] sm:$0xf] %v776_v50  ;;  %v818_v62 = vsel %vm202_vm3, %v812_v51, %v6613_v2  ;;  %v840_v5 = vsel %vm202_vm3, %v834_v56, %v6613_v2  ;;  %v856_v10 = vunpack.c.l.bf16 %v5409_v57  ;;  %v878_v12 = vunpack.c.h.bf16 %v5409_v57  ;;  %v5479_v51 = vld [vmem:[%s6661_s10 + $0x190] sm:$0xff]   ;;  %v5417_v56 = vld [vmem:[%s6661_s10 + $0x98] sm:$0xff]  }
  0x44   : > { %v820_v4 = vpack.c.bf16 %v6576_v19, %v818_v62  ;;  %800 = vst [vmem:[#allocation17 + $0x6c] sm:$0xf] %v798_v59  ;;  %2186 = vst [vmem:[#allocation17 + $0x168] sm:$0xf] %v2184_v60  ;;  %v842_v9 = vpack.c.bf16 %v6576_v19, %v840_v5  ;;  %v2264_v13 = vunpack.c.l.bf16 %v5473_v58  ;;  %v2226_v15 = vsel %vm202_vm3, %v2220_v6, %v6613_v2  ;;  %v6516_v57 = vld [vmem:[#allocation17 + $0x130] sm:$0xff]   ;;  %v5481_v62 = vld [vmem:[%s6661_s10 + $0x198] sm:$0xff]  }
  0x45   : > { %2208 = vst [vmem:[#allocation17 + $0x16c] sm:$0xf] %v2206_v61  ;;  %v2248_v16 = vsel %vm202_vm3, %v2242_v7, %v6613_v2  ;;  %v2286_v17 = vunpack.c.h.bf16 %v5473_v58  ;;  %v900_v18 = vunpack.c.l.bf16 %v5411_v63  ;;  %v2228_v20 = vpack.c.bf16 %v6576_v19, %v2226_v15 }
  0x46   : > { %822 = vst [vmem:[#allocation17 + $0x70] sm:$0xf] %v820_v4  ;;  %844 = vst [vmem:[#allocation17 + $0x74] sm:$0xf] %v842_v9  ;;  %v2250_v21 = vpack.c.bf16 %v6576_v19, %v2248_v16  ;;  %v862_v22 = vsel %vm202_vm3, %v856_v10, %v6613_v2  ;;  %v884_v23 = vsel %vm202_vm3, %v878_v12, %v6613_v2  ;;  %v922_v34 = vunpack.c.h.bf16 %v5411_v63 }
  0x47   : > { %v864_v26 = vpack.c.bf16 %v6576_v19, %v862_v22  ;;  %v886_v27 = vpack.c.bf16 %v6576_v19, %v884_v23  ;;  %v2270_v28 = vsel %vm202_vm3, %v2264_v13, %v6613_v2  ;;  %v2292_v29 = vsel %vm202_vm3, %v2286_v17, %v6613_v2  ;;  %6347 = vmatmul.mubr.bf16.gmra.mrb[4].mxu0 %v6509_v0 }
  0x48   : > { %6411 = vmatmul.mubr.bf16.gmra.mrb[4].mxu1 %v6510_v3  ;;  %2230 = vst [vmem:[#allocation17 + $0x170] sm:$0xf] %v2228_v20  ;;  %2252 = vst [vmem:[#allocation17 + $0x174] sm:$0xf] %v2250_v21  ;;  %v2272_v31 = vpack.c.bf16 %v6576_v19, %v2270_v28  ;;  %v2294_v32 = vpack.c.bf16 %v6576_v19, %v2292_v29  ;;  %v906_v33 = vsel %vm202_vm3, %v900_v18, %v6613_v2  ;;  %v5483_v20 = vld [vmem:[%s6661_s10 + $0x1a0] sm:$0xff]   ;;  %v6518_v28 = vld [vmem:[#allocation17 + $0x138] sm:$0xff]  }
  0x49   : > { %6350 = vmatprep.mubr.bf16.mxu0 %v6511_v8  ;;  %6414 = vmatprep.mubr.bf16.mxu1 %v6512_v14  ;;  %866 = vst [vmem:[#allocation17 + $0x78] sm:$0xf] %v864_v26  ;;  %888 = vst [vmem:[#allocation17 + $0x7c] sm:$0xf] %v886_v27  ;;  %v908_v35 = vpack.c.bf16 %v6576_v19, %v906_v33  ;;  %v2308_v36 = vunpack.c.l.bf16 %v5475_v24  ;;  %v2330_v37 = vunpack.c.h.bf16 %v5475_v24  ;;  %v944_v38 = vunpack.c.l.bf16 %v5413_v25  ;;  %v5419_v14 = vld [vmem:[%s6661_s10 + $0xa0] sm:$0xff]   ;;  %v5485_v26 = vld [vmem:[%s6661_s10 + $0x1a8] sm:$0xff]  }
  0x4a   : > { %2274 = vst [vmem:[#allocation17 + $0x178] sm:$0xf] %v2272_v31  ;;  %2296 = vst [vmem:[#allocation17 + $0x17c] sm:$0xf] %v2294_v32  ;;  %v928_v41 = vsel %vm202_vm3, %v922_v34, %v6613_v2  ;;  %v966_v42 = vunpack.c.h.bf16 %v5413_v25  ;;  %v2352_v43 = vunpack.c.l.bf16 %v5477_v30  ;;  %v2374_v44 = vunpack.c.h.bf16 %v5477_v30  ;;  %v5421_v25 = vld [vmem:[%s6661_s10 + $0xa8] sm:$0xff]   ;;  %v6517_v27 = vld [vmem:[#allocation17 + $0x38] sm:$0xff]  }
  0x4b   : > { %910 = vst [vmem:[#allocation17 + $0x80] sm:$0xf] %v908_v35  ;;  %v930_v47 = vpack.c.bf16 %v6576_v19, %v928_v41  ;;  %v2314_v48 = vsel %vm202_vm3, %v2308_v36, %v6613_v2  ;;  %v2336_v49 = vsel %vm202_vm3, %v2330_v37, %v6613_v2  ;;  %v950_v50 = vsel %vm202_vm3, %v944_v38, %v6613_v2  ;;  %v6519_v33 = vld [vmem:[#allocation17 + $0x40] sm:$0xff]  }
  0x4c   : > { %v2316_v52 = vpack.c.bf16 %v6576_v19, %v2314_v48  ;;  %v2338_v53 = vpack.c.bf16 %v6576_v19, %v2336_v49  ;;  %v952_v54 = vpack.c.bf16 %v6576_v19, %v950_v50  ;;  %v972_v55 = vsel %vm202_vm3, %v966_v42, %v6613_v2  ;;  %v6520_v34 = vld [vmem:[#allocation17 + $0x140] sm:$0xff]  }
  0x4d   : > { %932 = vst [vmem:[#allocation17 + $0x84] sm:$0xf] %v930_v47  ;;  %v974_v58 = vpack.c.bf16 %v6576_v19, %v972_v55  ;;  %v2358_v59 = vsel %vm202_vm3, %v2352_v43, %v6613_v2  ;;  %v2380_v60 = vsel %vm202_vm3, %v2374_v44, %v6613_v2  ;;  %v988_v61 = vunpack.c.l.bf16 %v5415_v45  ;;  %v5423_v43 = vld [vmem:[%s6661_s10 + $0xb0] sm:$0xff]  }
  0x4e   : > { %2318 = vst [vmem:[#allocation17 + $0x180] sm:$0xf] %v2316_v52  ;;  %2340 = vst [vmem:[#allocation17 + $0x184] sm:$0xf] %v2338_v53  ;;  %v2360_v63 = vpack.c.bf16 %v6576_v19, %v2358_v59  ;;  %v2382_v0 = vpack.c.bf16 %v6576_v19, %v2380_v60  ;;  %v1010_v3 = vunpack.c.h.bf16 %v5415_v45  ;;  %v2396_v4 = vunpack.c.l.bf16 %v5479_v51  ;;  %v5487_v52 = vld [vmem:[%s6661_s10 + $0x1b0] sm:$0xff]  }
  0x4f   : > { %954 = vst [vmem:[#allocation17 + $0x88] sm:$0xf] %v952_v54  ;;  %976 = vst [vmem:[#allocation17 + $0x8c] sm:$0xf] %v974_v58  ;;  %v994_v5 = vsel %vm202_vm3, %v988_v61, %v6613_v2  ;;  %v2418_v6 = vunpack.c.h.bf16 %v5479_v51  ;;  %v1032_v7 = vunpack.c.l.bf16 %v5417_v56  ;;  %v1054_v8 = vunpack.c.h.bf16 %v5417_v56  ;;  %6351 = vmatmul.mubr.bf16.gmra.mrb[8].mxu0 %v6513_v39  ;;  %v5425_v61 = vld [vmem:[%s6661_s10 + $0xb8] sm:$0xff]  }
  0x50   : > { %6415 = vmatmul.mubr.bf16.gmra.mrb[8].mxu1 %v6514_v40  ;;  %2362 = vst [vmem:[#allocation17 + $0x188] sm:$0xf] %v2360_v63  ;;  %2384 = vst [vmem:[#allocation17 + $0x18c] sm:$0xf] %v2382_v0  ;;  %v996_v9 = vpack.c.bf16 %v6576_v19, %v994_v5  ;;  %v1016_v10 = vsel %vm202_vm3, %v1010_v3, %v6613_v2  ;;  %v2402_v12 = vsel %vm202_vm3, %v2396_v4, %v6613_v2  ;;  %v5489_v5 = vld [vmem:[%s6661_s10 + $0x1b8] sm:$0xff]  }
  0x51   : > { %v2440_v13 = vunpack.c.l.bf16 %v5481_v62  ;;  %6354 = vmatprep.mubr.bf16.mxu0 %v6515_v46  ;;  %6418 = vmatprep.mubr.bf16.mxu1 %v6516_v57  ;;  %v1018_v15 = vpack.c.bf16 %v6576_v19, %v1016_v10  ;;  %v2404_v16 = vpack.c.bf16 %v6576_v19, %v2402_v12  ;;  %v2424_v17 = vsel %vm202_vm3, %v2418_v6, %v6613_v2  ;;  %v6522_v6 = vld [vmem:[#allocation17 + $0x148] sm:$0xff]   ;;  %v5427_v12 = vld [vmem:[%s6661_s10 + $0xc0] sm:$0xff]  }
  0x52   : > { %v2462_v18 = vunpack.c.h.bf16 %v5481_v62  ;;  %998 = vst [vmem:[#allocation17 + $0x90] sm:$0xf] %v996_v9  ;;  %v2426_v21 = vpack.c.bf16 %v6576_v19, %v2424_v17  ;;  %v1038_v22 = vsel %vm202_vm3, %v1032_v7, %v6613_v2  ;;  %v1060_v23 = vsel %vm202_vm3, %v1054_v8, %v6613_v2  ;;  %v6521_v62 = vld [vmem:[#allocation17 + $0x48] sm:$0xff]  }
  0x53   : > { %v2446_v24 = vsel %vm202_vm3, %v2440_v13, %v6613_v2  ;;  %1020 = vst [vmem:[#allocation17 + $0x94] sm:$0xf] %v1018_v15  ;;  %2406 = vst [vmem:[#allocation17 + $0x190] sm:$0xf] %v2404_v16  ;;  %v1040_v29 = vpack.c.bf16 %v6576_v19, %v1038_v22  ;;  %v1062_v30 = vpack.c.bf16 %v6576_v19, %v1060_v23  ;;  %v1076_v36 = vunpack.c.l.bf16 %v5419_v14  ;;  %v6523_v13 = vld [vmem:[#allocation17 + $0x50] sm:$0xff]  }
  0x54   : > { %v2448_v31 = vpack.c.bf16 %v6576_v19, %v2446_v24  ;;  %v2468_v32 = vsel %vm202_vm3, %v2462_v18, %v6613_v2  ;;  %2428 = vst [vmem:[#allocation17 + $0x194] sm:$0xf] %v2426_v21  ;;  %v1098_v37 = vunpack.c.h.bf16 %v5419_v14  ;;  %v2484_v38 = vunpack.c.l.bf16 %v5483_v20  ;;  %v6524_v18 = vld [vmem:[#allocation17 + $0x150] sm:$0xff]  }
  0x55   : > { %v2470_v35 = vpack.c.bf16 %v6576_v19, %v2468_v32  ;;  %1042 = vst [vmem:[#allocation17 + $0x98] sm:$0xf] %v1040_v29  ;;  %1064 = vst [vmem:[#allocation17 + $0x9c] sm:$0xf] %v1062_v30  ;;  %v2506_v39 = vunpack.c.h.bf16 %v5483_v20  ;;  %v1120_v40 = vunpack.c.l.bf16 %v5421_v25  ;;  %v1142_v41 = vunpack.c.h.bf16 %v5421_v25  ;;  %v5429_v29 = vld [vmem:[%s6661_s10 + $0xc8] sm:$0xff]  }
  0x56   : > { %2450 = vst [vmem:[#allocation17 + $0x198] sm:$0xf] %v2448_v31  ;;  %v2528_v42 = vunpack.c.l.bf16 %v5485_v26  ;;  %v1082_v44 = vsel %vm202_vm3, %v1076_v36, %v6613_v2  ;;  %v1104_v45 = vsel %vm202_vm3, %v1098_v37, %v6613_v2  ;;  %v2490_v46 = vsel %vm202_vm3, %v2484_v38, %v6613_v2 }
  0x57   : > { %2472 = vst [vmem:[#allocation17 + $0x19c] sm:$0xf] %v2470_v35  ;;  %v2550_v47 = vunpack.c.h.bf16 %v5485_v26  ;;  %v1084_v48 = vpack.c.bf16 %v6576_v19, %v1082_v44  ;;  %v1106_v49 = vpack.c.bf16 %v6576_v19, %v1104_v45  ;;  %v2492_v50 = vpack.c.bf16 %v6576_v19, %v2490_v46  ;;  %6355 = vmatmul.mubr.bf16.gmra.mrb[12].mxu0 %v6517_v27  ;;  %v6526_v44 = vld [vmem:[#allocation17 + $0x158] sm:$0xff]  }
  0x58   : > { %v2512_v51 = vsel %vm202_vm3, %v2506_v39, %v6613_v2  ;;  %6419 = vmatmul.mubr.bf16.gmra.mrb[12].mxu1 %v6518_v28  ;;  %v1126_v54 = vsel %vm202_vm3, %v1120_v40, %v6613_v2  ;;  %v1148_v55 = vsel %vm202_vm3, %v1142_v41, %v6613_v2  ;;  %v1164_v56 = vunpack.c.l.bf16 %v5423_v43  ;;  %6358 = vmatprep.mubr.bf16.mxu0 %v6519_v33  ;;  %v5491_v28 = vld [vmem:[%s6661_s10 + $0x1c0] sm:$0xff]  }
  0x59   : > { %v2514_v53 = vpack.c.bf16 %v6576_v19, %v2512_v51  ;;  %6422 = vmatprep.mubr.bf16.mxu1 %v6520_v34  ;;  %1086 = vst [vmem:[#allocation17 + $0xa0] sm:$0xf] %v1084_v48  ;;  %1108 = vst [vmem:[#allocation17 + $0xa4] sm:$0xf] %v1106_v49  ;;  %v1128_v57 = vpack.c.bf16 %v6576_v19, %v1126_v54  ;;  %v1150_v58 = vpack.c.bf16 %v6576_v19, %v1148_v55  ;;  %v5493_v34 = vld [vmem:[%s6661_s10 + $0x1c8] sm:$0xff]   ;;  %v5431_v49 = vld [vmem:[%s6661_s10 + $0xd0] sm:$0xff]  }
  0x5a   : > { %2494 = vst [vmem:[#allocation17 + $0x1a0] sm:$0xf] %v2492_v50  ;;  %v2534_v59 = vsel %vm202_vm3, %v2528_v42, %v6613_v2  ;;  %v1186_v60 = vunpack.c.h.bf16 %v5423_v43  ;;  %v2556_v0 = vsel %vm202_vm3, %v2550_v47, %v6613_v2  ;;  %v1170_v3 = vsel %vm202_vm3, %v1164_v56, %v6613_v2  ;;  %v6525_v43 = vld [vmem:[#allocation17 + $0x58] sm:$0xff]   ;;  %v6527_v50 = vld [vmem:[#allocation17 + $0x60] sm:$0xff]   ;;  %v5495_v55 = vld [vmem:[%s6661_s10 + $0x1d0] sm:$0xff]  }
  0x5b   : > { %2516 = vst [vmem:[#allocation17 + $0x1a4] sm:$0xf] %v2514_v53  ;;  %v2536_v63 = vpack.c.bf16 %v6576_v19, %v2534_v59  ;;  %v2572_v4 = vunpack.c.l.bf16 %v5487_v52  ;;  %1130 = vst [vmem:[#allocation17 + $0xa8] sm:$0xf] %v1128_v57  ;;  %v2558_v7 = vpack.c.bf16 %v6576_v19, %v2556_v0  ;;  %v1172_v8 = vpack.c.bf16 %v6576_v19, %v1170_v3 }
  0x5c   : > { %1152 = vst [vmem:[#allocation17 + $0xac] sm:$0xf] %v1150_v58  ;;  %v1192_v9 = vsel %vm202_vm3, %v1186_v60, %v6613_v2  ;;  %v2594_v10 = vunpack.c.h.bf16 %v5487_v52  ;;  %v1208_v16 = vunpack.c.l.bf16 %v5425_v61  ;;  %v1230_v17 = vunpack.c.h.bf16 %v5425_v61  ;;  %v5433_v60 = vld [vmem:[%s6661_s10 + $0xd8] sm:$0xff]   ;;  %v6528_v61 = vld [vmem:[#allocation17 + $0x160] sm:$0xff]  }
  0x5d   : > { %2538 = vst [vmem:[#allocation17 + $0x1a8] sm:$0xf] %v2536_v63  ;;  %v1194_v14 = vpack.c.bf16 %v6576_v19, %v1192_v9  ;;  %v2578_v15 = vsel %vm202_vm3, %v2572_v4, %v6613_v2  ;;  %2560 = vst [vmem:[#allocation17 + $0x1ac] sm:$0xf] %v2558_v7  ;;  %v2616_v22 = vunpack.c.l.bf16 %v5489_v5  ;;  %v2638_v23 = vunpack.c.h.bf16 %v5489_v5  ;;  %v5497_v4 = vld [vmem:[%s6661_s10 + $0x1d8] sm:$0xff]  }
  0x5e   : > { %1174 = vst [vmem:[#allocation17 + $0xb0] sm:$0xf] %v1172_v8  ;;  %v2580_v20 = vpack.c.bf16 %v6576_v19, %v2578_v15  ;;  %v2600_v21 = vsel %vm202_vm3, %v2594_v10, %v6613_v2  ;;  %v1214_v25 = vsel %vm202_vm3, %v1208_v16, %v6613_v2  ;;  %v1236_v26 = vsel %vm202_vm3, %v1230_v17, %v6613_v2  ;;  %v6541_v11 = vld [vmem:[#allocation17 + $0x98] sm:$0xff]  }
  0x5f   : > { %1196 = vst [vmem:[#allocation17 + $0xb4] sm:$0xf] %v1194_v14  ;;  %v2602_v24 = vpack.c.bf16 %v6576_v19, %v2600_v21  ;;  %v1252_v27 = vunpack.c.l.bf16 %v5427_v12  ;;  %v1216_v30 = vpack.c.bf16 %v6576_v19, %v1214_v25  ;;  %v1238_v31 = vpack.c.bf16 %v6576_v19, %v1236_v26  ;;  %6359 = vmatmul.mubr.bf16.gmra.mrb[16].mxu0 %v6521_v62 }
  0x60   : > { %2582 = vst [vmem:[#allocation17 + $0x1b0] sm:$0xf] %v2580_v20  ;;  %v2622_v32 = vsel %vm202_vm3, %v2616_v22, %v6613_v2  ;;  %v2644_v33 = vsel %vm202_vm3, %v2638_v23, %v6613_v2  ;;  %6423 = vmatmul.mubr.bf16.gmra.mrb[16].mxu1 %v6522_v6  ;;  %v1274_v38 = vunpack.c.h.bf16 %v5427_v12  ;;  %6362 = vmatprep.mubr.bf16.mxu0 %v6523_v13  ;;  %v2660_v40 = vunpack.c.l.bf16 %v5491_v28 }
  0x61   : > { %2604 = vst [vmem:[#allocation17 + $0x1b4] sm:$0xf] %v2602_v24  ;;  %v2624_v35 = vpack.c.bf16 %v6576_v19, %v2622_v32  ;;  %v2646_v36 = vpack.c.bf16 %v6576_v19, %v2644_v33  ;;  %v1258_v37 = vsel %vm202_vm3, %v1252_v27, %v6613_v2  ;;  %6426 = vmatprep.mubr.bf16.mxu1 %v6524_v18  ;;  %1218 = vst [vmem:[#allocation17 + $0xb8] sm:$0xf] %v1216_v30  ;;  %v5435_v18 = vld [vmem:[%s6661_s10 + $0xe0] sm:$0xff]   ;;  %v5501_v30 = vld [vmem:[%s6661_s10 + $0x1e8] sm:$0xff]  }
  0x62   : > { %1240 = vst [vmem:[#allocation17 + $0xbc] sm:$0xf] %v1238_v31  ;;  %v1260_v39 = vpack.c.bf16 %v6576_v19, %v1258_v37  ;;  %v2682_v41 = vunpack.c.h.bf16 %v5491_v28  ;;  %v1296_v42 = vunpack.c.l.bf16 %v5429_v29  ;;  %v1280_v45 = vsel %vm202_vm3, %v1274_v38, %v6613_v2  ;;  %v5499_v24 = vld [vmem:[%s6661_s10 + $0x1e0] sm:$0xff]   ;;  %v6529_v31 = vld [vmem:[#allocation17 + $0x68] sm:$0xff]   ;;  %v6531_v37 = vld [vmem:[#allocation17 + $0x70] sm:$0xff]  }
  0x63   : > { %2626 = vst [vmem:[#allocation17 + $0x1b8] sm:$0xf] %v2624_v35  ;;  %2648 = vst [vmem:[#allocation17 + $0x1bc] sm:$0xf] %v2646_v36  ;;  %v1318_v46 = vunpack.c.h.bf16 %v5429_v29  ;;  %v2704_v47 = vunpack.c.l.bf16 %v5493_v34  ;;  %v2726_v48 = vunpack.c.h.bf16 %v5493_v34  ;;  %v1282_v51 = vpack.c.bf16 %v6576_v19, %v1280_v45  ;;  %v5437_v29 = vld [vmem:[%s6661_s10 + $0xe8] sm:$0xff]   ;;  %v6532_v38 = vld [vmem:[#allocation17 + $0x170] sm:$0xff]  }
  0x64   : > { %1262 = vst [vmem:[#allocation17 + $0xc0] sm:$0xf] %v1260_v39  ;;  %v2666_v52 = vsel %vm202_vm3, %v2660_v40, %v6613_v2  ;;  %v2688_v53 = vsel %vm202_vm3, %v2682_v41, %v6613_v2  ;;  %v1302_v54 = vsel %vm202_vm3, %v1296_v42, %v6613_v2  ;;  %v1340_v3 = vunpack.c.l.bf16 %v5431_v49  ;;  %v6530_v32 = vld [vmem:[#allocation17 + $0x168] sm:$0xff]  }
  0x65   : > { %v2668_v56 = vpack.c.bf16 %v6576_v19, %v2666_v52  ;;  %v2690_v57 = vpack.c.bf16 %v6576_v19, %v2688_v53  ;;  %v1304_v58 = vpack.c.bf16 %v6576_v19, %v1302_v54  ;;  %v1324_v59 = vsel %vm202_vm3, %v1318_v46, %v6613_v2  ;;  %1284 = vst [vmem:[#allocation17 + $0xc4] sm:$0xf] %v1282_v51 }
  0x66   : > { %v1326_v62 = vpack.c.bf16 %v6576_v19, %v1324_v59  ;;  %v2710_v63 = vsel %vm202_vm3, %v2704_v47, %v6613_v2  ;;  %v2732_v0 = vsel %vm202_vm3, %v2726_v48, %v6613_v2  ;;  %v1362_v7 = vunpack.c.h.bf16 %v5431_v49  ;;  %v5439_v47 = vld [vmem:[%s6661_s10 + $0xf0] sm:$0xff]  }
  0x67   : > { %2670 = vst [vmem:[#allocation17 + $0x1c0] sm:$0xf] %v2668_v56  ;;  %2692 = vst [vmem:[#allocation17 + $0x1c4] sm:$0xf] %v2690_v57  ;;  %v2712_v5 = vpack.c.bf16 %v6576_v19, %v2710_v63  ;;  %v2734_v6 = vpack.c.bf16 %v6576_v19, %v2732_v0  ;;  %v2748_v8 = vunpack.c.l.bf16 %v5495_v55  ;;  %v1346_v9 = vsel %vm202_vm3, %v1340_v3, %v6613_v2  ;;  %v5503_v56 = vld [vmem:[%s6661_s10 + $0x1f0] sm:$0xff]   ;;  %v5441_v3 = vld [vmem:[%s6661_s10 + $0xf8] sm:$0xff]  }
  0x68   : > { %1306 = vst [vmem:[#allocation17 + $0xc8] sm:$0xf] %v1304_v58  ;;  %1328 = vst [vmem:[#allocation17 + $0xcc] sm:$0xf] %v1326_v62  ;;  %v2770_v10 = vunpack.c.h.bf16 %v5495_v55  ;;  %v1384_v12 = vunpack.c.l.bf16 %v5433_v60  ;;  %v1406_v13 = vunpack.c.h.bf16 %v5433_v60  ;;  %6363 = vmatmul.mubr.bf16.gmra.mrb[20].mxu0 %v6525_v43  ;;  %6427 = vmatmul.mubr.bf16.gmra.mrb[20].mxu1 %v6526_v44  ;;  %v1348_v14 = vpack.c.bf16 %v6576_v19, %v1346_v9  ;;  %v6533_v9 = vld [vmem:[#allocation17 + $0x78] sm:$0xff]  }
  0x69   : > { %2714 = vst [vmem:[#allocation17 + $0x1c8] sm:$0xf] %v2712_v5  ;;  %2736 = vst [vmem:[#allocation17 + $0x1cc] sm:$0xf] %v2734_v6  ;;  %v1368_v15 = vsel %vm202_vm3, %v1362_v7, %v6613_v2  ;;  %v2754_v16 = vsel %vm202_vm3, %v2748_v8, %v6613_v2  ;;  %v2792_v17 = vunpack.c.l.bf16 %v5497_v4  ;;  %6366 = vmatprep.mubr.bf16.mxu0 %v6527_v50  ;;  %6430 = vmatprep.mubr.bf16.mxu1 %v6528_v61  ;;  %v5505_v8 = vld [vmem:[%s6661_s10 + $0x1f8] sm:$0xff]  }
  0x6a   : > { %v1370_v20 = vpack.c.bf16 %v6576_v19, %v1368_v15  ;;  %v2756_v21 = vpack.c.bf16 %v6576_v19, %v2754_v16  ;;  %v2776_v22 = vsel %vm202_vm3, %v2770_v10, %v6613_v2  ;;  %v2814_v23 = vunpack.c.h.bf16 %v5497_v4  ;;  %1350 = vst [vmem:[#allocation17 + $0xd0] sm:$0xf] %v1348_v14  ;;  %v6534_v10 = vld [vmem:[#allocation17 + $0x178] sm:$0xff]   ;;  %v6535_v16 = vld [vmem:[#allocation17 + $0x80] sm:$0xff]  }
  0x6b   : > { %v2778_v25 = vpack.c.bf16 %v6576_v19, %v2776_v22  ;;  %v1390_v26 = vsel %vm202_vm3, %v1384_v12, %v6613_v2  ;;  %v1412_v27 = vsel %vm202_vm3, %v1406_v13, %v6613_v2  ;;  %v2798_v28 = vsel %vm202_vm3, %v2792_v17, %v6613_v2  ;;  %v6536_v22 = vld [vmem:[#allocation17 + $0x180] sm:$0xff]  }
  0x6c   : > { %1372 = vst [vmem:[#allocation17 + $0xd4] sm:$0xf] %v1370_v20  ;;  %2758 = vst [vmem:[#allocation17 + $0x1d0] sm:$0xf] %v2756_v21  ;;  %v1392_v33 = vpack.c.bf16 %v6576_v19, %v1390_v26  ;;  %v1414_v34 = vpack.c.bf16 %v6576_v19, %v1412_v27  ;;  %v2800_v35 = vpack.c.bf16 %v6576_v19, %v2798_v28  ;;  %v1428_v40 = vunpack.c.l.bf16 %v5435_v18 }
  0x6d   : > { %v2820_v36 = vsel %vm202_vm3, %v2814_v23, %v6613_v2  ;;  %2780 = vst [vmem:[#allocation17 + $0x1d4] sm:$0xf] %v2778_v25  ;;  %v1450_v41 = vunpack.c.h.bf16 %v5435_v18  ;;  %v2836_v42 = vunpack.c.l.bf16 %v5499_v24  ;;  %v2858_v43 = vunpack.c.h.bf16 %v5499_v24 }
  0x6e   : > { %v2822_v39 = vpack.c.bf16 %v6576_v19, %v2820_v36  ;;  %1394 = vst [vmem:[#allocation17 + $0xd8] sm:$0xf] %v1392_v33  ;;  %1416 = vst [vmem:[#allocation17 + $0xdc] sm:$0xf] %v1414_v34  ;;  %v1472_v44 = vunpack.c.l.bf16 %v5437_v29  ;;  %v1494_v45 = vunpack.c.h.bf16 %v5437_v29  ;;  %v2880_v46 = vunpack.c.l.bf16 %v5501_v30  ;;  %v6537_v36 = vld [vmem:[#allocation17 + $0x88] sm:$0xff]  }
  0x6f   : > { %2802 = vst [vmem:[#allocation17 + $0x1d8] sm:$0xf] %v2800_v35  ;;  %v1434_v48 = vsel %vm202_vm3, %v1428_v40, %v6613_v2  ;;  %v1456_v49 = vsel %vm202_vm3, %v1450_v41, %v6613_v2  ;;  %v2842_v50 = vsel %vm202_vm3, %v2836_v42, %v6613_v2  ;;  %v2902_v51 = vunpack.c.h.bf16 %v5501_v30  ;;  %v6542_v40 = vld [vmem:[#allocation17 + $0x198] sm:$0xff]   ;;  %v6543_v41 = vld [vmem:[#allocation17 + $0xa0] sm:$0xff]  }
  0x70   : > { %2824 = vst [vmem:[#allocation17 + $0x1dc] sm:$0xf] %v2822_v39  ;;  %v1436_v52 = vpack.c.bf16 %v6576_v19, %v1434_v48  ;;  %v1458_v53 = vpack.c.bf16 %v6576_v19, %v1456_v49  ;;  %v2844_v54 = vpack.c.bf16 %v6576_v19, %v2842_v50  ;;  %v2864_v55 = vsel %vm202_vm3, %v2858_v43, %v6613_v2  ;;  %v6540_v39 = vld [vmem:[#allocation17 + $0x190] sm:$0xff]   ;;  %v6544_v42 = vld [vmem:[#allocation17 + $0x1a0] sm:$0xff]   ;;  %v6546_v43 = vld [vmem:[#allocation17 + $0x1a8] sm:$0xff]  }
  0x71   : > { %6367 = vmatmul.mubr.bf16.gmra.mrb[24].mxu0 %v6529_v31  ;;  %6431 = vmatmul.mubr.bf16.gmra.mrb[24].mxu1 %v6530_v32  ;;  %v2866_v57 = vpack.c.bf16 %v6576_v19, %v2864_v55  ;;  %v1478_v58 = vsel %vm202_vm3, %v1472_v44, %v6613_v2  ;;  %v1500_v59 = vsel %vm202_vm3, %v1494_v45, %v6613_v2  ;;  %v1516_v60 = vunpack.c.l.bf16 %v5439_v47  ;;  %v6547_v44 = vld [vmem:[#allocation17 + $0xb0] sm:$0xff]   ;;  %v6551_v48 = vld [vmem:[#allocation17 + $0xc0] sm:$0xff]   ;;  %v6553_v50 = vld [vmem:[#allocation17 + $0xc8] sm:$0xff]  }
  0x72   : > { %6370 = vmatprep.mubr.bf16.mxu0 %v6531_v37  ;;  %6434 = vmatprep.mubr.bf16.mxu1 %v6532_v38  ;;  %1438 = vst [vmem:[#allocation17 + $0xe0] sm:$0xf] %v1436_v52  ;;  %1460 = vst [vmem:[#allocation17 + $0xe4] sm:$0xf] %v1458_v53  ;;  %v1480_v61 = vpack.c.bf16 %v6576_v19, %v1478_v58  ;;  %v1502_v62 = vpack.c.bf16 %v6576_v19, %v1500_v59  ;;  %v1538_v0 = vunpack.c.h.bf16 %v5439_v47  ;;  %v6538_v37 = vld [vmem:[#allocation17 + $0x188] sm:$0xff]   ;;  %v6539_v38 = vld [vmem:[#allocation17 + $0x90] sm:$0xff]  }
  0x73   : > { %2846 = vst [vmem:[#allocation17 + $0x1e0] sm:$0xf] %v2844_v54  ;;  %v2886_v63 = vsel %vm202_vm3, %v2880_v46, %v6613_v2  ;;  %2868 = vst [vmem:[#allocation17 + $0x1e4] sm:$0xf] %v2866_v57  ;;  %v2908_v5 = vsel %vm202_vm3, %v2902_v51, %v6613_v2  ;;  %v1522_v6 = vsel %vm202_vm3, %v1516_v60, %v6613_v2  ;;  %v2924_v7 = vunpack.c.l.bf16 %v5503_v56  ;;  %v6548_v45 = vld [vmem:[#allocation17 + $0x1b0] sm:$0xff]   ;;  %v6549_v46 = vld [vmem:[#allocation17 + $0xb8] sm:$0xff]  }
  0x74   : > { %v2888_v4 = vpack.c.bf16 %v6576_v19, %v2886_v63  ;;  %1482 = vst [vmem:[#allocation17 + $0xe8] sm:$0xf] %v1480_v61  ;;  %1504 = vst [vmem:[#allocation17 + $0xec] sm:$0xf] %v1502_v62  ;;  %v2910_v12 = vpack.c.bf16 %v6576_v19, %v2908_v5  ;;  %v1524_v13 = vpack.c.bf16 %v6576_v19, %v1522_v6  ;;  %v2946_v15 = vunpack.c.h.bf16 %v5503_v56  ;;  %v6550_v47 = vld [vmem:[#allocation17 + $0x1b8] sm:$0xff]   ;;  %v6552_v49 = vld [vmem:[#allocation17 + $0x1c0] sm:$0xff]  }
  0x75   : > { %v1544_v14 = vsel %vm202_vm3, %v1538_v0, %v6613_v2  ;;  %v2930_v18 = vsel %vm202_vm3, %v2924_v7, %v6613_v2  ;;  %v1560_v20 = vunpack.c.l.bf16 %v5441_v3  ;;  %v1582_v21 = vunpack.c.h.bf16 %v5441_v3  ;;  %v6554_v51 = vld [vmem:[#allocation17 + $0x1c8] sm:$0xff]   ;;  %v6555_v52 = vld [vmem:[#allocation17 + $0xd0] sm:$0xff]   ;;  %v6557_v54 = vld [vmem:[#allocation17 + $0xd8] sm:$0xff]  }
  0x76   : > { %2890 = vst [vmem:[#allocation17 + $0x1e8] sm:$0xf] %v2888_v4  ;;  %v1546_v17 = vpack.c.bf16 %v6576_v19, %v1544_v14  ;;  %2912 = vst [vmem:[#allocation17 + $0x1ec] sm:$0xf] %v2910_v12  ;;  %v2932_v23 = vpack.c.bf16 %v6576_v19, %v2930_v18  ;;  %v2952_v24 = vsel %vm202_vm3, %v2946_v15, %v6613_v2  ;;  %v2968_v25 = vunpack.c.l.bf16 %v5505_v8  ;;  %v6556_v53 = vld [vmem:[#allocation17 + $0x1d0] sm:$0xff]  }
  0x77   : > { %1526 = vst [vmem:[#allocation17 + $0xf0] sm:$0xf] %v1524_v13  ;;  %v2990_v26 = vunpack.c.h.bf16 %v5505_v8  ;;  %v2954_v27 = vpack.c.bf16 %v6576_v19, %v2952_v24  ;;  %v1566_v28 = vsel %vm202_vm3, %v1560_v20, %v6613_v2  ;;  %v1588_v29 = vsel %vm202_vm3, %v1582_v21, %v6613_v2  ;;  %v6558_v55 = vld [vmem:[#allocation17 + $0x1d8] sm:$0xff]   ;;  %v7251_v0 = vld [vmem:[#allocation19] ss:$0 sm:$0xff] }
  0x78   : > { %1548 = vst [vmem:[#allocation17 + $0xf4] sm:$0xf] %v1546_v17  ;;  %2934 = vst [vmem:[#allocation17 + $0x1f0] sm:$0xf] %v2932_v23  ;;  %v1568_v30 = vpack.c.bf16 %v6576_v19, %v1566_v28  ;;  %v1590_v31 = vpack.c.bf16 %v6576_v19, %v1588_v29  ;;  %v2974_v32 = vsel %vm202_vm3, %v2968_v25, %v6613_v2 }
  0x79   : > { %v2996_v33 = vsel %vm202_vm3, %v2990_v26, %v6613_v2  ;;  %6371 = vmatmul.mubr.bf16.gmra.mrb[28].mxu0 %v6533_v9  ;;  %6435 = vmatmul.mubr.bf16.gmra.mrb[28].mxu1 %v6534_v10  ;;  %2956 = vst [vmem:[#allocation17 + $0x1f4] sm:$0xf] %v2954_v27  ;;  %v2976_v34 = vpack.c.bf16 %v6576_v19, %v2974_v32  ;;  %v6559_v56 = vld [vmem:[#allocation17 + $0xe0] sm:$0xff]  }
  0x7a   : > { %v2998_v35 = vpack.c.bf16 %v6576_v19, %v2996_v33  ;;  %6374 = vmatprep.mubr.bf16.mxu0 %v6535_v16  ;;  %6438 = vmatprep.mubr.bf16.mxu1 %v6536_v22  ;;  %1570 = vst [vmem:[#allocation17 + $0xf8] sm:$0xf] %v1568_v30  ;;  %1592 = vst [vmem:[#allocation17 + $0xfc] sm:$0xf] %v1590_v31  ;;  %v6545_v19 = vld [vmem:[#allocation17 + $0xa8] sm:$0xff]   ;;  %v6560_v57 = vld [vmem:[#allocation17 + $0x1e0] sm:$0xff]  }
  0x7b   : > { %2978 = vst [vmem:[#allocation17 + $0x1f8] sm:$0xf] %v2976_v34  ;;  %v6561_v58 = vld [vmem:[#allocation17 + $0xe8] sm:$0xff]  }
  0x7c   : > { %3000 = vst [vmem:[#allocation17 + $0x1fc] sm:$0xf] %v2998_v35 }
  0x7d   : > { %v6562_v59 = vld [vmem:[#allocation17 + $0x1e8] sm:$0xff]  }
  0x7f   : > { %v6563_v60 = vld [vmem:[#allocation17 + $0xf0] sm:$0xff]  }
  0x80   : > { %v6564_v61 = vld [vmem:[#allocation17 + $0x1f0] sm:$0xff]  }
  0x81   : > { %6375 = vmatmul.mubr.bf16.gmra.mrb[32].mxu0 %v6537_v36  ;;  %6439 = vmatmul.mubr.bf16.gmra.mrb[32].mxu1 %v6538_v37  ;;  %v6565_v62 = vld [vmem:[#allocation17 + $0xf8] sm:$0xff]  }
  0x82   : > { %6378 = vmatprep.mubr.bf16.mxu0 %v6539_v38  ;;  %6442 = vmatprep.mubr.bf16.mxu1 %v6540_v39 }
  0x83   : > { %v6566_v63 = vld [vmem:[#allocation17 + $0x1f8] sm:$0xff]  }
  0x89   : > { %6379 = vmatmul.mubr.bf16.gmra.mrb[36].mxu0 %v6541_v11  ;;  %6443 = vmatmul.mubr.bf16.gmra.mrb[36].mxu1 %v6542_v40 }
  0x8a   : > { %6382 = vmatprep.mubr.bf16.mxu0 %v6543_v41  ;;  %6446 = vmatprep.mubr.bf16.mxu1 %v6544_v42 }
  0x91   : > { %6383 = vmatmul.mubr.bf16.gmra.mrb[40].mxu0 %v6545_v19  ;;  %6447 = vmatmul.mubr.bf16.gmra.mrb[40].mxu1 %v6546_v43 }
  0x92   : > { %6386 = vmatprep.mubr.bf16.mxu0 %v6547_v44  ;;  %6450 = vmatprep.mubr.bf16.mxu1 %v6548_v45 }
  0x99   : > { %6387 = vmatmul.mubr.bf16.gmra.mrb[44].mxu0 %v6549_v46  ;;  %6451 = vmatmul.mubr.bf16.gmra.mrb[44].mxu1 %v6550_v47 }
  0x9a   : > { %6390 = vmatprep.mubr.bf16.mxu0 %v6551_v48  ;;  %6454 = vmatprep.mubr.bf16.mxu1 %v6552_v49 }
  0xa1   : > { %6391 = vmatmul.mubr.bf16.gmra.mrb[48].mxu0 %v6553_v50  ;;  %6455 = vmatmul.mubr.bf16.gmra.mrb[48].mxu1 %v6554_v51 }
  0xa2   : > { %6394 = vmatprep.mubr.bf16.mxu0 %v6555_v52  ;;  %6458 = vmatprep.mubr.bf16.mxu1 %v6556_v53 }
  0xa9   : > { %6395 = vmatmul.mubr.bf16.gmra.mrb[52].mxu0 %v6557_v54  ;;  %6459 = vmatmul.mubr.bf16.gmra.mrb[52].mxu1 %v6558_v55 }
  0xaa   : > { %6398 = vmatprep.mubr.bf16.mxu0 %v6559_v56  ;;  %6462 = vmatprep.mubr.bf16.mxu1 %v6560_v57 }
  0xb1   : > { %6399 = vmatmul.mubr.bf16.gmra.mrb[56].mxu0 %v6561_v58  ;;  %6463 = vmatmul.mubr.bf16.gmra.mrb[56].mxu1 %v6562_v59 }
  0xb2   : > { %6402 = vmatprep.mubr.bf16.mxu0 %v6563_v60  ;;  %6466 = vmatprep.mubr.bf16.mxu1 %v6564_v61 }
  0xb9   : > { %6403 = vmatmul.mubr.bf16.gmra.mrb[60].mxu0 %v6565_v62  ;;  %6467 = vmatmul.mubr.bf16.gmra.mrb[60].mxu1 %v6566_v63 }
 0x112   : > { %v6344_v3 = vpop.f32.mrb[0].mxu0 }
 0x113   : > { %v6408_v4 = vpop.f32.mrb[0].mxu1  ;;  %v3789_v5 = vadd.f32 %v6344_v3, %v7251_v0  ;;  %v3780_v7 = vpop.f32.mrb[1].mxu0 }
 0x114   : > { %v4045_v6 = vadd.f32 %v6408_v4, %v7251_v0  ;;  %v4036_v8 = vpop.f32.mrb[1].mxu1  ;;  %v3781_v9 = vadd.f32 %v7251_v0, %v3780_v7  ;;  %v6345_v12 = vpop.f32.mrb[2].mxu0 }
 0x115   : > { %v4037_v10 = vadd.f32 %v7251_v0, %v4036_v8  ;;  %v6409_v13 = vpop.f32.mrb[2].mxu1  ;;  %vm4293_vm4 = vcmp.gt.f32.partialorder %v3789_v5, 0.0  ;;  %v4421_v14 = vmul.f32 0.1, %v3789_v5  ;;  %v3792_v18 = vadd.f32 %v6345_v12, %v7251_v0  ;;  %v3783_v21 = vpop.f32.mrb[3].mxu0 }
 0x116   : > { %vm4357_vm5 = vcmp.gt.f32.partialorder %v4045_v6, 0.0  ;;  %v4485_v15 = vmul.f32 0.1, %v4045_v6  ;;  %vm4291_vm6 = vcmp.gt.f32.partialorder %v3781_v9, 0.0  ;;  %v4419_v16 = vmul.f32 0.1, %v3781_v9 }
 0x117   : > { %vm4355_vm7 = vcmp.gt.f32.partialorder %v4037_v10, 0.0  ;;  %v4483_v17 = vmul.f32 0.1, %v4037_v10  ;;  %v4048_v20 = vadd.f32 %v6409_v13, %v7251_v0  ;;  %v4039_v22 = vpop.f32.mrb[3].mxu1  ;;  %v4549_v23 = vsel %vm4293_vm4, %v3789_v5, %v4421_v14 }
 0x118   : > { %v4613_v24 = vsel %vm4357_vm5, %v4045_v6, %v4485_v15  ;;  %v3784_v25 = vadd.f32 %v7251_v0, %v3783_v21  ;;  %v4040_v26 = vadd.f32 %v7251_v0, %v4039_v22  ;;  %vm4294_vm8 = vcmp.gt.f32.partialorder %v3792_v18, 0.0 }
 0x119   : > { %v4422_v27 = vmul.f32 0.1, %v3792_v18  ;;  %vm4358_vm9 = vcmp.gt.f32.partialorder %v4048_v20, 0.0  ;;  %v4486_v28 = vmul.f32 0.1, %v4048_v20  ;;  %v4547_v31 = vsel %vm4291_vm6, %v3781_v9, %v4419_v16 }
 0x11a   : > { %vm4292_vm10 = vcmp.gt.f32.partialorder %v3784_v25, 0.0  ;;  %v4420_v29 = vmul.f32 0.1, %v3784_v25  ;;  %vm4356_vm11 = vcmp.gt.f32.partialorder %v4040_v26, 0.0  ;;  %v4484_v30 = vmul.f32 0.1, %v4040_v26 }
 0x11b   : > { %v4611_v32 = vsel %vm4355_vm7, %v4037_v10, %v4483_v17  ;;  %v4550_v33 = vsel %vm4294_vm8, %v3792_v18, %v4422_v27  ;;  %v4614_v34 = vsel %vm4358_vm9, %v4048_v20, %v4486_v28  ;;  %v6348_v35 = vpop.f32.mrb[4].mxu0  ;;  %v6412_v36 = vpop.f32.mrb[4].mxu1 }
 0x11c   : > { %v5879_v37 = vpack.c.bf16 %v4550_v33, %v4549_v23  ;;  %v6039_v38 = vpack.c.bf16 %v4614_v34, %v4613_v24  ;;  %v4548_v39 = vsel %vm4292_vm10, %v3784_v25, %v4420_v29  ;;  %v4612_v11 = vsel %vm4356_vm11, %v4040_v26, %v4484_v30  ;;  %v3796_v40 = vpop.f32.mrb[5].mxu0  ;;  %v4052_v41 = vpop.f32.mrb[5].mxu1 }
 0x11d   : > { %v5874_v42 = vpack.c.bf16 %v4548_v39, %v4547_v31  ;;  %v6034_v19 = vpack.c.bf16 %v4612_v11, %v4611_v32  ;;  %v3805_v43 = vadd.f32 %v6348_v35, %v7251_v0  ;;  %v4061_v44 = vadd.f32 %v6412_v36, %v7251_v0  ;;  %v6349_v45 = vpop.f32.mrb[6].mxu0  ;;  %v6413_v46 = vpop.f32.mrb[6].mxu1 }
 0x11e   : > { %6191 = vst [vmem:[%s7268_s13 + $0x8] sm:$0xff] %v5879_v37   ;;  %6223 = vst [vmem:[%s7268_s13 + $0x108] sm:$0xff] %v6039_v38   ;;  %v3797_v47 = vadd.f32 %v7251_v0, %v3796_v40  ;;  %v4053_v48 = vadd.f32 %v7251_v0, %v4052_v41  ;;  %v3808_v49 = vadd.f32 %v6349_v45, %v7251_v0  ;;  %v3799_v51 = vpop.f32.mrb[7].mxu0  ;;  %v4055_v52 = vpop.f32.mrb[7].mxu1 }
 0x11f   : > { %v4064_v50 = vadd.f32 %v6413_v46, %v7251_v0  ;;  %5875 = vst [vmem:[%s7268_s13] sm:$0xff] %v5874_v42   ;;  %6222 = vst [vmem:[%s7268_s13 + $0x100] sm:$0xff] %v6034_v19   ;;  %vm4297_vm12 = vcmp.gt.f32.partialorder %v3805_v43, 0.0  ;;  %v4425_v53 = vmul.f32 0.1, %v3805_v43  ;;  %vm4361_vm13 = vcmp.gt.f32.partialorder %v4061_v44, 0.0 }
 0x120   : > { %v4489_v54 = vmul.f32 0.1, %v4061_v44  ;;  %vm4295_vm14 = vcmp.gt.f32.partialorder %v3797_v47, 0.0  ;;  %v4423_v55 = vmul.f32 0.1, %v3797_v47  ;;  %vm4359_vm15 = vcmp.gt.f32.partialorder %v4053_v48, 0.0 }
 0x121   : > { %v4487_v56 = vmul.f32 0.1, %v4053_v48  ;;  %v4553_v57 = vsel %vm4297_vm12, %v3805_v43, %v4425_v53  ;;  %vm4298_vm0 = vcmp.gt.f32.partialorder %v3808_v49, 0.0  ;;  %v4426_v59 = vmul.f32 0.1, %v3808_v49 }
 0x122   : > { %v4617_v58 = vsel %vm4361_vm13, %v4061_v44, %v4489_v54  ;;  %v4551_v60 = vsel %vm4295_vm14, %v3797_v47, %v4423_v55  ;;  %vm4362_vm1 = vcmp.gt.f32.partialorder %v4064_v50, 0.0  ;;  %v4490_v62 = vmul.f32 0.1, %v4064_v50  ;;  %v6352_v63 = vpop.f32.mrb[8].mxu0 }
 0x123   : > { %v4615_v61 = vsel %vm4359_vm15, %v4053_v48, %v4487_v56  ;;  %v6416_v3 = vpop.f32.mrb[8].mxu1  ;;  %v4554_v4 = vsel %vm4298_vm0, %v3808_v49, %v4426_v59  ;;  %v3800_v5 = vadd.f32 %v7251_v0, %v3799_v51  ;;  %v4056_v6 = vadd.f32 %v7251_v0, %v4055_v52  ;;  %v3812_v8 = vpop.f32.mrb[9].mxu0 }
 0x124   : > { %v3821_v7 = vadd.f32 %v6352_v63, %v7251_v0  ;;  %v4068_v9 = vpop.f32.mrb[9].mxu1  ;;  %v5889_v10 = vpack.c.bf16 %v4554_v4, %v4553_v57  ;;  %v4618_v12 = vsel %vm4362_vm1, %v4064_v50, %v4490_v62  ;;  %v4077_v13 = vadd.f32 %v6416_v3, %v7251_v0  ;;  %v6353_v15 = vpop.f32.mrb[10].mxu0 }
 0x125   : > { %v3813_v14 = vadd.f32 %v7251_v0, %v3812_v8  ;;  %v6417_v16 = vpop.f32.mrb[10].mxu1  ;;  %v6049_v17 = vpack.c.bf16 %v4618_v12, %v4617_v58  ;;  %vm4296_vm2 = vcmp.gt.f32.partialorder %v3800_v5, 0.0  ;;  %v4424_v18 = vmul.f32 0.1, %v3800_v5  ;;  %v3815_v20 = vpop.f32.mrb[11].mxu0 }
 0x126   : > { %vm4360_vm3 = vcmp.gt.f32.partialorder %v4056_v6, 0.0  ;;  %v4071_v21 = vpop.f32.mrb[11].mxu1  ;;  %6193 = vst [vmem:[%s7268_s13 + $0x18] sm:$0xff] %v5889_v10   ;;  %v4488_v22 = vmul.f32 0.1, %v4056_v6  ;;  %vm4301_vm4 = vcmp.gt.f32.partialorder %v3821_v7, 0.0  ;;  %v4069_v30 = vadd.f32 %v7251_v0, %v4068_v9 }
 0x127   : > { %v4429_v23 = vmul.f32 0.1, %v3821_v7  ;;  %vm4365_vm5 = vcmp.gt.f32.partialorder %v4077_v13, 0.0  ;;  %6225 = vst [vmem:[%s7268_s13 + $0x118] sm:$0xff] %v6049_v17   ;;  %v4552_v24 = vsel %vm4296_vm2, %v3800_v5, %v4424_v18  ;;  %v4493_v25 = vmul.f32 0.1, %v4077_v13 }
 0x128   : > { %vm4299_vm6 = vcmp.gt.f32.partialorder %v3813_v14, 0.0  ;;  %v4427_v26 = vmul.f32 0.1, %v3813_v14  ;;  %v5884_v27 = vpack.c.bf16 %v4552_v24, %v4551_v60  ;;  %v4616_v28 = vsel %vm4360_vm3, %v4056_v6, %v4488_v22 }
 0x129   : > { %v4557_v29 = vsel %vm4301_vm4, %v3821_v7, %v4429_v23  ;;  %v6044_v31 = vpack.c.bf16 %v4616_v28, %v4615_v61  ;;  %v4621_v32 = vsel %vm4365_vm5, %v4077_v13, %v4493_v25  ;;  %v3824_v34 = vadd.f32 %v6353_v15, %v7251_v0 }
 0x12a   : > { %v4555_v33 = vsel %vm4299_vm6, %v3813_v14, %v4427_v26  ;;  %6192 = vst [vmem:[%s7268_s13 + $0x10] sm:$0xff] %v5884_v27   ;;  %vm4363_vm7 = vcmp.gt.f32.partialorder %v4069_v30, 0.0  ;;  %v4491_v35 = vmul.f32 0.1, %v4069_v30  ;;  %v4080_v36 = vadd.f32 %v6417_v16, %v7251_v0  ;;  %v6356_v38 = vpop.f32.mrb[12].mxu0 }
 0x12b   : > { %v3816_v37 = vadd.f32 %v7251_v0, %v3815_v20  ;;  %v6420_v39 = vpop.f32.mrb[12].mxu1  ;;  %6224 = vst [vmem:[%s7268_s13 + $0x110] sm:$0xff] %v6044_v31   ;;  %vm4302_vm8 = vcmp.gt.f32.partialorder %v3824_v34, 0.0  ;;  %v4430_v11 = vmul.f32 0.1, %v3824_v34  ;;  %v4072_v40 = vadd.f32 %v7251_v0, %v4071_v21  ;;  %v3828_v42 = vpop.f32.mrb[13].mxu0 }
 0x12c   : > { %v3837_v41 = vadd.f32 %v6356_v38, %v7251_v0  ;;  %v4084_v19 = vpop.f32.mrb[13].mxu1  ;;  %v4619_v43 = vsel %vm4363_vm7, %v4069_v30, %v4491_v35  ;;  %vm4366_vm9 = vcmp.gt.f32.partialorder %v4080_v36, 0.0  ;;  %v4494_v44 = vmul.f32 0.1, %v4080_v36  ;;  %v6357_v45 = vpop.f32.mrb[14].mxu0 }
 0x12d   : > { %vm4300_vm10 = vcmp.gt.f32.partialorder %v3816_v37, 0.0  ;;  %v6421_v46 = vpop.f32.mrb[14].mxu1  ;;  %v4558_v47 = vsel %vm4302_vm8, %v3824_v34, %v4430_v11  ;;  %v4428_v48 = vmul.f32 0.1, %v3816_v37  ;;  %vm4364_vm11 = vcmp.gt.f32.partialorder %v4072_v40, 0.0  ;;  %v3831_v50 = vpop.f32.mrb[15].mxu0 }
 0x12e   : > { %v4492_v49 = vmul.f32 0.1, %v4072_v40  ;;  %v5899_v51 = vpack.c.bf16 %v4558_v47, %v4557_v29  ;;  %v4622_v52 = vsel %vm4366_vm9, %v4080_v36, %v4494_v44  ;;  %vm4305_vm12 = vcmp.gt.f32.partialorder %v3837_v41, 0.0  ;;  %v4087_v54 = vpop.f32.mrb[15].mxu1 }
 0x12f   : > { %v4433_v53 = vmul.f32 0.1, %v3837_v41  ;;  %v6059_v55 = vpack.c.bf16 %v4622_v52, %v4621_v32  ;;  %v4556_v56 = vsel %vm4300_vm10, %v3816_v37, %v4428_v48  ;;  %v4093_v58 = vadd.f32 %v6420_v39, %v7251_v0 }
 0x130   : > { %v4620_v57 = vsel %vm4364_vm11, %v4072_v40, %v4492_v49  ;;  %6195 = vst [vmem:[%s7268_s13 + $0x28] sm:$0xff] %v5899_v51   ;;  %v5894_v59 = vpack.c.bf16 %v4556_v56, %v4555_v33  ;;  %v3829_v62 = vadd.f32 %v7251_v0, %v3828_v42  ;;  %v4085_v3 = vadd.f32 %v7251_v0, %v4084_v19 }
 0x131   : > { %v6054_v60 = vpack.c.bf16 %v4620_v57, %v4619_v43  ;;  %v4561_v61 = vsel %vm4305_vm12, %v3837_v41, %v4433_v53  ;;  %6227 = vst [vmem:[%s7268_s13 + $0x128] sm:$0xff] %v6059_v55   ;;  %vm4369_vm13 = vcmp.gt.f32.partialorder %v4093_v58, 0.0  ;;  %v4497_v63 = vmul.f32 0.1, %v4093_v58 }
 0x132   : > { %v3840_v4 = vadd.f32 %v6357_v45, %v7251_v0  ;;  %6194 = vst [vmem:[%s7268_s13 + $0x20] sm:$0xff] %v5894_v59   ;;  %vm4303_vm14 = vcmp.gt.f32.partialorder %v3829_v62, 0.0  ;;  %v4431_v5 = vmul.f32 0.1, %v3829_v62  ;;  %v4096_v6 = vadd.f32 %v6421_v46, %v7251_v0  ;;  %v6360_v8 = vpop.f32.mrb[16].mxu0 }
 0x133   : > { %6226 = vst [vmem:[%s7268_s13 + $0x120] sm:$0xff] %v6054_v60   ;;  %v3832_v7 = vadd.f32 %v7251_v0, %v3831_v50  ;;  %v6424_v9 = vpop.f32.mrb[16].mxu1  ;;  %v4625_v10 = vsel %vm4369_vm13, %v4093_v58, %v4497_v63  ;;  %vm4367_vm15 = vcmp.gt.f32.partialorder %v4085_v3, 0.0  ;;  %v4495_v12 = vmul.f32 0.1, %v4085_v3  ;;  %v3844_v13 = vpop.f32.mrb[17].mxu0 }
 0x134   : > { %vm4306_vm0 = vcmp.gt.f32.partialorder %v3840_v4, 0.0  ;;  %v4100_v14 = vpop.f32.mrb[17].mxu1  ;;  %v4559_v15 = vsel %vm4303_vm14, %v3829_v62, %v4431_v5  ;;  %v4434_v16 = vmul.f32 0.1, %v3840_v4  ;;  %vm4370_vm1 = vcmp.gt.f32.partialorder %v4096_v6, 0.0  ;;  %v6361_v18 = vpop.f32.mrb[18].mxu0 }
 0x135   : > { %v4498_v17 = vmul.f32 0.1, %v4096_v6  ;;  %v4623_v20 = vsel %vm4367_vm15, %v4085_v3, %v4495_v12  ;;  %vm4304_vm2 = vcmp.gt.f32.partialorder %v3832_v7, 0.0  ;;  %v4432_v21 = vmul.f32 0.1, %v3832_v7  ;;  %v6425_v23 = vpop.f32.mrb[18].mxu1 }
 0x136   : > { %v4088_v22 = vadd.f32 %v7251_v0, %v4087_v54  ;;  %v3847_v24 = vpop.f32.mrb[19].mxu0  ;;  %v4562_v25 = vsel %vm4306_vm0, %v3840_v4, %v4434_v16  ;;  %v3853_v27 = vadd.f32 %v6360_v8, %v7251_v0  ;;  %v4109_v28 = vadd.f32 %v6424_v9, %v7251_v0  ;;  %v4103_v29 = vpop.f32.mrb[19].mxu1 }
 0x137   : > { %v4626_v26 = vsel %vm4370_vm1, %v4096_v6, %v4498_v17  ;;  %v5909_v30 = vpack.c.bf16 %v4562_v25, %v4561_v61  ;;  %v4560_v32 = vsel %vm4304_vm2, %v3832_v7, %v4432_v21  ;;  %v3845_v37 = vadd.f32 %v7251_v0, %v3844_v13 }
 0x138   : > { %v6069_v31 = vpack.c.bf16 %v4626_v26, %v4625_v10  ;;  %vm4368_vm3 = vcmp.gt.f32.partialorder %v4088_v22, 0.0  ;;  %v5904_v33 = vpack.c.bf16 %v4560_v32, %v4559_v15  ;;  %v4496_v34 = vmul.f32 0.1, %v4088_v22 }
 0x139   : > { %vm4309_vm4 = vcmp.gt.f32.partialorder %v3853_v27, 0.0  ;;  %v4437_v35 = vmul.f32 0.1, %v3853_v27  ;;  %6197 = vst [vmem:[%s7268_s13 + $0x38] sm:$0xff] %v5909_v30   ;;  %vm4373_vm5 = vcmp.gt.f32.partialorder %v4109_v28, 0.0  ;;  %v4101_v38 = vadd.f32 %v7251_v0, %v4100_v14 }
 0x13a   : > { %6229 = vst [vmem:[%s7268_s13 + $0x138] sm:$0xff] %v6069_v31   ;;  %v4501_v36 = vmul.f32 0.1, %v4109_v28  ;;  %6196 = vst [vmem:[%s7268_s13 + $0x30] sm:$0xff] %v5904_v33   ;;  %v4624_v39 = vsel %vm4368_vm3, %v4088_v22, %v4496_v34  ;;  %v3856_v40 = vadd.f32 %v6361_v18, %v7251_v0  ;;  %v4112_v41 = vadd.f32 %v6425_v23, %v7251_v0 }
 0x13b   : > { %v4565_v11 = vsel %vm4309_vm4, %v3853_v27, %v4437_v35  ;;  %v6364_v42 = vpop.f32.mrb[20].mxu0  ;;  %v6428_v19 = vpop.f32.mrb[20].mxu1  ;;  %v6064_v43 = vpack.c.bf16 %v4624_v39, %v4623_v20  ;;  %vm4307_vm6 = vcmp.gt.f32.partialorder %v3845_v37, 0.0  ;;  %v4435_v45 = vmul.f32 0.1, %v3845_v37 }
 0x13c   : > { %v4629_v44 = vsel %vm4373_vm5, %v4109_v28, %v4501_v36  ;;  %v3860_v46 = vpop.f32.mrb[21].mxu0  ;;  %v4116_v47 = vpop.f32.mrb[21].mxu1  ;;  %vm4371_vm7 = vcmp.gt.f32.partialorder %v4101_v38, 0.0  ;;  %v4499_v48 = vmul.f32 0.1, %v4101_v38  ;;  %vm4310_vm8 = vcmp.gt.f32.partialorder %v3856_v40, 0.0 }
 0x13d   : > { %v4438_v49 = vmul.f32 0.1, %v3856_v40  ;;  %6228 = vst [vmem:[%s7268_s13 + $0x130] sm:$0xff] %v6064_v43   ;;  %v4563_v50 = vsel %vm4307_vm6, %v3845_v37, %v4435_v45  ;;  %vm4374_vm9 = vcmp.gt.f32.partialorder %v4112_v41, 0.0  ;;  %v4502_v51 = vmul.f32 0.1, %v4112_v41 }
 0x13e   : > { %v3848_v52 = vadd.f32 %v7251_v0, %v3847_v24  ;;  %v6365_v53 = vpop.f32.mrb[22].mxu0  ;;  %v6429_v54 = vpop.f32.mrb[22].mxu1  ;;  %v4627_v55 = vsel %vm4371_vm7, %v4101_v38, %v4499_v48  ;;  %v4104_v57 = vadd.f32 %v7251_v0, %v4103_v29  ;;  %v3869_v58 = vadd.f32 %v6364_v42, %v7251_v0 }
 0x13f   : > { %v4566_v56 = vsel %vm4310_vm8, %v3856_v40, %v4438_v49  ;;  %v3863_v59 = vpop.f32.mrb[23].mxu0  ;;  %v4119_v60 = vpop.f32.mrb[23].mxu1  ;;  %v4630_v62 = vsel %vm4374_vm9, %v4112_v41, %v4502_v51  ;;  %v4125_v7 = vadd.f32 %v6428_v19, %v7251_v0  ;;  %v3861_v8 = vadd.f32 %v7251_v0, %v3860_v46 }
 0x140   : > { %v5919_v61 = vpack.c.bf16 %v4566_v56, %v4565_v11  ;;  %vm4308_vm10 = vcmp.gt.f32.partialorder %v3848_v52, 0.0  ;;  %v4436_v63 = vmul.f32 0.1, %v3848_v52  ;;  %v6079_v3 = vpack.c.bf16 %v4630_v62, %v4629_v44 }
 0x141   : > { %vm4372_vm11 = vcmp.gt.f32.partialorder %v4104_v57, 0.0  ;;  %v4500_v4 = vmul.f32 0.1, %v4104_v57  ;;  %vm4313_vm12 = vcmp.gt.f32.partialorder %v3869_v58, 0.0  ;;  %v4441_v6 = vmul.f32 0.1, %v3869_v58 }
 0x142   : > { %6199 = vst [vmem:[%s7268_s13 + $0x48] sm:$0xff] %v5919_v61   ;;  %v4564_v5 = vsel %vm4308_vm10, %v3848_v52, %v4436_v63  ;;  %6231 = vst [vmem:[%s7268_s13 + $0x148] sm:$0xff] %v6079_v3   ;;  %v4117_v12 = vadd.f32 %v7251_v0, %v4116_v47  ;;  %v3872_v13 = vadd.f32 %v6365_v53, %v7251_v0  ;;  %vm4377_vm13 = vcmp.gt.f32.partialorder %v4125_v7, 0.0 }
 0x143   : > { %v5914_v9 = vpack.c.bf16 %v4564_v5, %v4563_v50  ;;  %v4628_v10 = vsel %vm4372_vm11, %v4104_v57, %v4500_v4  ;;  %v4569_v17 = vsel %vm4313_vm12, %v3869_v58, %v4441_v6  ;;  %v4505_v18 = vmul.f32 0.1, %v4125_v7 }
 0x144   : > { %v6368_v14 = vpop.f32.mrb[24].mxu0  ;;  %v6432_v15 = vpop.f32.mrb[24].mxu1  ;;  %v6074_v16 = vpack.c.bf16 %v4628_v10, %v4627_v55  ;;  %vm4311_vm14 = vcmp.gt.f32.partialorder %v3861_v8, 0.0  ;;  %v4439_v22 = vmul.f32 0.1, %v3861_v8  ;;  %vm4375_vm15 = vcmp.gt.f32.partialorder %v4117_v12, 0.0 }
 0x145   : > { %v3876_v20 = vpop.f32.mrb[25].mxu0  ;;  %v4132_v21 = vpop.f32.mrb[25].mxu1  ;;  %6198 = vst [vmem:[%s7268_s13 + $0x40] sm:$0xff] %v5914_v9   ;;  %v4503_v23 = vmul.f32 0.1, %v4117_v12  ;;  %v4633_v24 = vsel %vm4377_vm13, %v4125_v7, %v4505_v18  ;;  %vm4314_vm0 = vcmp.gt.f32.partialorder %v3872_v13, 0.0  ;;  %v4128_v26 = vadd.f32 %v6429_v54, %v7251_v0 }
 0x146   : > { %6230 = vst [vmem:[%s7268_s13 + $0x140] sm:$0xff] %v6074_v16   ;;  %v4442_v25 = vmul.f32 0.1, %v3872_v13  ;;  %v6369_v27 = vpop.f32.mrb[26].mxu0  ;;  %v6433_v28 = vpop.f32.mrb[26].mxu1  ;;  %v4567_v29 = vsel %vm4311_vm14, %v3861_v8, %v4439_v22  ;;  %v3864_v31 = vadd.f32 %v7251_v0, %v3863_v59  ;;  %v4120_v32 = vadd.f32 %v7251_v0, %v4119_v60 }
 0x147   : > { %v4631_v30 = vsel %vm4375_vm15, %v4117_v12, %v4503_v23  ;;  %v3879_v33 = vpop.f32.mrb[27].mxu0  ;;  %v4135_v34 = vpop.f32.mrb[27].mxu1  ;;  %vm4378_vm1 = vcmp.gt.f32.partialorder %v4128_v26, 0.0  ;;  %v4506_v36 = vmul.f32 0.1, %v4128_v26  ;;  %v3885_v37 = vadd.f32 %v6368_v14, %v7251_v0 }
 0x148   : > { %v4570_v35 = vsel %vm4314_vm0, %v3872_v13, %v4442_v25  ;;  %vm4312_vm2 = vcmp.gt.f32.partialorder %v3864_v31, 0.0  ;;  %v4440_v39 = vmul.f32 0.1, %v3864_v31  ;;  %vm4376_vm3 = vcmp.gt.f32.partialorder %v4120_v32, 0.0 }
 0x149   : > { %v5929_v38 = vpack.c.bf16 %v4570_v35, %v4569_v17  ;;  %v4634_v11 = vsel %vm4378_vm1, %v4128_v26, %v4506_v36  ;;  %v4504_v40 = vmul.f32 0.1, %v4120_v32  ;;  %vm4317_vm4 = vcmp.gt.f32.partialorder %v3885_v37, 0.0 }
 0x14a   : > { %v4445_v41 = vmul.f32 0.1, %v3885_v37  ;;  %v6089_v42 = vpack.c.bf16 %v4634_v11, %v4633_v24  ;;  %v4568_v19 = vsel %vm4312_vm2, %v3864_v31, %v4440_v39  ;;  %v4141_v43 = vadd.f32 %v6432_v15, %v7251_v0 }
 0x14b   : > { %6201 = vst [vmem:[%s7268_s13 + $0x58] sm:$0xff] %v5929_v38   ;;  %v3877_v44 = vadd.f32 %v7251_v0, %v3876_v20  ;;  %v5924_v47 = vpack.c.bf16 %v4568_v19, %v4567_v29  ;;  %v4632_v48 = vsel %vm4376_vm3, %v4120_v32, %v4504_v40  ;;  %v4133_v50 = vadd.f32 %v7251_v0, %v4132_v21 }
 0x14c   : > { %v6372_v45 = vpop.f32.mrb[28].mxu0  ;;  %v6436_v46 = vpop.f32.mrb[28].mxu1  ;;  %v4573_v49 = vsel %vm4317_vm4, %v3885_v37, %v4445_v41  ;;  %6233 = vst [vmem:[%s7268_s13 + $0x158] sm:$0xff] %v6089_v42   ;;  %v6084_v53 = vpack.c.bf16 %v4632_v48, %v4631_v30  ;;  %vm4381_vm5 = vcmp.gt.f32.partialorder %v4141_v43, 0.0  ;;  %v4509_v54 = vmul.f32 0.1, %v4141_v43 }
 0x14d   : > { %v3892_v51 = vpop.f32.mrb[29].mxu0  ;;  %v4148_v52 = vpop.f32.mrb[29].mxu1  ;;  %vm4315_vm6 = vcmp.gt.f32.partialorder %v3877_v44, 0.0  ;;  %6200 = vst [vmem:[%s7268_s13 + $0x50] sm:$0xff] %v5924_v47   ;;  %v4443_v57 = vmul.f32 0.1, %v3877_v44  ;;  %v3888_v59 = vadd.f32 %v6369_v27, %v7251_v0  ;;  %v4144_v62 = vadd.f32 %v6433_v28, %v7251_v0 }
 0x14e   : > { %v6373_v55 = vpop.f32.mrb[30].mxu0  ;;  %v6437_v56 = vpop.f32.mrb[30].mxu1  ;;  %vm4379_vm7 = vcmp.gt.f32.partialorder %v4133_v50, 0.0  ;;  %v4507_v58 = vmul.f32 0.1, %v4133_v50  ;;  %6232 = vst [vmem:[%s7268_s13 + $0x150] sm:$0xff] %v6084_v53   ;;  %v4637_v61 = vsel %vm4381_vm5, %v4141_v43, %v4509_v54  ;;  %v3880_v63 = vadd.f32 %v7251_v0, %v3879_v33 }
 0x14f   : > { %v3895_v60 = vpop.f32.mrb[31].mxu0  ;;  %v4136_v3 = vadd.f32 %v7251_v0, %v4135_v34  ;;  %v4151_v4 = vpop.f32.mrb[31].mxu1  ;;  %v4571_v5 = vsel %vm4315_vm6, %v3877_v44, %v4443_v57  ;;  %vm4318_vm8 = vcmp.gt.f32.partialorder %v3888_v59, 0.0  ;;  %v4446_v7 = vmul.f32 0.1, %v3888_v59 }
 0x150   : > { %v4635_v6 = vsel %vm4379_vm7, %v4133_v50, %v4507_v58  ;;  %vm4382_vm9 = vcmp.gt.f32.partialorder %v4144_v62, 0.0  ;;  %v4510_v8 = vmul.f32 0.1, %v4144_v62  ;;  %vm4316_vm10 = vcmp.gt.f32.partialorder %v3880_v63, 0.0 }
 0x151   : > { %v4444_v9 = vmul.f32 0.1, %v3880_v63  ;;  %v4574_v10 = vsel %vm4318_vm8, %v3888_v59, %v4446_v7  ;;  %vm4380_vm11 = vcmp.gt.f32.partialorder %v4136_v3, 0.0  ;;  %v4508_v12 = vmul.f32 0.1, %v4136_v3 }
 0x152   : > { %v3901_v13 = vadd.f32 %v6372_v45, %v7251_v0  ;;  %v5939_v14 = vpack.c.bf16 %v4574_v10, %v4573_v49  ;;  %v4638_v15 = vsel %vm4382_vm9, %v4144_v62, %v4510_v8  ;;  %v4157_v17 = vadd.f32 %v6436_v46, %v7251_v0 }
 0x153   : > { %v4572_v16 = vsel %vm4316_vm10, %v3880_v63, %v4444_v9  ;;  %v6099_v21 = vpack.c.bf16 %v4638_v15, %v4637_v61  ;;  %v4636_v23 = vsel %vm4380_vm11, %v4136_v3, %v4508_v12  ;;  %v3893_v30 = vadd.f32 %v7251_v0, %v3892_v51 }
 0x154   : > { %v6376_v18 = vpop.f32.mrb[32].mxu0  ;;  %v6440_v20 = vpop.f32.mrb[32].mxu1  ;;  %v5934_v22 = vpack.c.bf16 %v4572_v16, %v4571_v5  ;;  %vm4321_vm12 = vcmp.gt.f32.partialorder %v3901_v13, 0.0  ;;  %6203 = vst [vmem:[%s7268_s13 + $0x68] sm:$0xff] %v5939_v14   ;;  %v6094_v26 = vpack.c.bf16 %v4636_v23, %v4635_v6  ;;  %v4449_v27 = vmul.f32 0.1, %v3901_v13 }
 0x155   : > { %v3908_v24 = vpop.f32.mrb[33].mxu0  ;;  %v4164_v25 = vpop.f32.mrb[33].mxu1  ;;  %vm4385_vm13 = vcmp.gt.f32.partialorder %v4157_v17, 0.0  ;;  %v4513_v28 = vmul.f32 0.1, %v4157_v17  ;;  %6235 = vst [vmem:[%s7268_s13 + $0x168] sm:$0xff] %v6099_v21   ;;  %v4149_v31 = vadd.f32 %v7251_v0, %v4148_v52  ;;  %v3904_v32 = vadd.f32 %v6373_v55, %v7251_v0 }
 0x156   : > { %v6377_v29 = vpop.f32.mrb[34].mxu0  ;;  %6202 = vst [vmem:[%s7268_s13 + $0x60] sm:$0xff] %v5934_v22   ;;  %v4160_v33 = vadd.f32 %v6437_v56, %v7251_v0  ;;  %v6441_v34 = vpop.f32.mrb[34].mxu1  ;;  %6234 = vst [vmem:[%s7268_s13 + $0x160] sm:$0xff] %v6094_v26   ;;  %v4577_v36 = vsel %vm4321_vm12, %v3901_v13, %v4449_v27  ;;  %v3896_v38 = vadd.f32 %v7251_v0, %v3895_v60  ;;  %vm4319_vm14 = vcmp.gt.f32.partialorder %v3893_v30, 0.0 }
 0x157   : > { %v3911_v35 = vpop.f32.mrb[35].mxu0  ;;  %v4641_v37 = vsel %vm4385_vm13, %v4157_v17, %v4513_v28  ;;  %v4152_v39 = vadd.f32 %v7251_v0, %v4151_v4  ;;  %v4167_v11 = vpop.f32.mrb[35].mxu1  ;;  %v4447_v40 = vmul.f32 0.1, %v3893_v30  ;;  %vm4383_vm15 = vcmp.gt.f32.partialorder %v4149_v31, 0.0 }
 0x158   : > { %v4511_v41 = vmul.f32 0.1, %v4149_v31  ;;  %vm4322_vm0 = vcmp.gt.f32.partialorder %v3904_v32, 0.0  ;;  %v4450_v42 = vmul.f32 0.1, %v3904_v32  ;;  %vm4386_vm1 = vcmp.gt.f32.partialorder %v4160_v33, 0.0 }
 0x159   : > { %v4514_v19 = vmul.f32 0.1, %v4160_v33  ;;  %v4575_v43 = vsel %vm4319_vm14, %v3893_v30, %v4447_v40  ;;  %vm4320_vm2 = vcmp.gt.f32.partialorder %v3896_v38, 0.0  ;;  %v4448_v45 = vmul.f32 0.1, %v3896_v38 }
 0x15a   : > { %v4639_v44 = vsel %vm4383_vm15, %v4149_v31, %v4511_v41  ;;  %v4578_v46 = vsel %vm4322_vm0, %v3904_v32, %v4450_v42  ;;  %vm4384_vm3 = vcmp.gt.f32.partialorder %v4152_v39, 0.0  ;;  %v4512_v48 = vmul.f32 0.1, %v4152_v39 }
 0x15b   : > { %v4642_v47 = vsel %vm4386_vm1, %v4160_v33, %v4514_v19  ;;  %v5949_v51 = vpack.c.bf16 %v4578_v46, %v4577_v36  ;;  %v4576_v53 = vsel %vm4320_vm2, %v3896_v38, %v4448_v45  ;;  %v3917_v54 = vadd.f32 %v6376_v18, %v7251_v0 }
 0x15c   : > { %v6380_v49 = vpop.f32.mrb[36].mxu0  ;;  %v6444_v50 = vpop.f32.mrb[36].mxu1  ;;  %v6109_v52 = vpack.c.bf16 %v4642_v47, %v4641_v37  ;;  %v5944_v57 = vpack.c.bf16 %v4576_v53, %v4575_v43  ;;  %v4640_v58 = vsel %vm4384_vm3, %v4152_v39, %v4512_v48  ;;  %v4173_v59 = vadd.f32 %v6440_v20, %v7251_v0 }
 0x15d   : > { %v7356_v55 = vpop.f32.mrb[37].mxu0  ;;  %v7358_v56 = vpop.f32.mrb[37].mxu1  ;;  %v3909_v60 = vadd.f32 %v7251_v0, %v3908_v24  ;;  %6205 = vst [vmem:[%s7268_s13 + $0x78] sm:$0xff] %v5949_v51   ;;  %v6104_v63 = vpack.c.bf16 %v4640_v58, %v4639_v44  ;;  %vm4325_vm4 = vcmp.gt.f32.partialorder %v3917_v54, 0.0  ;;  %v4453_v3 = vmul.f32 0.1, %v3917_v54 }
 0x15e   : > { %v6381_v61 = vpop.f32.mrb[38].mxu0  ;;  %v6445_v62 = vpop.f32.mrb[38].mxu1  ;;  %6237 = vst [vmem:[%s7268_s13 + $0x178] sm:$0xff] %v6109_v52   ;;  %v4165_v4 = vadd.f32 %v7251_v0, %v4164_v25  ;;  %6204 = vst [vmem:[%s7268_s13 + $0x70] sm:$0xff] %v5944_v57   ;;  %vm4389_vm5 = vcmp.gt.f32.partialorder %v4173_v59, 0.0  ;;  %v3920_v12 = vadd.f32 %v6377_v29, %v7251_v0  ;;  %v4176_v15 = vadd.f32 %v6441_v34, %v7251_v0 }
 0x15f   : > { %v3927_v5 = vpop.f32.mrb[39].mxu0  ;;  %v4183_v6 = vpop.f32.mrb[39].mxu1  ;;  %v4517_v7 = vmul.f32 0.1, %v4173_v59  ;;  %vm4323_vm6 = vcmp.gt.f32.partialorder %v3909_v60, 0.0  ;;  %6236 = vst [vmem:[%s7268_s13 + $0x170] sm:$0xff] %v6104_v63   ;;  %v4581_v9 = vsel %vm4325_vm4, %v3917_v54, %v4453_v3  ;;  %v3912_v16 = vadd.f32 %v7251_v0, %v3911_v35 }
 0x160   : > { %v4451_v8 = vmul.f32 0.1, %v3909_v60  ;;  %vm4387_vm7 = vcmp.gt.f32.partialorder %v4165_v4, 0.0  ;;  %v4515_v10 = vmul.f32 0.1, %v4165_v4  ;;  %vm4326_vm8 = vcmp.gt.f32.partialorder %v3920_v12, 0.0 }
 0x161   : > { %v4645_v13 = vsel %vm4389_vm5, %v4173_v59, %v4517_v7  ;;  %v4454_v18 = vmul.f32 0.1, %v3920_v12  ;;  %v4168_v20 = vadd.f32 %v7251_v0, %v4167_v11  ;;  %vm4390_vm9 = vcmp.gt.f32.partialorder %v4176_v15, 0.0 }
 0x162   : > { %v4579_v14 = vsel %vm4323_vm6, %v3909_v60, %v4451_v8  ;;  %v4643_v17 = vsel %vm4387_vm7, %v4165_v4, %v4515_v10  ;;  %v4518_v21 = vmul.f32 0.1, %v4176_v15  ;;  %vm4324_vm10 = vcmp.gt.f32.partialorder %v3912_v16, 0.0 }
 0x163   : > { %v4452_v22 = vmul.f32 0.1, %v3912_v16  ;;  %v4582_v23 = vsel %vm4326_vm8, %v3920_v12, %v4454_v18  ;;  %vm4388_vm11 = vcmp.gt.f32.partialorder %v4168_v20, 0.0  ;;  %v4516_v24 = vmul.f32 0.1, %v4168_v20 }
 0x164   : > { %v3933_v25 = vadd.f32 %v6380_v49, %v7251_v0  ;;  %v6384_v26 = vpop.f32.mrb[40].mxu0  ;;  %v6448_v27 = vpop.f32.mrb[40].mxu1  ;;  %v5959_v28 = vpack.c.bf16 %v4582_v23, %v4581_v9  ;;  %v4646_v29 = vsel %vm4390_vm9, %v4176_v15, %v4518_v21  ;;  %v4189_v31 = vadd.f32 %v6444_v50, %v7251_v0 }
 0x165   : > { %v4580_v30 = vsel %vm4324_vm10, %v3912_v16, %v4452_v22  ;;  %v3940_v32 = vpop.f32.mrb[41].mxu0  ;;  %v4196_v33 = vpop.f32.mrb[41].mxu1  ;;  %v6119_v34 = vpack.c.bf16 %v4646_v29, %v4645_v13  ;;  %v4644_v36 = vsel %vm4388_vm11, %v4168_v20, %v4516_v24  ;;  %v3925_v42 = vadd.f32 %v7251_v0, %v7356_v55 }
 0x166   : > { %v5954_v35 = vpack.c.bf16 %v4580_v30, %v4579_v14  ;;  %vm4329_vm12 = vcmp.gt.f32.partialorder %v3933_v25, 0.0  ;;  %v7373_v37 = vpop.f32.mrb[42].mxu0  ;;  %v7375_v38 = vpop.f32.mrb[42].mxu1  ;;  %6207 = vst [vmem:[%s7268_s13 + $0x88] sm:$0xff] %v5959_v28   ;;  %v6114_v39 = vpack.c.bf16 %v4644_v36, %v4643_v17  ;;  %v4457_v11 = vmul.f32 0.1, %v3933_v25 }
 0x167   : > { %vm4393_vm13 = vcmp.gt.f32.partialorder %v4189_v31, 0.0  ;;  %v4521_v40 = vmul.f32 0.1, %v4189_v31  ;;  %v7378_v41 = vpop.f32.mrb[43].mxu0  ;;  %6239 = vst [vmem:[%s7268_s13 + $0x188] sm:$0xff] %v6119_v34   ;;  %v4181_v19 = vadd.f32 %v7251_v0, %v7358_v56  ;;  %v3936_v43 = vadd.f32 %v6381_v61, %v7251_v0  ;;  %v7388_v45 = vpop.f32.mrb[43].mxu1 }
 0x168   : > { %6206 = vst [vmem:[%s7268_s13 + $0x80] sm:$0xff] %v5954_v35   ;;  %v4192_v44 = vadd.f32 %v6445_v62, %v7251_v0  ;;  %6238 = vst [vmem:[%s7268_s13 + $0x180] sm:$0xff] %v6114_v39   ;;  %v4585_v46 = vsel %vm4329_vm12, %v3933_v25, %v4457_v11  ;;  %v3928_v48 = vadd.f32 %v7251_v0, %v3927_v5  ;;  %vm4327_vm14 = vcmp.gt.f32.partialorder %v3925_v42, 0.0 }
 0x169   : > { %v4649_v47 = vsel %vm4393_vm13, %v4189_v31, %v4521_v40  ;;  %v4184_v49 = vadd.f32 %v7251_v0, %v4183_v6  ;;  %v4455_v50 = vmul.f32 0.1, %v3925_v42  ;;  %vm4391_vm15 = vcmp.gt.f32.partialorder %v4181_v19, 0.0 }
 0x16a   : > { %v4519_v51 = vmul.f32 0.1, %v4181_v19  ;;  %vm4330_vm0 = vcmp.gt.f32.partialorder %v3936_v43, 0.0  ;;  %v4458_v52 = vmul.f32 0.1, %v3936_v43  ;;  %vm4394_vm1 = vcmp.gt.f32.partialorder %v4192_v44, 0.0 }
 0x16b   : > { %v4522_v53 = vmul.f32 0.1, %v4192_v44  ;;  %v4583_v54 = vsel %vm4327_vm14, %v3925_v42, %v4455_v50  ;;  %vm4328_vm2 = vcmp.gt.f32.partialorder %v3928_v48, 0.0  ;;  %v4456_v56 = vmul.f32 0.1, %v3928_v48 }
 0x16c   : > { %v4647_v55 = vsel %vm4391_vm15, %v4181_v19, %v4519_v51  ;;  %v6388_v57 = vpop.f32.mrb[44].mxu0  ;;  %v6452_v58 = vpop.f32.mrb[44].mxu1  ;;  %v4586_v59 = vsel %vm4330_vm0, %v3936_v43, %v4458_v52  ;;  %vm4392_vm3 = vcmp.gt.f32.partialorder %v4184_v49, 0.0  ;;  %v4520_v61 = vmul.f32 0.1, %v4184_v49 }
 0x16d   : > { %v4650_v60 = vsel %vm4394_vm1, %v4192_v44, %v4522_v53  ;;  %v7394_v62 = vpop.f32.mrb[45].mxu0  ;;  %v7396_v63 = vpop.f32.mrb[45].mxu1  ;;  %v5969_v3 = vpack.c.bf16 %v4586_v59, %v4585_v46  ;;  %v4584_v5 = vsel %vm4328_vm2, %v3928_v48, %v4456_v56  ;;  %v3949_v6 = vadd.f32 %v6384_v26, %v7251_v0 }
 0x16e   : > { %v6129_v4 = vpack.c.bf16 %v4650_v60, %v4649_v47  ;;  %v7399_v7 = vpop.f32.mrb[46].mxu0  ;;  %v7401_v8 = vpop.f32.mrb[46].mxu1  ;;  %v5964_v9 = vpack.c.bf16 %v4584_v5, %v4583_v54  ;;  %v4648_v10 = vsel %vm4392_vm3, %v4184_v49, %v4520_v61  ;;  %v4205_v12 = vadd.f32 %v6448_v27, %v7251_v0  ;;  %v7416_v27 = vld [vmem:[#allocation19] ss:$0 sm:$0xff] }
 0x16f   : > { %v3941_v13 = vadd.f32 %v7251_v0, %v3940_v32  ;;  %v7405_v14 = vpop.f32.mrb[47].mxu0  ;;  %v7407_v15 = vpop.f32.mrb[47].mxu1  ;;  %6209 = vst [vmem:[%s7268_s13 + $0x98] sm:$0xff] %v5969_v3   ;;  %v6124_v16 = vpack.c.bf16 %v4648_v10, %v4647_v55  ;;  %vm4333_vm4 = vcmp.gt.f32.partialorder %v3949_v6, 0.0  ;;  %v4461_v17 = vmul.f32 0.1, %v3949_v6 }
 0x170   : > { %6241 = vst [vmem:[%s7268_s13 + $0x198] sm:$0xff] %v6129_v4   ;;  %v4197_v18 = vadd.f32 %v7251_v0, %v4196_v33  ;;  %6208 = vst [vmem:[%s7268_s13 + $0x90] sm:$0xff] %v5964_v9   ;;  %vm4397_vm5 = vcmp.gt.f32.partialorder %v4205_v12, 0.0  ;;  %v4525_v20 = vmul.f32 0.1, %v4205_v12  ;;  %v3952_v24 = vadd.f32 %v7373_v37, %v7251_v0 }
 0x171   : > { %vm4331_vm6 = vcmp.gt.f32.partialorder %v3941_v13, 0.0  ;;  %v4459_v21 = vmul.f32 0.1, %v3941_v13  ;;  %6240 = vst [vmem:[%s7268_s13 + $0x190] sm:$0xff] %v6124_v16   ;;  %v4589_v22 = vsel %vm4333_vm4, %v3949_v6, %v4461_v17  ;;  %v4208_v28 = vadd.f32 %v7416_v27, %v7375_v38 }
 0x172   : > { %vm4395_vm7 = vcmp.gt.f32.partialorder %v4197_v18, 0.0  ;;  %v4523_v23 = vmul.f32 0.1, %v4197_v18  ;;  %v4653_v25 = vsel %vm4397_vm5, %v4205_v12, %v4525_v20  ;;  %v3944_v29 = vadd.f32 %v7416_v27, %v7378_v41 }
 0x173   : > { %v4587_v26 = vsel %vm4331_vm6, %v3941_v13, %v4459_v21  ;;  %vm4334_vm8 = vcmp.gt.f32.partialorder %v3952_v24, 0.0  ;;  %v4462_v33 = vmul.f32 0.1, %v3952_v24  ;;  %v4200_v0 = vadd.f32 %v7416_v27, %v7388_v45 }
 0x174   : > { %v7422_v30 = vpop.f32.mrb[48].mxu0  ;;  %v7424_v31 = vpop.f32.mrb[48].mxu1  ;;  %v4651_v32 = vsel %vm4395_vm7, %v4197_v18, %v4523_v23  ;;  %vm4398_vm9 = vcmp.gt.f32.partialorder %v4208_v28, 0.0  ;;  %v4526_v36 = vmul.f32 0.1, %v4208_v28  ;;  %vm4332_vm10 = vcmp.gt.f32.partialorder %v3944_v29, 0.0 }
 0x175   : > { %v7428_v34 = vpop.f32.mrb[49].mxu0  ;;  %v7430_v35 = vpop.f32.mrb[49].mxu1  ;;  %v4460_v37 = vmul.f32 0.1, %v3944_v29  ;;  %v4590_v38 = vsel %vm4334_vm8, %v3952_v24, %v4462_v33  ;;  %vm4396_vm11 = vcmp.gt.f32.partialorder %v4200_v0, 0.0  ;;  %v3965_v11 = vadd.f32 %v7416_v27, %v6388_v57 }
 0x176   : > { %v4524_v39 = vmul.f32 0.1, %v4200_v0  ;;  %v7433_v40 = vpop.f32.mrb[50].mxu0  ;;  %v7435_v41 = vpop.f32.mrb[50].mxu1  ;;  %v5979_v42 = vpack.c.bf16 %v4590_v38, %v4589_v22  ;;  %v4654_v19 = vsel %vm4398_vm9, %v4208_v28, %v4526_v36  ;;  %v4221_v44 = vadd.f32 %v7416_v27, %v6452_v58 }
 0x177   : > { %v4588_v43 = vsel %vm4332_vm10, %v3944_v29, %v4460_v37  ;;  %v7438_v45 = vpop.f32.mrb[51].mxu0  ;;  %v7440_v46 = vpop.f32.mrb[51].mxu1  ;;  %v6139_v47 = vpack.c.bf16 %v4654_v19, %v4653_v25  ;;  %vm4337_vm12 = vcmp.gt.f32.partialorder %v3965_v11, 0.0  ;;  %v4465_v51 = vmul.f32 0.1, %v3965_v11 }
 0x178   : > { %v5974_v48 = vpack.c.bf16 %v4588_v43, %v4587_v26  ;;  %v4652_v49 = vsel %vm4396_vm11, %v4200_v0, %v4524_v39  ;;  %6211 = vst [vmem:[%s7268_s13 + $0xa8] sm:$0xff] %v5979_v42   ;;  %vm4401_vm13 = vcmp.gt.f32.partialorder %v4221_v44, 0.0  ;;  %v4529_v52 = vmul.f32 0.1, %v4221_v44 }
 0x179   : > { %v6134_v50 = vpack.c.bf16 %v4652_v49, %v4651_v32  ;;  %6243 = vst [vmem:[%s7268_s13 + $0x1a8] sm:$0xff] %v6139_v47   ;;  %v3957_v53 = vadd.f32 %v7416_v27, %v7394_v62  ;;  %v4213_v54 = vadd.f32 %v7416_v27, %v7396_v63  ;;  %v3968_v55 = vadd.f32 %v7416_v27, %v7399_v7 }
 0x17a   : > { %6210 = vst [vmem:[%s7268_s13 + $0xa0] sm:$0xff] %v5974_v48   ;;  %v4224_v56 = vadd.f32 %v7416_v27, %v7401_v8  ;;  %v4593_v57 = vsel %vm4337_vm12, %v3965_v11, %v4465_v51  ;;  %v4657_v58 = vsel %vm4401_vm13, %v4221_v44, %v4529_v52  ;;  %v3960_v59 = vadd.f32 %v7416_v27, %v7405_v14 }
 0x17b   : > { %6242 = vst [vmem:[%s7268_s13 + $0x1a0] sm:$0xff] %v6134_v50   ;;  %v4216_v60 = vadd.f32 %v7416_v27, %v7407_v15  ;;  %vm4335_vm14 = vcmp.gt.f32.partialorder %v3957_v53, 0.0  ;;  %v4463_v63 = vmul.f32 0.1, %v3957_v53  ;;  %vm4399_vm15 = vcmp.gt.f32.partialorder %v4213_v54, 0.0 }
 0x17c   : > { %v7458_v61 = vpop.f32.mrb[52].mxu0  ;;  %v7460_v62 = vpop.f32.mrb[52].mxu1  ;;  %v4527_v3 = vmul.f32 0.1, %v4213_v54  ;;  %vm4338_vm0 = vcmp.gt.f32.partialorder %v3968_v55, 0.0  ;;  %vm4402_vm1 = vcmp.gt.f32.partialorder %v4224_v56, 0.0  ;;  %v3981_v21 = vadd.f32 %v7416_v27, %v7422_v30 }
 0x17d   : > { %v4466_v4 = vmul.f32 0.1, %v3968_v55  ;;  %v4530_v5 = vmul.f32 0.1, %v4224_v56  ;;  %v4591_v6 = vsel %vm4335_vm14, %v3957_v53, %v4463_v63  ;;  %vm4336_vm2 = vcmp.gt.f32.partialorder %v3960_v59, 0.0  ;;  %v7462_v9 = vpop.f32.mrb[53].mxu0 }
 0x17e   : > { %v4655_v7 = vsel %vm4399_vm15, %v4213_v54, %v4527_v3  ;;  %v4464_v8 = vmul.f32 0.1, %v3960_v59  ;;  %v7464_v10 = vpop.f32.mrb[53].mxu1  ;;  %vm4400_vm3 = vcmp.gt.f32.partialorder %v4216_v60, 0.0  ;;  %v4528_v14 = vmul.f32 0.1, %v4216_v60 }
 0x17f   : > { %v4594_v12 = vsel %vm4338_vm0, %v3968_v55, %v4466_v4  ;;  %v4658_v13 = vsel %vm4402_vm1, %v4224_v56, %v4530_v5  ;;  %v7466_v15 = vpop.f32.mrb[54].mxu0  ;;  %v7468_v16 = vpop.f32.mrb[54].mxu1  ;;  %v4237_v26 = vadd.f32 %v7416_v27, %v7424_v31  ;;  %v3973_v28 = vadd.f32 %v7416_v27, %v7428_v34 }
 0x180   : > { %v5989_v17 = vpack.c.bf16 %v4594_v12, %v4593_v57  ;;  %v6149_v18 = vpack.c.bf16 %v4658_v13, %v4657_v58  ;;  %v4592_v20 = vsel %vm4336_vm2, %v3960_v59, %v4464_v8  ;;  %v7472_v22 = vpop.f32.mrb[55].mxu0  ;;  %v7474_v23 = vpop.f32.mrb[55].mxu1  ;;  %v4656_v25 = vsel %vm4400_vm3, %v4216_v60, %v4528_v14 }
 0x181   : > { %v5984_v24 = vpack.c.bf16 %v4592_v20, %v4591_v6  ;;  %v6144_v29 = vpack.c.bf16 %v4656_v25, %v4655_v7  ;;  %vm4341_vm4 = vcmp.gt.f32.partialorder %v3981_v21, 0.0  ;;  %v4469_v32 = vmul.f32 0.1, %v3981_v21 }
 0x182   : > { %6213 = vst [vmem:[%s7268_s13 + $0xb8] sm:$0xff] %v5989_v17   ;;  %6245 = vst [vmem:[%s7268_s13 + $0x1b8] sm:$0xff] %v6149_v18   ;;  %v4229_v30 = vadd.f32 %v7416_v27, %v7430_v35  ;;  %vm4405_vm5 = vcmp.gt.f32.partialorder %v4237_v26, 0.0  ;;  %v4533_v33 = vmul.f32 0.1, %v4237_v26  ;;  %vm4339_vm6 = vcmp.gt.f32.partialorder %v3973_v28, 0.0 }
 0x183   : > { %6212 = vst [vmem:[%s7268_s13 + $0xb0] sm:$0xff] %v5984_v24   ;;  %v4467_v0 = vmul.f32 0.1, %v3973_v28  ;;  %6244 = vst [vmem:[%s7268_s13 + $0x1b0] sm:$0xff] %v6144_v29   ;;  %v4597_v36 = vsel %vm4341_vm4, %v3981_v21, %v4469_v32  ;;  %v3984_v34 = vadd.f32 %v7416_v27, %v7433_v40  ;;  %v4240_v35 = vadd.f32 %v7416_v27, %v7435_v41 }
 0x184   : > { %vm4403_vm7 = vcmp.gt.f32.partialorder %v4229_v30, 0.0  ;;  %v4531_v31 = vmul.f32 0.1, %v4229_v30  ;;  %v7488_v37 = vpop.f32.mrb[56].mxu0  ;;  %v7490_v38 = vpop.f32.mrb[56].mxu1  ;;  %v4661_v39 = vsel %vm4405_vm5, %v4237_v26, %v4533_v33  ;;  %v3976_v42 = vadd.f32 %v7416_v27, %v7438_v45 }
 0x185   : > { %v4595_v11 = vsel %vm4339_vm6, %v3973_v28, %v4467_v0  ;;  %v7496_v19 = vpop.f32.mrb[57].mxu0  ;;  %v7498_v43 = vpop.f32.mrb[57].mxu1  ;;  %vm4342_vm8 = vcmp.gt.f32.partialorder %v3984_v34, 0.0  ;;  %v4470_v47 = vmul.f32 0.1, %v3984_v34  ;;  %v4232_v40 = vadd.f32 %v7416_v27, %v7440_v46 }
 0x186   : > { %v4659_v44 = vsel %vm4403_vm7, %v4229_v30, %v4531_v31  ;;  %v7502_v48 = vpop.f32.mrb[58].mxu0  ;;  %v7504_v49 = vpop.f32.mrb[58].mxu1  ;;  %vm4406_vm9 = vcmp.gt.f32.partialorder %v4240_v35, 0.0  ;;  %v4534_v50 = vmul.f32 0.1, %v4240_v35  ;;  %vm4340_vm10 = vcmp.gt.f32.partialorder %v3976_v42, 0.0 }
 0x187   : > { %v4468_v41 = vmul.f32 0.1, %v3976_v42  ;;  %v4598_v45 = vsel %vm4342_vm8, %v3984_v34, %v4470_v47  ;;  %vm4404_vm11 = vcmp.gt.f32.partialorder %v4232_v40, 0.0  ;;  %v4532_v51 = vmul.f32 0.1, %v4232_v40  ;;  %v7508_v53 = vpop.f32.mrb[59].mxu0 }
 0x188   : > { %v3997_v52 = vadd.f32 %v7416_v27, %v7458_v61  ;;  %v7510_v54 = vpop.f32.mrb[59].mxu1  ;;  %v5999_v46 = vpack.c.bf16 %v4598_v45, %v4597_v36  ;;  %v4662_v55 = vsel %vm4406_vm9, %v4240_v35, %v4534_v50  ;;  %v4253_v57 = vadd.f32 %v7416_v27, %v7460_v62 }
 0x189   : > { %v4596_v56 = vsel %vm4340_vm10, %v3976_v42, %v4468_v41  ;;  %v6159_v58 = vpack.c.bf16 %v4662_v55, %v4661_v39  ;;  %v4660_v60 = vsel %vm4404_vm11, %v4232_v40, %v4532_v51  ;;  %v3989_v5 = vadd.f32 %v7416_v27, %v7462_v9 }
 0x18a   : > { %v5994_v59 = vpack.c.bf16 %v4596_v56, %v4595_v11  ;;  %vm4345_vm12 = vcmp.gt.f32.partialorder %v3997_v52, 0.0  ;;  %6215 = vst [vmem:[%s7268_s13 + $0xc8] sm:$0xff] %v5999_v46   ;;  %v6154_v63 = vpack.c.bf16 %v4660_v60, %v4659_v44  ;;  %v4473_v61 = vmul.f32 0.1, %v3997_v52 }
 0x18b   : > { %vm4409_vm13 = vcmp.gt.f32.partialorder %v4253_v57, 0.0  ;;  %v4537_v3 = vmul.f32 0.1, %v4253_v57  ;;  %6247 = vst [vmem:[%s7268_s13 + $0x1c8] sm:$0xff] %v6159_v58   ;;  %v4245_v62 = vadd.f32 %v7416_v27, %v7464_v10  ;;  %v4000_v6 = vadd.f32 %v7416_v27, %v7466_v15 }
 0x18c   : > { %v7515_v4 = vpop.f32.mrb[60].mxu0  ;;  %6214 = vst [vmem:[%s7268_s13 + $0xc0] sm:$0xff] %v5994_v59   ;;  %v4256_v7 = vadd.f32 %v7416_v27, %v7468_v16  ;;  %v7527_v8 = vpop.f32.mrb[60].mxu1  ;;  %6246 = vst [vmem:[%s7268_s13 + $0x1c0] sm:$0xff] %v6154_v63   ;;  %v4601_v13 = vsel %vm4345_vm12, %v3997_v52, %v4473_v61  ;;  %v3992_v9 = vadd.f32 %v7416_v27, %v7472_v22  ;;  %vm4343_vm14 = vcmp.gt.f32.partialorder %v3989_v5, 0.0 }
 0x18d   : > { %v7529_v12 = vpop.f32.mrb[61].mxu0  ;;  %v4665_v14 = vsel %vm4409_vm13, %v4253_v57, %v4537_v3  ;;  %v4248_v10 = vadd.f32 %v7416_v27, %v7474_v23  ;;  %v7537_v17 = vpop.f32.mrb[61].mxu1  ;;  %v4471_v16 = vmul.f32 0.1, %v3989_v5  ;;  %vm4407_vm15 = vcmp.gt.f32.partialorder %v4245_v62, 0.0 }
 0x18e   : > { %v7539_v15 = vpop.f32.mrb[62].mxu0  ;;  %v4535_v18 = vmul.f32 0.1, %v4245_v62  ;;  %vm4346_vm0 = vcmp.gt.f32.partialorder %v4000_v6, 0.0  ;;  %v4474_v20 = vmul.f32 0.1, %v4000_v6  ;;  %v4013_v31 = vadd.f32 %v7416_v27, %v7488_v37 }
 0x18f   : > { %vm4410_vm1 = vcmp.gt.f32.partialorder %v4256_v7, 0.0  ;;  %v4538_v21 = vmul.f32 0.1, %v4256_v7  ;;  %v4599_v24 = vsel %vm4343_vm14, %v3989_v5, %v4471_v16  ;;  %vm4344_vm2 = vcmp.gt.f32.partialorder %v3992_v9, 0.0  ;;  %v7541_v22 = vpop.f32.mrb[62].mxu1  ;;  %v7543_v23 = vpop.f32.mrb[63].mxu0 }
 0x190   : > { %v4663_v25 = vsel %vm4407_vm15, %v4245_v62, %v4535_v18  ;;  %v4472_v26 = vmul.f32 0.1, %v3992_v9  ;;  %v4602_v28 = vsel %vm4346_vm0, %v4000_v6, %v4474_v20  ;;  %vm4408_vm3 = vcmp.gt.f32.partialorder %v4248_v10, 0.0  ;;  %v4279_v30 = vpop.f32.mrb[63].mxu1 }
 0x191   : > { %v4666_v29 = vsel %vm4410_vm1, %v4256_v7, %v4538_v21  ;;  %v4536_v32 = vmul.f32 0.1, %v4248_v10  ;;  %v6009_v33 = vpack.c.bf16 %v4602_v28, %v4601_v13  ;;  %v4269_v11 = vadd.f32 %v7416_v27, %v7490_v38 }
 0x192   : > { %v6169_v0 = vpack.c.bf16 %v4666_v29, %v4665_v14  ;;  %v4600_v36 = vsel %vm4344_vm2, %v3992_v9, %v4472_v26  ;;  %v4005_v35 = vadd.f32 %v7416_v27, %v7496_v19  ;;  %vm4349_vm4 = vcmp.gt.f32.partialorder %v4013_v31, 0.0 }
 0x193   : > { %v6004_v34 = vpack.c.bf16 %v4600_v36, %v4599_v24  ;;  %v4664_v39 = vsel %vm4408_vm3, %v4248_v10, %v4536_v32  ;;  %6217 = vst [vmem:[%s7268_s13 + $0xd8] sm:$0xff] %v6009_v33   ;;  %v4477_v44 = vmul.f32 0.1, %v4013_v31  ;;  %v4261_v47 = vadd.f32 %v7416_v27, %v7498_v43 }
 0x194   : > { %6249 = vst [vmem:[%s7268_s13 + $0x1d8] sm:$0xff] %v6169_v0   ;;  %v6164_v42 = vpack.c.bf16 %v4664_v39, %v4663_v25  ;;  %vm4413_vm5 = vcmp.gt.f32.partialorder %v4269_v11, 0.0  ;;  %v4541_v37 = vmul.f32 0.1, %v4269_v11  ;;  %vm4347_vm6 = vcmp.gt.f32.partialorder %v4005_v35, 0.0 }
 0x195   : > { %6216 = vst [vmem:[%s7268_s13 + $0xd0] sm:$0xff] %v6004_v34   ;;  %v4475_v40 = vmul.f32 0.1, %v4005_v35  ;;  %v4605_v50 = vsel %vm4349_vm4, %v4013_v31, %v4477_v44  ;;  %vm4411_vm7 = vcmp.gt.f32.partialorder %v4261_v47, 0.0  ;;  %v4016_v38 = vadd.f32 %v7416_v27, %v7502_v48 }
 0x196   : > { %6248 = vst [vmem:[%s7268_s13 + $0x1d0] sm:$0xff] %v6164_v42   ;;  %v4669_v19 = vsel %vm4413_vm5, %v4269_v11, %v4541_v37  ;;  %v4539_v41 = vmul.f32 0.1, %v4261_v47  ;;  %v4272_v45 = vadd.f32 %v7416_v27, %v7504_v49  ;;  %v4008_v51 = vadd.f32 %v7416_v27, %v7508_v53 }
 0x197   : > { %v4603_v43 = vsel %vm4347_vm6, %v4005_v35, %v4475_v40  ;;  %vm4350_vm8 = vcmp.gt.f32.partialorder %v4016_v38, 0.0  ;;  %v4478_v52 = vmul.f32 0.1, %v4016_v38  ;;  %v4264_v46 = vadd.f32 %v7416_v27, %v7510_v54 }
 0x198   : > { %vm4414_vm9 = vcmp.gt.f32.partialorder %v4272_v45, 0.0  ;;  %v4542_v55 = vmul.f32 0.1, %v4272_v45  ;;  %vm4348_vm10 = vcmp.gt.f32.partialorder %v4008_v51, 0.0  ;;  %v4476_v56 = vmul.f32 0.1, %v4008_v51 }
 0x199   : > { %v4606_v48 = vsel %vm4350_vm8, %v4016_v38, %v4478_v52  ;;  %vm4412_vm11 = vcmp.gt.f32.partialorder %v4264_v46, 0.0  ;;  %v4540_v57 = vmul.f32 0.1, %v4264_v46  ;;  %v4029_v49 = vadd.f32 %v7416_v27, %v7515_v4 }
 0x19a   : > { %v6019_v53 = vpack.c.bf16 %v4606_v48, %v4605_v50  ;;  %v4670_v58 = vsel %vm4414_vm9, %v4272_v45, %v4542_v55  ;;  %v4604_v59 = vsel %vm4348_vm10, %v4008_v51, %v4476_v56  ;;  %v4285_v60 = vadd.f32 %v7416_v27, %v7527_v8 }
 0x19b   : > { %v4667_v54 = vsel %vm4411_vm7, %v4261_v47, %v4539_v41  ;;  %v6179_v63 = vpack.c.bf16 %v4670_v58, %v4669_v19  ;;  %v6014_v61 = vpack.c.bf16 %v4604_v59, %v4603_v43  ;;  %v4668_v3 = vsel %vm4412_vm11, %v4264_v46, %v4540_v57 }
 0x19c   : > { %6219 = vst [vmem:[%s7268_s13 + $0xe8] sm:$0xff] %v6019_v53   ;;  %v6174_v5 = vpack.c.bf16 %v4668_v3, %v4667_v54  ;;  %vm4353_vm12 = vcmp.gt.f32.partialorder %v4029_v49, 0.0  ;;  %v4481_v62 = vmul.f32 0.1, %v4029_v49  ;;  %v4545_v6 = vmul.f32 0.1, %v4285_v60 }
 0x19d   : > { %6251 = vst [vmem:[%s7268_s13 + $0x1e8] sm:$0xff] %v6179_v63   ;;  %6218 = vst [vmem:[%s7268_s13 + $0xe0] sm:$0xff] %v6014_v61   ;;  %v4021_v4 = vadd.f32 %v7416_v27, %v7529_v12  ;;  %v4277_v7 = vadd.f32 %v7416_v27, %v7537_v17  ;;  %v4032_v8 = vadd.f32 %v7416_v27, %v7539_v15  ;;  %vm4417_vm13 = vcmp.gt.f32.partialorder %v4285_v60, 0.0 }
 0x19e   : > { %v4288_v13 = vadd.f32 %v7416_v27, %v7541_v22  ;;  %6250 = vst [vmem:[%s7268_s13 + $0x1e0] sm:$0xff] %v6174_v5   ;;  %v4024_v14 = vadd.f32 %v7416_v27, %v7543_v23  ;;  %v4280_v9 = vadd.f32 %v7416_v27, %v4279_v30  ;;  %v4609_v10 = vsel %vm4353_vm12, %v4029_v49, %v4481_v62 }
 0x19f   : > { %vm4351_vm14 = vcmp.gt.f32.partialorder %v4021_v4, 0.0  ;;  %v4479_v16 = vmul.f32 0.1, %v4021_v4  ;;  %v4543_v12 = vmul.f32 0.1, %v4277_v7  ;;  %vm4354_vm15 = vcmp.gt.f32.partialorder %v4032_v8, 0.0 }
 0x1a0   : > { %v4482_v18 = vmul.f32 0.1, %v4032_v8  ;;  %vm4418_vm0 = vcmp.gt.f32.partialorder %v4288_v13, 0.0  ;;  %v4546_v17 = vmul.f32 0.1, %v4288_v13  ;;  %v4673_v15 = vsel %vm4417_vm13, %v4285_v60, %v4545_v6 }
 0x1a1   : > { %vm4415_vm1 = vcmp.gt.f32.partialorder %v4277_v7, 0.0  ;;  %vm4352_vm2 = vcmp.gt.f32.partialorder %v4024_v14, 0.0  ;;  %v4480_v20 = vmul.f32 0.1, %v4024_v14  ;;  %vm4416_vm3 = vcmp.gt.f32.partialorder %v4280_v9, 0.0 }
 0x1a2   : > { %v4610_v21 = vsel %vm4354_vm15, %v4032_v8, %v4482_v18  ;;  %v4674_v24 = vsel %vm4418_vm0, %v4288_v13, %v4546_v17  ;;  %v4544_v27 = vmul.f32 0.1, %v4280_v9  ;;  %v4607_v25 = vsel %vm4351_vm14, %v4021_v4, %v4479_v16 }
 0x1a3   : > { %v6029_v26 = vpack.c.bf16 %v4610_v21, %v4609_v10  ;;  %v6189_v22 = vpack.c.bf16 %v4674_v24, %v4673_v15  ;;  %v4608_v23 = vsel %vm4352_vm2, %v4024_v14, %v4480_v20  ;;  %v4671_v28 = vsel %vm4415_vm1, %v4277_v7, %v4543_v12 }
 0x1a4   : > { %v6024_v29 = vpack.c.bf16 %v4608_v23, %v4607_v25  ;;  %v4672_v32 = vsel %vm4416_vm3, %v4280_v9, %v4544_v27 }
 0x1a5   : > { %6221 = vst [vmem:[%s7268_s13 + $0xf8] sm:$0xff] %v6029_v26   ;;  %6253 = vst [vmem:[%s7268_s13 + $0x1f8] sm:$0xff] %v6189_v22   ;;  %v6184_v30 = vpack.c.bf16 %v4672_v32, %v4671_v28 }
 0x1a6   : > { %6220 = vst [vmem:[%s7268_s13 + $0xf0] sm:$0xff] %v6024_v29  }
 0x1a7   : > { %6252 = vst [vmem:[%s7268_s13 + $0x1f0] sm:$0xff] %v6184_v30  }
 0x1a8 PF: > { %s26_s22 = sadd.s32 1, %s6574_s22  }
 0x1a9   : > { %p23_p4 = scmp.ge.s32.totalorder %s26_s22, 4  }
 0x1ab   :  { %25 = sbr.rel (!%p23_p4) target bundleno = 3 (0x3), region = 334 }

// kernel: build_model_forward.17
= control target key start
LH: loop header
LB: loop body
LE: loop exit
PB: predicated region body
PF: predicated region fallthrough
CT: control target
= control target key end

     0   :  { %s3150_s22 = smov 0   ;;  %s3521_s0 = inlined_call_operand.vmem [shape: bf16[512,144], index: 0, kind: input, shape index: {}]   ;;  %s3522_s1 = inlined_call_operand.<no memory space> [shape: bf16[], index: 1, kind: input, shape index: {}]   ;;  %s3523_s2 = inlined_call_operand.vmem [shape: bf16[144,32], index: 2, kind: input, shape index: {}]   ;;  %s3524_s3 = inlined_call_operand.vmem [shape: f32[32], index: 3, kind: input, shape index: {}]   ;;  %s3525_s4 = inlined_call_operand.<no memory space> [shape: f32[], index: 4, kind: input, shape index: {}]   ;;  %s3526_s5 = inlined_call_operand.vmem [shape: bf16[512,128], index: 5, kind: output, shape index: {}]  }
   0x1   :  { %v10_v0 = vstv %s3522_s1  ;;  %v20_v1 = vstv %s3525_s4 }
   0x2   :  { %v3148_v2 = vunpack.i.l.bf16 %v10_v0 }
   0x3 LB: > { %s2566_s23 = sadd.s32 4294967295, %s3109_s22   ;;  %p2570_p0 = scmp.ge.s32.totalorder %s3109_s22, 1  ;;  %s3109_s22 = sphi %s3150_s22, %s26_s22  }
   0x4   : > { %p152_p1 = scmp.lt.s32.totalorder %s3109_s22, 3 }
   0x6   : > { %p153_p2 = pnand %p2570_p0, %p152_p1 }
   0x8   : > { %156 = sbr.rel (%p153_p2) target bundleno = 346 (0x15a), region = 32 }
   0xf   : > { %v214_v3 = vlaneseq  ;;  %v2654_v4 = vld [vmem:[%s3523_s2 + $0x40] sm:$0xff]   ;;  %v2775_v7 = vpack.c.bf16 %v3148_v2, %v3148_v2  ;;  %s2571_s29 = sshll.u32 %s2566_s23, 5  ;;  %v2640_v12 = vld [vmem:[%s3523_s2 + $0x8] sm:$0xff]   ;;  %v2642_v13 = vld [vmem:[%s3523_s2 + $0x10] sm:$0xff]   ;;  %v3111_v30 = vmov 0.0  }
  0x10   : > { %v1758_v5 = vld [vmem:[%s3524_s3] sm:$0x1]  ;;  %v1669_v8 = vunpack.c.l.bf16 %v2654_v4  ;;  %v1691_v9 = vunpack.c.h.bf16 %v2654_v4  ;;  %v2644_v14 = vld [vmem:[%s3523_s2 + $0x18] sm:$0xff]   ;;  %p178_p3 = scmp.lt.s32.totalorder %s2571_s29, 63  ;;  %v1361_v16 = vunpack.c.l.bf16 %v2640_v12  ;;  %v1383_v17 = vunpack.c.h.bf16 %v2640_v12  ;;  %v2648_v34 = vld [vmem:[%s3523_s2 + $0x28] sm:$0xff]  }
  0x11   : > { %v1317_v6 = vld [vmem:[%s3523_s2] sm:$0xff]   ;;  %v3178_v15 = vand.u32 127, %v214_v3  ;;  %vm1761_vm0 = vcmp.lt.s32.totalorder %v214_v3, 32  ;;  %2776 = vst [vmem:[#allocation18 + $0x48] sm:$0xff] %v2775_v7   ;;  %2781 = vst [vmem:[#allocation18 + $0x50] sm:$0xff] %v2775_v7   ;;  %v1405_v20 = vunpack.c.l.bf16 %v2642_v13  ;;  %v1427_v21 = vunpack.c.h.bf16 %v2642_v13  ;;  %v2650_v39 = vld [vmem:[%s3523_s2 + $0x30] sm:$0xff]  }
  0x12   : > { %v1318_v10 = vunpack.c.l.bf16 %v1317_v6  ;;  %v1339_v11 = vunpack.c.h.bf16 %v1317_v6  ;;  %2786 = vst [vmem:[#allocation18 + $0x58] sm:$0xff] %v2775_v7   ;;  %2791 = vst [vmem:[#allocation18 + $0x60] sm:$0xff] %v2775_v7   ;;  %v3183_v18 = vld [vmem:[%s3523_s2 + $0x20] sm:$0xff]   ;;  %v1762_v19 = vsel %vm1761_vm0, %v1758_v5, %v20_v1  ;;  %v1449_v22 = vunpack.c.l.bf16 %v2644_v14  ;;  %s3528_s29 = smov (!%p178_p3, %s2571_s29), 63  ;;  %v2652_v46 = vld [vmem:[%s3523_s2 + $0x38] sm:$0xff]  }
  0x13   : > { %2796 = vst [vmem:[#allocation18 + $0x68] sm:$0xff] %v2775_v7   ;;  %2801 = vst [vmem:[#allocation18 + $0x70] sm:$0xff] %v2775_v7   ;;  %v3193_v23 = vadd.s32 128, %v3178_v15  ;;  %vm1323_vm1 = vcmp.lt.s32.totalorder %v3178_v15, 32  ;;  %v1471_v24 = vunpack.c.h.bf16 %v2644_v14  ;;  %v1493_v25 = vunpack.c.l.bf16 %v3183_v18  ;;  %s2739_s15 = sshll.u32 %s3528_s29, 3  ;;  %s2575_s25 = sshll.u32 %s3528_s29, 2 }
  0x14   : > { %2806 = vst [vmem:[#allocation18 + $0x78] sm:$0xff] %v2775_v7   ;;  %1764 = vst [vmem:[#allocation19] sm:$0x1] %v1762_v19  ;;  %v1675_v26 = vsel %vm1323_vm1, %v1669_v8, %v3148_v2  ;;  %v1697_v27 = vsel %vm1323_vm1, %v1691_v9, %v3148_v2  ;;  %v1324_v28 = vsel %vm1323_vm1, %v1318_v10, %v3148_v2  ;;  %s3220_s20 = scalar_lea.vmem %s3521_s0, %s2739_s15  ;;  %v1515_v57 = vunpack.c.h.bf16 %v3183_v18  ;;  %s3472_s28 = scalar_lea.vmem %s3526_s5, %s2575_s25 }
  0x15   : > { %v1345_v29 = vsel %vm1323_vm1, %v1339_v11, %v3148_v2  ;;  %vm217_vm2 = vcmp.lt.s32.totalorder %v3193_v23, 144  ;;  %v1677_v31 = vpack.c.bf16 %v3111_v30, %v1675_v26  ;;  %v1699_v32 = vpack.c.bf16 %v3111_v30, %v1697_v27  ;;  %v190_v40 = vld [vmem:[%s3220_s20] sm:$0xf]  ;;  %v2577_v41 = vld [vmem:[%s3220_s20 + $0x8] sm:$0xf] }
  0x16   : > { %v1325_v33 = vpack.c.bf16 %v3111_v30, %v1324_v28  ;;  %v1347_v35 = vpack.c.bf16 %v3111_v30, %v1345_v29  ;;  %v1367_v36 = vsel %vm1323_vm1, %v1361_v16, %v3148_v2  ;;  %v1389_v37 = vsel %vm1323_vm1, %v1383_v17, %v3148_v2  ;;  %200 = vst [vmem:[#allocation17] sm:$0xf] %v190_v40  ;;  %v2607_v47 = vld [vmem:[%s3220_s20 + $0x80] sm:$0xf]  ;;  %v2609_v48 = vld [vmem:[%s3220_s20 + $0x88] sm:$0xf] }
  0x17   : > { %v1411_v38 = vsel %vm1323_vm1, %v1405_v20, %v3148_v2  ;;  %1679 = vst [vmem:[#allocation18 + $0x40] sm:$0xf] %v1677_v31  ;;  %1701 = vst [vmem:[#allocation18 + $0x44] sm:$0xf] %v1699_v32  ;;  %v1369_v42 = vpack.c.bf16 %v3111_v30, %v1367_v36  ;;  %v1391_v43 = vpack.c.bf16 %v3111_v30, %v1389_v37  ;;  %v2576_v53 = vld [vmem:[%s3220_s20 + $0x4] ss:$8 sps:$4 sm:$0xff]   ;;  %v1537_v58 = vunpack.c.l.bf16 %v2648_v34 }
  0x18   : > { %1327 = vst [vmem:[#allocation18] sm:$0xf] %v1325_v33  ;;  %v1413_v44 = vpack.c.bf16 %v3111_v30, %v1411_v38  ;;  %v1433_v45 = vsel %vm1323_vm1, %v1427_v21, %v3148_v2  ;;  %235 = vst [vmem:[#allocation17 + $0x8] sm:$0xf] %v2577_v41  ;;  %v1455_v50 = vsel %vm1323_vm1, %v1449_v22, %v3148_v2  ;;  %v1559_v59 = vunpack.c.h.bf16 %v2648_v34  ;;  %v2608_v8 = vld [vmem:[%s3220_s20 + $0x84] ss:$8 sps:$4 sm:$0xff]  }
  0x19   : > { %1349 = vst [vmem:[#allocation18 + $0x4] sm:$0xf] %v1347_v35  ;;  %v1435_v49 = vpack.c.bf16 %v3111_v30, %v1433_v45  ;;  %v1477_v51 = vsel %vm1323_vm1, %v1471_v24, %v3148_v2  ;;  %v1499_v52 = vsel %vm1323_vm1, %v1493_v25, %v3148_v2  ;;  %760 = vst [vmem:[#allocation17 + $0x80] sm:$0xf] %v2607_v47  ;;  %v1581_v60 = vunpack.c.l.bf16 %v2650_v39  ;;  %v3041_v9 = vld [vmem:[#allocation18 + $0x48] sm:$0xff]   ;;  %v3043_v29 = vld [vmem:[#allocation18 + $0x50] sm:$0xff]  }
  0x1a   : > { %795 = vst [vmem:[#allocation17 + $0x88] sm:$0xf] %v2609_v48  ;;  %1371 = vst [vmem:[#allocation18 + $0x8] sm:$0xf] %v1369_v42  ;;  %v1457_v54 = vpack.c.bf16 %v3111_v30, %v1455_v50  ;;  %v1479_v55 = vpack.c.bf16 %v3111_v30, %v1477_v51  ;;  %v1501_v56 = vpack.c.bf16 %v3111_v30, %v1499_v52  ;;  %v1603_v61 = vunpack.c.h.bf16 %v2650_v39  ;;  %v2579_v36 = vld [vmem:[%s3220_s20 + $0x10] sm:$0xf] }
  0x1b   : > { %1393 = vst [vmem:[#allocation18 + $0xc] sm:$0xf] %v1391_v43  ;;  %1415 = vst [vmem:[#allocation18 + $0x10] sm:$0xf] %v1413_v44  ;;  %v1521_v62 = vsel %vm1323_vm1, %v1515_v57, %v3148_v2  ;;  %v1625_v63 = vunpack.c.l.bf16 %v2652_v46  ;;  %v1647_v0 = vunpack.c.h.bf16 %v2652_v46  ;;  %v212_v3 = vunpack.c.l.bf16 %v2576_v53  ;;  %v2580_v38 = vld [vmem:[%s3220_s20 + $0x14] ss:$8 sps:$4 sm:$0xff]  }
  0x1c   : > { %1437 = vst [vmem:[#allocation18 + $0x14] sm:$0xf] %v1435_v49  ;;  %1459 = vst [vmem:[#allocation18 + $0x18] sm:$0xf] %v1457_v54  ;;  %v1523_v4 = vpack.c.bf16 %v3111_v30, %v1521_v62  ;;  %v1543_v5 = vsel %vm1323_vm1, %v1537_v58, %v3148_v2  ;;  %v1565_v6 = vsel %vm1323_vm1, %v1559_v59, %v3148_v2  ;;  %v247_v25 = vunpack.c.h.bf16 %v2576_v53  ;;  %v3045_v39 = vld [vmem:[#allocation18 + $0x58] sm:$0xff]   ;;  %v3047_v43 = vld [vmem:[#allocation18 + $0x60] sm:$0xff]  }
  0x1d   : > { %1481 = vst [vmem:[#allocation18 + $0x1c] sm:$0xf] %v1479_v55  ;;  %1503 = vst [vmem:[#allocation18 + $0x20] sm:$0xf] %v1501_v56  ;;  %v1587_v7 = vsel %vm1323_vm1, %v1581_v60, %v3148_v2  ;;  %v1545_v10 = vpack.c.bf16 %v3111_v30, %v1543_v5  ;;  %v1567_v11 = vpack.c.bf16 %v3111_v30, %v1565_v6  ;;  %v772_v15 = vunpack.c.l.bf16 %v2608_v8  ;;  %v2581_v47 = vld [vmem:[%s3220_s20 + $0x18] sm:$0xf] }
  0x1e   : > { %v1589_v12 = vpack.c.bf16 %v3111_v30, %v1587_v7  ;;  %v1609_v13 = vsel %vm1323_vm1, %v1603_v61, %v3148_v2  ;;  %v3039_v14 = vld [vmem:[#allocation18 + $0x40] sm:$0xff]   ;;  %1525 = vst [vmem:[#allocation18 + $0x24] sm:$0xf] %v1523_v4  ;;  %v1631_v17 = vsel %vm1323_vm1, %v1625_v63, %v3148_v2  ;;  %v1653_v18 = vsel %vm1323_vm1, %v1647_v0, %v3148_v2  ;;  %v2611_v49 = vld [vmem:[%s3220_s20 + $0x90] sm:$0xf]  ;;  %v3049_v57 = vld [vmem:[#allocation18 + $0x68] sm:$0xff]  }
  0x1f   : > { %v1611_v16 = vpack.c.bf16 %v3111_v30, %v1609_v13  ;;  %v218_v19 = vsel %vm217_vm2, %v212_v3, %v3148_v2  ;;  %1547 = vst [vmem:[#allocation18 + $0x28] sm:$0xf] %v1545_v10  ;;  %1569 = vst [vmem:[#allocation18 + $0x2c] sm:$0xf] %v1567_v11  ;;  %v1633_v21 = vpack.c.bf16 %v3111_v30, %v1631_v17  ;;  %2902 = vmatprep.subr.bf16.mxu0 %v3039_v14  ;;  %v2612_v50 = vld [vmem:[%s3220_s20 + $0x94] ss:$8 sps:$4 sm:$0xff]  }
  0x20   : > { %v3040_v20 = vld [vmem:[#allocation18] sm:$0xff]   ;;  %1591 = vst [vmem:[#allocation18 + $0x30] sm:$0xf] %v1589_v12  ;;  %v1655_v22 = vpack.c.bf16 %v3111_v30, %v1653_v18  ;;  %v220_v24 = vpack.c.bf16 %v3111_v30, %v218_v19  ;;  %3014 = vmatprep.subr.bf16.mxu1 %v3039_v14  ;;  %v807_v26 = vunpack.c.h.bf16 %v2608_v8  ;;  %v253_v28 = vsel %vm217_vm2, %v247_v25, %v3148_v2  ;;  %v2613_v51 = vld [vmem:[%s3220_s20 + $0x98] sm:$0xf] }
  0x21   : > { %1613 = vst [vmem:[#allocation18 + $0x34] sm:$0xf] %v1611_v16  ;;  %2903 = vmatpush3.bf16.msra.mxu0 %v3040_v20  ;;  %3022 = vmatpush3.bf16.msra.mxu1 %v3040_v20  ;;  %1635 = vst [vmem:[#allocation18 + $0x38] sm:$0xf] %v1633_v21  ;;  %v255_v31 = vpack.c.bf16 %v3111_v30, %v253_v28  ;;  %v778_v32 = vsel %vm217_vm2, %v772_v15, %v3148_v2  ;;  %v282_v40 = vunpack.c.l.bf16 %v2580_v38  ;;  %v2583_v52 = vld [vmem:[%s3220_s20 + $0x20] sm:$0xf] }
  0x22   : > { %v3042_v27 = vld [vmem:[#allocation18 + $0x8] sm:$0xff]   ;;  %1657 = vst [vmem:[#allocation18 + $0x3c] sm:$0xf] %v1655_v22  ;;  %222 = vst [vmem:[#allocation17 + $0x4] sm:$0xf] %v220_v24  ;;  %2904 = vmatprep.subr.bf16.mxu0 %v3041_v9  ;;  %3015 = vmatprep.subr.bf16.mxu1 %v3041_v9  ;;  %v813_v33 = vsel %vm217_vm2, %v807_v26, %v3148_v2  ;;  %v780_v34 = vpack.c.bf16 %v3111_v30, %v778_v32  ;;  %v317_v41 = vunpack.c.h.bf16 %v2580_v38 }
  0x23   : > { %v815_v35 = vpack.c.bf16 %v3111_v30, %v813_v33  ;;  %257 = vst [vmem:[#allocation17 + $0xc] sm:$0xf] %v255_v31  ;;  %v3044_v37 = vld [vmem:[#allocation18 + $0x10] sm:$0xff]   ;;  %270 = vst [vmem:[#allocation17 + $0x10] sm:$0xf] %v2579_v36  ;;  %v288_v44 = vsel %vm217_vm2, %v282_v40, %v3148_v2  ;;  %v842_v54 = vunpack.c.l.bf16 %v2612_v50  ;;  %v877_v55 = vunpack.c.h.bf16 %v2612_v50 }
  0x24   : > { %782 = vst [vmem:[#allocation17 + $0x84] sm:$0xf] %v780_v34  ;;  %v3046_v42 = vld [vmem:[#allocation18 + $0x18] sm:$0xff]   ;;  %v323_v45 = vsel %vm217_vm2, %v317_v41, %v3148_v2  ;;  %v290_v46 = vpack.c.bf16 %v3111_v30, %v288_v44  ;;  %305 = vst [vmem:[#allocation17 + $0x18] sm:$0xf] %v2581_v47 }
  0x25   : > { %2905 = vmatpush3.bf16.msra.mxu0 %v3042_v27  ;;  %3023 = vmatpush3.bf16.msra.mxu1 %v3042_v27  ;;  %817 = vst [vmem:[#allocation17 + $0x8c] sm:$0xf] %v815_v35  ;;  %v325_v48 = vpack.c.bf16 %v3111_v30, %v323_v45  ;;  %830 = vst [vmem:[#allocation17 + $0x90] sm:$0xf] %v2611_v49  ;;  %v3048_v56 = vld [vmem:[#allocation18 + $0x20] sm:$0xff]   ;;  %v848_v59 = vsel %vm217_vm2, %v842_v54, %v3148_v2 }
  0x26   : > { %2906 = vmatprep.subr.bf16.mxu0 %v3043_v29  ;;  %3016 = vmatprep.subr.bf16.mxu1 %v3043_v29  ;;  %292 = vst [vmem:[#allocation17 + $0x14] sm:$0xf] %v290_v46  ;;  %865 = vst [vmem:[#allocation17 + $0x98] sm:$0xf] %v2613_v51  ;;  %v883_v60 = vsel %vm217_vm2, %v877_v55, %v3148_v2  ;;  %v2584_v61 = vld [vmem:[%s3220_s20 + $0x24] ss:$8 sps:$4 sm:$0xff]   ;;  %v850_v63 = vpack.c.bf16 %v3111_v30, %v848_v59 }
  0x27   : > { %327 = vst [vmem:[#allocation17 + $0x1c] sm:$0xf] %v325_v48  ;;  %340 = vst [vmem:[#allocation17 + $0x20] sm:$0xf] %v2583_v52  ;;  %v2585_v62 = vld [vmem:[%s3220_s20 + $0x28] sm:$0xf]  ;;  %v885_v0 = vpack.c.bf16 %v3111_v30, %v883_v60  ;;  %v352_v3 = vunpack.c.l.bf16 %v2584_v61  ;;  %v387_v4 = vunpack.c.h.bf16 %v2584_v61 }
  0x28   : > { %375 = vst [vmem:[#allocation17 + $0x28] sm:$0xf] %v2585_v62  ;;  %v2615_v5 = vld [vmem:[%s3220_s20 + $0xa0] sm:$0xf]  ;;  %v2616_v6 = vld [vmem:[%s3220_s20 + $0xa4] ss:$8 sps:$4 sm:$0xff]  }
  0x29   : > { %2907 = vmatpush3.bf16.msra.mxu0 %v3044_v37  ;;  %3024 = vmatpush3.bf16.msra.mxu1 %v3044_v37  ;;  %v2617_v7 = vld [vmem:[%s3220_s20 + $0xa8] sm:$0xf]  ;;  %900 = vst [vmem:[#allocation17 + $0xa0] sm:$0xf] %v2615_v5  ;;  %v912_v9 = vunpack.c.l.bf16 %v2616_v6  ;;  %v947_v10 = vunpack.c.h.bf16 %v2616_v6  ;;  %v2587_v11 = vld [vmem:[%s3220_s20 + $0x30] sm:$0xf]  ;;  %v358_v14 = vsel %vm217_vm2, %v352_v3, %v3148_v2  ;;  %v393_v16 = vsel %vm217_vm2, %v387_v4, %v3148_v2 }
  0x2a   : > { %2908 = vmatprep.subr.bf16.mxu0 %v3045_v39  ;;  %3017 = vmatprep.subr.bf16.mxu1 %v3045_v39  ;;  %v3057_v53 = vld [vmem:[#allocation17 + $0x4] ss:$8 sps:$4 sm:$0xff]   ;;  %935 = vst [vmem:[#allocation17 + $0xa8] sm:$0xf] %v2617_v7  ;;  %v2588_v12 = vld [vmem:[%s3220_s20 + $0x34] ss:$8 sps:$4 sm:$0xff]   ;;  %v360_v22 = vpack.c.bf16 %v3111_v30, %v358_v14  ;;  %v395_v24 = vpack.c.bf16 %v3111_v30, %v393_v16 }
  0x2b   : > { %v3050_v8 = vld [vmem:[#allocation18 + $0x28] sm:$0xff]   ;;  %2125 = vmatprep.mubr.bf16.mxu0 %v3057_v53  ;;  %v2589_v13 = vld [vmem:[%s3220_s20 + $0x38] sm:$0xf]  ;;  %852 = vst [vmem:[#allocation17 + $0x94] sm:$0xf] %v850_v63  ;;  %v422_v17 = vunpack.c.l.bf16 %v2588_v12  ;;  %v457_v18 = vunpack.c.h.bf16 %v2588_v12  ;;  %v918_v25 = vsel %vm217_vm2, %v912_v9, %v3148_v2  ;;  %v3051_v29 = vld [vmem:[#allocation18 + $0x70] sm:$0xff]   ;;  %v953_v32 = vsel %vm217_vm2, %v947_v10, %v3148_v2 }
  0x2c   : > { %v3060_v58 = vld [vmem:[#allocation17 + $0x84] ss:$8 sps:$4 sm:$0xff]   ;;  %887 = vst [vmem:[#allocation17 + $0x9c] sm:$0xf] %v885_v0  ;;  %410 = vst [vmem:[#allocation17 + $0x30] sm:$0xf] %v2587_v11  ;;  %v920_v31 = vpack.c.bf16 %v3111_v30, %v918_v25  ;;  %v955_v36 = vpack.c.bf16 %v3111_v30, %v953_v32 }
  0x2d   : > { %2909 = vmatpush3.bf16.msra.mxu0 %v3046_v42  ;;  %3025 = vmatpush3.bf16.msra.mxu1 %v3046_v42  ;;  %445 = vst [vmem:[#allocation17 + $0x38] sm:$0xf] %v2589_v13  ;;  %v2619_v19 = vld [vmem:[%s3220_s20 + $0xb0] sm:$0xf]  ;;  %v2620_v20 = vld [vmem:[%s3220_s20 + $0xb4] ss:$8 sps:$4 sm:$0xff]   ;;  %v428_v33 = vsel %vm217_vm2, %v422_v17, %v3148_v2  ;;  %v463_v38 = vsel %vm217_vm2, %v457_v18, %v3148_v2 }
  0x2e   : > { %2910 = vmatprep.subr.bf16.mxu0 %v3047_v43  ;;  %3018 = vmatprep.subr.bf16.mxu1 %v3047_v43  ;;  %v2621_v21 = vld [vmem:[%s3220_s20 + $0xb8] sm:$0xf]  ;;  %970 = vst [vmem:[#allocation17 + $0xb0] sm:$0xf] %v2619_v19  ;;  %v982_v15 = vunpack.c.l.bf16 %v2620_v20  ;;  %v2591_v26 = vld [vmem:[%s3220_s20 + $0x40] sm:$0xf]  ;;  %v1017_v34 = vunpack.c.h.bf16 %v2620_v20  ;;  %v430_v37 = vpack.c.bf16 %v3111_v30, %v428_v33  ;;  %v465_v42 = vpack.c.bf16 %v3111_v30, %v463_v38 }
  0x2f   : > { %2189 = vmatprep.mubr.bf16.mxu1 %v3060_v58  ;;  %1005 = vst [vmem:[#allocation17 + $0xb8] sm:$0xf] %v2621_v21  ;;  %v2592_v27 = vld [vmem:[%s3220_s20 + $0x44] ss:$8 sps:$4 sm:$0xff]   ;;  %v2593_v28 = vld [vmem:[%s3220_s20 + $0x48] sm:$0xf] }
  0x30   : > { %480 = vst [vmem:[#allocation17 + $0x40] sm:$0xf] %v2591_v26  ;;  %515 = vst [vmem:[#allocation17 + $0x48] sm:$0xf] %v2593_v28  ;;  %v3052_v35 = vld [vmem:[#allocation18 + $0x30] sm:$0xff]   ;;  %v988_v39 = vsel %vm217_vm2, %v982_v15, %v3148_v2  ;;  %v1023_v44 = vsel %vm217_vm2, %v1017_v34, %v3148_v2  ;;  %v492_v45 = vunpack.c.l.bf16 %v2592_v27  ;;  %v527_v50 = vunpack.c.h.bf16 %v2592_v27  ;;  %v3054_v6 = vld [vmem:[#allocation18 + $0x38] sm:$0xff]  }
  0x31   : > { %2911 = vmatpush3.bf16.msra.mxu0 %v3048_v56  ;;  %3026 = vmatpush3.bf16.msra.mxu1 %v3048_v56  ;;  %362 = vst [vmem:[#allocation17 + $0x24] sm:$0xf] %v360_v22  ;;  %397 = vst [vmem:[#allocation17 + $0x2c] sm:$0xf] %v395_v24  ;;  %v2623_v40 = vld [vmem:[%s3220_s20 + $0xc0] sm:$0xf]  ;;  %v990_v43 = vpack.c.bf16 %v3111_v30, %v988_v39  ;;  %v1025_v49 = vpack.c.bf16 %v3111_v30, %v1023_v44 }
  0x32   : > { %2912 = vmatprep.subr.bf16.mxu0 %v3049_v57  ;;  %3019 = vmatprep.subr.bf16.mxu1 %v3049_v57  ;;  %v2624_v41 = vld [vmem:[%s3220_s20 + $0xc4] ss:$8 sps:$4 sm:$0xff]   ;;  %922 = vst [vmem:[#allocation17 + $0xa4] sm:$0xf] %v920_v31  ;;  %1040 = vst [vmem:[#allocation17 + $0xc0] sm:$0xf] %v2623_v40  ;;  %v498_v57 = vsel %vm217_vm2, %v492_v45, %v3148_v2  ;;  %v533_v0 = vsel %vm217_vm2, %v527_v50, %v3148_v2 }
  0x33   : > { %v2625_v46 = vld [vmem:[%s3220_s20 + $0xc8] sm:$0xf]  ;;  %v2595_v47 = vld [vmem:[%s3220_s20 + $0x50] sm:$0xf]  ;;  %v2596_v48 = vld [vmem:[%s3220_s20 + $0x54] ss:$8 sps:$4 sm:$0xff]   ;;  %v1052_v51 = vunpack.c.l.bf16 %v2624_v41  ;;  %v1087_v52 = vunpack.c.h.bf16 %v2624_v41  ;;  %v500_v63 = vpack.c.bf16 %v3111_v30, %v498_v57  ;;  %v535_v7 = vpack.c.bf16 %v3111_v30, %v533_v0 }
  0x34   : > { %957 = vst [vmem:[#allocation17 + $0xac] sm:$0xf] %v955_v36  ;;  %432 = vst [vmem:[#allocation17 + $0x34] sm:$0xf] %v430_v37  ;;  %v2597_v53 = vld [vmem:[%s3220_s20 + $0x58] sm:$0xf]  ;;  %v562_v58 = vunpack.c.l.bf16 %v2596_v48  ;;  %v597_v59 = vunpack.c.h.bf16 %v2596_v48 }
  0x35   : > { %2913 = vmatpush3.bf16.msra.mxu0 %v3050_v8  ;;  %3027 = vmatpush3.bf16.msra.mxu1 %v3050_v8  ;;  %1075 = vst [vmem:[#allocation17 + $0xc8] sm:$0xf] %v2625_v46  ;;  %550 = vst [vmem:[#allocation17 + $0x50] sm:$0xf] %v2595_v47  ;;  %v2627_v54 = vld [vmem:[%s3220_s20 + $0xd0] sm:$0xf]  ;;  %v1058_v3 = vsel %vm217_vm2, %v1052_v51, %v3148_v2  ;;  %v1093_v4 = vsel %vm217_vm2, %v1087_v52, %v3148_v2 }
  0x36   : > { %v2628_v55 = vld [vmem:[%s3220_s20 + $0xd4] ss:$8 sps:$4 sm:$0xff]   ;;  %2914 = vmatprep.subr.bf16.mxu0 %v3051_v29  ;;  %3020 = vmatprep.subr.bf16.mxu1 %v3051_v29  ;;  %467 = vst [vmem:[#allocation17 + $0x3c] sm:$0xf] %v465_v42  ;;  %992 = vst [vmem:[#allocation17 + $0xb4] sm:$0xf] %v990_v43  ;;  %v1060_v8 = vpack.c.bf16 %v3111_v30, %v1058_v3  ;;  %v1095_v9 = vpack.c.bf16 %v3111_v30, %v1093_v4 }
  0x37   : > { %v3053_v56 = vld [vmem:[#allocation18 + $0x78] sm:$0xff]   ;;  %585 = vst [vmem:[#allocation17 + $0x58] sm:$0xf] %v2597_v53  ;;  %1110 = vst [vmem:[#allocation17 + $0xd0] sm:$0xf] %v2627_v54  ;;  %v1122_v60 = vunpack.c.l.bf16 %v2628_v55  ;;  %v568_v10 = vsel %vm217_vm2, %v562_v58, %v3148_v2  ;;  %v603_v14 = vsel %vm217_vm2, %v597_v59, %v3148_v2  ;;  %v1157_v17 = vunpack.c.h.bf16 %v2628_v55 }
  0x38   : > { %v2629_v61 = vld [vmem:[%s3220_s20 + $0xd8] sm:$0xf]  ;;  %v2599_v62 = vld [vmem:[%s3220_s20 + $0x60] sm:$0xf]  ;;  %1027 = vst [vmem:[#allocation17 + $0xbc] sm:$0xf] %v1025_v49  ;;  %v570_v13 = vpack.c.bf16 %v3111_v30, %v568_v10  ;;  %v605_v21 = vpack.c.bf16 %v3111_v30, %v603_v14 }
  0x39   : > { %1145 = vst [vmem:[#allocation17 + $0xd8] sm:$0xf] %v2629_v61  ;;  %620 = vst [vmem:[#allocation17 + $0x60] sm:$0xf] %v2599_v62  ;;  %v2600_v5 = vld [vmem:[%s3220_s20 + $0x64] ss:$8 sps:$4 sm:$0xff]   ;;  %2915 = vmatpush3.bf16.msra.mxu0 %v3052_v35  ;;  %3028 = vmatpush3.bf16.msra.mxu1 %v3052_v35  ;;  %v1128_v16 = vsel %vm217_vm2, %v1122_v60, %v3148_v2  ;;  %v1163_v26 = vsel %vm217_vm2, %v1157_v17, %v3148_v2 }
  0x3a   : > { %v2601_v11 = vld [vmem:[%s3220_s20 + $0x68] sm:$0xf]  ;;  %v2631_v12 = vld [vmem:[%s3220_s20 + $0xe0] sm:$0xf]  ;;  %502 = vst [vmem:[#allocation17 + $0x44] sm:$0xf] %v500_v63  ;;  %2916 = vmatprep.subr.bf16.mxu0 %v3053_v56  ;;  %3021 = vmatprep.subr.bf16.mxu1 %v3053_v56  ;;  %v1130_v22 = vpack.c.bf16 %v3111_v30, %v1128_v16  ;;  %v632_v24 = vunpack.c.l.bf16 %v2600_v5  ;;  %v667_v25 = vunpack.c.h.bf16 %v2600_v5  ;;  %v1165_v33 = vpack.c.bf16 %v3111_v30, %v1163_v26 }
  0x3b   : > { %655 = vst [vmem:[#allocation17 + $0x68] sm:$0xf] %v2601_v11  ;;  %1180 = vst [vmem:[#allocation17 + $0xe0] sm:$0xf] %v2631_v12  ;;  %v2632_v18 = vld [vmem:[%s3220_s20 + $0xe4] ss:$8 sps:$4 sm:$0xff]  }
  0x3c   : > { %v2633_v19 = vld [vmem:[%s3220_s20 + $0xe8] sm:$0xf]  ;;  %v2603_v20 = vld [vmem:[%s3220_s20 + $0x70] sm:$0xf]  ;;  %537 = vst [vmem:[#allocation17 + $0x4c] sm:$0xf] %v535_v7  ;;  %v1192_v27 = vunpack.c.l.bf16 %v2632_v18  ;;  %v1227_v28 = vunpack.c.h.bf16 %v2632_v18  ;;  %v638_v34 = vsel %vm217_vm2, %v632_v24, %v3148_v2  ;;  %v673_v35 = vsel %vm217_vm2, %v667_v25, %v3148_v2 }
  0x3d   : > { %1062 = vst [vmem:[#allocation17 + $0xc4] sm:$0xf] %v1060_v8  ;;  %1097 = vst [vmem:[#allocation17 + $0xcc] sm:$0xf] %v1095_v9  ;;  %v3055_v15 = vld [vmem:[#allocation17] ss:$8 sps:$4 sm:$0xff]   ;;  %2917 = vmatpush3.bf16.msra.mxu0 %v3054_v6  ;;  %3029 = vmatpush3.bf16.msra.mxu1 %v3054_v6  ;;  %v640_v38 = vpack.c.bf16 %v3111_v30, %v638_v34  ;;  %v675_v39 = vpack.c.bf16 %v3111_v30, %v673_v35 }
  0x3e   : > { %1215 = vst [vmem:[#allocation17 + $0xe8] sm:$0xf] %v2633_v19  ;;  %690 = vst [vmem:[#allocation17 + $0x70] sm:$0xf] %v2603_v20  ;;  %v2604_v29 = vld [vmem:[%s3220_s20 + $0x74] ss:$8 sps:$4 sm:$0xff]   ;;  %v1198_v40 = vsel %vm217_vm2, %v1192_v27, %v3148_v2  ;;  %v1233_v43 = vsel %vm217_vm2, %v1227_v28, %v3148_v2 }
  0x3f   : > { %572 = vst [vmem:[#allocation17 + $0x54] sm:$0xf] %v570_v13  ;;  %v3058_v31 = vld [vmem:[#allocation17 + $0x80] ss:$8 sps:$4 sm:$0xff]   ;;  %v3061_v32 = vld [vmem:[#allocation17 + $0x14] ss:$8 sps:$4 sm:$0xff]   ;;  %v702_v36 = vunpack.c.l.bf16 %v2604_v29  ;;  %v737_v41 = vunpack.c.h.bf16 %v2604_v29  ;;  %v1200_v42 = vpack.c.bf16 %v3111_v30, %v1198_v40  ;;  %v1235_v45 = vpack.c.bf16 %v3111_v30, %v1233_v43 }
  0x40   : > { %607 = vst [vmem:[#allocation17 + $0x5c] sm:$0xf] %v605_v21  ;;  %1132 = vst [vmem:[#allocation17 + $0xd4] sm:$0xf] %v1130_v22  ;;  %v3063_v37 = vld [vmem:[#allocation17 + $0x94] ss:$8 sps:$4 sm:$0xff]   ;;  %2126 = vmatmul.mubr.bf16.vlgmr.msra.gmra.mrb[0].mxu0 %v3055_v15  ;;  %2190 = vmatmul.mubr.bf16.vlgmr.msra.gmra.mrb[0].mxu1 %v3058_v31 }
  0x41   : > { %1167 = vst [vmem:[#allocation17 + $0xdc] sm:$0xf] %v1165_v33  ;;  %v708_v44 = vsel %vm217_vm2, %v702_v36, %v3148_v2  ;;  %642 = vst [vmem:[#allocation17 + $0x64] sm:$0xf] %v640_v38  ;;  %v2605_v47 = vld [vmem:[%s3220_s20 + $0x78] sm:$0xf]  ;;  %v743_v48 = vsel %vm217_vm2, %v737_v41, %v3148_v2  ;;  %2133 = vmatprep.mubr.bf16.mxu0 %v3061_v32  ;;  %2197 = vmatprep.mubr.bf16.mxu1 %v3063_v37 }
  0x42   : > { %677 = vst [vmem:[#allocation17 + $0x6c] sm:$0xf] %v675_v39  ;;  %v710_v46 = vpack.c.bf16 %v3111_v30, %v708_v44  ;;  %1202 = vst [vmem:[#allocation17 + $0xe4] sm:$0xf] %v1200_v42  ;;  %v745_v49 = vpack.c.bf16 %v3111_v30, %v743_v48  ;;  %v2635_v50 = vld [vmem:[%s3220_s20 + $0xf0] sm:$0xf] }
  0x43   : > { %725 = vst [vmem:[#allocation17 + $0x78] sm:$0xf] %v2605_v47  ;;  %v2636_v51 = vld [vmem:[%s3220_s20 + $0xf4] ss:$8 sps:$4 sm:$0xff]   ;;  %1237 = vst [vmem:[#allocation17 + $0xec] sm:$0xf] %v1235_v45 }
  0x44   : > { %712 = vst [vmem:[#allocation17 + $0x74] sm:$0xf] %v710_v46  ;;  %1250 = vst [vmem:[#allocation17 + $0xf0] sm:$0xf] %v2635_v50  ;;  %v1262_v52 = vunpack.c.l.bf16 %v2636_v51  ;;  %v1297_v53 = vunpack.c.h.bf16 %v2636_v51  ;;  %v3065_v56 = vld [vmem:[#allocation17 + $0x10] ss:$8 sps:$4 sm:$0xff]  }
  0x45   : > { %747 = vst [vmem:[#allocation17 + $0x7c] sm:$0xf] %v745_v49  ;;  %v3066_v57 = vld [vmem:[#allocation17 + $0x90] ss:$8 sps:$4 sm:$0xff]   ;;  %v3067_v60 = vld [vmem:[#allocation17 + $0x24] ss:$8 sps:$4 sm:$0xff]  }
  0x46   : > { %v1268_v54 = vsel %vm217_vm2, %v1262_v52, %v3148_v2  ;;  %v1303_v55 = vsel %vm217_vm2, %v1297_v53, %v3148_v2  ;;  %v3069_v61 = vld [vmem:[#allocation17 + $0xa4] ss:$8 sps:$4 sm:$0xff]   ;;  %v2637_v62 = vld [vmem:[%s3220_s20 + $0xf8] sm:$0xf]  ;;  %v3071_v63 = vld [vmem:[#allocation17 + $0x20] ss:$8 sps:$4 sm:$0xff]  }
  0x47   : > { %v1270_v58 = vpack.c.bf16 %v3111_v30, %v1268_v54  ;;  %v1305_v59 = vpack.c.bf16 %v3111_v30, %v1303_v55  ;;  %1285 = vst [vmem:[#allocation17 + $0xf8] sm:$0xf] %v2637_v62  ;;  %v3072_v0 = vld [vmem:[#allocation17 + $0xa0] ss:$8 sps:$4 sm:$0xff]   ;;  %v3073_v23 = vld [vmem:[#allocation17 + $0x34] ss:$8 sps:$4 sm:$0xff]  }
  0x48   : > { %2134 = vmatmul.mubr.bf16.gmra.mrb[4].mxu0 %v3065_v56  ;;  %2198 = vmatmul.mubr.bf16.gmra.mrb[4].mxu1 %v3066_v57  ;;  %v3075_v3 = vld [vmem:[#allocation17 + $0xb4] ss:$8 sps:$4 sm:$0xff]   ;;  %v3077_v4 = vld [vmem:[#allocation17 + $0x30] ss:$8 sps:$4 sm:$0xff]   ;;  %v3079_v5 = vld [vmem:[#allocation17 + $0x44] ss:$8 sps:$4 sm:$0xff]  }
  0x49   : > { %1272 = vst [vmem:[#allocation17 + $0xf4] sm:$0xf] %v1270_v58  ;;  %1307 = vst [vmem:[#allocation17 + $0xfc] sm:$0xf] %v1305_v59  ;;  %2141 = vmatprep.mubr.bf16.mxu0 %v3067_v60  ;;  %2205 = vmatprep.mubr.bf16.mxu1 %v3069_v61  ;;  %v3078_v30 = vld [vmem:[#allocation17 + $0xb0] ss:$8 sps:$4 sm:$0xff]  }
  0x4a   : > { %v3081_v6 = vld [vmem:[#allocation17 + $0xc4] ss:$8 sps:$4 sm:$0xff]   ;;  %v3083_v7 = vld [vmem:[#allocation17 + $0x40] ss:$8 sps:$4 sm:$0xff]   ;;  %v3085_v9 = vld [vmem:[#allocation17 + $0x54] ss:$8 sps:$4 sm:$0xff]  }
  0x4b   : > { %v3084_v8 = vld [vmem:[#allocation17 + $0xc0] ss:$8 sps:$4 sm:$0xff]   ;;  %v3087_v10 = vld [vmem:[#allocation17 + $0xd4] ss:$8 sps:$4 sm:$0xff]   ;;  %v3089_v11 = vld [vmem:[#allocation17 + $0x50] ss:$8 sps:$4 sm:$0xff]  }
  0x4c   : > { %v3090_v12 = vld [vmem:[#allocation17 + $0xd0] ss:$8 sps:$4 sm:$0xff]   ;;  %v3091_v13 = vld [vmem:[#allocation17 + $0x64] ss:$8 sps:$4 sm:$0xff]   ;;  %v3095_v16 = vld [vmem:[#allocation17 + $0x60] ss:$8 sps:$4 sm:$0xff]  }
  0x4d   : > { %v3093_v14 = vld [vmem:[#allocation17 + $0xe4] ss:$8 sps:$4 sm:$0xff]   ;;  %v3096_v17 = vld [vmem:[#allocation17 + $0xe0] ss:$8 sps:$4 sm:$0xff]   ;;  %v3097_v18 = vld [vmem:[#allocation17 + $0x74] ss:$8 sps:$4 sm:$0xff]  }
  0x4e   : > { %v3101_v20 = vld [vmem:[#allocation17 + $0x70] ss:$8 sps:$4 sm:$0xff]   ;;  %v3462_v25 = vld [vmem:[#allocation19] ss:$0 sm:$0xff] }
  0x4f   : > { %v3102_v21 = vld [vmem:[#allocation17 + $0xf0] ss:$8 sps:$4 sm:$0xff]  }
  0x50   : > { %2142 = vmatmul.mubr.bf16.gmra.mrb[8].mxu0 %v3071_v63  ;;  %2206 = vmatmul.mubr.bf16.gmra.mrb[8].mxu1 %v3072_v0  ;;  %v3099_v19 = vld [vmem:[#allocation17 + $0xf4] ss:$8 sps:$4 sm:$0xff]  }
  0x51   : > { %2149 = vmatprep.mubr.bf16.mxu0 %v3073_v23  ;;  %2213 = vmatprep.mubr.bf16.mxu1 %v3075_v3 }
  0x58   : > { %2150 = vmatmul.mubr.bf16.gmra.mrb[12].mxu0 %v3077_v4  ;;  %2214 = vmatmul.mubr.bf16.gmra.mrb[12].mxu1 %v3078_v30 }
  0x59   : > { %2157 = vmatprep.mubr.bf16.mxu0 %v3079_v5  ;;  %2221 = vmatprep.mubr.bf16.mxu1 %v3081_v6 }
  0x60   : > { %2158 = vmatmul.mubr.bf16.gmra.mrb[16].mxu0 %v3083_v7  ;;  %2222 = vmatmul.mubr.bf16.gmra.mrb[16].mxu1 %v3084_v8 }
  0x61   : > { %2165 = vmatprep.mubr.bf16.mxu0 %v3085_v9  ;;  %2229 = vmatprep.mubr.bf16.mxu1 %v3087_v10 }
  0x68   : > { %2166 = vmatmul.mubr.bf16.gmra.mrb[20].mxu0 %v3089_v11  ;;  %2230 = vmatmul.mubr.bf16.gmra.mrb[20].mxu1 %v3090_v12 }
  0x69   : > { %2173 = vmatprep.mubr.bf16.mxu0 %v3091_v13  ;;  %2237 = vmatprep.mubr.bf16.mxu1 %v3093_v14 }
  0x70   : > { %2174 = vmatmul.mubr.bf16.gmra.mrb[24].mxu0 %v3095_v16  ;;  %2238 = vmatmul.mubr.bf16.gmra.mrb[24].mxu1 %v3096_v17 }
  0x71   : > { %2181 = vmatprep.mubr.bf16.mxu0 %v3097_v18  ;;  %2245 = vmatprep.mubr.bf16.mxu1 %v3099_v19 }
  0x78   : > { %2182 = vmatmul.mubr.bf16.gmra.mrb[28].mxu0 %v3101_v20  ;;  %2246 = vmatmul.mubr.bf16.gmra.mrb[28].mxu1 %v3102_v21 }
 0x113   : > { %v2918_v22 = vpop.f32.mrb[0].mxu0  ;;  %v2966_v24 = vpop.f32.mrb[0].mxu1 }
 0x114   : > { %v2919_v15 = vpop.f32.mrb[1].mxu0  ;;  %v2967_v26 = vpop.f32.mrb[1].mxu1 }
 0x115   : > { %v2920_v27 = vadd.f32 %v2919_v15, %v2918_v22  ;;  %v2968_v28 = vadd.f32 %v2967_v26, %v2966_v24  ;;  %v2921_v29 = vpop.f32.mrb[2].mxu0  ;;  %v2969_v31 = vpop.f32.mrb[2].mxu1 }
 0x116   : > { %v2922_v32 = vpop.f32.mrb[3].mxu0  ;;  %v2970_v33 = vpop.f32.mrb[3].mxu1 }
 0x117   : > { %v2128_v34 = vadd.f32 %v2920_v27, %v3462_v25  ;;  %v2192_v35 = vadd.f32 %v2968_v28, %v3462_v25  ;;  %v2923_v36 = vadd.f32 %v2922_v32, %v2921_v29  ;;  %v2971_v37 = vadd.f32 %v2970_v33, %v2969_v31 }
 0x119   : > { %v2286_v38 = vmul.f32 0.1, %v2128_v34  ;;  %v2302_v39 = vmul.f32 0.1, %v2192_v35  ;;  %vm2254_vm3 = vcmp.gt.f32.partialorder %v2128_v34, 0.0  ;;  %vm2270_vm4 = vcmp.gt.f32.partialorder %v2192_v35, 0.0 }
 0x11a   : > { %v2131_v40 = vadd.f32 %v2923_v36, %v3462_v25  ;;  %v2195_v41 = vadd.f32 %v2971_v37, %v3462_v25 }
 0x11b   : > { %v2924_v42 = vpop.f32.mrb[4].mxu0  ;;  %v2972_v43 = vpop.f32.mrb[4].mxu1  ;;  %v2318_v46 = vsel %vm2254_vm3, %v2128_v34, %v2286_v38  ;;  %v2334_v47 = vsel %vm2270_vm4, %v2192_v35, %v2302_v39 }
 0x11c   : > { %vm2255_vm5 = vcmp.gt.f32.partialorder %v2131_v40, 0.0  ;;  %v2287_v44 = vmul.f32 0.1, %v2131_v40  ;;  %vm2271_vm6 = vcmp.gt.f32.partialorder %v2195_v41, 0.0  ;;  %v2303_v45 = vmul.f32 0.1, %v2195_v41 }
 0x11d   : > { %v2925_v48 = vpop.f32.mrb[5].mxu0  ;;  %v2973_v49 = vpop.f32.mrb[5].mxu1 }
 0x11e   : > { %v2319_v50 = vsel %vm2255_vm5, %v2131_v40, %v2287_v44  ;;  %v2335_v51 = vsel %vm2271_vm6, %v2195_v41, %v2303_v45  ;;  %v2926_v52 = vadd.f32 %v2925_v48, %v2924_v42  ;;  %v2974_v53 = vadd.f32 %v2973_v49, %v2972_v43  ;;  %v2927_v54 = vpop.f32.mrb[6].mxu0  ;;  %v2975_v55 = vpop.f32.mrb[6].mxu1 }
 0x11f   : > { %v2810_v56 = vpack.c.bf16 %v2319_v50, %v2318_v46  ;;  %v2850_v57 = vpack.c.bf16 %v2335_v51, %v2334_v47  ;;  %v2928_v58 = vpop.f32.mrb[7].mxu0  ;;  %v2976_v59 = vpop.f32.mrb[7].mxu1 }
 0x120   : > { %v2136_v60 = vadd.f32 %v2926_v52, %v3462_v25  ;;  %v2200_v61 = vadd.f32 %v2974_v53, %v3462_v25  ;;  %v2929_v62 = vadd.f32 %v2928_v58, %v2927_v54  ;;  %v2977_v63 = vadd.f32 %v2976_v59, %v2975_v55 }
 0x121   : > { %2811 = vst [vmem:[%s3472_s28] sm:$0xff] %v2810_v56   ;;  %2894 = vst [vmem:[%s3472_s28 + $0x40] sm:$0xff] %v2850_v57  }
 0x122   : > { %v2288_v0 = vmul.f32 0.1, %v2136_v60  ;;  %v2304_v23 = vmul.f32 0.1, %v2200_v61  ;;  %v2139_v3 = vadd.f32 %v2929_v62, %v3462_v25  ;;  %v2203_v4 = vadd.f32 %v2977_v63, %v3462_v25 }
 0x123   : > { %v2930_v30 = vpop.f32.mrb[8].mxu0  ;;  %v2978_v5 = vpop.f32.mrb[8].mxu1  ;;  %vm2256_vm7 = vcmp.gt.f32.partialorder %v2136_v60, 0.0  ;;  %vm2272_vm8 = vcmp.gt.f32.partialorder %v2200_v61, 0.0 }
 0x124   : > { %v2931_v6 = vpop.f32.mrb[9].mxu0  ;;  %v2979_v7 = vpop.f32.mrb[9].mxu1  ;;  %vm2257_vm9 = vcmp.gt.f32.partialorder %v2139_v3, 0.0  ;;  %v2289_v8 = vmul.f32 0.1, %v2139_v3  ;;  %vm2273_vm10 = vcmp.gt.f32.partialorder %v2203_v4, 0.0  ;;  %v2320_v14 = vsel %vm2256_vm7, %v2136_v60, %v2288_v0 }
 0x125   : > { %v2305_v9 = vmul.f32 0.1, %v2203_v4  ;;  %v2932_v10 = vadd.f32 %v2931_v6, %v2930_v30  ;;  %v2980_v11 = vadd.f32 %v2979_v7, %v2978_v5  ;;  %v2933_v12 = vpop.f32.mrb[10].mxu0  ;;  %v2981_v13 = vpop.f32.mrb[10].mxu1  ;;  %v2336_v16 = vsel %vm2272_vm8, %v2200_v61, %v2304_v23 }
 0x126   : > { %v2321_v17 = vsel %vm2257_vm9, %v2139_v3, %v2289_v8  ;;  %v2934_v19 = vpop.f32.mrb[11].mxu0  ;;  %v2982_v20 = vpop.f32.mrb[11].mxu1 }
 0x127   : > { %v2337_v18 = vsel %vm2273_vm10, %v2203_v4, %v2305_v9  ;;  %v2815_v21 = vpack.c.bf16 %v2321_v17, %v2320_v14  ;;  %v2144_v24 = vadd.f32 %v2932_v10, %v3462_v25  ;;  %v2208_v15 = vadd.f32 %v2980_v11, %v3462_v25 }
 0x128   : > { %v2855_v22 = vpack.c.bf16 %v2337_v18, %v2336_v16  ;;  %v2935_v26 = vadd.f32 %v2934_v19, %v2933_v12  ;;  %v2983_v27 = vadd.f32 %v2982_v20, %v2981_v13 }
 0x129   : > { %2887 = vst [vmem:[%s3472_s28 + $0x8] sm:$0xff] %v2815_v21   ;;  %v2290_v28 = vmul.f32 0.1, %v2144_v24  ;;  %v2306_v29 = vmul.f32 0.1, %v2208_v15  ;;  %vm2258_vm11 = vcmp.gt.f32.partialorder %v2144_v24, 0.0 }
 0x12a   : > { %2895 = vst [vmem:[%s3472_s28 + $0x48] sm:$0xff] %v2855_v22   ;;  %v2147_v31 = vadd.f32 %v2935_v26, %v3462_v25  ;;  %v2211_v32 = vadd.f32 %v2983_v27, %v3462_v25  ;;  %vm2274_vm12 = vcmp.gt.f32.partialorder %v2208_v15, 0.0 }
 0x12b   : > { %v2936_v33 = vpop.f32.mrb[12].mxu0  ;;  %v2984_v34 = vpop.f32.mrb[12].mxu1  ;;  %v2322_v43 = vsel %vm2258_vm11, %v2144_v24, %v2290_v28  ;;  %v2338_v44 = vsel %vm2274_vm12, %v2208_v15, %v2306_v29 }
 0x12c   : > { %v2937_v35 = vpop.f32.mrb[13].mxu0  ;;  %v2985_v36 = vpop.f32.mrb[13].mxu1  ;;  %vm2259_vm13 = vcmp.gt.f32.partialorder %v2147_v31, 0.0  ;;  %v2291_v37 = vmul.f32 0.1, %v2147_v31  ;;  %vm2275_vm14 = vcmp.gt.f32.partialorder %v2211_v32, 0.0 }
 0x12d   : > { %v2307_v38 = vmul.f32 0.1, %v2211_v32  ;;  %v2938_v39 = vadd.f32 %v2937_v35, %v2936_v33  ;;  %v2986_v40 = vadd.f32 %v2985_v36, %v2984_v34  ;;  %v2939_v41 = vpop.f32.mrb[14].mxu0  ;;  %v2987_v42 = vpop.f32.mrb[14].mxu1 }
 0x12e   : > { %v2323_v45 = vsel %vm2259_vm13, %v2147_v31, %v2291_v37  ;;  %v2940_v47 = vpop.f32.mrb[15].mxu0  ;;  %v2988_v48 = vpop.f32.mrb[15].mxu1 }
 0x12f   : > { %v2339_v46 = vsel %vm2275_vm14, %v2211_v32, %v2307_v38  ;;  %v2820_v49 = vpack.c.bf16 %v2323_v45, %v2322_v43  ;;  %v2152_v51 = vadd.f32 %v2938_v39, %v3462_v25  ;;  %v2216_v52 = vadd.f32 %v2986_v40, %v3462_v25 }
 0x130   : > { %v2860_v50 = vpack.c.bf16 %v2339_v46, %v2338_v44  ;;  %v2941_v53 = vadd.f32 %v2940_v47, %v2939_v41  ;;  %v2989_v54 = vadd.f32 %v2988_v48, %v2987_v42 }
 0x131   : > { %2888 = vst [vmem:[%s3472_s28 + $0x10] sm:$0xff] %v2820_v49   ;;  %v2292_v55 = vmul.f32 0.1, %v2152_v51  ;;  %v2308_v56 = vmul.f32 0.1, %v2216_v52  ;;  %vm2260_vm15 = vcmp.gt.f32.partialorder %v2152_v51, 0.0 }
 0x132   : > { %2896 = vst [vmem:[%s3472_s28 + $0x50] sm:$0xff] %v2860_v50   ;;  %v2155_v57 = vadd.f32 %v2941_v53, %v3462_v25  ;;  %v2219_v58 = vadd.f32 %v2989_v54, %v3462_v25  ;;  %vm2276_vm0 = vcmp.gt.f32.partialorder %v2216_v52, 0.0 }
 0x133   : > { %v2942_v59 = vpop.f32.mrb[16].mxu0  ;;  %v2990_v60 = vpop.f32.mrb[16].mxu1  ;;  %v2324_v5 = vsel %vm2260_vm15, %v2152_v51, %v2292_v55  ;;  %v2340_v6 = vsel %vm2276_vm0, %v2216_v52, %v2308_v56 }
 0x134   : > { %v2943_v61 = vpop.f32.mrb[17].mxu0  ;;  %v2991_v62 = vpop.f32.mrb[17].mxu1  ;;  %vm2261_vm1 = vcmp.gt.f32.partialorder %v2155_v57, 0.0  ;;  %v2293_v63 = vmul.f32 0.1, %v2155_v57  ;;  %vm2277_vm2 = vcmp.gt.f32.partialorder %v2219_v58, 0.0 }
 0x135   : > { %v2309_v0 = vmul.f32 0.1, %v2219_v58  ;;  %v2944_v23 = vadd.f32 %v2943_v61, %v2942_v59  ;;  %v2992_v3 = vadd.f32 %v2991_v62, %v2990_v60  ;;  %v2945_v4 = vpop.f32.mrb[18].mxu0  ;;  %v2993_v30 = vpop.f32.mrb[18].mxu1 }
 0x136   : > { %v2325_v7 = vsel %vm2261_vm1, %v2155_v57, %v2293_v63  ;;  %v2946_v9 = vpop.f32.mrb[19].mxu0  ;;  %v2994_v10 = vpop.f32.mrb[19].mxu1 }
 0x137   : > { %v2341_v8 = vsel %vm2277_vm2, %v2219_v58, %v2309_v0  ;;  %v2825_v11 = vpack.c.bf16 %v2325_v7, %v2324_v5  ;;  %v2160_v13 = vadd.f32 %v2944_v23, %v3462_v25  ;;  %v2224_v14 = vadd.f32 %v2992_v3, %v3462_v25 }
 0x138   : > { %v2865_v12 = vpack.c.bf16 %v2341_v8, %v2340_v6  ;;  %v2947_v16 = vadd.f32 %v2946_v9, %v2945_v4  ;;  %v2995_v17 = vadd.f32 %v2994_v10, %v2993_v30 }
 0x139   : > { %2889 = vst [vmem:[%s3472_s28 + $0x18] sm:$0xff] %v2825_v11   ;;  %v2294_v18 = vmul.f32 0.1, %v2160_v13  ;;  %v2310_v19 = vmul.f32 0.1, %v2224_v14  ;;  %vm2262_vm3 = vcmp.gt.f32.partialorder %v2160_v13, 0.0 }
 0x13a   : > { %2897 = vst [vmem:[%s3472_s28 + $0x58] sm:$0xff] %v2865_v12   ;;  %v2163_v20 = vadd.f32 %v2947_v16, %v3462_v25  ;;  %v2227_v21 = vadd.f32 %v2995_v17, %v3462_v25  ;;  %vm2278_vm4 = vcmp.gt.f32.partialorder %v2224_v14, 0.0 }
 0x13b   : > { %v2948_v22 = vpop.f32.mrb[20].mxu0  ;;  %v2996_v24 = vpop.f32.mrb[20].mxu1  ;;  %v2326_v34 = vsel %vm2262_vm3, %v2160_v13, %v2294_v18  ;;  %v2342_v35 = vsel %vm2278_vm4, %v2224_v14, %v2310_v19 }
 0x13c   : > { %v2949_v15 = vpop.f32.mrb[21].mxu0  ;;  %v2997_v26 = vpop.f32.mrb[21].mxu1  ;;  %vm2263_vm5 = vcmp.gt.f32.partialorder %v2163_v20, 0.0  ;;  %v2295_v27 = vmul.f32 0.1, %v2163_v20  ;;  %vm2279_vm6 = vcmp.gt.f32.partialorder %v2227_v21, 0.0 }
 0x13d   : > { %v2311_v28 = vmul.f32 0.1, %v2227_v21  ;;  %v2950_v29 = vadd.f32 %v2949_v15, %v2948_v22  ;;  %v2998_v31 = vadd.f32 %v2997_v26, %v2996_v24  ;;  %v2951_v32 = vpop.f32.mrb[22].mxu0  ;;  %v2999_v33 = vpop.f32.mrb[22].mxu1 }
 0x13e   : > { %v2327_v36 = vsel %vm2263_vm5, %v2163_v20, %v2295_v27  ;;  %v2952_v38 = vpop.f32.mrb[23].mxu0  ;;  %v3000_v39 = vpop.f32.mrb[23].mxu1 }
 0x13f   : > { %v2343_v37 = vsel %vm2279_vm6, %v2227_v21, %v2311_v28  ;;  %v2830_v40 = vpack.c.bf16 %v2327_v36, %v2326_v34  ;;  %v2168_v42 = vadd.f32 %v2950_v29, %v3462_v25  ;;  %v2232_v43 = vadd.f32 %v2998_v31, %v3462_v25 }
 0x140   : > { %v2870_v41 = vpack.c.bf16 %v2343_v37, %v2342_v35  ;;  %v2953_v44 = vadd.f32 %v2952_v38, %v2951_v32  ;;  %v3001_v45 = vadd.f32 %v3000_v39, %v2999_v33 }
 0x141   : > { %2890 = vst [vmem:[%s3472_s28 + $0x20] sm:$0xff] %v2830_v40   ;;  %v2296_v46 = vmul.f32 0.1, %v2168_v42  ;;  %v2312_v47 = vmul.f32 0.1, %v2232_v43  ;;  %vm2264_vm7 = vcmp.gt.f32.partialorder %v2168_v42, 0.0 }
 0x142   : > { %2898 = vst [vmem:[%s3472_s28 + $0x60] sm:$0xff] %v2870_v41   ;;  %v2171_v48 = vadd.f32 %v2953_v44, %v3462_v25  ;;  %v2235_v49 = vadd.f32 %v3001_v45, %v3462_v25  ;;  %vm2280_vm8 = vcmp.gt.f32.partialorder %v2232_v43, 0.0 }
 0x143   : > { %v2954_v50 = vpop.f32.mrb[24].mxu0  ;;  %v3002_v51 = vpop.f32.mrb[24].mxu1  ;;  %v2328_v60 = vsel %vm2264_vm7, %v2168_v42, %v2296_v46  ;;  %v2344_v61 = vsel %vm2280_vm8, %v2232_v43, %v2312_v47 }
 0x144   : > { %v2955_v52 = vpop.f32.mrb[25].mxu0  ;;  %v3003_v53 = vpop.f32.mrb[25].mxu1  ;;  %vm2265_vm9 = vcmp.gt.f32.partialorder %v2171_v48, 0.0  ;;  %v2297_v54 = vmul.f32 0.1, %v2171_v48  ;;  %vm2281_vm10 = vcmp.gt.f32.partialorder %v2235_v49, 0.0 }
 0x145   : > { %v2313_v55 = vmul.f32 0.1, %v2235_v49  ;;  %v2956_v56 = vadd.f32 %v2955_v52, %v2954_v50  ;;  %v3004_v57 = vadd.f32 %v3003_v53, %v3002_v51  ;;  %v2957_v58 = vpop.f32.mrb[26].mxu0  ;;  %v3005_v59 = vpop.f32.mrb[26].mxu1 }
 0x146   : > { %v2329_v62 = vsel %vm2265_vm9, %v2171_v48, %v2297_v54  ;;  %v2958_v0 = vpop.f32.mrb[27].mxu0  ;;  %v3006_v23 = vpop.f32.mrb[27].mxu1 }
 0x147   : > { %v2345_v63 = vsel %vm2281_vm10, %v2235_v49, %v2313_v55  ;;  %v2835_v3 = vpack.c.bf16 %v2329_v62, %v2328_v60  ;;  %v2176_v30 = vadd.f32 %v2956_v56, %v3462_v25  ;;  %v2240_v5 = vadd.f32 %v3004_v57, %v3462_v25 }
 0x148   : > { %v2875_v4 = vpack.c.bf16 %v2345_v63, %v2344_v61  ;;  %v2959_v6 = vadd.f32 %v2958_v0, %v2957_v58  ;;  %v3007_v7 = vadd.f32 %v3006_v23, %v3005_v59 }
 0x149   : > { %2891 = vst [vmem:[%s3472_s28 + $0x28] sm:$0xff] %v2835_v3   ;;  %v2298_v8 = vmul.f32 0.1, %v2176_v30  ;;  %v2314_v9 = vmul.f32 0.1, %v2240_v5  ;;  %vm2266_vm11 = vcmp.gt.f32.partialorder %v2176_v30, 0.0 }
 0x14a   : > { %2899 = vst [vmem:[%s3472_s28 + $0x68] sm:$0xff] %v2875_v4   ;;  %v2179_v10 = vadd.f32 %v2959_v6, %v3462_v25  ;;  %v2243_v11 = vadd.f32 %v3007_v7, %v3462_v25  ;;  %vm2282_vm12 = vcmp.gt.f32.partialorder %v2240_v5, 0.0 }
 0x14b   : > { %v2960_v12 = vpop.f32.mrb[28].mxu0  ;;  %v3008_v13 = vpop.f32.mrb[28].mxu1  ;;  %v2330_v24 = vsel %vm2266_vm11, %v2176_v30, %v2298_v8  ;;  %v2346_v15 = vsel %vm2282_vm12, %v2240_v5, %v2314_v9 }
 0x14c   : > { %v2961_v14 = vpop.f32.mrb[29].mxu0  ;;  %v3009_v16 = vpop.f32.mrb[29].mxu1  ;;  %vm2267_vm13 = vcmp.gt.f32.partialorder %v2179_v10, 0.0  ;;  %v2299_v17 = vmul.f32 0.1, %v2179_v10  ;;  %vm2283_vm14 = vcmp.gt.f32.partialorder %v2243_v11, 0.0 }
 0x14d   : > { %v2315_v18 = vmul.f32 0.1, %v2243_v11  ;;  %v2962_v19 = vadd.f32 %v2961_v14, %v2960_v12  ;;  %v3010_v20 = vadd.f32 %v3009_v16, %v3008_v13  ;;  %v2963_v21 = vpop.f32.mrb[30].mxu0  ;;  %v3011_v22 = vpop.f32.mrb[30].mxu1 }
 0x14e   : > { %v2331_v26 = vsel %vm2267_vm13, %v2179_v10, %v2299_v17  ;;  %v2964_v28 = vpop.f32.mrb[31].mxu0  ;;  %v3012_v29 = vpop.f32.mrb[31].mxu1 }
 0x14f   : > { %v2347_v27 = vsel %vm2283_vm14, %v2243_v11, %v2315_v18  ;;  %v2840_v31 = vpack.c.bf16 %v2331_v26, %v2330_v24  ;;  %v2184_v33 = vadd.f32 %v2962_v19, %v3462_v25  ;;  %v2248_v34 = vadd.f32 %v3010_v20, %v3462_v25 }
 0x150   : > { %v2880_v32 = vpack.c.bf16 %v2347_v27, %v2346_v15  ;;  %v2965_v35 = vadd.f32 %v2964_v28, %v2963_v21  ;;  %v3013_v36 = vadd.f32 %v3012_v29, %v3011_v22 }
 0x151   : > { %2892 = vst [vmem:[%s3472_s28 + $0x30] sm:$0xff] %v2840_v31   ;;  %v2300_v37 = vmul.f32 0.1, %v2184_v33  ;;  %v2316_v38 = vmul.f32 0.1, %v2248_v34  ;;  %vm2268_vm15 = vcmp.gt.f32.partialorder %v2184_v33, 0.0 }
 0x152   : > { %2900 = vst [vmem:[%s3472_s28 + $0x70] sm:$0xff] %v2880_v32   ;;  %v2187_v39 = vadd.f32 %v2965_v35, %v3462_v25  ;;  %v2251_v40 = vadd.f32 %v3013_v36, %v3462_v25  ;;  %vm2284_vm0 = vcmp.gt.f32.partialorder %v2248_v34, 0.0 }
 0x153   : > { %v2332_v43 = vsel %vm2268_vm15, %v2184_v33, %v2300_v37  ;;  %v2348_v44 = vsel %vm2284_vm0, %v2248_v34, %v2316_v38 }
 0x154   : > { %vm2269_vm1 = vcmp.gt.f32.partialorder %v2187_v39, 0.0  ;;  %v2301_v41 = vmul.f32 0.1, %v2187_v39  ;;  %vm2285_vm2 = vcmp.gt.f32.partialorder %v2251_v40, 0.0  ;;  %v2317_v42 = vmul.f32 0.1, %v2251_v40 }
 0x156   : > { %v2333_v45 = vsel %vm2269_vm1, %v2187_v39, %v2301_v41  ;;  %v2349_v46 = vsel %vm2285_vm2, %v2251_v40, %v2317_v42 }
 0x157   : > { %v2845_v47 = vpack.c.bf16 %v2333_v45, %v2332_v43  ;;  %v2885_v48 = vpack.c.bf16 %v2349_v46, %v2348_v44 }
 0x159   : > { %2893 = vst [vmem:[%s3472_s28 + $0x38] sm:$0xff] %v2845_v47   ;;  %2901 = vst [vmem:[%s3472_s28 + $0x78] sm:$0xff] %v2885_v48  }
 0x15a PF: > { %s26_s22 = sadd.s32 1, %s3109_s22  }
 0x15b   : > { %p23_p4 = scmp.ge.s32.totalorder %s26_s22, 4  }
 0x15d   :  { %25 = sbr.rel (!%p23_p4) target bundleno = 3 (0x3), region = 236 }

// kernel: build_model_forward.19
= control target key start
LH: loop header
LB: loop body
LE: loop exit
PB: predicated region body
PF: predicated region fallthrough
CT: control target
= control target key end

     0   :  { %s2327_s22 = smov 0   ;;  %s2638_s0 = inlined_call_operand.vmem [shape: bf16[288,64], index: 0, kind: input, shape index: {}]   ;;  %s2639_s1 = inlined_call_operand.<no memory space> [shape: bf16[], index: 1, kind: input, shape index: {}]   ;;  %s2640_s2 = inlined_call_operand.vmem [shape: bf16[128,288], index: 2, kind: input, shape index: {}]   ;;  %s2641_s3 = inlined_call_operand.vmem [shape: f32[64], index: 3, kind: input, shape index: {}]   ;;  %s2642_s4 = inlined_call_operand.<no memory space> [shape: f32[], index: 4, kind: input, shape index: {}]   ;;  %s2643_s5 = inlined_call_operand.vmem [shape: bf16[128,128], index: 5, kind: output, shape index: {}]  }
   0x1   :  { %v10_v0 = vstv %s2639_s1  ;;  %v20_v1 = vstv %s2642_s4 }
   0x2   :  { %v2325_v2 = vunpack.i.l.bf16 %v10_v0 }
   0x3 LB: > { %s1947_s23 = sadd.s32 4294967295, %s2286_s22   ;;  %p1951_p0 = scmp.ge.s32.totalorder %s2286_s22, 1  ;;  %s2286_s22 = sphi %s2327_s22, %s26_s22  }
   0x4   : > { %p152_p1 = scmp.lt.s32.totalorder %s2286_s22, 3 }
   0x6   : > { %p153_p2 = pnand %p1951_p0, %p152_p1 }
   0x8   : > { %156 = sbr.rel (%p153_p2) target bundleno = 315 (0x13b), region = 32 }
   0xf   : > { %v227_v3 = vlaneseq  ;;  %v1994_v4 = vld [vmem:[%s2638_s0 + $0x40] sm:$0xff]   ;;  %v1996_v6 = vld [vmem:[%s2638_s0 + $0x48] sm:$0xff]   ;;  %v2107_v7 = vpack.c.bf16 %v2325_v2, %v2325_v2  ;;  %s1952_s29 = sshll.u32 %s1947_s23, 3  ;;  %v1998_v14 = vld [vmem:[%s2638_s0 + $0x50] sm:$0xff]   ;;  %v2288_v31 = vmov 0.0  }
  0x10   : > { %v581_v5 = vld [vmem:[%s2638_s0] sm:$0xff]   ;;  %v933_v8 = vunpack.c.l.bf16 %v1994_v4  ;;  %v955_v9 = vunpack.c.h.bf16 %v1994_v4  ;;  %v1980_v13 = vld [vmem:[%s2638_s0 + $0x8] sm:$0xff]   ;;  %p178_p3 = scmp.lt.s32.totalorder %s1952_s29, 15  ;;  %v977_v16 = vunpack.c.l.bf16 %v1996_v6  ;;  %v999_v17 = vunpack.c.h.bf16 %v1996_v6  ;;  %v1982_v44 = vld [vmem:[%s2638_s0 + $0x10] sm:$0xff]  }
  0x11   : > { %v582_v10 = vunpack.c.l.bf16 %v581_v5  ;;  %v603_v11 = vunpack.c.h.bf16 %v581_v5  ;;  %v2010_v12 = vld [vmem:[%s2638_s0 + $0x80] sm:$0xff]   ;;  %v2356_v15 = vand.u32 127, %v227_v3  ;;  %v2012_v19 = vld [vmem:[%s2638_s0 + $0x88] sm:$0xff]   ;;  %2108 = vst [vmem:[#allocation18 + $0x90] sm:$0xff] %v2107_v7   ;;  %2113 = vst [vmem:[#allocation18 + $0x98] sm:$0xff] %v2107_v7   ;;  %v625_v21 = vunpack.c.l.bf16 %v1980_v13 }
  0x12   : > { %v1285_v18 = vunpack.c.l.bf16 %v2010_v12  ;;  %2118 = vst [vmem:[#allocation18 + $0xa0] sm:$0xff] %v2107_v7   ;;  %2123 = vst [vmem:[#allocation18 + $0xa8] sm:$0xff] %v2107_v7   ;;  %v1307_v20 = vunpack.c.h.bf16 %v2010_v12  ;;  %v647_v22 = vunpack.c.h.bf16 %v1980_v13  ;;  %v1021_v23 = vunpack.c.l.bf16 %v1998_v14  ;;  %s2645_s29 = smov (!%p178_p3, %s1952_s29), 15  ;;  %v2000_v51 = vld [vmem:[%s2638_s0 + $0x58] sm:$0xff]   ;;  %v2002_v61 = vld [vmem:[%s2638_s0 + $0x60] sm:$0xff]  }
  0x13   : > { %2128 = vst [vmem:[#allocation18 + $0xb0] sm:$0xff] %v2107_v7   ;;  %2133 = vst [vmem:[#allocation18 + $0xb8] sm:$0xff] %v2107_v7   ;;  %vm587_vm0 = vcmp.lt.s32.totalorder %v2356_v15, 64  ;;  %v1043_v24 = vunpack.c.h.bf16 %v1998_v14  ;;  %v1329_v25 = vunpack.c.l.bf16 %v2012_v19  ;;  %v1351_v26 = vunpack.c.h.bf16 %v2012_v19  ;;  %s2236_s13 = smul.u32 12, %s2645_s29  ;;  %v1984_v56 = vld [vmem:[%s2638_s0 + $0x18] sm:$0xff]   ;;  %v1986_v5 = vld [vmem:[%s2638_s0 + $0x20] sm:$0xff]  }
  0x14   : > { %v939_v27 = vsel %vm587_vm0, %v933_v8, %v2325_v2  ;;  %v961_v28 = vsel %vm587_vm0, %v955_v9, %v2325_v2  ;;  %v588_v29 = vsel %vm587_vm0, %v582_v10, %v2325_v2  ;;  %v609_v30 = vsel %vm587_vm0, %v603_v11, %v2325_v2  ;;  %v2004_v10 = vld [vmem:[%s2638_s0 + $0x68] sm:$0xff]   ;;  %s1955_s19 = sshll.u32 %s2645_s29, 2 }
  0x15   : > { %v941_v32 = vpack.c.bf16 %v2288_v31, %v939_v27  ;;  %v963_v33 = vpack.c.bf16 %v2288_v31, %v961_v28  ;;  %v589_v34 = vpack.c.bf16 %v2288_v31, %v588_v29  ;;  %v611_v35 = vpack.c.bf16 %v2288_v31, %v609_v30  ;;  %s2397_s16 = scalar_lea.vmem %s2640_s2, %s2236_s13  ;;  %s2623_s23 = scalar_lea.vmem %s2643_s5, %s1955_s19 }
  0x16   : > { %v983_v36 = vsel %vm587_vm0, %v977_v16, %v2325_v2  ;;  %v1005_v37 = vsel %vm587_vm0, %v999_v17, %v2325_v2  ;;  %v1291_v38 = vsel %vm587_vm0, %v1285_v18, %v2325_v2  ;;  %v1313_v39 = vsel %vm587_vm0, %v1307_v20, %v2325_v2  ;;  %v190_v45 = vld [vmem:[%s2397_s16] sm:$0xff]   ;;  %v1959_v46 = vld [vmem:[%s2397_s16 + $0x10] sm:$0xf]  ;;  %v1988_v16 = vld [vmem:[%s2638_s0 + $0x28] sm:$0xff]  }
  0x17   : > { %943 = vst [vmem:[#allocation18 + $0x40] sm:$0xf] %v941_v32  ;;  %965 = vst [vmem:[#allocation18 + $0x44] sm:$0xf] %v963_v33  ;;  %v985_v40 = vpack.c.bf16 %v2288_v31, %v983_v36  ;;  %v1007_v41 = vpack.c.bf16 %v2288_v31, %v1005_v37  ;;  %v1293_v42 = vpack.c.bf16 %v2288_v31, %v1291_v38  ;;  %v669_v59 = vunpack.c.l.bf16 %v1982_v44  ;;  %v2006_v33 = vld [vmem:[%s2638_s0 + $0x70] sm:$0xff]  }
  0x18   : > { %591 = vst [vmem:[#allocation18] sm:$0xf] %v589_v34  ;;  %613 = vst [vmem:[#allocation18 + $0x4] sm:$0xf] %v611_v35  ;;  %v1315_v43 = vpack.c.bf16 %v2288_v31, %v1313_v39  ;;  %v631_v47 = vsel %vm587_vm0, %v625_v21, %v2325_v2  ;;  %v653_v48 = vsel %vm587_vm0, %v647_v22, %v2325_v2  ;;  %v691_v60 = vunpack.c.h.bf16 %v1982_v44  ;;  %v1990_v39 = vld [vmem:[%s2638_s0 + $0x30] sm:$0xff]  }
  0x19   : > { %v1027_v49 = vsel %vm587_vm0, %v1021_v23, %v2325_v2  ;;  %v1049_v50 = vsel %vm587_vm0, %v1043_v24, %v2325_v2  ;;  %200 = vst [vmem:[#allocation17] sm:$0xff] %v190_v45   ;;  %261 = vst [vmem:[#allocation17 + $0x10] sm:$0xf] %v1959_v46  ;;  %v633_v52 = vpack.c.bf16 %v2288_v31, %v631_v47  ;;  %v1065_v0 = vunpack.c.l.bf16 %v2000_v51  ;;  %v2502_v46 = vld [vmem:[%s2638_s0 + $0x38] sm:$0xff]  }
  0x1a   : > { %987 = vst [vmem:[#allocation18 + $0x48] sm:$0xf] %v985_v40  ;;  %1009 = vst [vmem:[#allocation18 + $0x4c] sm:$0xf] %v1007_v41  ;;  %v655_v53 = vpack.c.bf16 %v2288_v31, %v653_v48  ;;  %v1029_v54 = vpack.c.bf16 %v2288_v31, %v1027_v49  ;;  %v1051_v55 = vpack.c.bf16 %v2288_v31, %v1049_v50  ;;  %v1087_v4 = vunpack.c.h.bf16 %v2000_v51  ;;  %v2489_v40 = vld [vmem:[%s2638_s0 + $0x78] sm:$0xff]  }
  0x1b   : > { %1295 = vst [vmem:[#allocation18 + $0x80] sm:$0xf] %v1293_v42  ;;  %1317 = vst [vmem:[#allocation18 + $0x84] sm:$0xf] %v1315_v43  ;;  %v1335_v57 = vsel %vm587_vm0, %v1329_v25, %v2325_v2  ;;  %v1357_v58 = vsel %vm587_vm0, %v1351_v26, %v2325_v2  ;;  %v675_v6 = vsel %vm587_vm0, %v669_v59, %v2325_v2  ;;  %v713_v8 = vunpack.c.l.bf16 %v1984_v56 }
  0x1c   : > { %635 = vst [vmem:[#allocation18 + $0x8] sm:$0xf] %v633_v52  ;;  %657 = vst [vmem:[#allocation18 + $0xc] sm:$0xf] %v655_v53  ;;  %v1337_v62 = vpack.c.bf16 %v2288_v31, %v1335_v57  ;;  %v1359_v63 = vpack.c.bf16 %v2288_v31, %v1357_v58  ;;  %v697_v7 = vsel %vm587_vm0, %v691_v60, %v2325_v2  ;;  %v735_v9 = vunpack.c.h.bf16 %v1984_v56  ;;  %v2255_v57 = vld [vmem:[#allocation18 + $0x90] sm:$0xff]  }
  0x1d   : > { %1031 = vst [vmem:[#allocation18 + $0x50] sm:$0xf] %v1029_v54  ;;  %1053 = vst [vmem:[#allocation18 + $0x54] sm:$0xf] %v1051_v55  ;;  %v677_v11 = vpack.c.bf16 %v2288_v31, %v675_v6  ;;  %v699_v12 = vpack.c.bf16 %v2288_v31, %v697_v7  ;;  %v1071_v13 = vsel %vm587_vm0, %v1065_v0, %v2325_v2  ;;  %v1109_v25 = vunpack.c.l.bf16 %v2002_v61 }
  0x1e   : > { %1339 = vst [vmem:[#allocation18 + $0x88] sm:$0xf] %v1337_v62  ;;  %1361 = vst [vmem:[#allocation18 + $0x8c] sm:$0xf] %v1359_v63  ;;  %v1093_v14 = vsel %vm587_vm0, %v1087_v4, %v2325_v2  ;;  %v2246_v17 = vld [vmem:[#allocation18 + $0x40] sm:$0xff]   ;;  %v1073_v18 = vpack.c.bf16 %v2288_v31, %v1071_v13  ;;  %v719_v20 = vsel %vm587_vm0, %v713_v8, %v2325_v2  ;;  %v1131_v26 = vunpack.c.h.bf16 %v2002_v61  ;;  %v2523_v62 = vld [vmem:[%s2397_s16 + $0x8] sm:$0xff]  }
  0x1f   : > { %v1095_v19 = vpack.c.bf16 %v2288_v31, %v1093_v14  ;;  %v741_v21 = vsel %vm587_vm0, %v735_v9, %v2325_v2  ;;  %v2247_v22 = vld [vmem:[#allocation18] sm:$0xff]   ;;  %679 = vst [vmem:[#allocation18 + $0x10] sm:$0xf] %v677_v11  ;;  %701 = vst [vmem:[#allocation18 + $0x14] sm:$0xf] %v699_v12  ;;  %v721_v23 = vpack.c.bf16 %v2288_v31, %v719_v20  ;;  %2160 = vmatprep.subr.bf16.mxu0 %v2246_v17  ;;  %v2527_v8 = vld [vmem:[#allocation18 + $0x98] sm:$0xff]  }
  0x20   : > { %v743_v24 = vpack.c.bf16 %v2288_v31, %v741_v21  ;;  %1075 = vst [vmem:[#allocation18 + $0x58] sm:$0xf] %v1073_v18  ;;  %v757_v28 = vunpack.c.l.bf16 %v1986_v5  ;;  %v779_v29 = vunpack.c.h.bf16 %v1986_v5  ;;  %v1153_v30 = vunpack.c.l.bf16 %v2004_v10  ;;  %2161 = vmatpush3.bf16.msra.mxu0 %v2247_v22  ;;  %v1960_v13 = vld [vmem:[%s2397_s16 + $0x14] ss:$24 sps:$4 sm:$0xff]   ;;  %v1963_v14 = vld [vmem:[%s2397_s16 + $0x20] sm:$0xff]  }
  0x21   : > { %v2248_v27 = vld [vmem:[#allocation18 + $0x48] sm:$0xff]   ;;  %1097 = vst [vmem:[#allocation18 + $0x5c] sm:$0xf] %v1095_v19  ;;  %v1175_v32 = vunpack.c.h.bf16 %v2004_v10  ;;  %723 = vst [vmem:[#allocation18 + $0x18] sm:$0xf] %v721_v23  ;;  %v1115_v35 = vsel %vm587_vm0, %v1109_v25, %v2325_v2  ;;  %v1137_v36 = vsel %vm587_vm0, %v1131_v26, %v2325_v2  ;;  %v801_v37 = vunpack.c.l.bf16 %v1988_v16  ;;  %v2554_v25 = vld [vmem:[%s2397_s16 + $0x18] sm:$0xff]  }
  0x22   : > { %v2249_v34 = vld [vmem:[#allocation18 + $0x80] sm:$0xff]   ;;  %745 = vst [vmem:[#allocation18 + $0x1c] sm:$0xf] %v743_v24  ;;  %v823_v38 = vunpack.c.h.bf16 %v1988_v16  ;;  %2162 = vmatprep.subr.bf16.mxu0 %v2248_v27  ;;  %v1117_v42 = vpack.c.bf16 %v2288_v31, %v1115_v35  ;;  %v1139_v43 = vpack.c.bf16 %v2288_v31, %v1137_v36  ;;  %v763_v44 = vsel %vm587_vm0, %v757_v28, %v2325_v2 }
  0x23   : > { %v2250_v41 = vld [vmem:[#allocation18 + $0x8] sm:$0xff]   ;;  %v785_v45 = vsel %vm587_vm0, %v779_v29, %v2325_v2  ;;  %2212 = vmatprep.subr.bf16.mxu1 %v2249_v34  ;;  %v765_v48 = vpack.c.bf16 %v2288_v31, %v763_v44  ;;  %v1159_v50 = vsel %vm587_vm0, %v1153_v30, %v2325_v2  ;;  %v1181_v51 = vsel %vm587_vm0, %v1175_v32, %v2325_v2 }
  0x24   : > { %v2251_v47 = vld [vmem:[#allocation18 + $0x50] sm:$0xff]   ;;  %v787_v49 = vpack.c.bf16 %v2288_v31, %v785_v45  ;;  %2213 = vmatpush3.bf16.msra.mxu1 %v2249_v34  ;;  %1119 = vst [vmem:[#allocation18 + $0x60] sm:$0xf] %v1117_v42  ;;  %1141 = vst [vmem:[#allocation18 + $0x64] sm:$0xf] %v1139_v43  ;;  %v1161_v53 = vpack.c.bf16 %v2288_v31, %v1159_v50  ;;  %v1183_v54 = vpack.c.bf16 %v2288_v31, %v1181_v51 }
  0x25   : > { %v2252_v52 = vld [vmem:[#allocation18 + $0x88] sm:$0xff]   ;;  %v807_v55 = vsel %vm587_vm0, %v801_v37, %v2325_v2  ;;  %v829_v56 = vsel %vm587_vm0, %v823_v38, %v2325_v2  ;;  %2163 = vmatpush3.bf16.msra.mxu0 %v2250_v41  ;;  %767 = vst [vmem:[#allocation18 + $0x20] sm:$0xf] %v765_v48  ;;  %v1197_v60 = vunpack.c.l.bf16 %v2006_v33  ;;  %v1219_v61 = vunpack.c.h.bf16 %v2006_v33  ;;  %v2261_v37 = vld [vmem:[#allocation18 + $0xa0] sm:$0xff]  }
  0x26   : > { %789 = vst [vmem:[#allocation18 + $0x24] sm:$0xf] %v787_v49  ;;  %v809_v58 = vpack.c.bf16 %v2288_v31, %v807_v55  ;;  %v831_v59 = vpack.c.bf16 %v2288_v31, %v829_v56  ;;  %2164 = vmatprep.subr.bf16.mxu0 %v2251_v47  ;;  %2214 = vmatprep.subr.bf16.mxu1 %v2252_v52  ;;  %v2253_v63 = vld [vmem:[#allocation18 + $0x10] sm:$0xff]   ;;  %1163 = vst [vmem:[#allocation18 + $0x68] sm:$0xf] %v1161_v53  ;;  %v845_v0 = vunpack.c.l.bf16 %v1990_v39  ;;  %v2264_v47 = vld [vmem:[#allocation18 + $0xa8] sm:$0xff]  }
  0x27   : > { %1185 = vst [vmem:[#allocation18 + $0x6c] sm:$0xf] %v1183_v54  ;;  %v867_v4 = vunpack.c.h.bf16 %v1990_v39  ;;  %v1241_v5 = vunpack.c.l.bf16 %v2489_v40  ;;  %v1263_v6 = vunpack.c.h.bf16 %v2489_v40  ;;  %v1203_v9 = vsel %vm587_vm0, %v1197_v60, %v2325_v2  ;;  %v1965_v30 = vld [vmem:[%s2397_s16 + $0x28] sm:$0xf]  ;;  %v1969_v53 = vld [vmem:[%s2397_s16 + $0x38] sm:$0xff]  }
  0x28   : > { %v2254_v7 = vld [vmem:[#allocation18 + $0x58] sm:$0xff]   ;;  %811 = vst [vmem:[#allocation18 + $0x28] sm:$0xf] %v809_v58  ;;  %833 = vst [vmem:[#allocation18 + $0x2c] sm:$0xf] %v831_v59  ;;  %v1225_v10 = vsel %vm587_vm0, %v1219_v61, %v2325_v2  ;;  %v889_v11 = vunpack.c.l.bf16 %v2502_v46  ;;  %v911_v12 = vunpack.c.h.bf16 %v2502_v46  ;;  %2215 = vmatpush3.bf16.msra.mxu1 %v2252_v52  ;;  %v1205_v17 = vpack.c.bf16 %v2288_v31, %v1203_v9  ;;  %v2583_v52 = vld [vmem:[%s2397_s16 + $0x30] sm:$0xff]  }
  0x29   : > { %v2256_v16 = vld [vmem:[#allocation18 + $0x18] sm:$0xff]   ;;  %v1227_v18 = vpack.c.bf16 %v2288_v31, %v1225_v10  ;;  %v851_v19 = vsel %vm587_vm0, %v845_v0, %v2325_v2  ;;  %v873_v20 = vsel %vm587_vm0, %v867_v4, %v2325_v2  ;;  %2165 = vmatpush3.bf16.msra.mxu0 %v2253_v63  ;;  %2216 = vmatprep.subr.bf16.mxu1 %v2255_v57  ;;  %v225_v24 = vunpack.c.l.bf16 %v2523_v62  ;;  %v1971_v54 = vld [vmem:[%s2397_s16 + $0x40] sm:$0xf]  ;;  %v1975_v59 = vld [vmem:[%s2397_s16 + $0x50] sm:$0xff]  }
  0x2a   : > { %v853_v21 = vpack.c.bf16 %v2288_v31, %v851_v19  ;;  %v875_v22 = vpack.c.bf16 %v2288_v31, %v873_v20  ;;  %v1247_v23 = vsel %vm587_vm0, %v1241_v5, %v2325_v2  ;;  %2166 = vmatprep.subr.bf16.mxu0 %v2254_v7  ;;  %1207 = vst [vmem:[#allocation18 + $0x70] sm:$0xf] %v1205_v17  ;;  %v229_v36 = vadd.s32 256, %v2356_v15  ;;  %v1972_v58 = vld [vmem:[%s2397_s16 + $0x44] ss:$24 sps:$4 sm:$0xff]   ;;  %v2279_v10 = vld [vmem:[%s2397_s16 + $0x48] sm:$0xff]  }
  0x2b   : > { %1229 = vst [vmem:[#allocation18 + $0x74] sm:$0xf] %v1227_v18  ;;  %v1249_v26 = vpack.c.bf16 %v2288_v31, %v1247_v23  ;;  %v1269_v27 = vsel %vm587_vm0, %v1263_v6, %v2325_v2  ;;  %v895_v28 = vsel %vm587_vm0, %v889_v11, %v2325_v2  ;;  %v917_v29 = vsel %vm587_vm0, %v911_v12, %v2325_v2  ;;  %v2257_v32 = vld [vmem:[#allocation18 + $0x60] sm:$0xff]   ;;  %v2267_v11 = vld [vmem:[#allocation18 + $0xb0] sm:$0xff]   ;;  %v1977_v17 = vld [vmem:[%s2397_s16 + $0x58] sm:$0xf] }
  0x2c   : > { %855 = vst [vmem:[#allocation18 + $0x30] sm:$0xf] %v853_v21  ;;  %877 = vst [vmem:[#allocation18 + $0x34] sm:$0xf] %v875_v22  ;;  %v1271_v33 = vpack.c.bf16 %v2288_v31, %v1269_v27  ;;  %v897_v34 = vpack.c.bf16 %v2288_v31, %v895_v28  ;;  %v919_v35 = vpack.c.bf16 %v2288_v31, %v917_v29  ;;  %2217 = vmatpush3.bf16.msra.mxu1 %v2255_v57  ;;  %v2272_v19 = vld [vmem:[#allocation18 + $0xb8] sm:$0xff]  }
  0x2d   : > { %357 = vst [vmem:[#allocation17 + $0x28] sm:$0xf] %v1965_v30  ;;  %1251 = vst [vmem:[#allocation18 + $0x78] sm:$0xf] %v1249_v26  ;;  %v2071_v38 = vunpack.c.h.bf16 %v2523_v62  ;;  %v273_v39 = vunpack.c.l.bf16 %v1960_v13  ;;  %v321_v40 = vunpack.c.l.bf16 %v1963_v14  ;;  %v2081_v41 = vunpack.c.h.bf16 %v1963_v14  ;;  %2167 = vmatpush3.bf16.msra.mxu0 %v2256_v16  ;;  %2218 = vmatprep.subr.bf16.mxu1 %v2527_v8  ;;  %v2259_v42 = vld [vmem:[#allocation18 + $0x20] sm:$0xff]  }
  0x2e   : > { %1273 = vst [vmem:[#allocation18 + $0x7c] sm:$0xf] %v1271_v33  ;;  %899 = vst [vmem:[#allocation18 + $0x38] sm:$0xf] %v897_v34  ;;  %vm230_vm1 = vcmp.lt.s32.totalorder %v229_v36, 288  ;;  %v369_v15 = vunpack.c.h.bf16 %v1960_v13  ;;  %2168 = vmatprep.subr.bf16.mxu0 %v2257_v32  ;;  %v2260_v43 = vld [vmem:[#allocation18 + $0x68] sm:$0xff]   ;;  %v417_v56 = vunpack.c.l.bf16 %v1969_v53  ;;  %v2091_v57 = vunpack.c.h.bf16 %v1969_v53 }
  0x2f   : > { %921 = vst [vmem:[#allocation18 + $0x3c] sm:$0xf] %v919_v35  ;;  %v231_v44 = vsel %vm230_vm1, %v225_v24, %v2325_v2  ;;  %v279_v45 = vsel %vm230_vm1, %v273_v39, %v2325_v2  ;;  %v327_v46 = vsel %vm230_vm1, %v321_v40, %v2325_v2  ;;  %453 = vst [vmem:[#allocation17 + $0x40] sm:$0xf] %v1971_v54  ;;  %v2262_v60 = vld [vmem:[#allocation18 + $0x28] sm:$0xff]   ;;  %v465_v61 = vunpack.c.l.bf16 %v1972_v58 }
  0x30   : > { %v2072_v48 = vpack.c.bf16 %v2071_v38, %v231_v44  ;;  %v281_v49 = vpack.c.bf16 %v2288_v31, %v279_v45  ;;  %v2082_v50 = vpack.c.bf16 %v2081_v41, %v327_v46  ;;  %v375_v51 = vsel %vm230_vm1, %v369_v15, %v2325_v2  ;;  %2219 = vmatpush3.bf16.msra.mxu1 %v2527_v8  ;;  %v2271_v21 = vld [vmem:[#allocation17 + $0x4] ss:$12 sps:$4 sm:$0xff]  }
  0x31   : > { %v377_v55 = vpack.c.bf16 %v2288_v31, %v375_v51  ;;  %2169 = vmatpush3.bf16.msra.mxu0 %v2259_v42  ;;  %2220 = vmatprep.subr.bf16.mxu1 %v2261_v37  ;;  %v513_v62 = vunpack.c.l.bf16 %v1975_v59  ;;  %v2101_v63 = vunpack.c.h.bf16 %v1975_v59  ;;  %v561_v0 = vunpack.c.h.bf16 %v1972_v58  ;;  %549 = vst [vmem:[#allocation17 + $0x58] sm:$0xf] %v1977_v17 }
  0x32   : > { %2073 = vst [vmem:[#allocation17 + $0x8] sm:$0xff] %v2072_v48   ;;  %283 = vst [vmem:[#allocation17 + $0x14] sm:$0xf] %v281_v49  ;;  %2170 = vmatprep.subr.bf16.mxu0 %v2260_v43  ;;  %v2263_v4 = vld [vmem:[#allocation18 + $0x70] sm:$0xff]   ;;  %v423_v5 = vsel %vm230_vm1, %v417_v56, %v2325_v2  ;;  %v471_v7 = vsel %vm230_vm1, %v465_v61, %v2325_v2  ;;  %1729 = vmatprep.mubr.bf16.mxu0 %v2271_v21  ;;  %vm1413_vm2 = vcmp.lt.s32.totalorder %v227_v3, 64 }
  0x33   : > { %2083 = vst [vmem:[#allocation17 + $0x20] sm:$0xff] %v2082_v50   ;;  %379 = vst [vmem:[#allocation17 + $0x2c] sm:$0xf] %v377_v55  ;;  %v2092_v6 = vpack.c.bf16 %v2091_v57, %v423_v5  ;;  %v519_v8 = vsel %vm230_vm1, %v513_v62, %v2325_v2  ;;  %v567_v9 = vsel %vm230_vm1, %v561_v0, %v2325_v2  ;;  %v2265_v16 = vld [vmem:[#allocation18 + $0x30] sm:$0xff]  }
  0x34   : > { %2221 = vmatpush3.bf16.msra.mxu1 %v2261_v37  ;;  %v473_v12 = vpack.c.bf16 %v2288_v31, %v471_v7  ;;  %v2102_v13 = vpack.c.bf16 %v2101_v63, %v519_v8  ;;  %v569_v14 = vpack.c.bf16 %v2288_v31, %v567_v9  ;;  %v1410_v37 = vld [vmem:[%s2641_s3] sm:$0x1] }
  0x35   : > { %2171 = vmatpush3.bf16.msra.mxu0 %v2262_v60  ;;  %2222 = vmatprep.subr.bf16.mxu1 %v2264_v47  ;;  %2093 = vst [vmem:[#allocation17 + $0x38] sm:$0xff] %v2092_v6   ;;  %v2266_v18 = vld [vmem:[#allocation18 + $0x78] sm:$0xff]  }
  0x36   : > { %2172 = vmatprep.subr.bf16.mxu0 %v2263_v4  ;;  %475 = vst [vmem:[#allocation17 + $0x44] sm:$0xf] %v473_v12  ;;  %2103 = vst [vmem:[#allocation17 + $0x50] sm:$0xff] %v2102_v13   ;;  %v2268_v20 = vld [vmem:[#allocation18 + $0x38] sm:$0xff]  }
  0x37   : > { %571 = vst [vmem:[#allocation17 + $0x5c] sm:$0xf] %v569_v14 }
  0x38   : > { %2223 = vmatpush3.bf16.msra.mxu1 %v2264_v47 }
  0x39   : > { %2173 = vmatpush3.bf16.msra.mxu0 %v2265_v16  ;;  %2224 = vmatprep.subr.bf16.mxu1 %v2267_v11  ;;  %v2273_v22 = vld [vmem:[#allocation17 + $0x8] ss:$12 sps:$4 sm:$0xff]   ;;  %v2269_v23 = vld [vmem:[#allocation17] ss:$12 sps:$4 sm:$0xff]  }
  0x3a   : > { %2174 = vmatprep.subr.bf16.mxu0 %v2266_v18  ;;  %2228 = vmatprep.mubr.bf16.mxu1 %v2273_v22  ;;  %v1424_v31 = vld [vmem:[#allocation17 + $0x24] sm:$0xff]  ;;  %v2274_v26 = vld [vmem:[#allocation17 + $0x20] ss:$12 sps:$4 sm:$0xff]  }
  0x3b   : > { %v2019_v24 = vcombine.high %v2554_v25, %v1424_v31  ;;  %v2018_v29 = vcombine.low %v2554_v25, %v1424_v31  ;;  %v1414_v25 = vsel %vm1413_vm2, %v1410_v37, %v20_v1 }
  0x3c   : > { %2225 = vmatpush3.bf16.msra.mxu1 %v2267_v11  ;;  %v1428_v28 = vld [vmem:[#allocation17 + $0x3c] sm:$0xff]  ;;  %1416 = vst [vmem:[#allocation19] sm:$0x1] %v1414_v25 }
  0x3d   : > { %2175 = vmatpush3.bf16.msra.mxu0 %v2268_v20  ;;  %2226 = vmatprep.subr.bf16.mxu1 %v2272_v19  ;;  %v2277_v27 = vld [vmem:[#allocation17 + $0x38] ss:$12 sps:$4 sm:$0xff]   ;;  %v2022_v30 = vcombine.high %v2583_v52, %v1428_v28  ;;  %v2021_v34 = vcombine.low %v2583_v52, %v1428_v28 }
  0x3e   : > { %v2278_v32 = vld [vmem:[#allocation17 + $0x50] ss:$12 sps:$4 sm:$0xff]   ;;  %v1432_v33 = vld [vmem:[#allocation17 + $0x54] sm:$0xff] }
  0x3f   : > { %v2025_v35 = vcombine.high %v2279_v10, %v1432_v33  ;;  %v2024_v36 = vcombine.low %v2279_v10, %v1432_v33 }
  0x40   : > { %1730 = vmatmul.mubr.bf16.vlgmr.msra.gmra.mrb[0].mxu0 %v2269_v23  ;;  %2227 = vmatpush3.bf16.msra.mxu1 %v2272_v19 }
  0x41   : > { %1737 = vmatprep.mubr.bf16.mxu0 %v2019_v24 }
  0x43   : > { %2229 = vmatmul.mubr.bf16.vlgmr.msra.gmra.mrb[0].mxu1 %v2274_v26  ;;  %v2615_v40 = vld [vmem:[#allocation19] ss:$0 sm:$0xff] }
  0x44   : > { %2232 = vmatprep.mubr.bf16.mxu1 %v2277_v27 }
  0x48   : > { %1738 = vmatmul.mubr.bf16.gmra.mrb[4].mxu0 %v2018_v29 }
  0x49   : > { %1745 = vmatprep.mubr.bf16.mxu0 %v2022_v30 }
  0x4b   : > { %2233 = vmatmul.mubr.bf16.gmra.mrb[4].mxu1 %v2278_v32 }
  0x50   : > { %1746 = vmatmul.mubr.bf16.gmra.mrb[8].mxu0 %v2021_v34 }
  0x51   : > { %1753 = vmatprep.mubr.bf16.mxu0 %v2025_v35 }
  0x58   : > { %1754 = vmatmul.mubr.bf16.gmra.mrb[12].mxu0 %v2024_v36 }
 0x113   : > { %v2176_v38 = vpop.f32.mrb[0].mxu0 }
 0x114   : > { %v2177_v39 = vpop.f32.mrb[1].mxu0 }
 0x115   : > { %v2178_v41 = vadd.f32 %v2177_v39, %v2176_v38  ;;  %v2179_v42 = vpop.f32.mrb[2].mxu0 }
 0x116   : > { %v2180_v15 = vpop.f32.mrb[3].mxu0  ;;  %v2230_v43 = vpop.f32.mrb[0].mxu1 }
 0x117   : > { %v2181_v44 = vadd.f32 %v2180_v15, %v2179_v42  ;;  %v1732_v45 = vadd.f32 %v2178_v41, %v2615_v40  ;;  %v1796_v46 = vpop.f32.mrb[1].mxu1 }
 0x118   : > { %v2231_v3 = vpop.f32.mrb[2].mxu1 }
 0x119   : > { %v1797_v47 = vadd.f32 %v1796_v46, %v1732_v45  ;;  %v1735_v48 = vadd.f32 %v2181_v44, %v2615_v40  ;;  %v1799_v49 = vpop.f32.mrb[3].mxu1 }
 0x11b   : > { %v1835_v50 = vmul.f32 0.1, %v1797_v47  ;;  %v1800_v51 = vadd.f32 %v1799_v49, %v1735_v48  ;;  %v2182_v52 = vpop.f32.mrb[4].mxu0  ;;  %vm1827_vm3 = vcmp.gt.f32.partialorder %v1797_v47, 0.0 }
 0x11c   : > { %v2183_v53 = vpop.f32.mrb[5].mxu0 }
 0x11d   : > { %vm1828_vm4 = vcmp.gt.f32.partialorder %v1800_v51, 0.0  ;;  %v1836_v54 = vmul.f32 0.1, %v1800_v51  ;;  %v2184_v55 = vadd.f32 %v2183_v53, %v2182_v52  ;;  %v2185_v56 = vpop.f32.mrb[6].mxu0  ;;  %v1843_v59 = vsel %vm1827_vm3, %v1797_v47, %v1835_v50 }
 0x11e   : > { %v2186_v57 = vpop.f32.mrb[7].mxu0  ;;  %v2234_v58 = vpop.f32.mrb[4].mxu1 }
 0x11f   : > { %v1844_v60 = vsel %vm1828_vm4, %v1800_v51, %v1836_v54  ;;  %v1740_v61 = vadd.f32 %v2184_v55, %v2615_v40  ;;  %v2187_v62 = vadd.f32 %v2186_v57, %v2185_v56  ;;  %v1812_v63 = vpop.f32.mrb[5].mxu1 }
 0x120   : > { %v2137_v0 = vpack.c.bf16 %v1844_v60, %v1843_v59  ;;  %v2235_v4 = vpop.f32.mrb[6].mxu1 }
 0x121   : > { %v1805_v5 = vadd.f32 %v2230_v43, %v1740_v61  ;;  %v1743_v6 = vadd.f32 %v2187_v62, %v2615_v40  ;;  %v1815_v7 = vpop.f32.mrb[7].mxu1 }
 0x122   : > { %2138 = vst [vmem:[%s2623_s23] sm:$0xff] %v2137_v0  }
 0x123   : > { %v1837_v8 = vmul.f32 0.1, %v1805_v5  ;;  %v1808_v9 = vadd.f32 %v2231_v3, %v1743_v6  ;;  %v2188_v10 = vpop.f32.mrb[8].mxu0  ;;  %vm1829_vm5 = vcmp.gt.f32.partialorder %v1805_v5, 0.0 }
 0x124   : > { %v2189_v11 = vpop.f32.mrb[9].mxu0 }
 0x125   : > { %vm1830_vm6 = vcmp.gt.f32.partialorder %v1808_v9, 0.0  ;;  %v1838_v12 = vmul.f32 0.1, %v1808_v9  ;;  %v2190_v13 = vadd.f32 %v2189_v11, %v2188_v10  ;;  %v2191_v14 = vpop.f32.mrb[10].mxu0  ;;  %v1845_v17 = vsel %vm1829_vm5, %v1805_v5, %v1837_v8 }
 0x126   : > { %v2192_v16 = vpop.f32.mrb[11].mxu0 }
 0x127   : > { %v1846_v18 = vsel %vm1830_vm6, %v1808_v9, %v1838_v12  ;;  %v2193_v19 = vadd.f32 %v2192_v16, %v2191_v14  ;;  %v1748_v20 = vadd.f32 %v2190_v13, %v2615_v40 }
 0x128   : > { %v2142_v21 = vpack.c.bf16 %v1846_v18, %v1845_v17 }
 0x129   : > { %v1813_v22 = vadd.f32 %v1812_v63, %v1748_v20  ;;  %v1751_v31 = vadd.f32 %v2193_v19, %v2615_v40 }
 0x12a   : > { %2157 = vst [vmem:[%s2623_s23 + $0x8] sm:$0xff] %v2142_v21  }
 0x12b   : > { %v1839_v23 = vmul.f32 0.1, %v1813_v22  ;;  %v1816_v24 = vadd.f32 %v1815_v7, %v1751_v31  ;;  %v2194_v26 = vpop.f32.mrb[12].mxu0  ;;  %vm1831_vm7 = vcmp.gt.f32.partialorder %v1813_v22, 0.0 }
 0x12c   : > { %v2195_v27 = vpop.f32.mrb[13].mxu0 }
 0x12d   : > { %vm1832_vm8 = vcmp.gt.f32.partialorder %v1816_v24, 0.0  ;;  %v1840_v28 = vmul.f32 0.1, %v1816_v24  ;;  %v2196_v29 = vadd.f32 %v2195_v27, %v2194_v26  ;;  %v2197_v30 = vpop.f32.mrb[14].mxu0  ;;  %v1847_v33 = vsel %vm1831_vm7, %v1813_v22, %v1839_v23 }
 0x12e   : > { %v2198_v32 = vpop.f32.mrb[15].mxu0 }
 0x12f   : > { %v1848_v34 = vsel %vm1832_vm8, %v1816_v24, %v1840_v28  ;;  %v1756_v35 = vadd.f32 %v2196_v29, %v2615_v40  ;;  %v2199_v36 = vadd.f32 %v2198_v32, %v2197_v30 }
 0x130   : > { %v2147_v37 = vpack.c.bf16 %v1848_v34, %v1847_v33 }
 0x131   : > { %v1821_v25 = vadd.f32 %v2234_v58, %v1756_v35  ;;  %v1759_v38 = vadd.f32 %v2199_v36, %v2615_v40 }
 0x132   : > { %2158 = vst [vmem:[%s2623_s23 + $0x10] sm:$0xff] %v2147_v37  }
 0x133   : > { %v1841_v39 = vmul.f32 0.1, %v1821_v25  ;;  %v1824_v41 = vadd.f32 %v2235_v4, %v1759_v38  ;;  %vm1833_vm9 = vcmp.gt.f32.partialorder %v1821_v25, 0.0 }
 0x135   : > { %vm1834_vm10 = vcmp.gt.f32.partialorder %v1824_v41, 0.0  ;;  %v1842_v42 = vmul.f32 0.1, %v1824_v41  ;;  %v1849_v15 = vsel %vm1833_vm9, %v1821_v25, %v1841_v39 }
 0x137   : > { %v1850_v43 = vsel %vm1834_vm10, %v1824_v41, %v1842_v42 }
 0x138   : > { %v2152_v44 = vpack.c.bf16 %v1850_v43, %v1849_v15 }
 0x13a   : > { %2159 = vst [vmem:[%s2623_s23 + $0x18] sm:$0xff] %v2152_v44  }
 0x13b PF: > { %s26_s22 = sadd.s32 1, %s2286_s22  }
 0x13c   : > { %p23_p4 = scmp.ge.s32.totalorder %s26_s22, 4  }
 0x13e   :  { %25 = sbr.rel (!%p23_p4) target bundleno = 3 (0x3), region = 190 }

// kernel: build_model_forward.18
= control target key start
LH: loop header
LB: loop body
LE: loop exit
PB: predicated region body
PF: predicated region fallthrough
CT: control target
= control target key end

     0   :  { %s2168_s17 = smov 0   ;;  %s2306_s0 = inlined_call_operand.vmem [shape: bf16[576,128], index: 0, kind: input, shape index: {}]   ;;  %s2307_s1 = inlined_call_operand.<no memory space> [shape: bf16[], index: 1, kind: input, shape index: {}]   ;;  %s2308_s2 = inlined_call_operand.vmem [shape: bf16[32,576], index: 2, kind: input, shape index: {}]   ;;  %s2309_s3 = inlined_call_operand.vmem [shape: f32[128], index: 3, kind: input, shape index: {}]   ;;  %s2310_s4 = inlined_call_operand.vmem [shape: bf16[32,128], index: 4, kind: output, shape index: {}]  }
   0x1   :  { %v9_v0 = vstv %s2307_s1 }
   0x2   :  { %v2166_v1 = vunpack.i.l.bf16 %v9_v0 }
   0x3 LB: > { %s1570_s18 = sadd.s32 4294967295, %s2134_s17   ;;  %p1574_p0 = scmp.ge.s32.totalorder %s2134_s17, 1  ;;  %s2134_s17 = sphi %s2168_s17, %s24_s17  }
   0x4   : > { %p150_p1 = scmp.lt.s32.totalorder %s2134_s17, 3 }
   0x6   : > { %p151_p2 = pnand %p1574_p0, %p150_p1 }
   0x8   : > { %154 = sbr.rel (%p151_p2) target bundleno = 310 (0x136), region = 32 }
   0xf   : > { %v2047_v2 = vld [vmem:[%s2306_s0 + $0x40] sm:$0xff]   ;;  %v1904_v3 = vpack.c.bf16 %v2166_v1, %v2166_v1  ;;  %v2054_v7 = vld [vmem:[%s2306_s0 + $0x48] sm:$0xff]   ;;  %v2062_v11 = vld [vmem:[%s2306_s0 + $0x50] sm:$0xff]   ;;  %s1575_s11 = sshll.u32 %s1570_s18, 1  ;;  %v251_v49 = vlaneseq  ;;  %vm2137_vm1 = vmmov 0  }
  0x10   : > { %v334_v4 = vld [vmem:[%s2306_s0] sm:$0xff]   ;;  %1765 = vst [vmem:[#allocation13 + $0x40] sm:$0xff] %v2047_v2   ;;  %v2056_v8 = vld [vmem:[%s2306_s0 + $0x8] sm:$0xff]   ;;  %1770 = vst [vmem:[#allocation13 + $0x48] sm:$0xff] %v2054_v7   ;;  %p176_p3 = scmp.lt.s32.totalorder %s1575_s11, 3 }
  0x11   : > { %339 = vst [vmem:[#allocation13] sm:$0xff] %v334_v4   ;;  %v2050_v5 = vld [vmem:[%s2306_s0 + $0xc0] sm:$0xff]   ;;  %1905 = vst [vmem:[#allocation13 + $0x120] sm:$0xff] %v1904_v3   ;;  %v2058_v9 = vld [vmem:[%s2306_s0 + $0xc8] sm:$0xff]   ;;  %v252_v54 = vand.u32 127, %v251_v49 }
  0x12   : > { %1910 = vst [vmem:[#allocation13 + $0x128] sm:$0xff] %v1904_v3   ;;  %1915 = vst [vmem:[#allocation13 + $0x130] sm:$0xff] %v1904_v3   ;;  %v2052_v6 = vld [vmem:[%s2306_s0 + $0x80] sm:$0xff]   ;;  %v2060_v10 = vld [vmem:[%s2306_s0 + $0x88] sm:$0xff]   ;;  %s2312_s11 = smov (!%p176_p3, %s1575_s11), 3 }
  0x13   : > { %1920 = vst [vmem:[#allocation13 + $0x138] sm:$0xff] %v1904_v3   ;;  %1845 = vst [vmem:[#allocation13 + $0xc0] sm:$0xff] %v2050_v5   ;;  %v2064_v21 = vld [vmem:[%s2306_s0 + $0x10] sm:$0xff]   ;;  %v2070_v24 = vld [vmem:[%s2306_s0 + $0x58] sm:$0xff]   ;;  %s2036_s22 = smul.u32 20, %s2312_s11  ;;  %v253_v59 = vadd.s32 512, %v252_v54 }
  0x14   : > { %1805 = vst [vmem:[#allocation13 + $0x80] sm:$0xff] %v2052_v6   ;;  %1730 = vst [vmem:[#allocation13 + $0x8] sm:$0xff] %v2056_v8   ;;  %v2066_v22 = vld [vmem:[%s2306_s0 + $0xd0] sm:$0xff]   ;;  %v2072_v25 = vld [vmem:[%s2306_s0 + $0x18] sm:$0xff]   ;;  %s1578_s21 = sshll.u32 %s2312_s11, 2 }
  0x15   : > { %1850 = vst [vmem:[#allocation13 + $0xc8] sm:$0xff] %v2058_v9   ;;  %1810 = vst [vmem:[#allocation13 + $0x88] sm:$0xff] %v2060_v10   ;;  %v2068_v23 = vld [vmem:[%s2306_s0 + $0x90] sm:$0xff]   ;;  %v2074_v26 = vld [vmem:[%s2306_s0 + $0xd8] sm:$0xff]   ;;  %s180_s27 = scalar_lea.vmem %s2308_s2, %s2036_s22  ;;  %vm254_vm0 = vcmp.lt.s32.totalorder %v253_v59, 576  ;;  %s186_s24 = scalar_lea.vmem %s2310_s4, %s1578_s21 }
  0x16   : > { %1775 = vst [vmem:[#allocation13 + $0x50] sm:$0xff] %v2062_v11   ;;  %1735 = vst [vmem:[#allocation13 + $0x10] sm:$0xff] %v2064_v21   ;;  %v2076_v27 = vld [vmem:[%s2306_s0 + $0x98] sm:$0xff]   ;;  %v2078_v28 = vld [vmem:[%s2306_s0 + $0x60] sm:$0xff]  }
  0x17   : > { %v2048_v12 = vld [vmem:[#allocation13 + $0x40] sm:$0xff]   ;;  %v2055_v16 = vld [vmem:[#allocation13 + $0x48] sm:$0xff]   ;;  %1855 = vst [vmem:[#allocation13 + $0xd0] sm:$0xff] %v2066_v22   ;;  %1815 = vst [vmem:[#allocation13 + $0x90] sm:$0xff] %v2068_v23  }
  0x18   : > { %v2049_v13 = vld [vmem:[#allocation13] sm:$0xff]   ;;  %1963 = vmatprep.subr.bf16.mxu0 %v2048_v12  ;;  %1780 = vst [vmem:[#allocation13 + $0x58] sm:$0xff] %v2070_v24   ;;  %1740 = vst [vmem:[#allocation13 + $0x18] sm:$0xff] %v2072_v25   ;;  %v2080_v29 = vld [vmem:[%s2306_s0 + $0x20] sm:$0xff]  }
  0x19   : > { %1964 = vmatpush3.bf16.msra.mxu0 %v2049_v13  ;;  %1860 = vst [vmem:[#allocation13 + $0xd8] sm:$0xff] %v2074_v26   ;;  %1820 = vst [vmem:[#allocation13 + $0x98] sm:$0xff] %v2076_v27   ;;  %v2082_v39 = vld [vmem:[%s2306_s0 + $0xe0] sm:$0xff]   ;;  %v2086_v41 = vld [vmem:[%s2306_s0 + $0x68] sm:$0xff]  }
  0x1a   : > { %v2051_v14 = vld [vmem:[#allocation13 + $0xc0] sm:$0xff]   ;;  %1965 = vmatprep.subr.bf16.mxu0 %v2055_v16  ;;  %1785 = vst [vmem:[#allocation13 + $0x60] sm:$0xff] %v2078_v28   ;;  %1745 = vst [vmem:[#allocation13 + $0x20] sm:$0xff] %v2080_v29   ;;  %v2084_v40 = vld [vmem:[%s2306_s0 + $0xa0] sm:$0xff]   ;;  %v2136_v16 = vmov 0.0  }
  0x1b   : > { %v2053_v15 = vld [vmem:[#allocation13 + $0x80] sm:$0xff]   ;;  %1985 = vmatprep.subr.bf16.mxu1 %v2051_v14  ;;  %v2057_v17 = vld [vmem:[#allocation13 + $0x8] sm:$0xff]   ;;  %1865 = vst [vmem:[#allocation13 + $0xe0] sm:$0xff] %v2082_v39   ;;  %1825 = vst [vmem:[#allocation13 + $0xa0] sm:$0xff] %v2084_v40  }
  0x1c   : > { %1986 = vmatpush3.bf16.msra.mxu1 %v2053_v15  ;;  %v2059_v18 = vld [vmem:[#allocation13 + $0xc8] sm:$0xff]   ;;  %v2088_v42 = vld [vmem:[%s2306_s0 + $0x28] sm:$0xff]   ;;  %1790 = vst [vmem:[#allocation13 + $0x68] sm:$0xff] %v2086_v41   ;;  %v2102_v61 = vld [vmem:[%s2306_s0 + $0x78] sm:$0xff]  }
  0x1d   : > { %1966 = vmatpush3.bf16.msra.mxu0 %v2057_v17  ;;  %v2061_v19 = vld [vmem:[#allocation13 + $0x88] sm:$0xff]   ;;  %1987 = vmatprep.subr.bf16.mxu1 %v2059_v18  ;;  %v2063_v20 = vld [vmem:[#allocation13 + $0x50] sm:$0xff]   ;;  %v2090_v43 = vld [vmem:[%s2306_s0 + $0xe8] sm:$0xff]   ;;  %1750 = vst [vmem:[#allocation13 + $0x28] sm:$0xff] %v2088_v42  }
  0x1e   : > { %1967 = vmatprep.subr.bf16.mxu0 %v2063_v20  ;;  %v2065_v30 = vld [vmem:[#allocation13 + $0x10] sm:$0xff]   ;;  %v2092_v44 = vld [vmem:[%s2306_s0 + $0xa8] sm:$0xff]   ;;  %1870 = vst [vmem:[#allocation13 + $0xe8] sm:$0xff] %v2090_v43   ;;  %v2094_v45 = vld [vmem:[%s2306_s0 + $0x70] sm:$0xff]  }
  0x1f   : > { %v2067_v31 = vld [vmem:[#allocation13 + $0xd0] sm:$0xff]   ;;  %v2071_v33 = vld [vmem:[#allocation13 + $0x58] sm:$0xff]   ;;  %1830 = vst [vmem:[#allocation13 + $0xa8] sm:$0xff] %v2092_v44   ;;  %v2096_v46 = vld [vmem:[%s2306_s0 + $0x30] sm:$0xff]  }
  0x20   : > { %1988 = vmatpush3.bf16.msra.mxu1 %v2061_v19  ;;  %v2069_v32 = vld [vmem:[#allocation13 + $0x90] sm:$0xff]   ;;  %v2073_v34 = vld [vmem:[#allocation13 + $0x18] sm:$0xff]   ;;  %1795 = vst [vmem:[#allocation13 + $0x70] sm:$0xff] %v2094_v45   ;;  %v2098_v47 = vld [vmem:[%s2306_s0 + $0xf0] sm:$0xff]  }
  0x21   : > { %1968 = vmatpush3.bf16.msra.mxu0 %v2065_v30  ;;  %1989 = vmatprep.subr.bf16.mxu1 %v2067_v31  ;;  %v2075_v35 = vld [vmem:[#allocation13 + $0xd8] sm:$0xff]   ;;  %v2079_v37 = vld [vmem:[#allocation13 + $0x60] sm:$0xff]   ;;  %1755 = vst [vmem:[#allocation13 + $0x30] sm:$0xff] %v2096_v46   ;;  %1875 = vst [vmem:[#allocation13 + $0xf0] sm:$0xff] %v2098_v47  }
  0x22   : > { %1969 = vmatprep.subr.bf16.mxu0 %v2071_v33  ;;  %v2077_v36 = vld [vmem:[#allocation13 + $0x98] sm:$0xff]   ;;  %v2081_v38 = vld [vmem:[#allocation13 + $0x20] sm:$0xff]   ;;  %v2100_v60 = vld [vmem:[%s2306_s0 + $0xb0] sm:$0xff]   ;;  %1800 = vst [vmem:[#allocation13 + $0x78] sm:$0xff] %v2102_v61  }
  0x23   : > { %v2083_v48 = vld [vmem:[#allocation13 + $0xe0] sm:$0xff]   ;;  %v2087_v51 = vld [vmem:[#allocation13 + $0x68] sm:$0xff]   ;;  %1835 = vst [vmem:[#allocation13 + $0xb0] sm:$0xff] %v2100_v60   ;;  %v2104_v62 = vld [vmem:[%s2306_s0 + $0x38] sm:$0xff]  }
  0x24   : > { %1990 = vmatpush3.bf16.msra.mxu1 %v2069_v32  ;;  %v2085_v50 = vld [vmem:[#allocation13 + $0xa0] sm:$0xff]   ;;  %v2089_v52 = vld [vmem:[#allocation13 + $0x28] sm:$0xff]   ;;  %v2106_v63 = vld [vmem:[%s2306_s0 + $0xf8] sm:$0xff]   ;;  %1760 = vst [vmem:[#allocation13 + $0x38] sm:$0xff] %v2104_v62  }
  0x25   : > { %1970 = vmatpush3.bf16.msra.mxu0 %v2073_v34  ;;  %1991 = vmatprep.subr.bf16.mxu1 %v2075_v35  ;;  %v2091_v53 = vld [vmem:[#allocation13 + $0xe8] sm:$0xff]   ;;  %v188_v0 = vld [vmem:[%s180_s27] sm:$0xff]   ;;  %v2108_v5 = vld [vmem:[%s180_s27 + $0x18] sm:$0xff]   ;;  %1880 = vst [vmem:[#allocation13 + $0xf8] sm:$0xff] %v2106_v63  }
  0x26   : > { %1971 = vmatprep.subr.bf16.mxu0 %v2079_v37  ;;  %v2093_v55 = vld [vmem:[#allocation13 + $0xa8] sm:$0xff]   ;;  %198 = vst [vmem:[#allocation12] sm:$0xff] %v188_v0   ;;  %v1587_v6 = vld [vmem:[%s180_s27 + $0x24] sm:$0xf]  ;;  %1725 = vst [vmem:[#allocation12 + $0x18] sm:$0xff] %v2108_v5  }
  0x27   : > { %v2095_v56 = vld [vmem:[#allocation13 + $0x70] sm:$0xff]   ;;  %v1582_v2 = vld [vmem:[%s180_s27 + $0x10] sm:$0xff]   ;;  %v323_v8 = vunpack.c.l.bf16 %v1587_v6  ;;  %v2114_v11 = vld [vmem:[%s180_s27 + $0x8] sm:$0xff]  }
  0x28   : > { %1992 = vmatpush3.bf16.msra.mxu1 %v2077_v36  ;;  %v2097_v57 = vld [vmem:[#allocation13 + $0x30] sm:$0xff]   ;;  %v249_v3 = vunpack.c.l.bf16 %v1582_v2  ;;  %v1718_v4 = vunpack.c.h.bf16 %v1582_v2  ;;  %v1586_v12 = vld [vmem:[%s180_s27 + $0x20] sm:$0xf]  ;;  %v2117_v21 = vld [vmem:[%s2306_s0 + $0x108] sm:$0xff]  }
  0x29   : > { %1972 = vmatpush3.bf16.msra.mxu0 %v2081_v38  ;;  %1993 = vmatprep.subr.bf16.mxu1 %v2083_v48  ;;  %v2099_v58 = vld [vmem:[#allocation13 + $0xf0] sm:$0xff]   ;;  %v329_v13 = vsel %vm254_vm0, %v323_v8, %v2166_v1  ;;  %311 = vst [vmem:[#allocation12 + $0x20] sm:$0xf] %v1586_v12  ;;  %v2115_v14 = vld [vmem:[%s2306_s0 + $0x100] sm:$0xff]   ;;  %v2119_v22 = vld [vmem:[%s2306_s0 + $0x110] sm:$0xff]  }
  0x2a   : > { %1973 = vmatprep.subr.bf16.mxu0 %v2087_v51  ;;  %v255_v7 = vsel %vm254_vm0, %v249_v3, %v2166_v1  ;;  %v2112_v9 = vld [vmem:[%s2306_s0 + $0xb8] sm:$0xff]   ;;  %v331_v17 = vpack.c.bf16 %v2136_v16, %v329_v13  ;;  %v2103_v18 = vld [vmem:[#allocation13 + $0x78] sm:$0xff]   ;;  %1885 = vst [vmem:[#allocation13 + $0x100] sm:$0xff] %v2115_v14   ;;  %1890 = vst [vmem:[#allocation13 + $0x108] sm:$0xff] %v2117_v21  }
  0x2b   : > { %v1719_v10 = vpack.c.bf16 %v1718_v4, %v255_v7  ;;  %1840 = vst [vmem:[#allocation13 + $0xb8] sm:$0xff] %v2112_v9   ;;  %v2101_v15 = vld [vmem:[#allocation13 + $0xb0] sm:$0xff]   ;;  %v2105_v19 = vld [vmem:[#allocation13 + $0x38] sm:$0xff]   ;;  %1895 = vst [vmem:[#allocation13 + $0x110] sm:$0xff] %v2119_v22  }
  0x2c   : > { %1994 = vmatpush3.bf16.msra.mxu1 %v2085_v50  ;;  %333 = vst [vmem:[#allocation12 + $0x24] sm:$0xf] %v331_v17  ;;  %v2107_v20 = vld [vmem:[#allocation13 + $0xf8] sm:$0xff]   ;;  %v2121_v30 = vld [vmem:[%s2306_s0 + $0x118] sm:$0xff]   ;;  %v2123_v34 = vld [vmem:[#allocation13 + $0x120] sm:$0xff]  }
  0x2d   : > { %1974 = vmatpush3.bf16.msra.mxu0 %v2089_v52  ;;  %1995 = vmatprep.subr.bf16.mxu1 %v2091_v53  ;;  %1720 = vst [vmem:[#allocation12 + $0x10] sm:$0xff] %v1719_v10   ;;  %v2111_v25 = vld [vmem:[#allocation12 + $0x4] ss:$20 sps:$4 sm:$0xff]   ;;  %1900 = vst [vmem:[#allocation13 + $0x118] sm:$0xff] %v2121_v30   ;;  %v2124_v35 = vld [vmem:[#allocation13 + $0x128] sm:$0xff]  }
  0x2e   : > { %1975 = vmatprep.subr.bf16.mxu0 %v2095_v56  ;;  %1407 = vmatprep.mubr.bf16.mxu0 %v2111_v25  ;;  %v2125_v36 = vld [vmem:[#allocation13 + $0x130] sm:$0xff]   ;;  %v2126_v37 = vld [vmem:[#allocation13 + $0x138] sm:$0xff]  }
  0x2f   : > { %v1012_v39 = vld [vmem:[%s2309_s3] sm:$0x1] }
  0x30   : > { %1996 = vmatpush3.bf16.msra.mxu1 %v2093_v55  ;;  %v1020_v26 = vld [vmem:[#allocation12 + $0x1c] sm:$0xff]  ;;  %1014 = vst [vmem:[#allocation14] sm:$0x1] %v1012_v39 }
  0x31   : > { %1976 = vmatpush3.bf16.msra.mxu0 %v2097_v57  ;;  %1997 = vmatprep.subr.bf16.mxu1 %v2099_v58  ;;  %v1662_v27 = vcombine.low %v2114_v11, %v1020_v26  ;;  %v1663_v28 = vcombine.high %v2114_v11, %v1020_v26  ;;  %v2116_v29 = vld [vmem:[#allocation13 + $0x100] sm:$0xff]   ;;  %v2118_v31 = vld [vmem:[#allocation13 + $0x108] sm:$0xff]  }
  0x32   : > { %1977 = vmatprep.subr.bf16.mxu0 %v2103_v18  ;;  %v2113_v23 = vld [vmem:[#allocation13 + $0xb8] sm:$0xff]   ;;  %v2120_v32 = vld [vmem:[#allocation13 + $0x110] sm:$0xff]  }
  0x33   : > { %1448 = vmatprep.mubr.bf16.mxu1 %v1663_v28 }
  0x34   : > { %1998 = vmatpush3.bf16.msra.mxu1 %v2101_v15  ;;  %v2109_v24 = vld [vmem:[#allocation12] ss:$20 sps:$4 sm:$0xff]   ;;  %v2127_v38 = vld [vmem:[#allocation12 + $0x10] ss:$20 sps:$4 sm:$0xff]  }
  0x35   : > { %1978 = vmatpush3.bf16.msra.mxu0 %v2105_v19  ;;  %1999 = vmatprep.subr.bf16.mxu1 %v2107_v20  ;;  %v2122_v33 = vld [vmem:[#allocation13 + $0x118] sm:$0xff]  }
  0x36   : > { %2016 = vmatprep.subr.bf16.mxu0 %v2136_v16 }
  0x37   : > { %v1659_v41 = vld [vmem:[#allocation14] ss:$0 sm:$0xff] }
  0x38   : > { %2000 = vmatpush3.bf16.msra.mxu1 %v2113_v23  ;;  %1408 = vmatmul.mubr.bf16.vlgmr.msra.gmra.mrb[0].mxu0 %v2109_v24 }
  0x39   : > { %2017 = vmatpush3.bf16.msra.mxu0 %v2116_v29  ;;  %2032 = vmatprep.mubr.msk.bf16.mxu0 %vm2137_vm1, %v2136_v16 }
  0x3a   : > { %2018 = vmatprep.subr.bf16.mxu0 %v2136_v16 }
  0x3b   : > { %1449 = vmatmul.mubr.bf16.vlgmr.msra.gmra.mrb[0].mxu1 %v1662_v27 }
  0x3d   : > { %2019 = vmatpush3.bf16.msra.mxu0 %v2118_v31 }
  0x3e   : > { %2020 = vmatprep.subr.bf16.mxu0 %v2136_v16 }
  0x41   : > { %2021 = vmatpush3.bf16.msra.mxu0 %v2120_v32 }
  0x42   : > { %2022 = vmatprep.subr.bf16.mxu0 %v2136_v16 }
  0x45   : > { %2023 = vmatpush3.bf16.msra.mxu0 %v2122_v33 }
  0x46   : > { %2024 = vmatprep.subr.bf16.mxu0 %v2136_v16 }
  0x49   : > { %2025 = vmatpush3.bf16.msra.mxu0 %v2123_v34 }
  0x4a   : > { %2026 = vmatprep.subr.bf16.mxu0 %v2136_v16 }
  0x4d   : > { %2027 = vmatpush3.bf16.msra.mxu0 %v2124_v35 }
  0x4e   : > { %2028 = vmatprep.subr.bf16.mxu0 %v2136_v16 }
  0x51   : > { %2029 = vmatpush3.bf16.msra.mxu0 %v2125_v36 }
  0x52   : > { %2030 = vmatprep.subr.bf16.mxu0 %v2136_v16 }
  0x55   : > { %2031 = vmatpush3.bf16.msra.mxu0 %v2126_v37 }
  0x58   : > { %2033 = vmatmul.mubr.bf16.vlgmr.msra.gmra.mrb[4].mxu0 %v2127_v38 }
 0x10b   : > { %v1979_v40 = vpop.f32.mrb[0].mxu0 }
 0x10c   : > { %v1980_v42 = vpop.f32.mrb[1].mxu0 }
 0x10d   : > { %v1981_v43 = vadd.f32 %v1980_v42, %v1979_v40  ;;  %v1982_v44 = vpop.f32.mrb[2].mxu0 }
 0x10e   : > { %v2001_v45 = vpop.f32.mrb[0].mxu1  ;;  %v1983_v46 = vpop.f32.mrb[3].mxu0 }
 0x10f   : > { %v2002_v47 = vpop.f32.mrb[1].mxu1  ;;  %v1410_v48 = vadd.f32 %v1981_v43, %v1659_v41  ;;  %v1984_v49 = vadd.f32 %v1983_v46, %v1982_v44 }
 0x110   : > { %v2003_v50 = vadd.f32 %v2002_v47, %v2001_v45  ;;  %v2004_v51 = vpop.f32.mrb[2].mxu1 }
 0x111   : > { %v2005_v52 = vpop.f32.mrb[3].mxu1  ;;  %v1413_v53 = vadd.f32 %v1984_v49, %v1659_v41 }
 0x112   : > { %v2006_v54 = vadd.f32 %v2005_v52, %v2004_v51  ;;  %v1451_v55 = vadd.f32 %v2003_v50, %v1410_v48 }
 0x114   : > { %v1454_v56 = vadd.f32 %v2006_v54, %v1413_v53 }
 0x12b   : > { %v1491_v57 = vpop.f32.mrb[4].mxu0 }
 0x12c   : > { %v1492_v58 = vadd.f32 %v1491_v57, %v1451_v55  ;;  %v2034_v59 = vpop.f32.mrb[5].mxu0 }
 0x12d   : > { %v1494_v60 = vpop.f32.mrb[6].mxu0 }
 0x12e   : > { %v1500_v61 = vmul.f32 0.1, %v1492_v58  ;;  %v1495_v62 = vadd.f32 %v1494_v60, %v1454_v56  ;;  %v2035_v63 = vpop.f32.mrb[7].mxu0  ;;  %vm1498_vm2 = vcmp.gt.f32.partialorder %v1492_v58, 0.0 }
 0x130   : > { %vm1499_vm3 = vcmp.gt.f32.partialorder %v1495_v62, 0.0  ;;  %v1501_v0 = vmul.f32 0.1, %v1495_v62  ;;  %v1502_v2 = vsel %vm1498_vm2, %v1492_v58, %v1500_v61 }
 0x132   : > { %v1503_v3 = vsel %vm1499_vm3, %v1495_v62, %v1501_v0 }
 0x133   : > { %v1924_v4 = vpack.c.bf16 %v1503_v3, %v1502_v2 }
 0x135   : > { %1925 = vst [vmem:[%s186_s24] sm:$0xff] %v1924_v4  }
 0x136 PF: > { %s24_s17 = sadd.s32 1, %s2134_s17  }
 0x137   : > { %p21_p4 = scmp.ge.s32.totalorder %s24_s17, 4  }
 0x139   :  { %23 = sbr.rel (!%p21_p4) target bundleno = 3 (0x3), region = 230 }

// kernel: build_model_forward.15
= control target key start
LH: loop header
LB: loop body
LE: loop exit
PB: predicated region body
PF: predicated region fallthrough
CT: control target
= control target key end

     0   :  { %v242_v0 = vmov 0.0   ;;  %vm243_vm0 = vmmov 0   ;;  %s330_s1 = inlined_call_operand.vmem [shape: bf16[128,128], index: 1, kind: input, shape index: {}]   ;;  %s331_s0 = inlined_call_operand.vmem [shape: bf16[8,128], index: 0, kind: input, shape index: {}]   ;;  %s332_s2 = inlined_call_operand.vmem [shape: f32[1,128], index: 2, kind: input, shape index: {}]   ;;  %s333_s5 = inlined_call_operand.vmem [shape: f32[8,128], index: 5, kind: output, shape index: {0}]   ;;  %s334_s3 = inlined_call_operand.vmem [shape: f32[8,128], index: 3, kind: input, shape index: {}]   ;;  %s335_s4 = inlined_call_operand.vmem [shape: f32[8,128], index: 4, kind: input, shape index: {}]   ;;  %s336_s6 = inlined_call_operand.vmem [shape: f32[8,128], index: 6, kind: output, shape index: {1}]  }
   0x1   :  { %206 = vmatprep.subr.bf16.mxu0 %v242_v0  ;;  %v228_v1 = vld [vmem:[%s330_s1] sm:$0xff]   ;;  %222 = vmatprep.mubr.msk.bf16.mxu0 %vm243_vm0, %v242_v0  ;;  %v229_v2 = vld [vmem:[%s330_s1 + $0x8] sm:$0xff]   ;;  %v230_v3 = vld [vmem:[%s330_s1 + $0x10] sm:$0xff]  }
   0x2   :  { %207 = vmatpush3.bf16.msra.mxu0 %v228_v1  ;;  %v231_v4 = vld [vmem:[%s330_s1 + $0x18] sm:$0xff]   ;;  %v232_v5 = vld [vmem:[%s330_s1 + $0x20] sm:$0xff]   ;;  %v233_v6 = vld [vmem:[%s330_s1 + $0x28] sm:$0xff]  }
   0x3   :  { %208 = vmatprep.subr.bf16.mxu0 %v242_v0  ;;  %v234_v7 = vld [vmem:[%s330_s1 + $0x30] sm:$0xff]   ;;  %v235_v8 = vld [vmem:[%s330_s1 + $0x38] sm:$0xff]   ;;  %v23_v9 = vld [vmem:[%s331_s0] sm:$0xf] }
   0x4   :  { %v183_v10 = vld [vmem:[%s332_s2] ss:$0 sm:$0xff]  ;;  %v193_v17 = vld [vmem:[%s334_s3 + $0x1] ss:$0 sm:$0xff]  ;;  %v194_v23 = vld [vmem:[%s334_s3 + $0x3] ss:$0 sm:$0xff] }
   0x5   :  { %v146_v24 = vld [vmem:[%s335_s4] sm:$0xff] }
   0x6   :  { %209 = vmatpush3.bf16.msra.mxu0 %v229_v2  ;;  %v195_v28 = vld [vmem:[%s334_s3] ss:$0 sm:$0xff]  ;;  %v196_v30 = vld [vmem:[%s334_s3 + $0x2] ss:$0 sm:$0xff] }
   0x7   :  { %210 = vmatprep.subr.bf16.mxu0 %v242_v0 }
   0xa   :  { %211 = vmatpush3.bf16.msra.mxu0 %v230_v3 }
   0xb   :  { %212 = vmatprep.subr.bf16.mxu0 %v242_v0 }
   0xe   :  { %213 = vmatpush3.bf16.msra.mxu0 %v231_v4 }
   0xf   :  { %214 = vmatprep.subr.bf16.mxu0 %v242_v0 }
  0x12   :  { %215 = vmatpush3.bf16.msra.mxu0 %v232_v5 }
  0x13   :  { %216 = vmatprep.subr.bf16.mxu0 %v242_v0 }
  0x16   :  { %217 = vmatpush3.bf16.msra.mxu0 %v233_v6 }
  0x17   :  { %218 = vmatprep.subr.bf16.mxu0 %v242_v0 }
  0x1a   :  { %219 = vmatpush3.bf16.msra.mxu0 %v234_v7 }
  0x1b   :  { %220 = vmatprep.subr.bf16.mxu0 %v242_v0 }
  0x1e   :  { %221 = vmatpush3.bf16.msra.mxu0 %v235_v8 }
  0x21   :  { %223 = vmatmul.mubr.bf16.vlgmr.msra.gmra.mrb[0].mxu0 %v23_v9 }
  0xf4   :  { %v129_v11 = vpop.f32.mrb[0].mxu0 }
  0xf5   :  { %v130_v12 = vadd.f32 %v183_v10, %v129_v11  ;;  %v224_v13 = vpop.f32.mrb[1].mxu0 }
  0xf6   :  { %v132_v14 = vpop.f32.mrb[2].mxu0 }
  0xf7   :  { %135 = vst [vmem:[%s333_s5] sm:$0xff] %v130_v12  ;;  %v192_v15 = vmul.f32 -1.442695, %v130_v12  ;;  %v225_v16 = vpop.f32.mrb[3].mxu0  ;;  %v153_v18 = vmul.f32 %v193_v17, %v130_v12 }
  0xf9   :  { %236 = vpow2.f32 %v192_v15  ;;  %v154_v19 = vmul.f32 1.442695, %v153_v18 }
  0xfb   :  { %238 = vpow2.f32 %v154_v19 }
 0x103   :  { %v237_v20 = vpop.eup %236 }
 0x104   :  { %v143_v21 = vadd.f32 1.0, %v237_v20 }
 0x105   :  { %v239_v22 = vpop.eup %238 }
 0x106   :  { %240 = vrcp.f32 %v143_v21  ;;  %v160_v27 = vmul.f32 %v239_v22, %v194_v23 }
 0x108   :  { %v166_v32 = vmul.f32 %v193_v17, %v160_v27 }
 0x110   :  { %v241_v25 = vpop.eup %240 }
 0x111   :  { %v147_v26 = vadd.f32 %v241_v25, %v146_v24  ;;  %v172_v34 = vmul.f32 %v241_v25, %v196_v30 }
 0x113   :  { %v148_v29 = vmul.f32 32.0, %v147_v26 }
 0x115   :  { %v165_v31 = vmul.f32 %v195_v28, %v148_v29 }
 0x117   :  { %v167_v33 = vadd.f32 %v166_v32, %v165_v31 }
 0x119   :  { %v173_v35 = vadd.f32 %v172_v34, %v167_v33 }
 0x11b   :  { %174 = vst [vmem:[%s336_s6] sm:$0xff] %v173_v35 }

// kernel: build_model_forward.20
= control target key start
LH: loop header
LB: loop body
LE: loop exit
PB: predicated region body
PF: predicated region fallthrough
CT: control target
= control target key end

     0   :  { %s1687_s0 = inlined_call_operand.vmem [shape: bf16[1152,128], index: 0, kind: input, shape index: {}]   ;;  %s1688_s1 = inlined_call_operand.vmem [shape: bf16[8,1152], index: 1, kind: input, shape index: {}]   ;;  %s1689_s2 = inlined_call_operand.<no memory space> [shape: bf16[], index: 2, kind: input, shape index: {}]   ;;  %s1690_s3 = inlined_call_operand.vmem [shape: f32[128], index: 3, kind: input, shape index: {}]   ;;  %s1691_s4 = inlined_call_operand.vmem [shape: bf16[16,128], index: 4, kind: output, shape index: {}]  }
   0x1   :  { %v9_v0 = vstv %s1689_s2 }
   0x2   :  { %v1445_v1 = vunpack.i.l.bf16 %v9_v0 }
   0x3   :  { %v1336_v2 = vld [vmem:[%s1687_s0 + $0x40] sm:$0xff]   ;;  %v1340_v7 = vld [vmem:[%s1687_s0 + $0x48] sm:$0xff]   ;;  %v1344_v11 = vld [vmem:[%s1687_s0 + $0x50] sm:$0xff]   ;;  %vm1416_vm0 = vmmov 0  }
   0x4   :  { %v1192_v3 = vpack.c.bf16 %v1445_v1, %v1445_v1  ;;  %v1337_v4 = vld [vmem:[%s1687_s0] sm:$0xff]   ;;  %1217 = vmatprep.subr.bf16.mxu0 %v1336_v2  ;;  %v1341_v8 = vld [vmem:[%s1687_s0 + $0x8] sm:$0xff]   ;;  %v1345_v12 = vld [vmem:[%s1687_s0 + $0x10] sm:$0xff]  }
   0x5   :  { %v1338_v5 = vld [vmem:[%s1687_s0 + $0xc0] sm:$0xff]   ;;  %1218 = vmatpush3.bf16.msra.mxu0 %v1337_v4  ;;  %v1342_v9 = vld [vmem:[%s1687_s0 + $0xc8] sm:$0xff]   ;;  %v1346_v13 = vld [vmem:[%s1687_s0 + $0xd0] sm:$0xff]  }
   0x6   :  { %1193 = vst [vmem:[#allocation7 + $0x28] sm:$0xff] %v1192_v3   ;;  %1198 = vst [vmem:[#allocation7 + $0x30] sm:$0xff] %v1192_v3   ;;  %v1339_v6 = vld [vmem:[%s1687_s0 + $0x80] sm:$0xff]   ;;  %1239 = vmatprep.subr.bf16.mxu1 %v1338_v5  ;;  %1219 = vmatprep.subr.bf16.mxu0 %v1340_v7  ;;  %v1343_v10 = vld [vmem:[%s1687_s0 + $0x88] sm:$0xff]  }
   0x7   :  { %1203 = vst [vmem:[#allocation7 + $0x38] sm:$0xff] %v1192_v3   ;;  %1208 = vst [vmem:[#allocation7 + $0x40] sm:$0xff] %v1192_v3   ;;  %1240 = vmatpush3.bf16.msra.mxu1 %v1339_v6  ;;  %v1347_v14 = vld [vmem:[%s1687_s0 + $0x90] sm:$0xff]   ;;  %v1348_v15 = vld [vmem:[%s1687_s0 + $0x58] sm:$0xff]  }
   0x8   :  { %1241 = vmatprep.subr.bf16.mxu1 %v1342_v9  ;;  %v1349_v16 = vld [vmem:[%s1687_s0 + $0x18] sm:$0xff]   ;;  %v1352_v19 = vld [vmem:[%s1687_s0 + $0x60] sm:$0xff]   ;;  %v1356_v23 = vld [vmem:[%s1687_s0 + $0x68] sm:$0xff]  }
   0x9   :  { %1220 = vmatpush3.bf16.msra.mxu0 %v1341_v8  ;;  %v1350_v17 = vld [vmem:[%s1687_s0 + $0xd8] sm:$0xff]   ;;  %v1353_v20 = vld [vmem:[%s1687_s0 + $0x20] sm:$0xff]   ;;  %v1357_v24 = vld [vmem:[%s1687_s0 + $0x28] sm:$0xff]  }
   0xa   :  { %1221 = vmatprep.subr.bf16.mxu0 %v1344_v11  ;;  %v1351_v18 = vld [vmem:[%s1687_s0 + $0x98] sm:$0xff]   ;;  %v1354_v21 = vld [vmem:[%s1687_s0 + $0xe0] sm:$0xff]   ;;  %v1358_v25 = vld [vmem:[%s1687_s0 + $0xe8] sm:$0xff]  }
   0xb   :  { %1242 = vmatpush3.bf16.msra.mxu1 %v1343_v10  ;;  %v1355_v22 = vld [vmem:[%s1687_s0 + $0xa0] sm:$0xff]   ;;  %v1359_v26 = vld [vmem:[%s1687_s0 + $0xa8] sm:$0xff]   ;;  %v1360_v27 = vld [vmem:[%s1687_s0 + $0x70] sm:$0xff]  }
   0xc   :  { %1243 = vmatprep.subr.bf16.mxu1 %v1346_v13  ;;  %v1361_v28 = vld [vmem:[%s1687_s0 + $0x30] sm:$0xff]   ;;  %v1364_v31 = vld [vmem:[%s1687_s0 + $0x78] sm:$0xff]   ;;  %v29_v34 = vld [vmem:[%s1688_s1] sm:$0xff]  }
   0xd   :  { %1222 = vmatpush3.bf16.msra.mxu0 %v1345_v12  ;;  %v1362_v29 = vld [vmem:[%s1687_s0 + $0xf0] sm:$0xff]   ;;  %v1365_v32 = vld [vmem:[%s1687_s0 + $0x38] sm:$0xff]   ;;  %v1082_v35 = vld [vmem:[%s1688_s1 + $0x20] sm:$0xf]  ;;  %34 = vst [vmem:[#allocation7] sm:$0xff] %v29_v34  }
   0xe   :  { %1223 = vmatprep.subr.bf16.mxu0 %v1348_v15  ;;  %v1363_v30 = vld [vmem:[%s1687_s0 + $0xb0] sm:$0xff]   ;;  %v1366_v33 = vld [vmem:[%s1687_s0 + $0xf8] sm:$0xff]   ;;  %v1185_v36 = vunpack.c.l.bf16 %v1082_v35  ;;  %v1371_v38 = vld [vmem:[%s1687_s0 + $0x140] sm:$0xff]  }
   0xf   :  { %1244 = vmatpush3.bf16.msra.mxu1 %v1347_v14  ;;  %v1370_v37 = vld [vmem:[%s1687_s0 + $0xb8] sm:$0xff]   ;;  %v1372_v40 = vld [vmem:[%s1688_s1 + $0x8] sm:$0xff]   ;;  %v1374_v44 = vld [vmem:[%s1687_s0 + $0x1c0] sm:$0xff]  }
  0x10   :  { %1245 = vmatprep.subr.bf16.mxu1 %v1350_v17  ;;  %v1187_v39 = vpack.c.bf16 %v1445_v1, %v1185_v36  ;;  %v217_v41 = vld [vmem:[#allocation7 + $0x2c] sm:$0xff]  ;;  %v1375_v45 = vld [vmem:[%s1687_s0 + $0x180] sm:$0xff]   ;;  %v1386_v57 = vld [vmem:[%s1687_s0 + $0x1d8] sm:$0xff]  }
  0x11   :  { %1224 = vmatpush3.bf16.msra.mxu0 %v1349_v16  ;;  %v1086_v42 = vcombine.low %v1372_v40, %v217_v41  ;;  %v1087_v43 = vcombine.high %v1372_v40, %v217_v41  ;;  %v1373_v46 = vld [vmem:[%s1687_s0 + $0x100] sm:$0xff]   ;;  %v1378_v47 = vld [vmem:[%s1687_s0 + $0x1c8] sm:$0xff]   ;;  %v1382_v53 = vld [vmem:[%s1687_s0 + $0x1d0] sm:$0xff]  }
  0x12   :  { %1225 = vmatprep.subr.bf16.mxu0 %v1352_v19  ;;  %1188 = vst [vmem:[#allocation7 + $0x20] sm:$0xff] %v1187_v39   ;;  %v1379_v48 = vld [vmem:[%s1687_s0 + $0x188] sm:$0xff]   ;;  %v1383_v54 = vld [vmem:[%s1687_s0 + $0x190] sm:$0xff]   ;;  %v1387_v58 = vld [vmem:[%s1687_s0 + $0x198] sm:$0xff]  }
  0x13   :  { %1246 = vmatpush3.bf16.msra.mxu1 %v1351_v18  ;;  %923 = vmatprep.mubr.bf16.mxu1 %v1087_v43  ;;  %v1376_v51 = vld [vmem:[%s1687_s0 + $0x148] sm:$0xff]   ;;  %v1380_v55 = vld [vmem:[%s1687_s0 + $0x150] sm:$0xff]   ;;  %v1384_v59 = vld [vmem:[%s1687_s0 + $0x158] sm:$0xff]  }
  0x14   :  { %1247 = vmatprep.subr.bf16.mxu1 %v1354_v21  ;;  %v1369_v50 = vld [vmem:[#allocation7 + $0x4] ss:$36 sps:$4 sm:$0xff]   ;;  %v1381_v56 = vld [vmem:[%s1687_s0 + $0x110] sm:$0xff]   ;;  %v1385_v60 = vld [vmem:[%s1687_s0 + $0x118] sm:$0xff]  }
  0x15   :  { %1226 = vmatpush3.bf16.msra.mxu0 %v1353_v20  ;;  %882 = vmatprep.mubr.bf16.mxu0 %v1369_v50  ;;  %v1377_v52 = vld [vmem:[%s1687_s0 + $0x108] sm:$0xff]   ;;  %v1390_v61 = vld [vmem:[%s1687_s0 + $0x1e0] sm:$0xff]   ;;  %v1398_v5 = vld [vmem:[%s1687_s0 + $0x1f0] sm:$0xff]  }
  0x16   :  { %1227 = vmatprep.subr.bf16.mxu0 %v1356_v23  ;;  %v1391_v62 = vld [vmem:[%s1687_s0 + $0x1a0] sm:$0xff]   ;;  %v1394_v1 = vld [vmem:[%s1687_s0 + $0x1e8] sm:$0xff]   ;;  %v1399_v6 = vld [vmem:[%s1687_s0 + $0x1b0] sm:$0xff]  }
  0x17   :  { %1248 = vmatpush3.bf16.msra.mxu1 %v1355_v22  ;;  %v1388_v63 = vld [vmem:[%s1687_s0 + $0x160] sm:$0xff]   ;;  %v1395_v2 = vld [vmem:[%s1687_s0 + $0x1a8] sm:$0xff]   ;;  %v1396_v7 = vld [vmem:[%s1687_s0 + $0x170] sm:$0xff]   ;;  %v1415_v22 = vmov 0.0  }
  0x18   :  { %1249 = vmatprep.subr.bf16.mxu1 %v1358_v25  ;;  %v1389_v0 = vld [vmem:[%s1687_s0 + $0x120] sm:$0xff]   ;;  %v1392_v3 = vld [vmem:[%s1687_s0 + $0x168] sm:$0xff]   ;;  %v1397_v8 = vld [vmem:[%s1687_s0 + $0x130] sm:$0xff]  }
  0x19   :  { %1228 = vmatpush3.bf16.msra.mxu0 %v1357_v24  ;;  %v1367_v49 = vld [vmem:[#allocation7] ss:$36 sps:$4 sm:$0xff]   ;;  %v1393_v4 = vld [vmem:[%s1687_s0 + $0x128] sm:$0xff]   ;;  %v1400_v9 = vld [vmem:[%s1687_s0 + $0x178] sm:$0xff]  }
  0x1a   :  { %1229 = vmatprep.subr.bf16.mxu0 %v1360_v27  ;;  %v1402_v10 = vld [vmem:[%s1687_s0 + $0x1f8] sm:$0xff]   ;;  %v1403_v11 = vld [vmem:[%s1688_s1 + $0x10] sm:$0xff]   ;;  %v1406_v21 = vld [vmem:[%s1687_s0 + $0x200] sm:$0xff]  }
  0x1b   :  { %1250 = vmatpush3.bf16.msra.mxu1 %v1359_v26  ;;  %v218_v12 = vld [vmem:[#allocation7 + $0x34] sm:$0xff]  ;;  %v219_v16 = vld [vmem:[#allocation7 + $0x3c] sm:$0xff]  ;;  %v1407_v23 = vld [vmem:[%s1687_s0 + $0x208] sm:$0xff]  }
  0x1c   :  { %1251 = vmatprep.subr.bf16.mxu1 %v1362_v29  ;;  %v1404_v13 = vld [vmem:[%s1687_s0 + $0x1b8] sm:$0xff]   ;;  %v1089_v14 = vcombine.high %v1403_v11, %v218_v12  ;;  %v1088_v20 = vcombine.low %v1403_v11, %v218_v12  ;;  %v1408_v24 = vld [vmem:[%s1687_s0 + $0x210] sm:$0xff]   ;;  %v1410_v26 = vld [vmem:[%s1687_s0 + $0x220] sm:$0xff]  }
  0x1d   :  { %1230 = vmatpush3.bf16.msra.mxu0 %v1361_v28  ;;  %v1405_v15 = vld [vmem:[%s1688_s1 + $0x18] sm:$0xff]   ;;  %v1411_v27 = vld [vmem:[%s1687_s0 + $0x228] sm:$0xff]   ;;  %v1412_v28 = vld [vmem:[%s1687_s0 + $0x230] sm:$0xff]  }
  0x1e   :  { %1231 = vmatprep.subr.bf16.mxu0 %v1364_v31  ;;  %v1401_v17 = vld [vmem:[%s1687_s0 + $0x138] sm:$0xff]   ;;  %v1090_v18 = vcombine.low %v1405_v15, %v219_v16  ;;  %v1091_v19 = vcombine.high %v1405_v15, %v219_v16  ;;  %v207_v31 = vld [vmem:[%s1690_s3] sm:$0x1] }
  0x1f   :  { %1252 = vmatpush3.bf16.msra.mxu1 %v1363_v30  ;;  %v1409_v25 = vld [vmem:[%s1687_s0 + $0x218] sm:$0xff]   ;;  %v1414_v30 = vld [vmem:[#allocation7 + $0x20] ss:$36 sps:$4 sm:$0xff]   ;;  %209 = vst [vmem:[#allocation8] sm:$0x1] %v207_v31 }
  0x20   :  { %1253 = vmatprep.subr.bf16.mxu1 %v1366_v33  ;;  %v1413_v29 = vld [vmem:[%s1687_s0 + $0x238] sm:$0xff]  }
  0x21   :  { %1232 = vmatpush3.bf16.msra.mxu0 %v1365_v32 }
  0x22   :  { %1261 = vmatprep.subr.bf16.mxu0 %v1371_v38 }
  0x23   :  { %1254 = vmatpush3.bf16.msra.mxu1 %v1370_v37 }
  0x24   :  { %1283 = vmatprep.subr.bf16.mxu1 %v1374_v44  ;;  %883 = vmatmul.mubr.bf16.vlgmr.msra.gmra.mrb[0].mxu0 %v1367_v49 }
  0x25   :  { %1262 = vmatpush3.bf16.msra.mxu0 %v1373_v46  ;;  %964 = vmatprep.mubr.bf16.mxu0 %v1089_v14 }
  0x26   :  { %924 = vmatmul.mubr.bf16.vlgmr.msra.gmra.mrb[0].mxu1 %v1086_v42  ;;  %1263 = vmatprep.subr.bf16.mxu0 %v1376_v51  ;;  %v1083_v39 = vld [vmem:[#allocation8] ss:$0 sm:$0xff] }
  0x27   :  { %1284 = vmatpush3.bf16.msra.mxu1 %v1375_v45  ;;  %1005 = vmatprep.mubr.bf16.mxu1 %v1091_v19 }
  0x28   :  { %1285 = vmatprep.subr.bf16.mxu1 %v1378_v47 }
  0x29   :  { %1264 = vmatpush3.bf16.msra.mxu0 %v1377_v52 }
  0x2a   :  { %1265 = vmatprep.subr.bf16.mxu0 %v1380_v55 }
  0x2b   :  { %1286 = vmatpush3.bf16.msra.mxu1 %v1379_v48 }
  0x2c   :  { %1287 = vmatprep.subr.bf16.mxu1 %v1382_v53 }
  0x2d   :  { %1266 = vmatpush3.bf16.msra.mxu0 %v1381_v56 }
  0x2e   :  { %1267 = vmatprep.subr.bf16.mxu0 %v1384_v59 }
  0x2f   :  { %1288 = vmatpush3.bf16.msra.mxu1 %v1383_v54 }
  0x30   :  { %1289 = vmatprep.subr.bf16.mxu1 %v1386_v57 }
  0x31   :  { %1268 = vmatpush3.bf16.msra.mxu0 %v1385_v60 }
  0x32   :  { %1269 = vmatprep.subr.bf16.mxu0 %v1388_v63 }
  0x33   :  { %1290 = vmatpush3.bf16.msra.mxu1 %v1387_v58 }
  0x34   :  { %1291 = vmatprep.subr.bf16.mxu1 %v1390_v61 }
  0x35   :  { %1270 = vmatpush3.bf16.msra.mxu0 %v1389_v0 }
  0x36   :  { %1271 = vmatprep.subr.bf16.mxu0 %v1392_v3 }
  0x37   :  { %1292 = vmatpush3.bf16.msra.mxu1 %v1391_v62 }
  0x38   :  { %1293 = vmatprep.subr.bf16.mxu1 %v1394_v1 }
  0x39   :  { %1272 = vmatpush3.bf16.msra.mxu0 %v1393_v4 }
  0x3a   :  { %1273 = vmatprep.subr.bf16.mxu0 %v1396_v7 }
  0x3b   :  { %1294 = vmatpush3.bf16.msra.mxu1 %v1395_v2 }
  0x3c   :  { %1295 = vmatprep.subr.bf16.mxu1 %v1398_v5 }
  0x3d   :  { %1274 = vmatpush3.bf16.msra.mxu0 %v1397_v8 }
  0x3e   :  { %1275 = vmatprep.subr.bf16.mxu0 %v1400_v9 }
  0x3f   :  { %1296 = vmatpush3.bf16.msra.mxu1 %v1399_v6 }
  0x40   :  { %1297 = vmatprep.subr.bf16.mxu1 %v1402_v10 }
  0x41   :  { %1276 = vmatpush3.bf16.msra.mxu0 %v1401_v17 }
  0x42   :  { %1314 = vmatprep.subr.bf16.mxu0 %v1415_v22 }
  0x43   :  { %1298 = vmatpush3.bf16.msra.mxu1 %v1404_v13 }
  0x44   :  { %965 = vmatmul.mubr.bf16.vlgmr.msra.gmra.mrb[4].mxu0 %v1088_v20 }
  0x45   :  { %1315 = vmatpush3.bf16.msra.mxu0 %v1406_v21  ;;  %1330 = vmatprep.mubr.msk.bf16.mxu0 %vm1416_vm0, %v1415_v22 }
  0x46   :  { %1006 = vmatmul.mubr.bf16.vlgmr.msra.gmra.mrb[4].mxu1 %v1090_v18  ;;  %1316 = vmatprep.subr.bf16.mxu0 %v1415_v22 }
  0x49   :  { %1317 = vmatpush3.bf16.msra.mxu0 %v1407_v23 }
  0x4a   :  { %1318 = vmatprep.subr.bf16.mxu0 %v1415_v22 }
  0x4d   :  { %1319 = vmatpush3.bf16.msra.mxu0 %v1408_v24 }
  0x4e   :  { %1320 = vmatprep.subr.bf16.mxu0 %v1415_v22 }
  0x51   :  { %1321 = vmatpush3.bf16.msra.mxu0 %v1409_v25 }
  0x52   :  { %1322 = vmatprep.subr.bf16.mxu0 %v1415_v22 }
  0x55   :  { %1323 = vmatpush3.bf16.msra.mxu0 %v1410_v26 }
  0x56   :  { %1324 = vmatprep.subr.bf16.mxu0 %v1415_v22 }
  0x59   :  { %1325 = vmatpush3.bf16.msra.mxu0 %v1411_v27 }
  0x5a   :  { %1326 = vmatprep.subr.bf16.mxu0 %v1415_v22 }
  0x5d   :  { %1327 = vmatpush3.bf16.msra.mxu0 %v1412_v28 }
  0x5e   :  { %1328 = vmatprep.subr.bf16.mxu0 %v1415_v22 }
  0x61   :  { %1329 = vmatpush3.bf16.msra.mxu0 %v1413_v29 }
  0x64   :  { %1331 = vmatmul.mubr.bf16.vlgmr.msra.gmra.mrb[8].mxu0 %v1414_v30 }
  0xf7   :  { %v1233_v38 = vpop.f32.mrb[0].mxu0 }
  0xf8   :  { %v1234_v40 = vpop.f32.mrb[1].mxu0 }
  0xf9   :  { %v1255_v32 = vpop.f32.mrb[0].mxu1  ;;  %v1235_v41 = vadd.f32 %v1234_v40, %v1233_v38  ;;  %v1236_v42 = vpop.f32.mrb[2].mxu0 }
  0xfa   :  { %v1256_v33 = vpop.f32.mrb[1].mxu1  ;;  %v1237_v43 = vpop.f32.mrb[3].mxu0 }
  0xfb   :  { %v1257_v34 = vadd.f32 %v1256_v33, %v1255_v32  ;;  %v1258_v35 = vpop.f32.mrb[2].mxu1  ;;  %v885_v44 = vadd.f32 %v1235_v41, %v1083_v39  ;;  %v1238_v45 = vadd.f32 %v1237_v43, %v1236_v42 }
  0xfc   :  { %v1259_v36 = vpop.f32.mrb[3].mxu1 }
  0xfd   :  { %v1260_v37 = vadd.f32 %v1259_v36, %v1258_v35  ;;  %v888_v46 = vadd.f32 %v1238_v45, %v1083_v39  ;;  %v926_v47 = vadd.f32 %v1257_v34, %v885_v44 }
  0xff   :  { %v929_v48 = vadd.f32 %v1260_v37, %v888_v46 }
 0x117   :  { %v1277_v54 = vpop.f32.mrb[4].mxu0 }
 0x118   :  { %v1278_v56 = vpop.f32.mrb[5].mxu0 }
 0x119   :  { %v1299_v49 = vpop.f32.mrb[4].mxu1  ;;  %v1279_v57 = vadd.f32 %v1278_v56, %v1277_v54  ;;  %v1280_v58 = vpop.f32.mrb[6].mxu0 }
 0x11a   :  { %v1300_v50 = vpop.f32.mrb[5].mxu1  ;;  %v1281_v59 = vpop.f32.mrb[7].mxu0 }
 0x11b   :  { %v1301_v51 = vadd.f32 %v1300_v50, %v1299_v49  ;;  %v1302_v52 = vpop.f32.mrb[6].mxu1  ;;  %v967_v60 = vadd.f32 %v1279_v57, %v926_v47  ;;  %v1282_v61 = vadd.f32 %v1281_v59, %v1280_v58 }
 0x11c   :  { %v1303_v53 = vpop.f32.mrb[7].mxu1 }
 0x11d   :  { %v1304_v55 = vadd.f32 %v1303_v53, %v1302_v52  ;;  %v970_v62 = vadd.f32 %v1282_v61, %v929_v48  ;;  %v1008_v63 = vadd.f32 %v1301_v51, %v967_v60 }
 0x11f   :  { %v1011_v0 = vadd.f32 %v1304_v55, %v970_v62 }
 0x137   :  { %v1048_v1 = vpop.f32.mrb[8].mxu0 }
 0x138   :  { %v1049_v2 = vadd.f32 %v1048_v1, %v1008_v63  ;;  %v1332_v3 = vpop.f32.mrb[9].mxu0 }
 0x139   :  { %v1051_v4 = vpop.f32.mrb[10].mxu0 }
 0x13a   :  { %v1057_v5 = vmul.f32 0.1, %v1049_v2  ;;  %v1052_v6 = vadd.f32 %v1051_v4, %v1011_v0  ;;  %v1333_v7 = vpop.f32.mrb[11].mxu0  ;;  %vm1055_vm1 = vcmp.gt.f32.partialorder %v1049_v2, 0.0 }
 0x13c   :  { %vm1056_vm2 = vcmp.gt.f32.partialorder %v1052_v6, 0.0  ;;  %v1058_v8 = vmul.f32 0.1, %v1052_v6  ;;  %v1059_v9 = vsel %vm1055_vm1, %v1049_v2, %v1057_v5 }
 0x13e   :  { %v1060_v10 = vsel %vm1056_vm2, %v1052_v6, %v1058_v8 }
 0x13f   :  { %v1212_v11 = vpack.c.bf16 %v1060_v10, %v1059_v9 }
 0x141   :  { %1213 = vst [vmem:[%s1691_s4] sm:$0xff] %v1212_v11  }

// kernel: build_model_forward.14
= control target key start
LH: loop header
LB: loop body
LE: loop exit
PB: predicated region body
PF: predicated region fallthrough
CT: control target
= control target key end

     0   :  { %s476_s1 = inlined_call_operand.vmem [shape: bf16[128,128], index: 1, kind: input, shape index: {}]   ;;  %s477_s0 = inlined_call_operand.vmem [shape: bf16[32,128], index: 0, kind: input, shape index: {}]   ;;  %s478_s2 = inlined_call_operand.vmem [shape: f32[1,128], index: 2, kind: input, shape index: {}]   ;;  %s479_s5 = inlined_call_operand.vmem [shape: f32[32,128], index: 5, kind: output, shape index: {0}]   ;;  %s480_s3 = inlined_call_operand.vmem [shape: f32[8,128], index: 3, kind: input, shape index: {}]   ;;  %s481_s4 = inlined_call_operand.vmem [shape: f32[32,128], index: 4, kind: input, shape index: {}]   ;;  %s482_s6 = inlined_call_operand.vmem [shape: f32[32,128], index: 6, kind: output, shape index: {1}]  }
   0x1   :  { %v316_v0 = vld [vmem:[%s476_s1] sm:$0xff]   ;;  %v317_v1 = vld [vmem:[%s476_s1 + $0x8] sm:$0xff]   ;;  %v318_v2 = vld [vmem:[%s476_s1 + $0x10] sm:$0xff]  }
   0x2   :  { %296 = vmatprep.subr.bf16.mxu0 %v316_v0  ;;  %v319_v3 = vld [vmem:[%s476_s1 + $0x18] sm:$0xff]   ;;  %v324_v4 = vld [vmem:[%s477_s0] sm:$0xff]   ;;  %v321_v6 = vld [vmem:[%s476_s1 + $0x28] sm:$0xff]  }
   0x3   :  { %297 = vmatpush3.bf16.msra.mxu0 %v316_v0  ;;  %312 = vmatprep.mubr.bf16.mxu0 %v324_v4  ;;  %v320_v5 = vld [vmem:[%s476_s1 + $0x20] sm:$0xff]   ;;  %v322_v7 = vld [vmem:[%s476_s1 + $0x30] sm:$0xff]   ;;  %v323_v8 = vld [vmem:[%s476_s1 + $0x38] sm:$0xff]  }
   0x4   :  { %298 = vmatprep.subr.bf16.mxu0 %v317_v1  ;;  %v325_v9 = vld [vmem:[%s477_s0 + $0x8] sm:$0xff]   ;;  %v267_v10 = vld [vmem:[%s478_s2] ss:$0 sm:$0xff]  ;;  %v427_v21 = vld [vmem:[%s480_s3 + $0x1] ss:$0 sm:$0xff] }
   0x5   :  { %v283_v41 = vld [vmem:[%s480_s3 + $0x3] ss:$0 sm:$0xff]  ;;  %v193_v42 = vld [vmem:[%s481_s4 + $0x10] sm:$0xff]  ;;  %v284_v50 = vld [vmem:[%s480_s3] ss:$0 sm:$0xff] }
   0x6   :  { %v191_v44 = vld [vmem:[%s481_s4] sm:$0xff]  ;;  %v194_v53 = vld [vmem:[%s481_s4 + $0x18] sm:$0xff]  ;;  %v192_v59 = vld [vmem:[%s481_s4 + $0x8] sm:$0xff] }
   0x7   :  { %299 = vmatpush3.bf16.msra.mxu0 %v317_v1  ;;  %v285_v57 = vld [vmem:[%s480_s3 + $0x2] ss:$0 sm:$0xff] }
   0x8   :  { %300 = vmatprep.subr.bf16.mxu0 %v318_v2 }
   0xb   :  { %301 = vmatpush3.bf16.msra.mxu0 %v318_v2 }
   0xc   :  { %302 = vmatprep.subr.bf16.mxu0 %v319_v3 }
   0xf   :  { %303 = vmatpush3.bf16.msra.mxu0 %v319_v3 }
  0x10   :  { %304 = vmatprep.subr.bf16.mxu0 %v320_v5 }
  0x13   :  { %305 = vmatpush3.bf16.msra.mxu0 %v320_v5 }
  0x14   :  { %306 = vmatprep.subr.bf16.mxu0 %v321_v6 }
  0x17   :  { %307 = vmatpush3.bf16.msra.mxu0 %v321_v6 }
  0x18   :  { %308 = vmatprep.subr.bf16.mxu0 %v322_v7 }
  0x1b   :  { %309 = vmatpush3.bf16.msra.mxu0 %v322_v7 }
  0x1c   :  { %310 = vmatprep.subr.bf16.mxu0 %v323_v8 }
  0x1f   :  { %311 = vmatpush3.bf16.msra.mxu0 %v323_v8 }
  0x22   :  { %313 = vmatmul.mubr.bf16.vlgmr.msra.gmra.mrb[0].mxu0 %v325_v9 }
  0xf5   :  { %v314_v11 = vpop.f32.mrb[0].mxu0 }
  0xf6   :  { %v153_v12 = vadd.f32 %v314_v11, %v267_v10  ;;  %v144_v13 = vpop.f32.mrb[1].mxu0 }
  0xf7   :  { %v145_v14 = vadd.f32 %v267_v10, %v144_v13  ;;  %v315_v15 = vpop.f32.mrb[2].mxu0 }
  0xf8   :  { %161 = vst [vmem:[%s479_s5 + $0x10] sm:$0xff] %v153_v12  ;;  %v280_v16 = vmul.f32 -1.442695, %v153_v12  ;;  %v156_v17 = vadd.f32 %v315_v15, %v267_v10  ;;  %v147_v18 = vpop.f32.mrb[3].mxu0  ;;  %v209_v24 = vmul.f32 %v427_v21, %v153_v12 }
  0xf9   :  { %159 = vst [vmem:[%s479_s5] sm:$0xff] %v145_v14  ;;  %v278_v19 = vmul.f32 -1.442695, %v145_v14  ;;  %v148_v20 = vadd.f32 %v267_v10, %v147_v18  ;;  %v207_v25 = vmul.f32 %v427_v21, %v145_v14 }
  0xfa   :  { %326 = vpow2.f32 %v280_v16  ;;  %162 = vst [vmem:[%s479_s5 + $0x18] sm:$0xff] %v156_v17  ;;  %v281_v22 = vmul.f32 -1.442695, %v156_v17  ;;  %v215_v26 = vmul.f32 1.442695, %v209_v24  ;;  %v210_v27 = vmul.f32 %v427_v21, %v156_v17 }
  0xfb   :  { %328 = vpow2.f32 %v278_v19  ;;  %160 = vst [vmem:[%s479_s5 + $0x8] sm:$0xff] %v148_v20  ;;  %v279_v23 = vmul.f32 -1.442695, %v148_v20  ;;  %v211_v28 = vmul.f32 1.442695, %v207_v25  ;;  %v208_v29 = vmul.f32 %v427_v21, %v148_v20 }
  0xfc   :  { %330 = vpow2.f32 %v281_v22  ;;  %v217_v33 = vmul.f32 1.442695, %v210_v27 }
  0xfd   :  { %332 = vpow2.f32 %v279_v23  ;;  %v213_v35 = vmul.f32 1.442695, %v208_v29 }
  0xfe   :  { %334 = vpow2.f32 %v215_v26 }
  0xff   :  { %336 = vpow2.f32 %v211_v28 }
 0x104   :  { %v327_v30 = vpop.eup %326 }
 0x105   :  { %v329_v31 = vpop.eup %328  ;;  %v181_v32 = vadd.f32 1.0, %v327_v30 }
 0x106   :  { %v179_v34 = vadd.f32 1.0, %v329_v31  ;;  %v331_v36 = vpop.eup %330 }
 0x107   :  { %338 = vrcp.f32 %v181_v32  ;;  %v182_v37 = vadd.f32 1.0, %v331_v36  ;;  %v333_v38 = vpop.eup %332 }
 0x108   :  { %340 = vrcp.f32 %v179_v34  ;;  %v180_v39 = vadd.f32 1.0, %v333_v38  ;;  %v335_v40 = vpop.eup %334 }
 0x109   :  { %342 = vpow2.f32 %v217_v33  ;;  %v337_v43 = vpop.eup %336  ;;  %v225_v48 = vmul.f32 %v335_v40, %v283_v41 }
 0x10a   :  { %344 = vpow2.f32 %v213_v35  ;;  %v223_v52 = vmul.f32 %v337_v43, %v283_v41 }
 0x10b   :  { %346 = vrcp.f32 %v182_v37  ;;  %v237_v61 = vmul.f32 %v427_v21, %v225_v48 }
 0x10c   :  { %348 = vrcp.f32 %v180_v39  ;;  %v235_v2 = vmul.f32 %v427_v21, %v223_v52 }
 0x111   :  { %v339_v45 = vpop.eup %338 }
 0x112   :  { %v341_v46 = vpop.eup %340  ;;  %v197_v47 = vadd.f32 %v339_v45, %v193_v42  ;;  %v249_v5 = vmul.f32 %v339_v45, %v285_v57 }
 0x113   :  { %v343_v49 = vpop.eup %342  ;;  %v195_v51 = vadd.f32 %v341_v46, %v191_v44  ;;  %v247_v9 = vmul.f32 %v341_v46, %v285_v57 }
 0x114   :  { %v345_v54 = vpop.eup %344  ;;  %v201_v55 = vmul.f32 16.0, %v197_v47  ;;  %v226_v63 = vmul.f32 %v343_v49, %v283_v41 }
 0x115   :  { %v347_v56 = vpop.eup %346  ;;  %v199_v58 = vmul.f32 16.0, %v195_v51  ;;  %v224_v3 = vmul.f32 %v345_v54, %v283_v41 }
 0x116   :  { %v233_v60 = vmul.f32 %v284_v50, %v201_v55  ;;  %v198_v62 = vadd.f32 %v347_v56, %v194_v53  ;;  %v349_v0 = vpop.eup %348  ;;  %v238_v12 = vmul.f32 %v427_v21, %v226_v63  ;;  %v250_v16 = vmul.f32 %v347_v56, %v285_v57 }
 0x117   :  { %v231_v1 = vmul.f32 %v284_v50, %v199_v58  ;;  %v196_v7 = vadd.f32 %v349_v0, %v192_v59  ;;  %v236_v18 = vmul.f32 %v427_v21, %v224_v3  ;;  %v248_v22 = vmul.f32 %v349_v0, %v285_v57 }
 0x118   :  { %v241_v4 = vadd.f32 %v237_v61, %v233_v60  ;;  %v202_v6 = vmul.f32 16.0, %v198_v62 }
 0x119   :  { %v239_v8 = vadd.f32 %v235_v2, %v231_v1  ;;  %v200_v13 = vmul.f32 16.0, %v196_v7 }
 0x11a   :  { %v253_v10 = vadd.f32 %v249_v5, %v241_v4  ;;  %v234_v11 = vmul.f32 %v284_v50, %v202_v6 }
 0x11b   :  { %v251_v14 = vadd.f32 %v247_v9, %v239_v8  ;;  %v232_v17 = vmul.f32 %v284_v50, %v200_v13 }
 0x11c   :  { %257 = vst [vmem:[%s482_s6 + $0x10] sm:$0xff] %v253_v10  ;;  %v242_v15 = vadd.f32 %v238_v12, %v234_v11 }
 0x11d   :  { %255 = vst [vmem:[%s482_s6] sm:$0xff] %v251_v14  ;;  %v240_v20 = vadd.f32 %v236_v18, %v232_v17 }
 0x11e   :  { %v254_v19 = vadd.f32 %v250_v16, %v242_v15 }
 0x11f   :  { %v252_v23 = vadd.f32 %v248_v22, %v240_v20 }
 0x120   :  { %258 = vst [vmem:[%s482_s6 + $0x18] sm:$0xff] %v254_v19 }
 0x121   :  { %256 = vst [vmem:[%s482_s6 + $0x8] sm:$0xff] %v252_v23 }

// kernel: build_model_forward.13
= control target key start
LH: loop header
LB: loop body
LE: loop exit
PB: predicated region body
PF: predicated region fallthrough
CT: control target
= control target key end

     0   :  { %vm118_vm0 = vcmask 523264   ;;  %s1159_s1 = inlined_call_operand.vmem [shape: bf16[64,128], index: 1, kind: input, shape index: {}]   ;;  %s1160_s0 = inlined_call_operand.vmem [shape: bf16[128,64], index: 0, kind: input, shape index: {}]   ;;  %s1161_s2 = inlined_call_operand.vmem [shape: f32[1,128], index: 2, kind: input, shape index: {}]   ;;  %s1162_s3 = inlined_call_operand.vmem [shape: f32[8,128], index: 3, kind: input, shape index: {}]   ;;  %s1163_s5 = inlined_call_operand.vmem [shape: f32[128,128], index: 5, kind: output, shape index: {0}]   ;;  %s1164_s4 = inlined_call_operand.vmem [shape: f32[128,128], index: 4, kind: input, shape index: {}]   ;;  %s1165_s6 = inlined_call_operand.vmem [shape: f32[128,128], index: 6, kind: output, shape index: {1}]  }
   0x1   :  { %v673_v0 = vld [vmem:[%s1159_s1] sm:$0xff]   ;;  %v674_v1 = vld [vmem:[%s1159_s1 + $0x8] sm:$0xff]   ;;  %v675_v2 = vld [vmem:[%s1159_s1 + $0x10] sm:$0xff]  }
   0x2   :  { %641 = vmatprep.subr.bf16.mxu0 %v673_v0  ;;  %665 = vmatprep.subr.bf16.mxu1 %v673_v0  ;;  %v677_v3 = vld [vmem:[%s1160_s0] sm:$0xff]   ;;  %v676_v5 = vld [vmem:[%s1159_s1 + $0x18] sm:$0xff]   ;;  %v679_v6 = vld [vmem:[%s1160_s0 + $0x8] sm:$0xff]  }
   0x3   :  { %642 = vmatpush3.bf16.msra.mxu0 %v673_v0  ;;  %669 = vmatpush3.bf16.msra.mxu1 %v673_v0  ;;  %v678_v4 = vld [vmem:[%s1160_s0 + $0x20] sm:$0xff]   ;;  %v680_v7 = vld [vmem:[%s1160_s0 + $0x28] sm:$0xff]   ;;  %v681_v8 = vld [vmem:[%s1160_s0 + $0x10] sm:$0xff]  }
   0x4   :  { %643 = vmatprep.subr.bf16.mxu0 %v674_v1  ;;  %666 = vmatprep.subr.bf16.mxu1 %v674_v1  ;;  %v682_v9 = vld [vmem:[%s1160_s0 + $0x30] sm:$0xff]   ;;  %v683_v10 = vld [vmem:[%s1160_s0 + $0x18] sm:$0xff]   ;;  %v863_v12 = vld [vmem:[%s1161_s2] ss:$0 sm:$0xff] }
   0x5   :  { %649 = vmatprep.mubr.msk.bf16.mxu0 %vm118_vm0, %v677_v3  ;;  %657 = vmatprep.mubr.msk.bf16.mxu1 %vm118_vm0, %v678_v4  ;;  %v684_v11 = vld [vmem:[%s1160_s0 + $0x38] sm:$0xff]   ;;  %v868_v14 = vld [vmem:[%s1162_s3 + $0x1] ss:$0 sm:$0xff] }
   0x7   :  { %644 = vmatpush3.bf16.msra.mxu0 %v674_v1  ;;  %670 = vmatpush3.bf16.msra.mxu1 %v674_v1 }
   0x8   :  { %645 = vmatprep.subr.bf16.mxu0 %v675_v2  ;;  %667 = vmatprep.subr.bf16.mxu1 %v675_v2 }
   0xb   :  { %646 = vmatpush3.bf16.msra.mxu0 %v675_v2  ;;  %671 = vmatpush3.bf16.msra.mxu1 %v675_v2 }
   0xc   :  { %647 = vmatprep.subr.bf16.mxu0 %v676_v5  ;;  %668 = vmatprep.subr.bf16.mxu1 %v676_v5 }
   0xf   :  { %648 = vmatpush3.bf16.msra.mxu0 %v676_v5  ;;  %672 = vmatpush3.bf16.msra.mxu1 %v676_v5 }
  0x12   :  { %650 = vmatmul.mubr.msk.bf16.vlgmr.msra.gmra.mrb[0].mxu0 %vm118_vm0, %v679_v6  ;;  %658 = vmatmul.mubr.msk.bf16.vlgmr.msra.gmra.mrb[0].mxu1 %vm118_vm0, %v680_v7 }
  0x13   :  { %653 = vmatprep.mubr.msk.bf16.mxu0 %vm118_vm0, %v681_v8  ;;  %661 = vmatprep.mubr.msk.bf16.mxu1 %vm118_vm0, %v682_v9 }
  0x1a   :  { %654 = vmatmul.mubr.msk.bf16.gmra.mrb[4].mxu0 %vm118_vm0, %v683_v10  ;;  %662 = vmatmul.mubr.msk.bf16.gmra.mrb[4].mxu1 %vm118_vm0, %v684_v11 }
  0xe5   :  { %v651_v13 = vpop.f32.mrb[0].mxu0  ;;  %v659_v15 = vpop.f32.mrb[0].mxu1 }
  0xe6   :  { %v186_v16 = vadd.f32 %v651_v13, %v863_v12  ;;  %v218_v17 = vadd.f32 %v659_v15, %v863_v12  ;;  %v177_v18 = vpop.f32.mrb[1].mxu0  ;;  %v209_v19 = vpop.f32.mrb[1].mxu1 }
  0xe7   :  { %v178_v20 = vadd.f32 %v863_v12, %v177_v18  ;;  %v210_v21 = vadd.f32 %v863_v12, %v209_v19  ;;  %v652_v22 = vpop.f32.mrb[2].mxu0  ;;  %v660_v23 = vpop.f32.mrb[2].mxu1  ;;  %v954_v19 = vld [vmem:[%s1162_s3 + $0x3] ss:$0 sm:$0xff] }
  0xe8   :  { %242 = vst [vmem:[%s1163_s5 + $0x10] sm:$0xff] %v186_v16  ;;  %v611_v24 = vmul.f32 -1.442695, %v186_v16  ;;  %v410_v25 = vmul.f32 %v868_v14, %v186_v16  ;;  %250 = vst [vmem:[%s1163_s5 + $0x50] sm:$0xff] %v218_v17  ;;  %v619_v26 = vmul.f32 -1.442695, %v218_v17  ;;  %v418_v27 = vmul.f32 %v868_v14, %v218_v17 }
  0xe9   :  { %v180_v28 = vpop.f32.mrb[3].mxu0  ;;  %v212_v29 = vpop.f32.mrb[3].mxu1  ;;  %240 = vst [vmem:[%s1163_s5] sm:$0xff] %v178_v20  ;;  %v408_v30 = vmul.f32 %v868_v14, %v178_v20  ;;  %248 = vst [vmem:[%s1163_s5 + $0x40] sm:$0xff] %v210_v21  ;;  %v609_v32 = vmul.f32 -1.442695, %v178_v20  ;;  %v189_v33 = vadd.f32 %v652_v22, %v863_v12  ;;  %v416_v35 = vmul.f32 %v868_v14, %v210_v21 }
  0xea   :  { %685 = vpow2.f32 %v611_v24  ;;  %v428_v31 = vmul.f32 1.442695, %v410_v25  ;;  %v444_v34 = vmul.f32 1.442695, %v418_v27  ;;  %v221_v36 = vadd.f32 %v660_v23, %v863_v12 }
  0xeb   :  { %687 = vpow2.f32 %v619_v26  ;;  %v617_v37 = vmul.f32 -1.442695, %v210_v21  ;;  %243 = vst [vmem:[%s1163_s5 + $0x18] sm:$0xff] %v189_v33  ;;  %v181_v38 = vadd.f32 %v863_v12, %v180_v28  ;;  %v424_v39 = vmul.f32 1.442695, %v408_v30 }
  0xec   :  { %689 = vpow2.f32 %v428_v31  ;;  %v411_v40 = vmul.f32 %v868_v14, %v189_v33  ;;  %251 = vst [vmem:[%s1163_s5 + $0x58] sm:$0xff] %v221_v36  ;;  %v213_v41 = vadd.f32 %v863_v12, %v212_v29  ;;  %v612_v44 = vmul.f32 -1.442695, %v189_v33  ;;  %v358_v31 = vld [vmem:[%s1164_s4 + $0x10] sm:$0xff] }
  0xed   :  { %v655_v42 = vpop.f32.mrb[4].mxu0  ;;  %v663_v43 = vpop.f32.mrb[4].mxu1  ;;  %691 = vpow2.f32 %v609_v32  ;;  %241 = vst [vmem:[%s1163_s5 + $0x8] sm:$0xff] %v181_v38  ;;  %v440_v47 = vmul.f32 1.442695, %v416_v35  ;;  %v419_v51 = vmul.f32 %v868_v14, %v221_v36  ;;  %v409_v7 = vmul.f32 %v868_v14, %v181_v38  ;;  %v366_v35 = vld [vmem:[%s1164_s4 + $0x50] sm:$0xff] }
  0xee   :  { %v193_v45 = vpop.f32.mrb[5].mxu0  ;;  %v225_v46 = vpop.f32.mrb[5].mxu1  ;;  %693 = vpow2.f32 %v444_v34  ;;  %v620_v48 = vmul.f32 -1.442695, %v221_v36  ;;  %249 = vst [vmem:[%s1163_s5 + $0x48] sm:$0xff] %v213_v41  ;;  %v202_v52 = vadd.f32 %v655_v42, %v863_v12  ;;  %v234_v53 = vadd.f32 %v663_v43, %v863_v12 }
  0xef   :  { %v656_v49 = vpop.f32.mrb[6].mxu0  ;;  %v664_v50 = vpop.f32.mrb[6].mxu1  ;;  %695 = vpow2.f32 %v617_v37  ;;  %v430_v56 = vmul.f32 1.442695, %v411_v40  ;;  %v194_v57 = vadd.f32 %v863_v12, %v193_v45  ;;  %v912_v58 = vadd.f32 %v863_v12, %v225_v46 }
  0xf0   :  { %v196_v54 = vpop.f32.mrb[7].mxu0  ;;  %v228_v55 = vpop.f32.mrb[7].mxu1  ;;  %697 = vpow2.f32 %v424_v39  ;;  %v610_v59 = vmul.f32 -1.442695, %v181_v38  ;;  %246 = vst [vmem:[%s1163_s5 + $0x30] sm:$0xff] %v202_v52  ;;  %254 = vst [vmem:[%s1163_s5 + $0x70] sm:$0xff] %v234_v53  ;;  %v928_v2 = vadd.f32 %v656_v49, %v863_v12  ;;  %v931_v4 = vadd.f32 %v664_v50, %v863_v12 }
  0xf1   :  { %699 = vpow2.f32 %v612_v44  ;;  %244 = vst [vmem:[%s1163_s5 + $0x20] sm:$0xff] %v194_v57  ;;  %252 = vst [vmem:[%s1163_s5 + $0x60] sm:$0xff] %v912_v58  ;;  %v446_v63 = vmul.f32 1.442695, %v419_v51  ;;  %v618_v1 = vmul.f32 -1.442695, %v213_v41  ;;  %v934_v5 = vadd.f32 %v863_v12, %v196_v54 }
  0xf2   :  { %701 = vpow2.f32 %v440_v47  ;;  %v417_v8 = vmul.f32 %v868_v14, %v213_v41  ;;  %247 = vst [vmem:[%s1163_s5 + $0x38] sm:$0xff] %v928_v2  ;;  %255 = vst [vmem:[%s1163_s5 + $0x78] sm:$0xff] %v931_v4  ;;  %v615_v13 = vmul.f32 -1.442695, %v202_v52  ;;  %v414_v17 = vmul.f32 %v868_v14, %v202_v52  ;;  %v356_v51 = vld [vmem:[%s1164_s4] sm:$0xff] }
  0xf3   :  { %703 = vpow2.f32 %v620_v48  ;;  %245 = vst [vmem:[%s1163_s5 + $0x28] sm:$0xff] %v934_v5  ;;  %v426_v20 = vmul.f32 1.442695, %v409_v7  ;;  %v623_v24 = vmul.f32 -1.442695, %v234_v53  ;;  %v957_v25 = vadd.f32 %v863_v12, %v228_v55 }
  0xf4   :  { %v686_v60 = vpop.eup %685  ;;  %705 = vpow2.f32 %v430_v56  ;;  %v442_v21 = vmul.f32 1.442695, %v417_v8  ;;  %v422_v27 = vmul.f32 %v868_v14, %v234_v53  ;;  %v613_v28 = vmul.f32 -1.442695, %v194_v57  ;;  %v985_v48 = vld [vmem:[%s1162_s3] ss:$0 sm:$0xff] }
  0xf5   :  { %v688_v61 = vpop.eup %687  ;;  %v310_v62 = vadd.f32 1.0, %v686_v60  ;;  %707 = vpow2.f32 %v610_v59  ;;  %v412_v29 = vmul.f32 %v868_v14, %v194_v57  ;;  %v436_v34 = vmul.f32 1.442695, %v414_v17  ;;  %253 = vst [vmem:[%s1163_s5 + $0x68] sm:$0xff] %v957_v25  ;;  %v997_v54 = vld [vmem:[%s1162_s3 + $0x2] ss:$0 sm:$0xff] }
  0xf6   :  { %v318_v0 = vadd.f32 1.0, %v688_v61  ;;  %v690_v3 = vpop.eup %689  ;;  %v975_v38 = vmul.f32 -1.442695, %v912_v58  ;;  %v980_v42 = vmul.f32 %v868_v14, %v912_v58  ;;  %v452_v45 = vmul.f32 1.442695, %v422_v27  ;;  %v364_v60 = vld [vmem:[%s1164_s4 + $0x40] sm:$0xff] }
  0xf7   :  { %709 = vrcp.f32 %v310_v62  ;;  %v692_v6 = vpop.eup %691  ;;  %v462_v32 = vmul.f32 %v690_v3, %v954_v19  ;;  %v432_v46 = vmul.f32 1.442695, %v412_v29  ;;  %v992_v52 = vmul.f32 -1.442695, %v928_v2  ;;  %v359_v8 = vld [vmem:[%s1164_s4 + $0x18] sm:$0xff] }
  0xf8   :  { %711 = vrcp.f32 %v318_v0  ;;  %v694_v9 = vpop.eup %693  ;;  %v308_v10 = vadd.f32 1.0, %v692_v6 }
  0xf9   :  { %713 = vpow2.f32 %v446_v63  ;;  %v696_v11 = vpop.eup %695  ;;  %v470_v36 = vmul.f32 %v694_v9, %v954_v19  ;;  %v498_v49 = vmul.f32 %v868_v14, %v462_v32 }
  0xfa   :  { %715 = vpow2.f32 %v618_v1  ;;  %v698_v15 = vpop.eup %697  ;;  %v316_v16 = vadd.f32 1.0, %v696_v11 }
  0xfb   :  { %717 = vrcp.f32 %v308_v10  ;;  %v700_v18 = vpop.eup %699  ;;  %v460_v37 = vmul.f32 %v698_v15, %v954_v19  ;;  %v506_v56 = vmul.f32 %v868_v14, %v470_v36  ;;  %v357_v36 = vld [vmem:[%s1164_s4 + $0x8] sm:$0xff] }
  0xfc   :  { %v702_v22 = vpop.eup %701  ;;  %719 = vrcp.f32 %v316_v16  ;;  %v311_v23 = vadd.f32 1.0, %v700_v18 }
  0xfd   :  { %v704_v26 = vpop.eup %703  ;;  %721 = vpow2.f32 %v615_v13  ;;  %v468_v40 = vmul.f32 %v702_v22, %v954_v19  ;;  %v496_v57 = vmul.f32 %v868_v14, %v460_v37 }
  0xfe   :  { %v706_v30 = vpop.eup %705  ;;  %723 = vrcp.f32 %v311_v23  ;;  %v319_v33 = vadd.f32 1.0, %v704_v26 }
  0xff   :  { %v708_v12 = vpop.eup %707  ;;  %725 = vpow2.f32 %v426_v20  ;;  %v504_v61 = vmul.f32 %v868_v14, %v468_v40  ;;  %v463_v1 = vmul.f32 %v706_v30, %v954_v19  ;;  %v367_v20 = vld [vmem:[%s1164_s4 + $0x58] sm:$0xff] }
 0x100   :  { %727 = vrcp.f32 %v319_v33  ;;  %v309_v41 = vadd.f32 1.0, %v708_v12 }
 0x101   :  { %v710_v39 = vpop.eup %709  ;;  %729 = vpow2.f32 %v623_v24 }
 0x102   :  { %v712_v43 = vpop.eup %711  ;;  %v374_v44 = vadd.f32 %v710_v39, %v358_v31  ;;  %731 = vrcp.f32 %v309_v41  ;;  %v534_v6 = vmul.f32 %v710_v39, %v997_v54  ;;  %v499_v31 = vmul.f32 %v868_v14, %v463_v1 }
 0x103   :  { %v714_v47 = vpop.eup %713  ;;  %v382_v50 = vadd.f32 %v712_v43, %v366_v35  ;;  %733 = vpow2.f32 %v442_v21  ;;  %v542_v18 = vmul.f32 %v712_v43, %v997_v54 }
 0x104   :  { %v716_v53 = vpop.eup %715  ;;  %v390_v55 = vmul.f32 8.0, %v374_v44  ;;  %735 = vpow2.f32 %v613_v28  ;;  %v471_v9 = vmul.f32 %v714_v47, %v954_v19 }
 0x105   :  { %v718_v58 = vpop.eup %717  ;;  %v398_v59 = vmul.f32 8.0, %v382_v50  ;;  %v317_v62 = vadd.f32 1.0, %v716_v53  ;;  %737 = vpow2.f32 %v436_v34 }
 0x106   :  { %v482_v63 = vmul.f32 %v985_v48, %v390_v55  ;;  %v372_v0 = vadd.f32 %v718_v58, %v356_v51  ;;  %v720_v3 = vpop.eup %719  ;;  %v532_v30 = vmul.f32 %v718_v58, %v997_v54  ;;  %v507_v40 = vmul.f32 %v868_v14, %v471_v9  ;;  %v365_v55 = vld [vmem:[%s1164_s4 + $0x48] sm:$0xff] }
 0x107   :  { %v490_v7 = vmul.f32 %v985_v48, %v398_v59  ;;  %739 = vrcp.f32 %v317_v62  ;;  %v722_v10 = vpop.eup %721  ;;  %v380_v15 = vadd.f32 %v720_v3, %v364_v60  ;;  %v540_v39 = vmul.f32 %v720_v3, %v997_v54 }
 0x108   :  { %v514_v11 = vadd.f32 %v498_v49, %v482_v63  ;;  %v388_v13 = vmul.f32 8.0, %v372_v0  ;;  %741 = vpow2.f32 %v452_v45  ;;  %v724_v16 = vpop.eup %723  ;;  %v314_v21 = vadd.f32 1.0, %v722_v10 }
 0x109   :  { %v522_v17 = vadd.f32 %v506_v56, %v490_v7  ;;  %743 = vpow2.f32 %v432_v46  ;;  %v726_v22 = vpop.eup %725  ;;  %v396_v26 = vmul.f32 8.0, %v380_v15  ;;  %v375_v27 = vadd.f32 %v724_v16, %v359_v8 }
 0x10a   :  { %v550_v23 = vadd.f32 %v534_v6, %v514_v11  ;;  %v480_v24 = vmul.f32 %v985_v48, %v388_v13  ;;  %v728_v28 = vpop.eup %727  ;;  %745 = vrcp.f32 %v314_v21  ;;  %v535_v50 = vmul.f32 %v724_v16, %v997_v54  ;;  %v362_v11 = vld [vmem:[%s1164_s4 + $0x30] sm:$0xff] }
 0x10b   :  { %v558_v29 = vadd.f32 %v542_v18, %v522_v17  ;;  %v730_v32 = vpop.eup %729  ;;  %v488_v34 = vmul.f32 %v985_v48, %v396_v26  ;;  %v391_v12 = vmul.f32 8.0, %v375_v27  ;;  %v383_v35 = vadd.f32 %v728_v28, %v367_v20  ;;  %v370_v27 = vld [vmem:[%s1164_s4 + $0x70] sm:$0xff] }
 0x10c   :  { %566 = vst [vmem:[%s1165_s6 + $0x10] sm:$0xff] %v550_v23  ;;  %v512_v33 = vadd.f32 %v496_v57, %v480_v24  ;;  %v732_v37 = vpop.eup %731  ;;  %v322_v41 = vadd.f32 1.0, %v730_v32  ;;  %747 = vpow2.f32 %v975_v38  ;;  %v461_v53 = vmul.f32 %v726_v22, %v954_v19 }
 0x10d   :  { %574 = vst [vmem:[%s1165_s6 + $0x50] sm:$0xff] %v558_v29  ;;  %v734_v43 = vpop.eup %733  ;;  %v520_v45 = vadd.f32 %v504_v61, %v488_v34  ;;  %v483_v46 = vmul.f32 %v985_v48, %v391_v12  ;;  %v399_v47 = vmul.f32 8.0, %v383_v35  ;;  %v373_v51 = vadd.f32 %v732_v37, %v357_v36 }
 0x10e   :  { %v548_v44 = vadd.f32 %v532_v30, %v512_v33  ;;  %v736_v49 = vpop.eup %735  ;;  %749 = vrcp.f32 %v322_v41  ;;  %v469_v62 = vmul.f32 %v734_v43, %v954_v19  ;;  %v448_v63 = vmul.f32 1.442695, %v980_v42 }
 0x10f   :  { %v738_v56 = vpop.eup %737  ;;  %v556_v38 = vadd.f32 %v540_v39, %v520_v45  ;;  %v515_v57 = vadd.f32 %v499_v31, %v483_v46  ;;  %v491_v58 = vmul.f32 %v985_v48, %v399_v47  ;;  %v312_v59 = vadd.f32 1.0, %v736_v49 }
 0x110   :  { %564 = vst [vmem:[%s1165_s6] sm:$0xff] %v548_v44  ;;  %v389_v61 = vmul.f32 8.0, %v373_v51  ;;  %v543_v6 = vmul.f32 %v728_v28, %v997_v54  ;;  %v497_v10 = vmul.f32 %v868_v14, %v461_v53  ;;  %v624_v42 = vmul.f32 -1.442695, %v931_v4 }
 0x111   :  { %v740_v60 = vpop.eup %739  ;;  %572 = vst [vmem:[%s1165_s6 + $0x40] sm:$0xff] %v556_v38  ;;  %v551_v1 = vadd.f32 %v535_v50, %v515_v57  ;;  %v523_v3 = vadd.f32 %v507_v40, %v491_v58  ;;  %751 = vrcp.f32 %v312_v59  ;;  %v533_v18 = vmul.f32 %v732_v37, %v997_v54  ;;  %v360_v40 = vld [vmem:[%s1164_s4 + $0x20] sm:$0xff] }
 0x112   :  { %v742_v0 = vpop.eup %741  ;;  %v381_v7 = vadd.f32 %v740_v60, %v365_v55  ;;  %v481_v9 = vmul.f32 %v985_v48, %v389_v61  ;;  %753 = vpow2.f32 %v992_v52  ;;  %v466_v20 = vmul.f32 %v738_v56, %v954_v19 }
 0x113   :  { %v744_v8 = vpop.eup %743  ;;  %567 = vst [vmem:[%s1165_s6 + $0x18] sm:$0xff] %v551_v1  ;;  %v559_v13 = vadd.f32 %v543_v6, %v523_v3  ;;  %v614_v21 = vmul.f32 -1.442695, %v934_v5  ;;  %v505_v23 = vmul.f32 %v868_v14, %v469_v62  ;;  %755 = vpow2.f32 %v448_v63 }
 0x114   :  { %v397_v15 = vmul.f32 8.0, %v381_v7  ;;  %v746_v16 = vpop.eup %745  ;;  %v513_v17 = vadd.f32 %v497_v10, %v481_v9  ;;  %v415_v28 = vmul.f32 %v868_v14, %v928_v2  ;;  %757 = vpow2.f32 %v624_v42 }
 0x115   :  { %575 = vst [vmem:[%s1165_s6 + $0x58] sm:$0xff] %v559_v13  ;;  %v378_v24 = vadd.f32 %v746_v16, %v362_v11  ;;  %v541_v30 = vmul.f32 %v740_v60, %v997_v54  ;;  %v502_v34 = vmul.f32 %v868_v14, %v466_v20  ;;  %v423_v12 = vmul.f32 %v868_v14, %v931_v4 }
 0x116   :  { %v489_v22 = vmul.f32 %v985_v48, %v397_v15  ;;  %v748_v26 = vpop.eup %747  ;;  %v549_v52 = vadd.f32 %v533_v18, %v513_v17  ;;  %759 = vpow2.f32 %v614_v21  ;;  %v622_v35 = vmul.f32 -1.442695, %v957_v25  ;;  %v363_v21 = vld [vmem:[%s1164_s4 + $0x38] sm:$0xff] }
 0x117   :  { %v394_v31 = vmul.f32 8.0, %v378_v24  ;;  %v320_v32 = vadd.f32 1.0, %v748_v26  ;;  %v474_v39 = vmul.f32 %v742_v0, %v954_v19  ;;  %v438_v41 = vmul.f32 1.442695, %v415_v28 }
 0x118   :  { %v521_v29 = vadd.f32 %v505_v23, %v489_v22  ;;  %v750_v33 = vpop.eup %749  ;;  %565 = vst [vmem:[%s1165_s6 + $0x8] sm:$0xff] %v549_v52  ;;  %v413_v43 = vmul.f32 %v868_v14, %v934_v5  ;;  %v538_v44 = vmul.f32 %v746_v16, %v997_v54  ;;  %v464_v47 = vmul.f32 %v744_v8, %v954_v19 }
 0x119   :  { %v486_v36 = vmul.f32 %v985_v48, %v394_v31  ;;  %v386_v37 = vadd.f32 %v750_v33, %v370_v27  ;;  %761 = vrcp.f32 %v320_v32  ;;  %v454_v49 = vmul.f32 1.442695, %v423_v12  ;;  %v361_v12 = vld [vmem:[%s1164_s4 + $0x28] sm:$0xff] }
 0x11a   :  { %v557_v2 = vadd.f32 %v541_v30, %v521_v29  ;;  %763 = vpow2.f32 %v622_v35  ;;  %v510_v55 = vmul.f32 %v868_v14, %v474_v39  ;;  %v434_v38 = vmul.f32 1.442695, %v413_v43  ;;  %v371_v30 = vld [vmem:[%s1164_s4 + $0x78] sm:$0xff] }
 0x11b   :  { %v518_v4 = vadd.f32 %v502_v34, %v486_v36  ;;  %v402_v45 = vmul.f32 8.0, %v386_v37  ;;  %v752_v46 = vpop.eup %751  ;;  %765 = vpow2.f32 %v438_v41  ;;  %v421_v57 = vmul.f32 %v868_v14, %v957_v25  ;;  %v368_v25 = vld [vmem:[%s1164_s4 + $0x60] sm:$0xff] }
 0x11c   :  { %573 = vst [vmem:[%s1165_s6 + $0x48] sm:$0xff] %v557_v2  ;;  %v754_v50 = vpop.eup %753  ;;  %v376_v5 = vadd.f32 %v752_v46, %v360_v40  ;;  %v546_v60 = vmul.f32 %v750_v33, %v997_v54  ;;  %v500_v63 = vmul.f32 %v868_v14, %v464_v47  ;;  %v536_v9 = vmul.f32 %v752_v46, %v997_v54  ;;  %v369_v46 = vld [vmem:[%s1164_s4 + $0x68] sm:$0xff] }
 0x11d   :  { %v554_v51 = vadd.f32 %v538_v44, %v518_v4  ;;  %v494_v53 = vmul.f32 %v985_v48, %v402_v45  ;;  %v315_v56 = vadd.f32 1.0, %v754_v50  ;;  %v756_v58 = vpop.eup %755  ;;  %v450_v7 = vmul.f32 1.442695, %v421_v57 }
 0x11e   :  { %v392_v61 = vmul.f32 8.0, %v376_v5  ;;  %v758_v62 = vpop.eup %757  ;;  %v472_v15 = vmul.f32 %v756_v58, %v954_v19 }
 0x11f   :  { %570 = vst [vmem:[%s1165_s6 + $0x30] sm:$0xff] %v554_v51  ;;  %v526_v59 = vadd.f32 %v510_v55, %v494_v53  ;;  %767 = vrcp.f32 %v315_v56  ;;  %v323_v3 = vadd.f32 1.0, %v758_v62 }
 0x120   :  { %v484_v1 = vmul.f32 %v985_v48, %v392_v61  ;;  %769 = vpow2.f32 %v454_v49  ;;  %v760_v6 = vpop.eup %759  ;;  %v508_v23 = vmul.f32 %v868_v14, %v472_v15 }
 0x121   :  { %v562_v0 = vadd.f32 %v546_v60, %v526_v59  ;;  %771 = vpow2.f32 %v434_v38  ;;  %v313_v10 = vadd.f32 1.0, %v760_v6 }
 0x122   :  { %v516_v8 = vadd.f32 %v500_v63, %v484_v1  ;;  %773 = vrcp.f32 %v323_v3 }
 0x123   :  { %578 = vst [vmem:[%s1165_s6 + $0x70] sm:$0xff] %v562_v0  ;;  %v762_v11 = vpop.eup %761  ;;  %775 = vrcp.f32 %v313_v10 }
 0x124   :  { %v552_v42 = vadd.f32 %v536_v9, %v516_v8  ;;  %v384_v13 = vadd.f32 %v762_v11, %v368_v25  ;;  %v764_v16 = vpop.eup %763  ;;  %777 = vpow2.f32 %v450_v7  ;;  %v544_v27 = vmul.f32 %v762_v11, %v997_v54 }
 0x125   :  { %v321_v18 = vadd.f32 1.0, %v764_v16  ;;  %v766_v20 = vpop.eup %765 }
 0x126   :  { %568 = vst [vmem:[%s1165_s6 + $0x20] sm:$0xff] %v552_v42  ;;  %v400_v17 = vmul.f32 8.0, %v384_v13  ;;  %v467_v29 = vmul.f32 %v766_v20, %v954_v19 }
 0x127   :  { %779 = vrcp.f32 %v321_v18 }
 0x128   :  { %v492_v22 = vmul.f32 %v985_v48, %v400_v17  ;;  %v503_v39 = vmul.f32 %v868_v14, %v467_v29 }
 0x129   :  { %v768_v24 = vpop.eup %767 }
 0x12a   :  { %v770_v26 = vpop.eup %769  ;;  %v524_v52 = vadd.f32 %v508_v23, %v492_v22  ;;  %v379_v28 = vadd.f32 %v768_v24, %v363_v21  ;;  %v539_v45 = vmul.f32 %v768_v24, %v997_v54 }
 0x12b   :  { %v772_v31 = vpop.eup %771  ;;  %v475_v2 = vmul.f32 %v770_v26, %v954_v19 }
 0x12c   :  { %v774_v32 = vpop.eup %773  ;;  %v560_v33 = vadd.f32 %v544_v27, %v524_v52  ;;  %v395_v34 = vmul.f32 8.0, %v379_v28  ;;  %v465_v40 = vmul.f32 %v772_v31, %v954_v19 }
 0x12d   :  { %v387_v35 = vadd.f32 %v774_v32, %v371_v30  ;;  %v776_v36 = vpop.eup %775  ;;  %v511_v49 = vmul.f32 %v868_v14, %v475_v2  ;;  %v547_v38 = vmul.f32 %v774_v32, %v997_v54 }
 0x12e   :  { %576 = vst [vmem:[%s1165_s6 + $0x60] sm:$0xff] %v560_v33  ;;  %v487_v37 = vmul.f32 %v985_v48, %v395_v34  ;;  %v778_v41 = vpop.eup %777  ;;  %v377_v4 = vadd.f32 %v776_v36, %v361_v12  ;;  %v501_v55 = vmul.f32 %v868_v14, %v465_v40  ;;  %v537_v61 = vmul.f32 %v776_v36, %v997_v54 }
 0x12f   :  { %v403_v43 = vmul.f32 8.0, %v387_v35  ;;  %v473_v5 = vmul.f32 %v778_v41, %v954_v19 }
 0x130   :  { %v519_v44 = vadd.f32 %v503_v39, %v487_v37  ;;  %v393_v50 = vmul.f32 8.0, %v377_v4 }
 0x131   :  { %v495_v47 = vmul.f32 %v985_v48, %v403_v43  ;;  %v780_v51 = vpop.eup %779  ;;  %v509_v0 = vmul.f32 %v868_v14, %v473_v5 }
 0x132   :  { %v555_v53 = vadd.f32 %v539_v45, %v519_v44  ;;  %v485_v57 = vmul.f32 %v985_v48, %v393_v50  ;;  %v385_v58 = vadd.f32 %v780_v51, %v369_v46  ;;  %v545_v3 = vmul.f32 %v780_v51, %v997_v54 }
 0x133   :  { %v527_v56 = vadd.f32 %v511_v49, %v495_v47 }
 0x134   :  { %571 = vst [vmem:[%s1165_s6 + $0x38] sm:$0xff] %v555_v53  ;;  %v517_v60 = vadd.f32 %v501_v55, %v485_v57  ;;  %v401_v62 = vmul.f32 8.0, %v385_v58 }
 0x135   :  { %v563_v59 = vadd.f32 %v547_v38, %v527_v56 }
 0x136   :  { %v553_v19 = vadd.f32 %v537_v61, %v517_v60  ;;  %v493_v63 = vmul.f32 %v985_v48, %v401_v62 }
 0x137   :  { %579 = vst [vmem:[%s1165_s6 + $0x78] sm:$0xff] %v563_v59 }
 0x138   :  { %569 = vst [vmem:[%s1165_s6 + $0x28] sm:$0xff] %v553_v19  ;;  %v525_v1 = vadd.f32 %v509_v0, %v493_v63 }
 0x13a   :  { %v561_v6 = vadd.f32 %v545_v3, %v525_v1 }
 0x13c   :  { %577 = vst [vmem:[%s1165_s6 + $0x68] sm:$0xff] %v561_v6 }

</bundles_post_ra>
